<compile_context>
chip_gen: v6e
topology: v6e:2x2x1
jax: 0.10.0
libtpu: 0.0.40
codegen_flags: <defaults>
</compile_context>

<pallas_src>
import functools

import jax
import jax.numpy as jnp
from jax.experimental import pallas as pl
from jax.experimental.pallas import tpu as pltpu

BN_EPS = 1e-5
NEG_SLOPE = 0.2
_TILE_TARGET = 512                    # mem-bound kernels ~85% of HBM roofline at 512 rows
_VMEM_FALLBACK = 48 * 1024 * 1024     # safe on v7x (64 MiB physical per TC)
_vmem_cache = [None]


def _vmem_limit_bytes():
    if _vmem_cache[0] is None:
        limit = _VMEM_FALLBACK
        try:
            cap = int(pltpu.get_tpu_info().vmem_capacity_bytes)
            # leave ~16 MiB compiler headroom; generous on v5e/v6e (128 MiB VMEM),
            # conservative on v7x (64 MiB per TC).
            limit = max(32 * 1024 * 1024,
                        min(cap - 16 * 1024 * 1024, 96 * 1024 * 1024))
        except Exception:
            pass
        _vmem_cache[0] = limit
    return _vmem_cache[0]


def _cparams(sem):
    return pltpu.CompilerParams(dimension_semantics=sem,
                                vmem_limit_bytes=_vmem_limit_bytes())


def _leaky(y):
    return jnp.where(y >= 0.0, y, NEG_SLOPE * y)


def _bf16(x):
    return x.astype(jnp.bfloat16)


def _pick_tile(n, target=_TILE_TARGET):
    """Largest tile <= target that divides n and is a multiple of 16 (else n)."""
    if n <= target:
        return n
    for t in range(target, 15, -16):
        if n % t == 0:
            return t
    return n


# -----------------------------------------------------------------------------
# Pairwise -||xi - xj||^2 (row-tiled, bf16 Gram for feature-space kNN) + gather
# -----------------------------------------------------------------------------
def _pairwise_kernel(xr_ref, xf_ref, sq_ref, o_ref):
    xr = xr_ref[0]                                        # (TN, C) rows of tile
    xf = xf_ref[0]                                        # (N, C)  all points
    g = jax.lax.dot_general(xr, xf, (((1,), (1,)), ((), ())),
                            preferred_element_type=jnp.float32)   # (TN, N)
    xr32 = xr.astype(jnp.float32)
    sr = jnp.sum(xr32 * xr32, axis=1, keepdims=True)      # (TN, 1)
    o_ref[0] = 2.0 * g - sr - sq_ref[0]                   # sq_ref[0]: (1, N)


def pairwise_neg_dist(x):
    """x: (B, N, C) f32 (coords) or bf16 (features) -> f32 (B, N, N)."""
    B, N, C = x.shape
    tn = _pick_tile(N)
    x32 = x.astype(jnp.float32)
    sq = jnp.sum(x32 * x32, axis=-1, keepdims=True).reshape(B, 1, N)
    return pl.pallas_call(
        _pairwise_kernel,
        out_shape=jax.ShapeDtypeStruct((B, N, N), jnp.float32),
        grid=(B, N // tn),
        in_specs=[
            pl.BlockSpec((1, tn, C), lambda b, n: (b, n, 0)),
            pl.BlockSpec((1, N, C), lambda b, n: (b, 0, 0)),
            pl.BlockSpec((1, 1, N), lambda b, n: (b, 0, 0)),
        ],
        out_specs=pl.BlockSpec((1, tn, N), lambda b, n: (b, n, 0)),
        compiler_params=_cparams(("parallel", "parallel")),
    )(x, x, sq)


def knn_gather(x, k):
    """x: (B, N, C) -> gathered neighbor features (B, k, N, C), bf16."""
    pd = pairwise_neg_dist(x)                   # Pallas kernel (Gram on MXU)
    idx = jax.lax.top_k(pd, k)[1]               # (B, N, k)   -- XLA top_k
    idx = jnp.swapaxes(idx, 1, 2)               # (B, k, N)
    # TODO(synk): the neighbor gather still materializes (B,k,N,C) via XLA; an
    # in-kernel gather (jnp.take on a VMEM-resident (N,C) table or DMA-gather)
    # would remove this HBM round trip.  Gathering bf16 halves it for now.
    return jax.vmap(lambda xb, ib: xb[ib])(x.astype(jnp.bfloat16), idx)


# -----------------------------------------------------------------------------
# Fused edge conv: edge feature + conv(+conv) + BN + LeakyReLU + max over K
# Whole K processed per grid step; the k-invariant center term is hoisted.
# -----------------------------------------------------------------------------
def _edge_conv2_max_kernel(neigh_ref, cen_ref, wa_ref, wb_ref, s1_ref,
                           w2_ref, s2_ref, o_ref, *, k):
    # cat(neigh - cen, cen) @ W1 == neigh @ Wd + cen @ (Wc - Wd)
    cen = _bf16(cen_ref[0])                               # (TN, Cin)
    cterm = (jnp.dot(cen, wb_ref[...], preferred_element_type=jnp.float32)
             + s1_ref[...])                               # (TN, C1), once per point
    acc = None
    for kk in range(k):                                   # static unroll over K
        nk = _bf16(neigh_ref[0, kk])                      # (TN, Cin)
        h = _leaky(jnp.dot(nk, wa_ref[...],
                           preferred_element_type=jnp.float32) + cterm)
        y = _leaky(jnp.dot(_bf16(h), w2_ref[...],
                           preferred_element_type=jnp.float32) + s2_ref[...])
        acc = y if acc is None else jnp.maximum(acc, y)
    o_ref[0] = acc.astype(o_ref.dtype)


def edge_conv2_max(neigh, center, wa, wb, s1, w2, s2):
    B, K, N, Cin = neigh.shape
    C1 = wa.shape[1]
    C2 = w2.shape[1]
    tn = _pick_tile(N)
    return pl.pallas_call(
        functools.partial(_edge_conv2_max_kernel, k=K),
        out_shape=jax.ShapeDtypeStruct((B, N, C2), jnp.bfloat16),
        grid=(B, N // tn),
        in_specs=[
            pl.BlockSpec((1, K, tn, Cin), lambda b, n: (b, 0, n, 0)),
            pl.BlockSpec((1, tn, Cin), lambda b, n: (b, n, 0)),
            pl.BlockSpec((Cin, C1), lambda b, n: (0, 0)),
            pl.BlockSpec((Cin, C1), lambda b, n: (0, 0)),
            pl.BlockSpec((1, C1), lambda b, n: (0, 0)),
            pl.BlockSpec((C1, C2), lambda b, n: (0, 0)),
            pl.BlockSpec((1, C2), lambda b, n: (0, 0)),
        ],
        out_specs=pl.BlockSpec((1, tn, C2), lambda b, n: (b, n, 0)),
        compiler_params=_cparams(("parallel", "parallel")),
    )(neigh, center, wa, wb, s1, w2, s2)


def _edge_conv1_max_kernel(neigh_ref, cen_ref, wa_ref, wb_ref, s_ref, o_ref, *, k):
    cen = _bf16(cen_ref[0])
    cterm = (jnp.dot(cen, wb_ref[...], preferred_element_type=jnp.float32)
             + s_ref[...])
    acc = None
    for kk in range(k):
        d = jnp.dot(_bf16(neigh_ref[0, kk]), wa_ref[...],
                    preferred_element_type=jnp.float32)
        acc = d if acc is None else jnp.maximum(acc, d)
    # k-invariant bias + monotone LeakyReLU commute with the max over K.
    o_ref[0] = _leaky(acc + cterm).astype(o_ref.dtype)


def edge_conv1_max(neigh, center, wa, wb, s):
    B, K, N, Cin = neigh.shape
    C1 = wa.shape[1]
    tn = _pick_tile(N)
    return pl.pallas_call(
        functools.partial(_edge_conv1_max_kernel, k=K),
        out_shape=jax.ShapeDtypeStruct((B, N, C1), jnp.bfloat16),
        grid=(B, N // tn),
        in_specs=[
            pl.BlockSpec((1, K, tn, Cin), lambda b, n: (b, 0, n, 0)),
            pl.BlockSpec((1, tn, Cin), lambda b, n: (b, n, 0)),
            pl.BlockSpec((Cin, C1), lambda b, n: (0, 0)),
            pl.BlockSpec((Cin, C1), lambda b, n: (0, 0)),
            pl.BlockSpec((1, C1), lambda b, n: (0, 0)),
        ],
        out_specs=pl.BlockSpec((1, tn, C1), lambda b, n: (b, n, 0)),
        compiler_params=_cparams(("parallel", "parallel")),
    )(neigh, center, wa, wb, s)


# -----------------------------------------------------------------------------
# 1x1 conv + BN + LeakyReLU + max over all points (grid reduction over N tiles)
# -----------------------------------------------------------------------------
def _conv_max_n_kernel(x_ref, w_ref, s_ref, o_ref):
    nt = pl.program_id(1)
    y = _leaky(jnp.dot(_bf16(x_ref[0]), w_ref[...],
                       preferred_element_type=jnp.float32) + s_ref[...])
    ymax = jnp.max(y, axis=0, keepdims=True)              # (1, Cout)

    @pl.when(nt == 0)
    def _():
        o_ref[0] = ymax

    @pl.when(nt > 0)
    def _():
        o_ref[0] = jnp.maximum(o_ref[0], ymax)


def conv_bn_act_max_n(x, w, shift):
    B, N, Cin = x.shape
    Cout = w.shape[1]
    tn = _pick_tile(N)
    return pl.pallas_call(
        _conv_max_n_kernel,
        out_shape=jax.ShapeDtypeStruct((B, 1, Cout), jnp.float32),
        grid=(B, N // tn),
        in_specs=[
            pl.BlockSpec((1, tn, Cin), lambda b, n: (b, n, 0)),
            pl.BlockSpec((Cin, Cout), lambda b, n: (0, 0)),
            pl.BlockSpec((1, Cout), lambda b, n: (0, 0)),
        ],
        out_specs=pl.BlockSpec((1, 1, Cout), lambda b, n: (b, 0, 0)),
        compiler_params=_cparams(("parallel", "arbitrary")),
    )(x, w, shift)


# -----------------------------------------------------------------------------
# Transform_Net MLP head: linear1+BN+LReLU, linear2+BN+LReLU, transform (bias)
# -----------------------------------------------------------------------------
def _tnet_head_kernel(x_ref, w1_ref, s1_ref, w2_ref, s2_ref, wt_ref, bt_ref,
                      o_ref):
    h = _leaky(jnp.dot(_bf16(x_ref[...]), w1_ref[...],
                       preferred_element_type=jnp.float32) + s1_ref[...])
    h = _leaky(jnp.dot(_bf16(h), w2_ref[...],
                       preferred_element_type=jnp.float32) + s2_ref[...])
    o_ref[...] = jnp.dot(_bf16(h), wt_ref[...],
                         preferred_element_type=jnp.float32) + bt_ref[...]


def tnet_head(x, w1, s1, w2, s2, wt, bt):
    B, _ = x.shape
    args = (x, w1, s1, w2, s2, wt, bt)
    in_specs = [pl.BlockSpec(a.shape, lambda i: (0, 0)) for a in args]
    return pl.pallas_call(
        _tnet_head_kernel,
        out_shape=jax.ShapeDtypeStruct((B, 9), jnp.float32),
        grid=(1,),
        in_specs=in_specs,
        out_specs=pl.BlockSpec((B, 9), lambda i: (0, 0)),
        compiler_params=_cparams(("arbitrary",)),
    )(*args)


# -----------------------------------------------------------------------------
# Batched (B, N, 3) @ (B, 3, 3)
# -----------------------------------------------------------------------------
def _bmm_kernel(x_ref, t_ref, o_ref):
    o_ref[0] = jnp.dot(x_ref[0], t_ref[0], preferred_element_type=jnp.float32)


def bmm(x, t):
    B, N, C = x.shape
    D = t.shape[2]
    tn = _pick_tile(N)
    return pl.pallas_call(
        _bmm_kernel,
        out_shape=jax.ShapeDtypeStruct((B, N, D), jnp.float32),
        grid=(B, N // tn),
        in_specs=[
            pl.BlockSpec((1, tn, C), lambda b, n: (b, n, 0)),
            pl.BlockSpec((1, C, D), lambda b, n: (b, 0, 0)),
        ],
        out_specs=pl.BlockSpec((1, tn, D), lambda b, n: (b, n, 0)),
        compiler_params=_cparams(("parallel", "parallel")),
    )(x, t)


# -----------------------------------------------------------------------------
# Per-batch global bias: conv7(label) + g6/label slices of conv8 + BN8 shift
# (hoisted out of the per-tile seg head; computed once per batch)
# -----------------------------------------------------------------------------
def _global_bias_kernel(g6_ref, l_ref, w7_ref, s7_ref, wg6_ref, wgl_ref,
                        s8_ref, o_ref):
    lfeat = _leaky(jnp.dot(_bf16(l_ref[0]), w7_ref[...],
                           preferred_element_type=jnp.float32) + s7_ref[...])
    o_ref[0] = (jnp.dot(_bf16(g6_ref[0]), wg6_ref[...],
                        preferred_element_type=jnp.float32)
                + jnp.dot(_bf16(lfeat), wgl_ref[...],
                          preferred_element_type=jnp.float32)
                + s8_ref[...])


def global_bias(g6, lab, pp):
    B = g6.shape[0]
    Cout = pp["c8g6"].shape[1]
    weights = (pp["c7w"], pp["c7s"], pp["c8g6"], pp["c8gl"], pp["c8s"])
    in_specs = ([pl.BlockSpec((1, 1, g6.shape[2]), lambda b: (b, 0, 0)),
                 pl.BlockSpec((1, 1, lab.shape[2]), lambda b: (b, 0, 0))]
                + [pl.BlockSpec(w.shape, lambda b: (0, 0)) for w in weights])
    return pl.pallas_call(
        _global_bias_kernel,
        out_shape=jax.ShapeDtypeStruct((B, 1, Cout), jnp.float32),
        grid=(B,),
        in_specs=in_specs,
        out_specs=pl.BlockSpec((1, 1, Cout), lambda b: (b, 0, 0)),
        compiler_params=_cparams(("parallel",)),
    )(g6, lab, *weights)


# -----------------------------------------------------------------------------
# Segmentation head: conv8 on the (x1|x2|x3) slab + global bias, conv9..conv11
# Output bf16, padded to 128 lanes (lane-dense stores), sliced outside.
# -----------------------------------------------------------------------------
def _head_kernel(gb_ref, x_ref, w8_ref, w9_ref, s9_ref, w10_ref, s10_ref,
                 w11_ref, o_ref):
    y = _leaky(jnp.dot(_bf16(x_ref[0]), w8_ref[...],
                       preferred_element_type=jnp.float32) + gb_ref[0])
    # dp1 / dp2 (Dropout) are identity in eval mode.
    y = _leaky(jnp.dot(_bf16(y), w9_ref[...],
                       preferred_element_type=jnp.float32) + s9_ref[...])
    y = _leaky(jnp.dot(_bf16(y), w10_ref[...],
                       preferred_element_type=jnp.float32) + s10_ref[...])
    o_ref[0] = jnp.dot(_bf16(y), w11_ref[...],
                       preferred_element_type=jnp.float32).astype(o_ref.dtype)


def seg_head(gbias, x123, pp):
    B, N, Cin = x123.shape
    tn = _pick_tile(N)
    Cpad = pp["c11w"].shape[1]
    Cg = gbias.shape[2]
    weights = (pp["c8x"], pp["c9w"], pp["c9s"], pp["c10w"], pp["c10s"],
               pp["c11w"])
    in_specs = ([pl.BlockSpec((1, 1, Cg), lambda b, n: (b, 0, 0)),
                 pl.BlockSpec((1, tn, Cin), lambda b, n: (b, n, 0))]
                + [pl.BlockSpec(w.shape, lambda b, n: (0, 0)) for w in weights])
    return pl.pallas_call(
        _head_kernel,
        out_shape=jax.ShapeDtypeStruct((B, N, Cpad), jnp.bfloat16),
        grid=(B, N // tn),
        in_specs=in_specs,
        out_specs=pl.BlockSpec((1, tn, Cpad), lambda b, n: (b, n, 0)),
        compiler_params=_cparams(("parallel", "parallel")),
    )(gbias, x123, *weights)


# -----------------------------------------------------------------------------
# Parameters (deterministic synthetic init) + host-side prep
# -----------------------------------------------------------------------------
def init_params(key, seg_num_all):
    keys = iter(jax.random.split(key, 32))

    def w(cin, cout):
        return 0.1 * jax.random.normal(next(keys), (cin, cout), jnp.float32)

    def bn(c):
        # eval-mode BatchNorm: running_mean=0, running_var=1
        i = jnp.arange(c, dtype=jnp.float32)
        gamma = 1.0 + 0.05 * jnp.cos(i)
        beta = 0.02 * jnp.sin(i)
        scale = gamma / jnp.sqrt(1.0 + BN_EPS)
        return scale, beta

    p = {}
    # Transform_Net
    p["t_conv1_w"] = w(6, 64);      p["t_bn1"] = bn(64)
    p["t_conv2_w"] = w(64, 128);    p["t_bn2"] = bn(128)
    p["t_conv3_w"] = w(128, 1024);  p["t_bn3"] = bn(1024)
    p["t_lin1_w"] = w(1024, 512);   p["t_bn4"] = bn(512)
    p["t_lin2_w"] = w(512, 256);    p["t_bn5"] = bn(256)
    p["t_trans_w"] = jnp.zeros((256, 9), jnp.float32)           # init.constant_(W, 0)
    p["t_trans_b"] = jnp.eye(3, dtype=jnp.float32).reshape(9)   # init.eye_(b.view(3,3))
    # DGCNN_partseg
    p["conv1_w"] = w(6, 64);     p["bn1"] = bn(64)
    p["conv2_w"] = w(64, 64);    p["bn2"] = bn(64)
    p["conv3_w"] = w(128, 64);   p["bn3"] = bn(64)
    p["conv4_w"] = w(64, 64);    p["bn4"] = bn(64)
    p["conv5_w"] = w(128, 64);   p["bn5"] = bn(64)
    p["conv6_w"] = w(192, 1024); p["bn6"] = bn(1024)
    p["conv7_w"] = w(16, 64);    p["bn7"] = bn(64)
    p["conv8_w"] = w(1280, 256); p["bn8"] = bn(256)
    p["conv9_w"] = w(256, 256);  p["bn9"] = bn(256)
    p["conv10_w"] = w(256, 128); p["bn10"] = bn(128)
    p["conv11_w"] = w(128, seg_num_all)
    return p


def prepare_params(p):
    """Fold BN scales into bf16 weights, split concat weights, pad conv11."""
    # TODO(synk): for real checkpoints fold running_mean/var into scale/shift.

    def fold(w, scale):
        return (w * scale[None, :]).astype(jnp.bfloat16)

    def edge_split(w, scale, cin):
        wd, wc = w[:cin], w[cin:]
        return fold(wd, scale), fold(wc - wd, scale)

    def row(v):
        return v.reshape(1, -1).astype(jnp.float32)

    pp = {}
    # Transform_Net
    s, b = p["t_bn1"]; pp["t1a"], pp["t1b"] = edge_split(p["t_conv1_w"], s, 3); pp["t1s"] = row(b)
    s, b = p["t_bn2"]; pp["t2w"] = fold(p["t_conv2_w"], s); pp["t2s"] = row(b)
    s, b = p["t_bn3"]; pp["t3w"] = fold(p["t_conv3_w"], s); pp["t3s"] = row(b)
    s, b = p["t_bn4"]; pp["tl1w"] = fold(p["t_lin1_w"], s); pp["tl1s"] = row(b)
    s, b = p["t_bn5"]; pp["tl2w"] = fold(p["t_lin2_w"], s); pp["tl2s"] = row(b)
    pp["ttw"] = p["t_trans_w"].astype(jnp.bfloat16); pp["ttb"] = row(p["t_trans_b"])
    # edge conv blocks
    s, b = p["bn1"]; pp["c1a"], pp["c1b"] = edge_split(p["conv1_w"], s, 3); pp["c1s"] = row(b)
    s, b = p["bn2"]; pp["c2w"] = fold(p["conv2_w"], s); pp["c2s"] = row(b)
    s, b = p["bn3"]; pp["c3a"], pp["c3b"] = edge_split(p["conv3_w"], s, 64); pp["c3s"] = row(b)
    s, b = p["bn4"]; pp["c4w"] = fold(p["conv4_w"], s); pp["c4s"] = row(b)
    s, b = p["bn5"]; pp["c5a"], pp["c5b"] = edge_split(p["conv5_w"], s, 64); pp["c5s"] = row(b)
    # conv6: consumes the packed (x1|x2|x3) slab directly (single 192-deep dot)
    s, b = p["bn6"]; pp["c6w"] = fold(p["conv6_w"], s); pp["c6s"] = row(b)
    # head: conv7 + conv8 split into [g6 | label | x1x2x3 slab] + conv9/10/11
    s, b = p["bn7"]; pp["c7w"] = fold(p["conv7_w"], s); pp["c7s"] = row(b)
    s, b = p["bn8"]; w8 = fold(p["conv8_w"], s)
    pp["c8g6"], pp["c8gl"], pp["c8x"] = w8[:1024], w8[1024:1088], w8[1088:1280]
    pp["c8s"] = row(b)
    s, b = p["bn9"]; pp["c9w"] = fold(p["conv9_w"], s); pp["c9s"] = row(b)
    s, b = p["bn10"]; pp["c10w"] = fold(p["conv10_w"], s); pp["c10s"] = row(b)
    w11 = p["conv11_w"]
    pad = (-w11.shape[1]) % 128
    pp["c11w"] = jnp.pad(w11, ((0, 0), (0, pad))).astype(jnp.bfloat16)
    return pp


# -----------------------------------------------------------------------------
# Forward pass
# -----------------------------------------------------------------------------
def dgcnn_partseg_forward(pp, x, l, *, k, seg):
    """x: (B, 3, N)  l: (B, 16, 1)  ->  (B, seg, N)  (matches PyTorch)."""
    B, _, N = x.shape
    xT = jnp.transpose(x, (0, 2, 1)).astype(jnp.float32)        # (B, N, 3)

    # ---- Transform_Net on the graph features of the raw points ----
    n0 = knn_gather(xT, k)                                      # (B, k, N, 3) bf16
    h = edge_conv2_max(n0, xT, pp["t1a"], pp["t1b"], pp["t1s"],
                       pp["t2w"], pp["t2s"])                    # (B, N, 128) bf16
    g = conv_bn_act_max_n(h, pp["t3w"], pp["t3s"])              # (B, 1, 1024) f32
    t = tnet_head(g.reshape(B, 1024), pp["tl1w"], pp["tl1s"],
                  pp["tl2w"], pp["tl2s"], pp["ttw"], pp["ttb"])  # (B, 9)
    xt = bmm(xT, t.reshape(B, 3, 3))                            # (B, N, 3) f32

    # ---- edge conv block 1 ----
    n1 = knn_gather(xt, k)
    x1 = edge_conv2_max(n1, xt, pp["c1a"], pp["c1b"], pp["c1s"],
                        pp["c2w"], pp["c2s"])                   # (B, N, 64) bf16
    # ---- edge conv block 2 ----
    n2 = knn_gather(x1, k)
    x2 = edge_conv2_max(n2, x1, pp["c3a"], pp["c3b"], pp["c3s"],
                        pp["c4w"], pp["c4s"])                   # (B, N, 64) bf16
    # ---- edge conv block 3 ----
    n3 = knn_gather(x2, k)
    x3 = edge_conv1_max(n3, x2, pp["c5a"], pp["c5b"], pp["c5s"])  # (B, N, 64) bf16

    # ---- packed 192-wide activation slab shared by conv6 and the seg head ----
    x123 = jnp.concatenate([x1, x2, x3], axis=-1)               # (B, N, 192) bf16

    # ---- global feature (conv6 + max over points) ----
    g6 = conv_bn_act_max_n(x123, pp["c6w"], pp["c6s"])          # (B, 1, 1024) f32

    # ---- per-batch global bias (conv7(label) + g6/label slice of conv8) ----
    lab = l.reshape(B, 1, 16).astype(jnp.float32)
    gbias = global_bias(g6, lab, pp)                            # (B, 1, 256) f32

    # ---- segmentation head (conv8..conv11 fused, lane-padded bf16 output) ----
    out = seg_head(gbias, x123, pp)                             # (B, N, 128) bf16
    out = out[:, :, :seg].astype(jnp.float32)
    return jnp.transpose(out, (0, 2, 1))                        # (B, seg, N)


# -----------------------------------------------------------------------------
if __name__ == "__main__":
    B, N, K_NN, NUM_CATEGORIES, SEG_NUM_ALL = 2, 16, 4, 16, 8

    key = jax.random.PRNGKey(0)
    kx, kl, kp = jax.random.split(key, 3)

    x = jax.random.normal(kx, (B, 3, N), jnp.float32)            # point cloud (B, 3, N)
    cat = jax.random.randint(kl, (B,), 0, NUM_CATEGORIES)
    l = jax.nn.one_hot(cat, NUM_CATEGORIES, dtype=jnp.float32).reshape(B, NUM_CATEGORIES, 1)

    params = prepare_params(init_params(kp, SEG_NUM_ALL))

    fwd = jax.jit(functools.partial(dgcnn_partseg_forward, k=K_NN, seg=SEG_NUM_ALL))
    out = jax.block_until_ready(fwd(params, x, l))

    assert out.shape == (B, SEG_NUM_ALL, N), out.shape
    assert bool(jnp.all(jnp.isfinite(out)))
    print("KERNEL_OK")
</pallas_src>

<mosaic_0001>
module attributes {stable_mosaic.version = 11 : i64} {
  func.func @_pairwise_kernel(%arg0: i32, %arg1: i32, %arg2: memref<1x16x3xf32, #tpu.memory_space<vmem>>, %arg3: memref<1x16x3xf32, #tpu.memory_space<vmem>>, %arg4: memref<1x1x16xf32, #tpu.memory_space<vmem>>, %arg5: memref<1x16x16xf32, #tpu.memory_space<vmem>>) attributes {dimension_semantics = [#tpu.dimension_semantics<parallel>, #tpu.dimension_semantics<parallel>], iteration_bounds = array<i64: 2, 1>, scalar_prefetch = 0 : i64, scratch_operands = 0 : i64, tpu.core_type = #tpu.core_type<tc>, window_params = [{transform_indices = @transform_0, window_bounds = array<i64: 1, 16, 3>}, {transform_indices = @transform_1, window_bounds = array<i64: 1, 16, 3>}, {transform_indices = @transform_2, window_bounds = array<i64: 1, 1, 16>}, {transform_indices = @transform_3, window_bounds = array<i64: 1, 16, 16>}]} {
    %c0 = arith.constant 0 : index
    %c0_0 = arith.constant 0 : index
    %c0_1 = arith.constant 0 : index
    %0 = vector.load %arg2[%c0, %c0_0, %c0_1] : memref<1x16x3xf32, #tpu.memory_space<vmem>>, vector<1x16x3xf32>
    %1 = vector.shape_cast %0 : vector<1x16x3xf32> to vector<16x3xf32>
    %c0_2 = arith.constant 0 : index
    %c0_3 = arith.constant 0 : index
    %c0_4 = arith.constant 0 : index
    %2 = vector.load %arg3[%c0_2, %c0_3, %c0_4] : memref<1x16x3xf32, #tpu.memory_space<vmem>>, vector<1x16x3xf32>
    %3 = vector.shape_cast %2 : vector<1x16x3xf32> to vector<16x3xf32>
    %cst = arith.constant dense<0.000000e+00> : vector<16x16xf32>
    %4 = tpu.matmul %1, %3, %cst {dimension_numbers = #tpu.dot_dimension_numbers<[1], [1], [0], [0], [0, 0, 1, 0], [], []>} : vector<16x3xf32>, vector<16x3xf32>, vector<16x16xf32> -> vector<16x16xf32>
    %5 = arith.mulf %1, %1 : vector<16x3xf32>
    %cst_5 = arith.constant dense<0.000000e+00> : vector<16xf32>
    %6 = vector.multi_reduction <add>, %5, %cst_5 [1] : vector<16x3xf32> to vector<16xf32>
    %7 = vector.shape_cast %6 : vector<16xf32> to vector<16x1xf32>
    %cst_6 = arith.constant 2.000000e+00 : f32
    %8 = vector.broadcast %cst_6 : f32 to vector<16x16xf32>
    %9 = arith.mulf %8, %4 : vector<16x16xf32>
    %10 = vector.broadcast %7 : vector<16x1xf32> to vector<16x16xf32>
    %11 = arith.subf %9, %10 : vector<16x16xf32>
    %c0_7 = arith.constant 0 : index
    %c0_8 = arith.constant 0 : index
    %c0_9 = arith.constant 0 : index
    %12 = vector.load %arg4[%c0_7, %c0_8, %c0_9] : memref<1x1x16xf32, #tpu.memory_space<vmem>>, vector<1x1x16xf32>
    %13 = vector.shape_cast %12 : vector<1x1x16xf32> to vector<1x16xf32>
    %14 = vector.broadcast %13 : vector<1x16xf32> to vector<16x16xf32>
    %15 = arith.subf %11, %14 : vector<16x16xf32>
    %c0_10 = arith.constant 0 : index
    %c0_11 = arith.constant 0 : index
    %c0_12 = arith.constant 0 : index
    %16 = vector.load %arg5[%c0_10, %c0_11, %c0_12] : memref<1x16x16xf32, #tpu.memory_space<vmem>>, vector<1x16x16xf32>
    %17 = vector.shape_cast %16 : vector<1x16x16xf32> to vector<16x16xf32>
    %18 = vector.shape_cast %15 : vector<16x16xf32> to vector<1x16x16xf32>
    tpu.vector_store %arg5[%c0_10, %c0_11, %c0_12], %18 {strides = array<i32>} : memref<1x16x16xf32, #tpu.memory_space<vmem>>, vector<1x16x16xf32>,
    return
  }
  func.func @transform_0(%arg0: i32, %arg1: i32) -> (i32, i32, i32) {
    %c0_i32 = arith.constant 0 : i32
    %c0_i32_0 = arith.constant 0 : i32
    return %arg0, %arg1, %c0_i32 : i32, i32, i32
  }
  func.func @transform_1(%arg0: i32, %arg1: i32) -> (i32, i32, i32) {
    %c0_i32 = arith.constant 0 : i32
    %c0_i32_0 = arith.constant 0 : i32
    %c0_i32_1 = arith.constant 0 : i32
    return %arg0, %c0_i32, %c0_i32_0 : i32, i32, i32
  }
  func.func @transform_2(%arg0: i32, %arg1: i32) -> (i32, i32, i32) {
    %c0_i32 = arith.constant 0 : i32
    %c0_i32_0 = arith.constant 0 : i32
    %c0_i32_1 = arith.constant 0 : i32
    return %arg0, %c0_i32, %c0_i32_0 : i32, i32, i32
  }
  func.func @transform_3(%arg0: i32, %arg1: i32) -> (i32, i32, i32) {
    %c0_i32 = arith.constant 0 : i32
    %c0_i32_0 = arith.constant 0 : i32
    return %arg0, %arg1, %c0_i32 : i32, i32, i32
  }
}

module attributes {stable_mosaic.version = 11 : i64} {
  func.func @_edge_conv2_max_kernel(%arg0: i32, %arg1: i32, %arg2: memref<1x4x16x3xbf16, #tpu.memory_space<vmem>>, %arg3: memref<1x16x3xf32, #tpu.memory_space<vmem>>, %arg4: memref<3x64xbf16, #tpu.memory_space<vmem>>, %arg5: memref<3x64xbf16, #tpu.memory_space<vmem>>, %arg6: memref<1x64xf32, #tpu.memory_space<vmem>>, %arg7: memref<64x128xbf16, #tpu.memory_space<vmem>>, %arg8: memref<1x128xf32, #tpu.memory_space<vmem>>, %arg9: memref<1x16x128xbf16, #tpu.memory_space<vmem>>) attributes {dimension_semantics = [#tpu.dimension_semantics<parallel>, #tpu.dimension_semantics<parallel>], iteration_bounds = array<i64: 2, 1>, scalar_prefetch = 0 : i64, scratch_operands = 0 : i64, tpu.core_type = #tpu.core_type<tc>, window_params = [{transform_indices = @transform_0, window_bounds = array<i64: 1, 4, 16, 3>}, {transform_indices = @transform_1, window_bounds = array<i64: 1, 16, 3>}, {pipeline_mode = #tpu.pipeline_mode<synchronous>, transform_indices = @transform_2, window_bounds = array<i64: 3, 64>}, {pipeline_mode = #tpu.pipeline_mode<synchronous>, transform_indices = @transform_3, window_bounds = array<i64: 3, 64>}, {pipeline_mode = #tpu.pipeline_mode<synchronous>, transform_indices = @transform_4, window_bounds = array<i64: 1, 64>}, {pipeline_mode = #tpu.pipeline_mode<synchronous>, transform_indices = @transform_5, window_bounds = array<i64: 64, 128>}, {pipeline_mode = #tpu.pipeline_mode<synchronous>, transform_indices = @transform_6, window_bounds = array<i64: 1, 128>}, {transform_indices = @transform_7, window_bounds = array<i64: 1, 16, 128>}]} {
    %c0 = arith.constant 0 : index
    %c0_0 = arith.constant 0 : index
    %c0_1 = arith.constant 0 : index
    %0 = vector.load %arg3[%c0, %c0_0, %c0_1] : memref<1x16x3xf32, #tpu.memory_space<vmem>>, vector<1x16x3xf32>
    %1 = vector.shape_cast %0 : vector<1x16x3xf32> to vector<16x3xf32>
    %2 = arith.truncf %1 : vector<16x3xf32> to vector<16x3xbf16>
    %c0_2 = arith.constant 0 : index
    %c0_3 = arith.constant 0 : index
    %3 = vector.load %arg5[%c0_2, %c0_3] : memref<3x64xbf16, #tpu.memory_space<vmem>>, vector<3x64xbf16>
    %cst = arith.constant dense<0.000000e+00> : vector<16x64xf32>
    %4 = tpu.matmul %2, %3, %cst {dimension_numbers = #tpu.dot_dimension_numbers<[1], [0], [0], [1], [0, 0, 1, 1], [], []>} : vector<16x3xbf16>, vector<3x64xbf16>, vector<16x64xf32> -> vector<16x64xf32>
    %c0_4 = arith.constant 0 : index
    %c0_5 = arith.constant 0 : index
    %5 = vector.load %arg6[%c0_4, %c0_5] : memref<1x64xf32, #tpu.memory_space<vmem>>, vector<1x64xf32>
    %6 = vector.broadcast %5 : vector<1x64xf32> to vector<16x64xf32>
    %7 = arith.addf %4, %6 : vector<16x64xf32>
    %c0_6 = arith.constant 0 : index
    %c0_7 = arith.constant 0 : index
    %c0_8 = arith.constant 0 : index
    %c0_9 = arith.constant 0 : index
    %8 = vector.load %arg2[%c0_6, %c0_7, %c0_8, %c0_9] : memref<1x4x16x3xbf16, #tpu.memory_space<vmem>>, vector<1x1x16x3xbf16>
    %9 = vector.shape_cast %8 : vector<1x1x16x3xbf16> to vector<16x3xbf16>
    %c0_10 = arith.constant 0 : index
    %c0_11 = arith.constant 0 : index
    %10 = vector.load %arg4[%c0_10, %c0_11] : memref<3x64xbf16, #tpu.memory_space<vmem>>, vector<3x64xbf16>
    %cst_12 = arith.constant dense<0.000000e+00> : vector<16x64xf32>
    %11 = tpu.matmul %9, %10, %cst_12 {dimension_numbers = #tpu.dot_dimension_numbers<[1], [0], [0], [1], [0, 0, 1, 1], [], []>} : vector<16x3xbf16>, vector<3x64xbf16>, vector<16x64xf32> -> vector<16x64xf32>
    %12 = arith.addf %11, %7 : vector<16x64xf32>
    %cst_13 = arith.constant 0.000000e+00 : f32
    %13 = vector.broadcast %cst_13 : f32 to vector<16x64xf32>
    %14 = arith.cmpf oge, %12, %13 : vector<16x64xf32>
    %cst_14 = arith.constant 2.000000e-01 : f32
    %15 = vector.broadcast %cst_14 : f32 to vector<16x64xf32>
    %16 = arith.mulf %15, %12 : vector<16x64xf32>
    %17 = arith.select %14, %12, %16 : vector<16x64xi1>, vector<16x64xf32>
    %18 = arith.truncf %17 : vector<16x64xf32> to vector<16x64xbf16>
    %c0_15 = arith.constant 0 : index
    %c0_16 = arith.constant 0 : index
    %19 = vector.load %arg7[%c0_15, %c0_16] : memref<64x128xbf16, #tpu.memory_space<vmem>>, vector<64x128xbf16>
    %cst_17 = arith.constant dense<0.000000e+00> : vector<16x128xf32>
    %20 = tpu.matmul %18, %19, %cst_17 {dimension_numbers = #tpu.dot_dimension_numbers<[1], [0], [0], [1], [0, 0, 1, 1], [], []>} : vector<16x64xbf16>, vector<64x128xbf16>, vector<16x128xf32> -> vector<16x128xf32>
    %c0_18 = arith.constant 0 : index
    %c0_19 = arith.constant 0 : index
    %21 = vector.load %arg8[%c0_18, %c0_19] : memref<1x128xf32, #tpu.memory_space<vmem>>, vector<1x128xf32>
    %22 = vector.broadcast %21 : vector<1x128xf32> to vector<16x128xf32>
    %23 = arith.addf %20, %22 : vector<16x128xf32>
    %cst_20 = arith.constant 0.000000e+00 : f32
    %24 = vector.broadcast %cst_20 : f32 to vector<16x128xf32>
    %25 = arith.cmpf oge, %23, %24 : vector<16x128xf32>
    %cst_21 = arith.constant 2.000000e-01 : f32
    %26 = vector.broadcast %cst_21 : f32 to vector<16x128xf32>
    %27 = arith.mulf %26, %23 : vector<16x128xf32>
    %28 = arith.select %25, %23, %27 : vector<16x128xi1>, vector<16x128xf32>
    %c0_22 = arith.constant 0 : index
    %c1 = arith.constant 1 : index
    %c0_23 = arith.constant 0 : index
    %c0_24 = arith.constant 0 : index
    %29 = vector.load %arg2[%c0_22, %c1, %c0_23, %c0_24] : memref<1x4x16x3xbf16, #tpu.memory_space<vmem>>, vector<1x1x16x3xbf16>
    %30 = vector.shape_cast %29 : vector<1x1x16x3xbf16> to vector<16x3xbf16>
    %c0_25 = arith.constant 0 : index
    %c0_26 = arith.constant 0 : index
    %31 = vector.load %arg4[%c0_25, %c0_26] : memref<3x64xbf16, #tpu.memory_space<vmem>>, vector<3x64xbf16>
    %cst_27 = arith.constant dense<0.000000e+00> : vector<16x64xf32>
    %32 = tpu.matmul %30, %31, %cst_27 {dimension_numbers = #tpu.dot_dimension_numbers<[1], [0], [0], [1], [0, 0, 1, 1], [], []>} : vector<16x3xbf16>, vector<3x64xbf16>, vector<16x64xf32> -> vector<16x64xf32>
    %33 = arith.addf %32, %7 : vector<16x64xf32>
    %cst_28 = arith.constant 0.000000e+00 : f32
    %34 = vector.broadcast %cst_28 : f32 to vector<16x64xf32>
    %35 = arith.cmpf oge, %33, %34 : vector<16x64xf32>
    %cst_29 = arith.constant 2.000000e-01 : f32
    %36 = vector.broadcast %cst_29 : f32 to vector<16x64xf32>
    %37 = arith.mulf %36, %33 : vector<16x64xf32>
    %38 = arith.select %35, %33, %37 : vector<16x64xi1>, vector<16x64xf32>
    %39 = arith.truncf %38 : vector<16x64xf32> to vector<16x64xbf16>
    %c0_30 = arith.constant 0 : index
    %c0_31 = arith.constant 0 : index
    %40 = vector.load %arg7[%c0_30, %c0_31] : memref<64x128xbf16, #tpu.memory_space<vmem>>, vector<64x128xbf16>
    %cst_32 = arith.constant dense<0.000000e+00> : vector<16x128xf32>
    %41 = tpu.matmul %39, %40, %cst_32 {dimension_numbers = #tpu.dot_dimension_numbers<[1], [0], [0], [1], [0, 0, 1, 1], [], []>} : vector<16x64xbf16>, vector<64x128xbf16>, vector<16x128xf32> -> vector<16x128xf32>
    %c0_33 = arith.constant 0 : index
    %c0_34 = arith.constant 0 : index
    %42 = vector.load %arg8[%c0_33, %c0_34] : memref<1x128xf32, #tpu.memory_space<vmem>>, vector<1x128xf32>
    %43 = vector.broadcast %42 : vector<1x128xf32> to vector<16x128xf32>
    %44 = arith.addf %41, %43 : vector<16x128xf32>
    %cst_35 = arith.constant 0.000000e+00 : f32
    %45 = vector.broadcast %cst_35 : f32 to vector<16x128xf32>
    %46 = arith.cmpf oge, %44, %45 : vector<16x128xf32>
    %cst_36 = arith.constant 2.000000e-01 : f32
    %47 = vector.broadcast %cst_36 : f32 to vector<16x128xf32>
    %48 = arith.mulf %47, %44 : vector<16x128xf32>
    %49 = arith.select %46, %44, %48 : vector<16x128xi1>, vector<16x128xf32>
    %50 = arith.maximumf %28, %49 : vector<16x128xf32>
    %c0_37 = arith.constant 0 : index
    %c2 = arith.constant 2 : index
    %c0_38 = arith.constant 0 : index
    %c0_39 = arith.constant 0 : index
    %51 = vector.load %arg2[%c0_37, %c2, %c0_38, %c0_39] : memref<1x4x16x3xbf16, #tpu.memory_space<vmem>>, vector<1x1x16x3xbf16>
    %52 = vector.shape_cast %51 : vector<1x1x16x3xbf16> to vector<16x3xbf16>
    %c0_40 = arith.constant 0 : index
    %c0_41 = arith.constant 0 : index
    %53 = vector.load %arg4[%c0_40, %c0_41] : memref<3x64xbf16, #tpu.memory_space<vmem>>, vector<3x64xbf16>
    %cst_42 = arith.constant dense<0.000000e+00> : vector<16x64xf32>
    %54 = tpu.matmul %52, %53, %cst_42 {dimension_numbers = #tpu.dot_dimension_numbers<[1], [0], [0], [1], [0, 0, 1, 1], [], []>} : vector<16x3xbf16>, vector<3x64xbf16>, vector<16x64xf32> -> vector<16x64xf32>
    %55 = arith.addf %54, %7 : vector<16x64xf32>
    %cst_43 = arith.constant 0.000000e+00 : f32
    %56 = vector.broadcast %cst_43 : f32 to vector<16x64xf32>
    %57 = arith.cmpf oge, %55, %56 : vector<16x64xf32>
    %cst_44 = arith.constant 2.000000e-01 : f32
    %58 = vector.broadcast %cst_44 : f32 to vector<16x64xf32>
    %59 = arith.mulf %58, %55 : vector<16x64xf32>
    %60 = arith.select %57, %55, %59 : vector<16x64xi1>, vector<16x64xf32>
    %61 = arith.truncf %60 : vector<16x64xf32> to vector<16x64xbf16>
    %c0_45 = arith.constant 0 : index
    %c0_46 = arith.constant 0 : index
    %62 = vector.load %arg7[%c0_45, %c0_46] : memref<64x128xbf16, #tpu.memory_space<vmem>>, vector<64x128xbf16>
    %cst_47 = arith.constant dense<0.000000e+00> : vector<16x128xf32>
    %63 = tpu.matmul %61, %62, %cst_47 {dimension_numbers = #tpu.dot_dimension_numbers<[1], [0], [0], [1], [0, 0, 1, 1], [], []>} : vector<16x64xbf16>, vector<64x128xbf16>, vector<16x128xf32> -> vector<16x128xf32>
    %c0_48 = arith.constant 0 : index
    %c0_49 = arith.constant 0 : index
    %64 = vector.load %arg8[%c0_48, %c0_49] : memref<1x128xf32, #tpu.memory_space<vmem>>, vector<1x128xf32>
    %65 = vector.broadcast %64 : vector<1x128xf32> to vector<16x128xf32>
    %66 = arith.addf %63, %65 : vector<16x128xf32>
    %cst_50 = arith.constant 0.000000e+00 : f32
    %67 = vector.broadcast %cst_50 : f32 to vector<16x128xf32>
    %68 = arith.cmpf oge, %66, %67 : vector<16x128xf32>
    %cst_51 = arith.constant 2.000000e-01 : f32
    %69 = vector.broadcast %cst_51 : f32 to vector<16x128xf32>
    %70 = arith.mulf %69, %66 : vector<16x128xf32>
    %71 = arith.select %68, %66, %70 : vector<16x128xi1>, vector<16x128xf32>
    %72 = arith.maximumf %50, %71 : vector<16x128xf32>
    %c0_52 = arith.constant 0 : index
    %c3 = arith.constant 3 : index
    %c0_53 = arith.constant 0 : index
    %c0_54 = arith.constant 0 : index
    %73 = vector.load %arg2[%c0_52, %c3, %c0_53, %c0_54] : memref<1x4x16x3xbf16, #tpu.memory_space<vmem>>, vector<1x1x16x3xbf16>
    %74 = vector.shape_cast %73 : vector<1x1x16x3xbf16> to vector<16x3xbf16>
    %c0_55 = arith.constant 0 : index
    %c0_56 = arith.constant 0 : index
    %75 = vector.load %arg4[%c0_55, %c0_56] : memref<3x64xbf16, #tpu.memory_space<vmem>>, vector<3x64xbf16>
    %cst_57 = arith.constant dense<0.000000e+00> : vector<16x64xf32>
    %76 = tpu.matmul %74, %75, %cst_57 {dimension_numbers = #tpu.dot_dimension_numbers<[1], [0], [0], [1], [0, 0, 1, 1], [], []>} : vector<16x3xbf16>, vector<3x64xbf16>, vector<16x64xf32> -> vector<16x64xf32>
    %77 = arith.addf %76, %7 : vector<16x64xf32>
    %cst_58 = arith.constant 0.000000e+00 : f32
    %78 = vector.broadcast %cst_58 : f32 to vector<16x64xf32>
    %79 = arith.cmpf oge, %77, %78 : vector<16x64xf32>
    %cst_59 = arith.constant 2.000000e-01 : f32
    %80 = vector.broadcast %cst_59 : f32 to vector<16x64xf32>
    %81 = arith.mulf %80, %77 : vector<16x64xf32>
    %82 = arith.select %79, %77, %81 : vector<16x64xi1>, vector<16x64xf32>
    %83 = arith.truncf %82 : vector<16x64xf32> to vector<16x64xbf16>
    %c0_60 = arith.constant 0 : index
    %c0_61 = arith.constant 0 : index
    %84 = vector.load %arg7[%c0_60, %c0_61] : memref<64x128xbf16, #tpu.memory_space<vmem>>, vector<64x128xbf16>
    %cst_62 = arith.constant dense<0.000000e+00> : vector<16x128xf32>
    %85 = tpu.matmul %83, %84, %cst_62 {dimension_numbers = #tpu.dot_dimension_numbers<[1], [0], [0], [1], [0, 0, 1, 1], [], []>} : vector<16x64xbf16>, vector<64x128xbf16>, vector<16x128xf32> -> vector<16x128xf32>
    %c0_63 = arith.constant 0 : index
    %c0_64 = arith.constant 0 : index
    %86 = vector.load %arg8[%c0_63, %c0_64] : memref<1x128xf32, #tpu.memory_space<vmem>>, vector<1x128xf32>
    %87 = vector.broadcast %86 : vector<1x128xf32> to vector<16x128xf32>
    %88 = arith.addf %85, %87 : vector<16x128xf32>
    %cst_65 = arith.constant 0.000000e+00 : f32
    %89 = vector.broadcast %cst_65 : f32 to vector<16x128xf32>
    %90 = arith.cmpf oge, %88, %89 : vector<16x128xf32>
    %cst_66 = arith.constant 2.000000e-01 : f32
    %91 = vector.broadcast %cst_66 : f32 to vector<16x128xf32>
    %92 = arith.mulf %91, %88 : vector<16x128xf32>
    %93 = arith.select %90, %88, %92 : vector<16x128xi1>, vector<16x128xf32>
    %94 = arith.maximumf %72, %93 : vector<16x128xf32>
    %95 = arith.truncf %94 : vector<16x128xf32> to vector<16x128xbf16>
    %c0_67 = arith.constant 0 : index
    %c0_68 = arith.constant 0 : index
    %c0_69 = arith.constant 0 : index
    %96 = vector.load %arg9[%c0_67, %c0_68, %c0_69] : memref<1x16x128xbf16, #tpu.memory_space<vmem>>, vector<1x16x128xbf16>
    %97 = vector.shape_cast %96 : vector<1x16x128xbf16> to vector<16x128xbf16>
    %98 = vector.shape_cast %95 : vector<16x128xbf16> to vector<1x16x128xbf16>
    tpu.vector_store %arg9[%c0_67, %c0_68, %c0_69], %98 {strides = array<i32>} : memref<1x16x128xbf16, #tpu.memory_space<vmem>>, vector<1x16x128xbf16>,
    return
  }
  func.func @transform_0(%arg0: i32, %arg1: i32) -> (i32, i32, i32, i32) {
    %c0_i32 = arith.constant 0 : i32
    %c0_i32_0 = arith.constant 0 : i32
    %c0_i32_1 = arith.constant 0 : i32
    return %arg0, %c0_i32, %arg1, %c0_i32_0 : i32, i32, i32, i32
  }
  func.func @transform_1(%arg0: i32, %arg1: i32) -> (i32, i32, i32) {
    %c0_i32 = arith.constant 0 : i32
    %c0_i32_0 = arith.constant 0 : i32
    return %arg0, %arg1, %c0_i32 : i32, i32, i32
  }
  func.func @transform_2(%arg0: i32, %arg1: i32) -> (i32, i32) {
    %c0_i32 = arith.constant 0 : i32
    %c0_i32_0 = arith.constant 0 : i32
    %c0_i32_1 = arith.constant 0 : i32
    return %c0_i32, %c0_i32_0 : i32, i32
  }
  func.func @transform_3(%arg0: i32, %arg1: i32) -> (i32, i32) {
    %c0_i32 = arith.constant 0 : i32
    %c0_i32_0 = arith.constant 0 : i32
    %c0_i32_1 = arith.constant 0 : i32
    return %c0_i32, %c0_i32_0 : i32, i32
  }
  func.func @transform_4(%arg0: i32, %arg1: i32) -> (i32, i32) {
    %c0_i32 = arith.constant 0 : i32
    %c0_i32_0 = arith.constant 0 : i32
    %c0_i32_1 = arith.constant 0 : i32
    return %c0_i32, %c0_i32_0 : i32, i32
  }
  func.func @transform_5(%arg0: i32, %arg1: i32) -> (i32, i32) {
    %c0_i32 = arith.constant 0 : i32
    %c0_i32_0 = arith.constant 0 : i32
    %c0_i32_1 = arith.constant 0 : i32
    return %c0_i32, %c0_i32_0 : i32, i32
  }
  func.func @transform_6(%arg0: i32, %arg1: i32) -> (i32, i32) {
    %c0_i32 = arith.constant 0 : i32
    %c0_i32_0 = arith.constant 0 : i32
    %c0_i32_1 = arith.constant 0 : i32
    return %c0_i32, %c0_i32_0 : i32, i32
  }
  func.func @transform_7(%arg0: i32, %arg1: i32) -> (i32, i32, i32) {
    %c0_i32 = arith.constant 0 : i32
    %c0_i32_0 = arith.constant 0 : i32
    return %arg0, %arg1, %c0_i32 : i32, i32, i32
  }
}

module attributes {stable_mosaic.version = 11 : i64} {
  func.func @_conv_max_n_kernel(%arg0: i32, %arg1: i32, %arg2: memref<1x16x128xbf16, #tpu.memory_space<vmem>>, %arg3: memref<128x1024xbf16, #tpu.memory_space<vmem>>, %arg4: memref<1x1024xf32, #tpu.memory_space<vmem>>, %arg5: memref<1x1x1024xf32, #tpu.memory_space<vmem>>) attributes {dimension_semantics = [#tpu.dimension_semantics<parallel>, #tpu.dimension_semantics<arbitrary>], iteration_bounds = array<i64: 2, 1>, scalar_prefetch = 0 : i64, scratch_operands = 0 : i64, tpu.core_type = #tpu.core_type<tc>, window_params = [{transform_indices = @transform_0, window_bounds = array<i64: 1, 16, 128>}, {pipeline_mode = #tpu.pipeline_mode<synchronous>, transform_indices = @transform_1, window_bounds = array<i64: 128, 1024>}, {pipeline_mode = #tpu.pipeline_mode<synchronous>, transform_indices = @transform_2, window_bounds = array<i64: 1, 1024>}, {transform_indices = @transform_3, window_bounds = array<i64: 1, 1, 1024>}]} {
    %c0 = arith.constant 0 : index
    %c0_0 = arith.constant 0 : index
    %c0_1 = arith.constant 0 : index
    %0 = vector.load %arg2[%c0, %c0_0, %c0_1] : memref<1x16x128xbf16, #tpu.memory_space<vmem>>, vector<1x16x128xbf16>
    %1 = vector.shape_cast %0 : vector<1x16x128xbf16> to vector<16x128xbf16>
    %c0_2 = arith.constant 0 : index
    %c0_3 = arith.constant 0 : index
    %2 = vector.load %arg3[%c0_2, %c0_3] : memref<128x1024xbf16, #tpu.memory_space<vmem>>, vector<128x1024xbf16>
    %cst = arith.constant dense<0.000000e+00> : vector<16x1024xf32>
    %3 = tpu.matmul %1, %2, %cst {dimension_numbers = #tpu.dot_dimension_numbers<[1], [0], [0], [1], [0, 0, 1, 1], [], []>} : vector<16x128xbf16>, vector<128x1024xbf16>, vector<16x1024xf32> -> vector<16x1024xf32>
    %c0_4 = arith.constant 0 : index
    %c0_5 = arith.constant 0 : index
    %4 = vector.load %arg4[%c0_4, %c0_5] : memref<1x1024xf32, #tpu.memory_space<vmem>>, vector<1x1024xf32>
    %5 = vector.broadcast %4 : vector<1x1024xf32> to vector<16x1024xf32>
    %6 = arith.addf %3, %5 : vector<16x1024xf32>
    %cst_6 = arith.constant 0.000000e+00 : f32
    %7 = vector.broadcast %cst_6 : f32 to vector<16x1024xf32>
    %8 = arith.cmpf oge, %6, %7 : vector<16x1024xf32>
    %cst_7 = arith.constant 2.000000e-01 : f32
    %9 = vector.broadcast %cst_7 : f32 to vector<16x1024xf32>
    %10 = arith.mulf %9, %6 : vector<16x1024xf32>
    %11 = arith.select %8, %6, %10 : vector<16x1024xi1>, vector<16x1024xf32>
    %cst_8 = arith.constant dense<0xFF800000> : vector<1024xf32>
    %12 = vector.multi_reduction <maximumf>, %11, %cst_8 [0] : vector<16x1024xf32> to vector<1024xf32>
    %13 = vector.shape_cast %12 : vector<1024xf32> to vector<1x1024xf32>
    %c0_i32 = arith.constant 0 : i32
    %14 = arith.cmpi eq, %arg1, %c0_i32 : i32
    %15 = arith.extui %14 : i1 to i32
    %c0_i32_9 = arith.constant 0 : i32
    %16 = arith.cmpi ne, %15, %c0_i32_9 : i32
    scf.if %16 {
      %c0_12 = arith.constant 0 : index
      %c0_13 = arith.constant 0 : index
      %c0_14 = arith.constant 0 : index
      %20 = vector.load %arg5[%c0_12, %c0_13, %c0_14] : memref<1x1x1024xf32, #tpu.memory_space<vmem>>, vector<1x1x1024xf32>
      %21 = vector.shape_cast %20 : vector<1x1x1024xf32> to vector<1x1024xf32>
      %22 = vector.shape_cast %13 : vector<1x1024xf32> to vector<1x1x1024xf32>
      tpu.vector_store %arg5[%c0_12, %c0_13, %c0_14], %22 {strides = array<i32>} : memref<1x1x1024xf32, #tpu.memory_space<vmem>>, vector<1x1x1024xf32>,
    } else {
    }
    %c0_i32_10 = arith.constant 0 : i32
    %17 = arith.cmpi sgt, %arg1, %c0_i32_10 : i32
    %18 = arith.extui %17 : i1 to i32
    %c0_i32_11 = arith.constant 0 : i32
    %19 = arith.cmpi ne, %18, %c0_i32_11 : i32
    scf.if %19 {
      %c0_12 = arith.constant 0 : index
      %c0_13 = arith.constant 0 : index
      %c0_14 = arith.constant 0 : index
      %20 = vector.load %arg5[%c0_12, %c0_13, %c0_14] : memref<1x1x1024xf32, #tpu.memory_space<vmem>>, vector<1x1x1024xf32>
      %21 = vector.shape_cast %20 : vector<1x1x1024xf32> to vector<1x1024xf32>
      %22 = arith.maximumf %21, %13 : vector<1x1024xf32>
      %c0_15 = arith.constant 0 : index
      %c0_16 = arith.constant 0 : index
      %c0_17 = arith.constant 0 : index
      %23 = vector.load %arg5[%c0_15, %c0_16, %c0_17] : memref<1x1x1024xf32, #tpu.memory_space<vmem>>, vector<1x1x1024xf32>
      %24 = vector.shape_cast %23 : vector<1x1x1024xf32> to vector<1x1024xf32>
      %25 = vector.shape_cast %22 : vector<1x1024xf32> to vector<1x1x1024xf32>
      tpu.vector_store %arg5[%c0_15, %c0_16, %c0_17], %25 {strides = array<i32>} : memref<1x1x1024xf32, #tpu.memory_space<vmem>>, vector<1x1x1024xf32>,
    } else {
    }
    return
  }
  func.func @transform_0(%arg0: i32, %arg1: i32) -> (i32, i32, i32) {
    %c0_i32 = arith.constant 0 : i32
    %c0_i32_0 = arith.constant 0 : i32
    return %arg0, %arg1, %c0_i32 : i32, i32, i32
  }
  func.func @transform_1(%arg0: i32, %arg1: i32) -> (i32, i32) {
    %c0_i32 = arith.constant 0 : i32
    %c0_i32_0 = arith.constant 0 : i32
    %c0_i32_1 = arith.constant 0 : i32
    return %c0_i32, %c0_i32_0 : i32, i32
  }
  func.func @transform_2(%arg0: i32, %arg1: i32) -> (i32, i32) {
    %c0_i32 = arith.constant 0 : i32
    %c0_i32_0 = arith.constant 0 : i32
    %c0_i32_1 = arith.constant 0 : i32
    return %c0_i32, %c0_i32_0 : i32, i32
  }
  func.func @transform_3(%arg0: i32, %arg1: i32) -> (i32, i32, i32) {
    %c0_i32 = arith.constant 0 : i32
    %c0_i32_0 = arith.constant 0 : i32
    %c0_i32_1 = arith.constant 0 : i32
    return %arg0, %c0_i32, %c0_i32_0 : i32, i32, i32
  }
}

module attributes {stable_mosaic.version = 11 : i64} {
  func.func @_tnet_head_kernel(%arg0: i32, %arg1: memref<2x1024xf32, #tpu.memory_space<vmem>>, %arg2: memref<1024x512xbf16, #tpu.memory_space<vmem>>, %arg3: memref<1x512xf32, #tpu.memory_space<vmem>>, %arg4: memref<512x256xbf16, #tpu.memory_space<vmem>>, %arg5: memref<1x256xf32, #tpu.memory_space<vmem>>, %arg6: memref<256x9xbf16, #tpu.memory_space<vmem>>, %arg7: memref<1x9xf32, #tpu.memory_space<vmem>>, %arg8: memref<2x9xf32, #tpu.memory_space<vmem>>) attributes {dimension_semantics = [#tpu.dimension_semantics<arbitrary>], iteration_bounds = array<i64: 1>, scalar_prefetch = 0 : i64, scratch_operands = 0 : i64, tpu.core_type = #tpu.core_type<tc>, window_params = [{pipeline_mode = #tpu.pipeline_mode<synchronous>, transform_indices = @transform_0, window_bounds = array<i64: 2, 1024>}, {pipeline_mode = #tpu.pipeline_mode<synchronous>, transform_indices = @transform_1, window_bounds = array<i64: 1024, 512>}, {pipeline_mode = #tpu.pipeline_mode<synchronous>, transform_indices = @transform_2, window_bounds = array<i64: 1, 512>}, {pipeline_mode = #tpu.pipeline_mode<synchronous>, transform_indices = @transform_3, window_bounds = array<i64: 512, 256>}, {pipeline_mode = #tpu.pipeline_mode<synchronous>, transform_indices = @transform_4, window_bounds = array<i64: 1, 256>}, {pipeline_mode = #tpu.pipeline_mode<synchronous>, transform_indices = @transform_5, window_bounds = array<i64: 256, 9>}, {pipeline_mode = #tpu.pipeline_mode<synchronous>, transform_indices = @transform_6, window_bounds = array<i64: 1, 9>}, {pipeline_mode = #tpu.pipeline_mode<synchronous>, transform_indices = @transform_7, window_bounds = array<i64: 2, 9>}]} {
    %c0 = arith.constant 0 : index
    %c0_0 = arith.constant 0 : index
    %0 = vector.load %arg1[%c0, %c0_0] : memref<2x1024xf32, #tpu.memory_space<vmem>>, vector<2x1024xf32>
    %1 = arith.truncf %0 : vector<2x1024xf32> to vector<2x1024xbf16>
    %c0_1 = arith.constant 0 : index
    %c0_2 = arith.constant 0 : index
    %2 = vector.load %arg2[%c0_1, %c0_2] : memref<1024x512xbf16, #tpu.memory_space<vmem>>, vector<1024x512xbf16>
    %cst = arith.constant dense<0.000000e+00> : vector<2x512xf32>
    %3 = tpu.matmul %1, %2, %cst {dimension_numbers = #tpu.dot_dimension_numbers<[1], [0], [0], [1], [0, 0, 1, 1], [], []>} : vector<2x1024xbf16>, vector<1024x512xbf16>, vector<2x512xf32> -> vector<2x512xf32>
    %c0_3 = arith.constant 0 : index
    %c0_4 = arith.constant 0 : index
    %4 = vector.load %arg3[%c0_3, %c0_4] : memref<1x512xf32, #tpu.memory_space<vmem>>, vector<1x512xf32>
    %5 = vector.broadcast %4 : vector<1x512xf32> to vector<2x512xf32>
    %6 = arith.addf %3, %5 : vector<2x512xf32>
    %cst_5 = arith.constant 0.000000e+00 : f32
    %7 = vector.broadcast %cst_5 : f32 to vector<2x512xf32>
    %8 = arith.cmpf oge, %6, %7 : vector<2x512xf32>
    %cst_6 = arith.constant 2.000000e-01 : f32
    %9 = vector.broadcast %cst_6 : f32 to vector<2x512xf32>
    %10 = arith.mulf %9, %6 : vector<2x512xf32>
    %11 = arith.select %8, %6, %10 : vector<2x512xi1>, vector<2x512xf32>
    %12 = arith.truncf %11 : vector<2x512xf32> to vector<2x512xbf16>
    %c0_7 = arith.constant 0 : index
    %c0_8 = arith.constant 0 : index
    %13 = vector.load %arg4[%c0_7, %c0_8] : memref<512x256xbf16, #tpu.memory_space<vmem>>, vector<512x256xbf16>
    %cst_9 = arith.constant dense<0.000000e+00> : vector<2x256xf32>
    %14 = tpu.matmul %12, %13, %cst_9 {dimension_numbers = #tpu.dot_dimension_numbers<[1], [0], [0], [1], [0, 0, 1, 1], [], []>} : vector<2x512xbf16>, vector<512x256xbf16>, vector<2x256xf32> -> vector<2x256xf32>
    %c0_10 = arith.constant 0 : index
    %c0_11 = arith.constant 0 : index
    %15 = vector.load %arg5[%c0_10, %c0_11] : memref<1x256xf32, #tpu.memory_space<vmem>>, vector<1x256xf32>
    %16 = vector.broadcast %15 : vector<1x256xf32> to vector<2x256xf32>
    %17 = arith.addf %14, %16 : vector<2x256xf32>
    %cst_12 = arith.constant 0.000000e+00 : f32
    %18 = vector.broadcast %cst_12 : f32 to vector<2x256xf32>
    %19 = arith.cmpf oge, %17, %18 : vector<2x256xf32>
    %cst_13 = arith.constant 2.000000e-01 : f32
    %20 = vector.broadcast %cst_13 : f32 to vector<2x256xf32>
    %21 = arith.mulf %20, %17 : vector<2x256xf32>
    %22 = arith.select %19, %17, %21 : vector<2x256xi1>, vector<2x256xf32>
    %23 = arith.truncf %22 : vector<2x256xf32> to vector<2x256xbf16>
    %c0_14 = arith.constant 0 : index
    %c0_15 = arith.constant 0 : index
    %24 = vector.load %arg6[%c0_14, %c0_15] : memref<256x9xbf16, #tpu.memory_space<vmem>>, vector<256x9xbf16>
    %cst_16 = arith.constant dense<0.000000e+00> : vector<2x9xf32>
    %25 = tpu.matmul %23, %24, %cst_16 {dimension_numbers = #tpu.dot_dimension_numbers<[1], [0], [0], [1], [0, 0, 1, 1], [], []>} : vector<2x256xbf16>, vector<256x9xbf16>, vector<2x9xf32> -> vector<2x9xf32>
    %c0_17 = arith.constant 0 : index
    %c0_18 = arith.constant 0 : index
    %26 = vector.load %arg7[%c0_17, %c0_18] : memref<1x9xf32, #tpu.memory_space<vmem>>, vector<1x9xf32>
    %27 = vector.broadcast %26 : vector<1x9xf32> to vector<2x9xf32>
    %28 = arith.addf %25, %27 : vector<2x9xf32>
    %c0_19 = arith.constant 0 : index
    %c0_20 = arith.constant 0 : index
    %29 = vector.load %arg8[%c0_19, %c0_20] : memref<2x9xf32, #tpu.memory_space<vmem>>, vector<2x9xf32>
    tpu.vector_store %arg8[%c0_19, %c0_20], %28 {strides = array<i32>} : memref<2x9xf32, #tpu.memory_space<vmem>>, vector<2x9xf32>,
    return
  }
  func.func @transform_0(%arg0: i32) -> (i32, i32) {
    %c0_i32 = arith.constant 0 : i32
    %c0_i32_0 = arith.constant 0 : i32
    %c0_i32_1 = arith.constant 0 : i32
    return %c0_i32, %c0_i32_0 : i32, i32
  }
  func.func @transform_1(%arg0: i32) -> (i32, i32) {
    %c0_i32 = arith.constant 0 : i32
    %c0_i32_0 = arith.constant 0 : i32
    %c0_i32_1 = arith.constant 0 : i32
    return %c0_i32, %c0_i32_0 : i32, i32
  }
  func.func @transform_2(%arg0: i32) -> (i32, i32) {
    %c0_i32 = arith.constant 0 : i32
    %c0_i32_0 = arith.constant 0 : i32
    %c0_i32_1 = arith.constant 0 : i32
    return %c0_i32, %c0_i32_0 : i32, i32
  }
  func.func @transform_3(%arg0: i32) -> (i32, i32) {
    %c0_i32 = arith.constant 0 : i32
    %c0_i32_0 = arith.constant 0 : i32
    %c0_i32_1 = arith.constant 0 : i32
    return %c0_i32, %c0_i32_0 : i32, i32
  }
  func.func @transform_4(%arg0: i32) -> (i32, i32) {
    %c0_i32 = arith.constant 0 : i32
    %c0_i32_0 = arith.constant 0 : i32
    %c0_i32_1 = arith.constant 0 : i32
    return %c0_i32, %c0_i32_0 : i32, i32
  }
  func.func @transform_5(%arg0: i32) -> (i32, i32) {
    %c0_i32 = arith.constant 0 : i32
    %c0_i32_0 = arith.constant 0 : i32
    %c0_i32_1 = arith.constant 0 : i32
    return %c0_i32, %c0_i32_0 : i32, i32
  }
  func.func @transform_6(%arg0: i32) -> (i32, i32) {
    %c0_i32 = arith.constant 0 : i32
    %c0_i32_0 = arith.constant 0 : i32
    %c0_i32_1 = arith.constant 0 : i32
    return %c0_i32, %c0_i32_0 : i32, i32
  }
  func.func @transform_7(%arg0: i32) -> (i32, i32) {
    %c0_i32 = arith.constant 0 : i32
    %c0_i32_0 = arith.constant 0 : i32
    %c0_i32_1 = arith.constant 0 : i32
    return %c0_i32, %c0_i32_0 : i32, i32
  }
}

module attributes {stable_mosaic.version = 11 : i64} {
  func.func @_bmm_kernel(%arg0: i32, %arg1: i32, %arg2: memref<1x16x3xf32, #tpu.memory_space<vmem>>, %arg3: memref<1x3x3xf32, #tpu.memory_space<vmem>>, %arg4: memref<1x16x3xf32, #tpu.memory_space<vmem>>) attributes {dimension_semantics = [#tpu.dimension_semantics<parallel>, #tpu.dimension_semantics<parallel>], iteration_bounds = array<i64: 2, 1>, scalar_prefetch = 0 : i64, scratch_operands = 0 : i64, tpu.core_type = #tpu.core_type<tc>, window_params = [{transform_indices = @transform_0, window_bounds = array<i64: 1, 16, 3>}, {transform_indices = @transform_1, window_bounds = array<i64: 1, 3, 3>}, {transform_indices = @transform_2, window_bounds = array<i64: 1, 16, 3>}]} {
    %c0 = arith.constant 0 : index
    %c0_0 = arith.constant 0 : index
    %c0_1 = arith.constant 0 : index
    %0 = vector.load %arg2[%c0, %c0_0, %c0_1] : memref<1x16x3xf32, #tpu.memory_space<vmem>>, vector<1x16x3xf32>
    %1 = vector.shape_cast %0 : vector<1x16x3xf32> to vector<16x3xf32>
    %c0_2 = arith.constant 0 : index
    %c0_3 = arith.constant 0 : index
    %c0_4 = arith.constant 0 : index
    %2 = vector.load %arg3[%c0_2, %c0_3, %c0_4] : memref<1x3x3xf32, #tpu.memory_space<vmem>>, vector<1x3x3xf32>
    %3 = vector.shape_cast %2 : vector<1x3x3xf32> to vector<3x3xf32>
    %cst = arith.constant dense<0.000000e+00> : vector<16x3xf32>
    %4 = tpu.matmul %1, %3, %cst {dimension_numbers = #tpu.dot_dimension_numbers<[1], [0], [0], [1], [0, 0, 1, 1], [], []>} : vector<16x3xf32>, vector<3x3xf32>, vector<16x3xf32> -> vector<16x3xf32>
    %c0_5 = arith.constant 0 : index
    %c0_6 = arith.constant 0 : index
    %c0_7 = arith.constant 0 : index
    %5 = vector.load %arg4[%c0_5, %c0_6, %c0_7] : memref<1x16x3xf32, #tpu.memory_space<vmem>>, vector<1x16x3xf32>
    %6 = vector.shape_cast %5 : vector<1x16x3xf32> to vector<16x3xf32>
    %7 = vector.shape_cast %4 : vector<16x3xf32> to vector<1x16x3xf32>
    tpu.vector_store %arg4[%c0_5, %c0_6, %c0_7], %7 {strides = array<i32>} : memref<1x16x3xf32, #tpu.memory_space<vmem>>, vector<1x16x3xf32>,
    return
  }
  func.func @transform_0(%arg0: i32, %arg1: i32) -> (i32, i32, i32) {
    %c0_i32 = arith.constant 0 : i32
    %c0_i32_0 = arith.constant 0 : i32
    return %arg0, %arg1, %c0_i32 : i32, i32, i32
  }
  func.func @transform_1(%arg0: i32, %arg1: i32) -> (i32, i32, i32) {
    %c0_i32 = arith.constant 0 : i32
    %c0_i32_0 = arith.constant 0 : i32
    %c0_i32_1 = arith.constant 0 : i32
    return %arg0, %c0_i32, %c0_i32_0 : i32, i32, i32
  }
  func.func @transform_2(%arg0: i32, %arg1: i32) -> (i32, i32, i32) {
    %c0_i32 = arith.constant 0 : i32
    %c0_i32_0 = arith.constant 0 : i32
    return %arg0, %arg1, %c0_i32 : i32, i32, i32
  }
}

module attributes {stable_mosaic.version = 11 : i64} {
  func.func @_pairwise_kernel(%arg0: i32, %arg1: i32, %arg2: memref<1x16x64xbf16, #tpu.memory_space<vmem>>, %arg3: memref<1x16x64xbf16, #tpu.memory_space<vmem>>, %arg4: memref<1x1x16xf32, #tpu.memory_space<vmem>>, %arg5: memref<1x16x16xf32, #tpu.memory_space<vmem>>) attributes {dimension_semantics = [#tpu.dimension_semantics<parallel>, #tpu.dimension_semantics<parallel>], iteration_bounds = array<i64: 2, 1>, scalar_prefetch = 0 : i64, scratch_operands = 0 : i64, tpu.core_type = #tpu.core_type<tc>, window_params = [{transform_indices = @transform_0, window_bounds = array<i64: 1, 16, 64>}, {transform_indices = @transform_1, window_bounds = array<i64: 1, 16, 64>}, {transform_indices = @transform_2, window_bounds = array<i64: 1, 1, 16>}, {transform_indices = @transform_3, window_bounds = array<i64: 1, 16, 16>}]} {
    %c0 = arith.constant 0 : index
    %c0_0 = arith.constant 0 : index
    %c0_1 = arith.constant 0 : index
    %0 = vector.load %arg2[%c0, %c0_0, %c0_1] : memref<1x16x64xbf16, #tpu.memory_space<vmem>>, vector<1x16x64xbf16>
    %1 = vector.shape_cast %0 : vector<1x16x64xbf16> to vector<16x64xbf16>
    %c0_2 = arith.constant 0 : index
    %c0_3 = arith.constant 0 : index
    %c0_4 = arith.constant 0 : index
    %2 = vector.load %arg3[%c0_2, %c0_3, %c0_4] : memref<1x16x64xbf16, #tpu.memory_space<vmem>>, vector<1x16x64xbf16>
    %3 = vector.shape_cast %2 : vector<1x16x64xbf16> to vector<16x64xbf16>
    %cst = arith.constant dense<0.000000e+00> : vector<16x16xf32>
    %4 = tpu.matmul %1, %3, %cst {dimension_numbers = #tpu.dot_dimension_numbers<[1], [1], [0], [0], [0, 0, 1, 0], [], []>} : vector<16x64xbf16>, vector<16x64xbf16>, vector<16x16xf32> -> vector<16x16xf32>
    %5 = arith.extf %1 : vector<16x64xbf16> to vector<16x64xf32>
    %6 = arith.mulf %5, %5 : vector<16x64xf32>
    %cst_5 = arith.constant dense<0.000000e+00> : vector<16xf32>
    %7 = vector.multi_reduction <add>, %6, %cst_5 [1] : vector<16x64xf32> to vector<16xf32>
    %8 = vector.shape_cast %7 : vector<16xf32> to vector<16x1xf32>
    %cst_6 = arith.constant 2.000000e+00 : f32
    %9 = vector.broadcast %cst_6 : f32 to vector<16x16xf32>
    %10 = arith.mulf %9, %4 : vector<16x16xf32>
    %11 = vector.broadcast %8 : vector<16x1xf32> to vector<16x16xf32>
    %12 = arith.subf %10, %11 : vector<16x16xf32>
    %c0_7 = arith.constant 0 : index
    %c0_8 = arith.constant 0 : index
    %c0_9 = arith.constant 0 : index
    %13 = vector.load %arg4[%c0_7, %c0_8, %c0_9] : memref<1x1x16xf32, #tpu.memory_space<vmem>>, vector<1x1x16xf32>
    %14 = vector.shape_cast %13 : vector<1x1x16xf32> to vector<1x16xf32>
    %15 = vector.broadcast %14 : vector<1x16xf32> to vector<16x16xf32>
    %16 = arith.subf %12, %15 : vector<16x16xf32>
    %c0_10 = arith.constant 0 : index
    %c0_11 = arith.constant 0 : index
    %c0_12 = arith.constant 0 : index
    %17 = vector.load %arg5[%c0_10, %c0_11, %c0_12] : memref<1x16x16xf32, #tpu.memory_space<vmem>>, vector<1x16x16xf32>
    %18 = vector.shape_cast %17 : vector<1x16x16xf32> to vector<16x16xf32>
    %19 = vector.shape_cast %16 : vector<16x16xf32> to vector<1x16x16xf32>
    tpu.vector_store %arg5[%c0_10, %c0_11, %c0_12], %19 {strides = array<i32>} : memref<1x16x16xf32, #tpu.memory_space<vmem>>, vector<1x16x16xf32>,
    return
  }
  func.func @transform_0(%arg0: i32, %arg1: i32) -> (i32, i32, i32) {
    %c0_i32 = arith.constant 0 : i32
    %c0_i32_0 = arith.constant 0 : i32
    return %arg0, %arg1, %c0_i32 : i32, i32, i32
  }
  func.func @transform_1(%arg0: i32, %arg1: i32) -> (i32, i32, i32) {
    %c0_i32 = arith.constant 0 : i32
    %c0_i32_0 = arith.constant 0 : i32
    %c0_i32_1 = arith.constant 0 : i32
    return %arg0, %c0_i32, %c0_i32_0 : i32, i32, i32
  }
  func.func @transform_2(%arg0: i32, %arg1: i32) -> (i32, i32, i32) {
    %c0_i32 = arith.constant 0 : i32
    %c0_i32_0 = arith.constant 0 : i32
    %c0_i32_1 = arith.constant 0 : i32
    return %arg0, %c0_i32, %c0_i32_0 : i32, i32, i32
  }
  func.func @transform_3(%arg0: i32, %arg1: i32) -> (i32, i32, i32) {
    %c0_i32 = arith.constant 0 : i32
    %c0_i32_0 = arith.constant 0 : i32
    return %arg0, %arg1, %c0_i32 : i32, i32, i32
  }
}

module attributes {stable_mosaic.version = 11 : i64} {
  func.func @_edge_conv2_max_kernel(%arg0: i32, %arg1: i32, %arg2: memref<1x4x16x3xbf16, #tpu.memory_space<vmem>>, %arg3: memref<1x16x3xf32, #tpu.memory_space<vmem>>, %arg4: memref<3x64xbf16, #tpu.memory_space<vmem>>, %arg5: memref<3x64xbf16, #tpu.memory_space<vmem>>, %arg6: memref<1x64xf32, #tpu.memory_space<vmem>>, %arg7: memref<64x64xbf16, #tpu.memory_space<vmem>>, %arg8: memref<1x64xf32, #tpu.memory_space<vmem>>, %arg9: memref<1x16x64xbf16, #tpu.memory_space<vmem>>) attributes {dimension_semantics = [#tpu.dimension_semantics<parallel>, #tpu.dimension_semantics<parallel>], iteration_bounds = array<i64: 2, 1>, scalar_prefetch = 0 : i64, scratch_operands = 0 : i64, tpu.core_type = #tpu.core_type<tc>, window_params = [{transform_indices = @transform_0, window_bounds = array<i64: 1, 4, 16, 3>}, {transform_indices = @transform_1, window_bounds = array<i64: 1, 16, 3>}, {pipeline_mode = #tpu.pipeline_mode<synchronous>, transform_indices = @transform_2, window_bounds = array<i64: 3, 64>}, {pipeline_mode = #tpu.pipeline_mode<synchronous>, transform_indices = @transform_3, window_bounds = array<i64: 3, 64>}, {pipeline_mode = #tpu.pipeline_mode<synchronous>, transform_indices = @transform_4, window_bounds = array<i64: 1, 64>}, {pipeline_mode = #tpu.pipeline_mode<synchronous>, transform_indices = @transform_5, window_bounds = array<i64: 64, 64>}, {pipeline_mode = #tpu.pipeline_mode<synchronous>, transform_indices = @transform_6, window_bounds = array<i64: 1, 64>}, {transform_indices = @transform_7, window_bounds = array<i64: 1, 16, 64>}]} {
    %c0 = arith.constant 0 : index
    %c0_0 = arith.constant 0 : index
    %c0_1 = arith.constant 0 : index
    %0 = vector.load %arg3[%c0, %c0_0, %c0_1] : memref<1x16x3xf32, #tpu.memory_space<vmem>>, vector<1x16x3xf32>
    %1 = vector.shape_cast %0 : vector<1x16x3xf32> to vector<16x3xf32>
    %2 = arith.truncf %1 : vector<16x3xf32> to vector<16x3xbf16>
    %c0_2 = arith.constant 0 : index
    %c0_3 = arith.constant 0 : index
    %3 = vector.load %arg5[%c0_2, %c0_3] : memref<3x64xbf16, #tpu.memory_space<vmem>>, vector<3x64xbf16>
    %cst = arith.constant dense<0.000000e+00> : vector<16x64xf32>
    %4 = tpu.matmul %2, %3, %cst {dimension_numbers = #tpu.dot_dimension_numbers<[1], [0], [0], [1], [0, 0, 1, 1], [], []>} : vector<16x3xbf16>, vector<3x64xbf16>, vector<16x64xf32> -> vector<16x64xf32>
    %c0_4 = arith.constant 0 : index
    %c0_5 = arith.constant 0 : index
    %5 = vector.load %arg6[%c0_4, %c0_5] : memref<1x64xf32, #tpu.memory_space<vmem>>, vector<1x64xf32>
    %6 = vector.broadcast %5 : vector<1x64xf32> to vector<16x64xf32>
    %7 = arith.addf %4, %6 : vector<16x64xf32>
    %c0_6 = arith.constant 0 : index
    %c0_7 = arith.constant 0 : index
    %c0_8 = arith.constant 0 : index
    %c0_9 = arith.constant 0 : index
    %8 = vector.load %arg2[%c0_6, %c0_7, %c0_8, %c0_9] : memref<1x4x16x3xbf16, #tpu.memory_space<vmem>>, vector<1x1x16x3xbf16>
    %9 = vector.shape_cast %8 : vector<1x1x16x3xbf16> to vector<16x3xbf16>
    %c0_10 = arith.constant 0 : index
    %c0_11 = arith.constant 0 : index
    %10 = vector.load %arg4[%c0_10, %c0_11] : memref<3x64xbf16, #tpu.memory_space<vmem>>, vector<3x64xbf16>
    %cst_12 = arith.constant dense<0.000000e+00> : vector<16x64xf32>
    %11 = tpu.matmul %9, %10, %cst_12 {dimension_numbers = #tpu.dot_dimension_numbers<[1], [0], [0], [1], [0, 0, 1, 1], [], []>} : vector<16x3xbf16>, vector<3x64xbf16>, vector<16x64xf32> -> vector<16x64xf32>
    %12 = arith.addf %11, %7 : vector<16x64xf32>
    %cst_13 = arith.constant 0.000000e+00 : f32
    %13 = vector.broadcast %cst_13 : f32 to vector<16x64xf32>
    %14 = arith.cmpf oge, %12, %13 : vector<16x64xf32>
    %cst_14 = arith.constant 2.000000e-01 : f32
    %15 = vector.broadcast %cst_14 : f32 to vector<16x64xf32>
    %16 = arith.mulf %15, %12 : vector<16x64xf32>
    %17 = arith.select %14, %12, %16 : vector<16x64xi1>, vector<16x64xf32>
    %18 = arith.truncf %17 : vector<16x64xf32> to vector<16x64xbf16>
    %c0_15 = arith.constant 0 : index
    %c0_16 = arith.constant 0 : index
    %19 = vector.load %arg7[%c0_15, %c0_16] : memref<64x64xbf16, #tpu.memory_space<vmem>>, vector<64x64xbf16>
    %cst_17 = arith.constant dense<0.000000e+00> : vector<16x64xf32>
    %20 = tpu.matmul %18, %19, %cst_17 {dimension_numbers = #tpu.dot_dimension_numbers<[1], [0], [0], [1], [0, 0, 1, 1], [], []>} : vector<16x64xbf16>, vector<64x64xbf16>, vector<16x64xf32> -> vector<16x64xf32>
    %c0_18 = arith.constant 0 : index
    %c0_19 = arith.constant 0 : index
    %21 = vector.load %arg8[%c0_18, %c0_19] : memref<1x64xf32, #tpu.memory_space<vmem>>, vector<1x64xf32>
    %22 = vector.broadcast %21 : vector<1x64xf32> to vector<16x64xf32>
    %23 = arith.addf %20, %22 : vector<16x64xf32>
    %cst_20 = arith.constant 0.000000e+00 : f32
    %24 = vector.broadcast %cst_20 : f32 to vector<16x64xf32>
    %25 = arith.cmpf oge, %23, %24 : vector<16x64xf32>
    %cst_21 = arith.constant 2.000000e-01 : f32
    %26 = vector.broadcast %cst_21 : f32 to vector<16x64xf32>
    %27 = arith.mulf %26, %23 : vector<16x64xf32>
    %28 = arith.select %25, %23, %27 : vector<16x64xi1>, vector<16x64xf32>
    %c0_22 = arith.constant 0 : index
    %c1 = arith.constant 1 : index
    %c0_23 = arith.constant 0 : index
    %c0_24 = arith.constant 0 : index
    %29 = vector.load %arg2[%c0_22, %c1, %c0_23, %c0_24] : memref<1x4x16x3xbf16, #tpu.memory_space<vmem>>, vector<1x1x16x3xbf16>
    %30 = vector.shape_cast %29 : vector<1x1x16x3xbf16> to vector<16x3xbf16>
    %c0_25 = arith.constant 0 : index
    %c0_26 = arith.constant 0 : index
    %31 = vector.load %arg4[%c0_25, %c0_26] : memref<3x64xbf16, #tpu.memory_space<vmem>>, vector<3x64xbf16>
    %cst_27 = arith.constant dense<0.000000e+00> : vector<16x64xf32>
    %32 = tpu.matmul %30, %31, %cst_27 {dimension_numbers = #tpu.dot_dimension_numbers<[1], [0], [0], [1], [0, 0, 1, 1], [], []>} : vector<16x3xbf16>, vector<3x64xbf16>, vector<16x64xf32> -> vector<16x64xf32>
    %33 = arith.addf %32, %7 : vector<16x64xf32>
    %cst_28 = arith.constant 0.000000e+00 : f32
    %34 = vector.broadcast %cst_28 : f32 to vector<16x64xf32>
    %35 = arith.cmpf oge, %33, %34 : vector<16x64xf32>
    %cst_29 = arith.constant 2.000000e-01 : f32
    %36 = vector.broadcast %cst_29 : f32 to vector<16x64xf32>
    %37 = arith.mulf %36, %33 : vector<16x64xf32>
    %38 = arith.select %35, %33, %37 : vector<16x64xi1>, vector<16x64xf32>
    %39 = arith.truncf %38 : vector<16x64xf32> to vector<16x64xbf16>
    %c0_30 = arith.constant 0 : index
    %c0_31 = arith.constant 0 : index
    %40 = vector.load %arg7[%c0_30, %c0_31] : memref<64x64xbf16, #tpu.memory_space<vmem>>, vector<64x64xbf16>
    %cst_32 = arith.constant dense<0.000000e+00> : vector<16x64xf32>
    %41 = tpu.matmul %39, %40, %cst_32 {dimension_numbers = #tpu.dot_dimension_numbers<[1], [0], [0], [1], [0, 0, 1, 1], [], []>} : vector<16x64xbf16>, vector<64x64xbf16>, vector<16x64xf32> -> vector<16x64xf32>
    %c0_33 = arith.constant 0 : index
    %c0_34 = arith.constant 0 : index
    %42 = vector.load %arg8[%c0_33, %c0_34] : memref<1x64xf32, #tpu.memory_space<vmem>>, vector<1x64xf32>
    %43 = vector.broadcast %42 : vector<1x64xf32> to vector<16x64xf32>
    %44 = arith.addf %41, %43 : vector<16x64xf32>
    %cst_35 = arith.constant 0.000000e+00 : f32
    %45 = vector.broadcast %cst_35 : f32 to vector<16x64xf32>
    %46 = arith.cmpf oge, %44, %45 : vector<16x64xf32>
    %cst_36 = arith.constant 2.000000e-01 : f32
    %47 = vector.broadcast %cst_36 : f32 to vector<16x64xf32>
    %48 = arith.mulf %47, %44 : vector<16x64xf32>
    %49 = arith.select %46, %44, %48 : vector<16x64xi1>, vector<16x64xf32>
    %50 = arith.maximumf %28, %49 : vector<16x64xf32>
    %c0_37 = arith.constant 0 : index
    %c2 = arith.constant 2 : index
    %c0_38 = arith.constant 0 : index
    %c0_39 = arith.constant 0 : index
    %51 = vector.load %arg2[%c0_37, %c2, %c0_38, %c0_39] : memref<1x4x16x3xbf16, #tpu.memory_space<vmem>>, vector<1x1x16x3xbf16>
    %52 = vector.shape_cast %51 : vector<1x1x16x3xbf16> to vector<16x3xbf16>
    %c0_40 = arith.constant 0 : index
    %c0_41 = arith.constant 0 : index
    %53 = vector.load %arg4[%c0_40, %c0_41] : memref<3x64xbf16, #tpu.memory_space<vmem>>, vector<3x64xbf16>
    %cst_42 = arith.constant dense<0.000000e+00> : vector<16x64xf32>
    %54 = tpu.matmul %52, %53, %cst_42 {dimension_numbers = #tpu.dot_dimension_numbers<[1], [0], [0], [1], [0, 0, 1, 1], [], []>} : vector<16x3xbf16>, vector<3x64xbf16>, vector<16x64xf32> -> vector<16x64xf32>
    %55 = arith.addf %54, %7 : vector<16x64xf32>
    %cst_43 = arith.constant 0.000000e+00 : f32
    %56 = vector.broadcast %cst_43 : f32 to vector<16x64xf32>
    %57 = arith.cmpf oge, %55, %56 : vector<16x64xf32>
    %cst_44 = arith.constant 2.000000e-01 : f32
    %58 = vector.broadcast %cst_44 : f32 to vector<16x64xf32>
    %59 = arith.mulf %58, %55 : vector<16x64xf32>
    %60 = arith.select %57, %55, %59 : vector<16x64xi1>, vector<16x64xf32>
    %61 = arith.truncf %60 : vector<16x64xf32> to vector<16x64xbf16>
    %c0_45 = arith.constant 0 : index
    %c0_46 = arith.constant 0 : index
    %62 = vector.load %arg7[%c0_45, %c0_46] : memref<64x64xbf16, #tpu.memory_space<vmem>>, vector<64x64xbf16>
    %cst_47 = arith.constant dense<0.000000e+00> : vector<16x64xf32>
    %63 = tpu.matmul %61, %62, %cst_47 {dimension_numbers = #tpu.dot_dimension_numbers<[1], [0], [0], [1], [0, 0, 1, 1], [], []>} : vector<16x64xbf16>, vector<64x64xbf16>, vector<16x64xf32> -> vector<16x64xf32>
    %c0_48 = arith.constant 0 : index
    %c0_49 = arith.constant 0 : index
    %64 = vector.load %arg8[%c0_48, %c0_49] : memref<1x64xf32, #tpu.memory_space<vmem>>, vector<1x64xf32>
    %65 = vector.broadcast %64 : vector<1x64xf32> to vector<16x64xf32>
    %66 = arith.addf %63, %65 : vector<16x64xf32>
    %cst_50 = arith.constant 0.000000e+00 : f32
    %67 = vector.broadcast %cst_50 : f32 to vector<16x64xf32>
    %68 = arith.cmpf oge, %66, %67 : vector<16x64xf32>
    %cst_51 = arith.constant 2.000000e-01 : f32
    %69 = vector.broadcast %cst_51 : f32 to vector<16x64xf32>
    %70 = arith.mulf %69, %66 : vector<16x64xf32>
    %71 = arith.select %68, %66, %70 : vector<16x64xi1>, vector<16x64xf32>
    %72 = arith.maximumf %50, %71 : vector<16x64xf32>
    %c0_52 = arith.constant 0 : index
    %c3 = arith.constant 3 : index
    %c0_53 = arith.constant 0 : index
    %c0_54 = arith.constant 0 : index
    %73 = vector.load %arg2[%c0_52, %c3, %c0_53, %c0_54] : memref<1x4x16x3xbf16, #tpu.memory_space<vmem>>, vector<1x1x16x3xbf16>
    %74 = vector.shape_cast %73 : vector<1x1x16x3xbf16> to vector<16x3xbf16>
    %c0_55 = arith.constant 0 : index
    %c0_56 = arith.constant 0 : index
    %75 = vector.load %arg4[%c0_55, %c0_56] : memref<3x64xbf16, #tpu.memory_space<vmem>>, vector<3x64xbf16>
    %cst_57 = arith.constant dense<0.000000e+00> : vector<16x64xf32>
    %76 = tpu.matmul %74, %75, %cst_57 {dimension_numbers = #tpu.dot_dimension_numbers<[1], [0], [0], [1], [0, 0, 1, 1], [], []>} : vector<16x3xbf16>, vector<3x64xbf16>, vector<16x64xf32> -> vector<16x64xf32>
    %77 = arith.addf %76, %7 : vector<16x64xf32>
    %cst_58 = arith.constant 0.000000e+00 : f32
    %78 = vector.broadcast %cst_58 : f32 to vector<16x64xf32>
    %79 = arith.cmpf oge, %77, %78 : vector<16x64xf32>
    %cst_59 = arith.constant 2.000000e-01 : f32
    %80 = vector.broadcast %cst_59 : f32 to vector<16x64xf32>
    %81 = arith.mulf %80, %77 : vector<16x64xf32>
    %82 = arith.select %79, %77, %81 : vector<16x64xi1>, vector<16x64xf32>
    %83 = arith.truncf %82 : vector<16x64xf32> to vector<16x64xbf16>
    %c0_60 = arith.constant 0 : index
    %c0_61 = arith.constant 0 : index
    %84 = vector.load %arg7[%c0_60, %c0_61] : memref<64x64xbf16, #tpu.memory_space<vmem>>, vector<64x64xbf16>
    %cst_62 = arith.constant dense<0.000000e+00> : vector<16x64xf32>
    %85 = tpu.matmul %83, %84, %cst_62 {dimension_numbers = #tpu.dot_dimension_numbers<[1], [0], [0], [1], [0, 0, 1, 1], [], []>} : vector<16x64xbf16>, vector<64x64xbf16>, vector<16x64xf32> -> vector<16x64xf32>
    %c0_63 = arith.constant 0 : index
    %c0_64 = arith.constant 0 : index
    %86 = vector.load %arg8[%c0_63, %c0_64] : memref<1x64xf32, #tpu.memory_space<vmem>>, vector<1x64xf32>
    %87 = vector.broadcast %86 : vector<1x64xf32> to vector<16x64xf32>
    %88 = arith.addf %85, %87 : vector<16x64xf32>
    %cst_65 = arith.constant 0.000000e+00 : f32
    %89 = vector.broadcast %cst_65 : f32 to vector<16x64xf32>
    %90 = arith.cmpf oge, %88, %89 : vector<16x64xf32>
    %cst_66 = arith.constant 2.000000e-01 : f32
    %91 = vector.broadcast %cst_66 : f32 to vector<16x64xf32>
    %92 = arith.mulf %91, %88 : vector<16x64xf32>
    %93 = arith.select %90, %88, %92 : vector<16x64xi1>, vector<16x64xf32>
    %94 = arith.maximumf %72, %93 : vector<16x64xf32>
    %95 = arith.truncf %94 : vector<16x64xf32> to vector<16x64xbf16>
    %c0_67 = arith.constant 0 : index
    %c0_68 = arith.constant 0 : index
    %c0_69 = arith.constant 0 : index
    %96 = vector.load %arg9[%c0_67, %c0_68, %c0_69] : memref<1x16x64xbf16, #tpu.memory_space<vmem>>, vector<1x16x64xbf16>
    %97 = vector.shape_cast %96 : vector<1x16x64xbf16> to vector<16x64xbf16>
    %98 = vector.shape_cast %95 : vector<16x64xbf16> to vector<1x16x64xbf16>
    tpu.vector_store %arg9[%c0_67, %c0_68, %c0_69], %98 {strides = array<i32>} : memref<1x16x64xbf16, #tpu.memory_space<vmem>>, vector<1x16x64xbf16>,
    return
  }
  func.func @transform_0(%arg0: i32, %arg1: i32) -> (i32, i32, i32, i32) {
    %c0_i32 = arith.constant 0 : i32
    %c0_i32_0 = arith.constant 0 : i32
    %c0_i32_1 = arith.constant 0 : i32
    return %arg0, %c0_i32, %arg1, %c0_i32_0 : i32, i32, i32, i32
  }
  func.func @transform_1(%arg0: i32, %arg1: i32) -> (i32, i32, i32) {
    %c0_i32 = arith.constant 0 : i32
    %c0_i32_0 = arith.constant 0 : i32
    return %arg0, %arg1, %c0_i32 : i32, i32, i32
  }
  func.func @transform_2(%arg0: i32, %arg1: i32) -> (i32, i32) {
    %c0_i32 = arith.constant 0 : i32
    %c0_i32_0 = arith.constant 0 : i32
    %c0_i32_1 = arith.constant 0 : i32
    return %c0_i32, %c0_i32_0 : i32, i32
  }
  func.func @transform_3(%arg0: i32, %arg1: i32) -> (i32, i32) {
    %c0_i32 = arith.constant 0 : i32
    %c0_i32_0 = arith.constant 0 : i32
    %c0_i32_1 = arith.constant 0 : i32
    return %c0_i32, %c0_i32_0 : i32, i32
  }
  func.func @transform_4(%arg0: i32, %arg1: i32) -> (i32, i32) {
    %c0_i32 = arith.constant 0 : i32
    %c0_i32_0 = arith.constant 0 : i32
    %c0_i32_1 = arith.constant 0 : i32
    return %c0_i32, %c0_i32_0 : i32, i32
  }
  func.func @transform_5(%arg0: i32, %arg1: i32) -> (i32, i32) {
    %c0_i32 = arith.constant 0 : i32
    %c0_i32_0 = arith.constant 0 : i32
    %c0_i32_1 = arith.constant 0 : i32
    return %c0_i32, %c0_i32_0 : i32, i32
  }
  func.func @transform_6(%arg0: i32, %arg1: i32) -> (i32, i32) {
    %c0_i32 = arith.constant 0 : i32
    %c0_i32_0 = arith.constant 0 : i32
    %c0_i32_1 = arith.constant 0 : i32
    return %c0_i32, %c0_i32_0 : i32, i32
  }
  func.func @transform_7(%arg0: i32, %arg1: i32) -> (i32, i32, i32) {
    %c0_i32 = arith.constant 0 : i32
    %c0_i32_0 = arith.constant 0 : i32
    return %arg0, %arg1, %c0_i32 : i32, i32, i32
  }
}

module attributes {stable_mosaic.version = 11 : i64} {
  func.func @_edge_conv2_max_kernel(%arg0: i32, %arg1: i32, %arg2: memref<1x4x16x64xbf16, #tpu.memory_space<vmem>>, %arg3: memref<1x16x64xbf16, #tpu.memory_space<vmem>>, %arg4: memref<64x64xbf16, #tpu.memory_space<vmem>>, %arg5: memref<64x64xbf16, #tpu.memory_space<vmem>>, %arg6: memref<1x64xf32, #tpu.memory_space<vmem>>, %arg7: memref<64x64xbf16, #tpu.memory_space<vmem>>, %arg8: memref<1x64xf32, #tpu.memory_space<vmem>>, %arg9: memref<1x16x64xbf16, #tpu.memory_space<vmem>>) attributes {dimension_semantics = [#tpu.dimension_semantics<parallel>, #tpu.dimension_semantics<parallel>], iteration_bounds = array<i64: 2, 1>, scalar_prefetch = 0 : i64, scratch_operands = 0 : i64, tpu.core_type = #tpu.core_type<tc>, window_params = [{transform_indices = @transform_0, window_bounds = array<i64: 1, 4, 16, 64>}, {transform_indices = @transform_1, window_bounds = array<i64: 1, 16, 64>}, {pipeline_mode = #tpu.pipeline_mode<synchronous>, transform_indices = @transform_2, window_bounds = array<i64: 64, 64>}, {pipeline_mode = #tpu.pipeline_mode<synchronous>, transform_indices = @transform_3, window_bounds = array<i64: 64, 64>}, {pipeline_mode = #tpu.pipeline_mode<synchronous>, transform_indices = @transform_4, window_bounds = array<i64: 1, 64>}, {pipeline_mode = #tpu.pipeline_mode<synchronous>, transform_indices = @transform_5, window_bounds = array<i64: 64, 64>}, {pipeline_mode = #tpu.pipeline_mode<synchronous>, transform_indices = @transform_6, window_bounds = array<i64: 1, 64>}, {transform_indices = @transform_7, window_bounds = array<i64: 1, 16, 64>}]} {
    %c0 = arith.constant 0 : index
    %c0_0 = arith.constant 0 : index
    %c0_1 = arith.constant 0 : index
    %0 = vector.load %arg3[%c0, %c0_0, %c0_1] : memref<1x16x64xbf16, #tpu.memory_space<vmem>>, vector<1x16x64xbf16>
    %1 = vector.shape_cast %0 : vector<1x16x64xbf16> to vector<16x64xbf16>
    %c0_2 = arith.constant 0 : index
    %c0_3 = arith.constant 0 : index
    %2 = vector.load %arg5[%c0_2, %c0_3] : memref<64x64xbf16, #tpu.memory_space<vmem>>, vector<64x64xbf16>
    %cst = arith.constant dense<0.000000e+00> : vector<16x64xf32>
    %3 = tpu.matmul %1, %2, %cst {dimension_numbers = #tpu.dot_dimension_numbers<[1], [0], [0], [1], [0, 0, 1, 1], [], []>} : vector<16x64xbf16>, vector<64x64xbf16>, vector<16x64xf32> -> vector<16x64xf32>
    %c0_4 = arith.constant 0 : index
    %c0_5 = arith.constant 0 : index
    %4 = vector.load %arg6[%c0_4, %c0_5] : memref<1x64xf32, #tpu.memory_space<vmem>>, vector<1x64xf32>
    %5 = vector.broadcast %4 : vector<1x64xf32> to vector<16x64xf32>
    %6 = arith.addf %3, %5 : vector<16x64xf32>
    %c0_6 = arith.constant 0 : index
    %c0_7 = arith.constant 0 : index
    %c0_8 = arith.constant 0 : index
    %c0_9 = arith.constant 0 : index
    %7 = vector.load %arg2[%c0_6, %c0_7, %c0_8, %c0_9] : memref<1x4x16x64xbf16, #tpu.memory_space<vmem>>, vector<1x1x16x64xbf16>
    %8 = vector.shape_cast %7 : vector<1x1x16x64xbf16> to vector<16x64xbf16>
    %c0_10 = arith.constant 0 : index
    %c0_11 = arith.constant 0 : index
    %9 = vector.load %arg4[%c0_10, %c0_11] : memref<64x64xbf16, #tpu.memory_space<vmem>>, vector<64x64xbf16>
    %cst_12 = arith.constant dense<0.000000e+00> : vector<16x64xf32>
    %10 = tpu.matmul %8, %9, %cst_12 {dimension_numbers = #tpu.dot_dimension_numbers<[1], [0], [0], [1], [0, 0, 1, 1], [], []>} : vector<16x64xbf16>, vector<64x64xbf16>, vector<16x64xf32> -> vector<16x64xf32>
    %11 = arith.addf %10, %6 : vector<16x64xf32>
    %cst_13 = arith.constant 0.000000e+00 : f32
    %12 = vector.broadcast %cst_13 : f32 to vector<16x64xf32>
    %13 = arith.cmpf oge, %11, %12 : vector<16x64xf32>
    %cst_14 = arith.constant 2.000000e-01 : f32
    %14 = vector.broadcast %cst_14 : f32 to vector<16x64xf32>
    %15 = arith.mulf %14, %11 : vector<16x64xf32>
    %16 = arith.select %13, %11, %15 : vector<16x64xi1>, vector<16x64xf32>
    %17 = arith.truncf %16 : vector<16x64xf32> to vector<16x64xbf16>
    %c0_15 = arith.constant 0 : index
    %c0_16 = arith.constant 0 : index
    %18 = vector.load %arg7[%c0_15, %c0_16] : memref<64x64xbf16, #tpu.memory_space<vmem>>, vector<64x64xbf16>
    %cst_17 = arith.constant dense<0.000000e+00> : vector<16x64xf32>
    %19 = tpu.matmul %17, %18, %cst_17 {dimension_numbers = #tpu.dot_dimension_numbers<[1], [0], [0], [1], [0, 0, 1, 1], [], []>} : vector<16x64xbf16>, vector<64x64xbf16>, vector<16x64xf32> -> vector<16x64xf32>
    %c0_18 = arith.constant 0 : index
    %c0_19 = arith.constant 0 : index
    %20 = vector.load %arg8[%c0_18, %c0_19] : memref<1x64xf32, #tpu.memory_space<vmem>>, vector<1x64xf32>
    %21 = vector.broadcast %20 : vector<1x64xf32> to vector<16x64xf32>
    %22 = arith.addf %19, %21 : vector<16x64xf32>
    %cst_20 = arith.constant 0.000000e+00 : f32
    %23 = vector.broadcast %cst_20 : f32 to vector<16x64xf32>
    %24 = arith.cmpf oge, %22, %23 : vector<16x64xf32>
    %cst_21 = arith.constant 2.000000e-01 : f32
    %25 = vector.broadcast %cst_21 : f32 to vector<16x64xf32>
    %26 = arith.mulf %25, %22 : vector<16x64xf32>
    %27 = arith.select %24, %22, %26 : vector<16x64xi1>, vector<16x64xf32>
    %c0_22 = arith.constant 0 : index
    %c1 = arith.constant 1 : index
    %c0_23 = arith.constant 0 : index
    %c0_24 = arith.constant 0 : index
    %28 = vector.load %arg2[%c0_22, %c1, %c0_23, %c0_24] : memref<1x4x16x64xbf16, #tpu.memory_space<vmem>>, vector<1x1x16x64xbf16>
    %29 = vector.shape_cast %28 : vector<1x1x16x64xbf16> to vector<16x64xbf16>
    %c0_25 = arith.constant 0 : index
    %c0_26 = arith.constant 0 : index
    %30 = vector.load %arg4[%c0_25, %c0_26] : memref<64x64xbf16, #tpu.memory_space<vmem>>, vector<64x64xbf16>
    %cst_27 = arith.constant dense<0.000000e+00> : vector<16x64xf32>
    %31 = tpu.matmul %29, %30, %cst_27 {dimension_numbers = #tpu.dot_dimension_numbers<[1], [0], [0], [1], [0, 0, 1, 1], [], []>} : vector<16x64xbf16>, vector<64x64xbf16>, vector<16x64xf32> -> vector<16x64xf32>
    %32 = arith.addf %31, %6 : vector<16x64xf32>
    %cst_28 = arith.constant 0.000000e+00 : f32
    %33 = vector.broadcast %cst_28 : f32 to vector<16x64xf32>
    %34 = arith.cmpf oge, %32, %33 : vector<16x64xf32>
    %cst_29 = arith.constant 2.000000e-01 : f32
    %35 = vector.broadcast %cst_29 : f32 to vector<16x64xf32>
    %36 = arith.mulf %35, %32 : vector<16x64xf32>
    %37 = arith.select %34, %32, %36 : vector<16x64xi1>, vector<16x64xf32>
    %38 = arith.truncf %37 : vector<16x64xf32> to vector<16x64xbf16>
    %c0_30 = arith.constant 0 : index
    %c0_31 = arith.constant 0 : index
    %39 = vector.load %arg7[%c0_30, %c0_31] : memref<64x64xbf16, #tpu.memory_space<vmem>>, vector<64x64xbf16>
    %cst_32 = arith.constant dense<0.000000e+00> : vector<16x64xf32>
    %40 = tpu.matmul %38, %39, %cst_32 {dimension_numbers = #tpu.dot_dimension_numbers<[1], [0], [0], [1], [0, 0, 1, 1], [], []>} : vector<16x64xbf16>, vector<64x64xbf16>, vector<16x64xf32> -> vector<16x64xf32>
    %c0_33 = arith.constant 0 : index
    %c0_34 = arith.constant 0 : index
    %41 = vector.load %arg8[%c0_33, %c0_34] : memref<1x64xf32, #tpu.memory_space<vmem>>, vector<1x64xf32>
    %42 = vector.broadcast %41 : vector<1x64xf32> to vector<16x64xf32>
    %43 = arith.addf %40, %42 : vector<16x64xf32>
    %cst_35 = arith.constant 0.000000e+00 : f32
    %44 = vector.broadcast %cst_35 : f32 to vector<16x64xf32>
    %45 = arith.cmpf oge, %43, %44 : vector<16x64xf32>
    %cst_36 = arith.constant 2.000000e-01 : f32
    %46 = vector.broadcast %cst_36 : f32 to vector<16x64xf32>
    %47 = arith.mulf %46, %43 : vector<16x64xf32>
    %48 = arith.select %45, %43, %47 : vector<16x64xi1>, vector<16x64xf32>
    %49 = arith.maximumf %27, %48 : vector<16x64xf32>
    %c0_37 = arith.constant 0 : index
    %c2 = arith.constant 2 : index
    %c0_38 = arith.constant 0 : index
    %c0_39 = arith.constant 0 : index
    %50 = vector.load %arg2[%c0_37, %c2, %c0_38, %c0_39] : memref<1x4x16x64xbf16, #tpu.memory_space<vmem>>, vector<1x1x16x64xbf16>
    %51 = vector.shape_cast %50 : vector<1x1x16x64xbf16> to vector<16x64xbf16>
    %c0_40 = arith.constant 0 : index
    %c0_41 = arith.constant 0 : index
    %52 = vector.load %arg4[%c0_40, %c0_41] : memref<64x64xbf16, #tpu.memory_space<vmem>>, vector<64x64xbf16>
    %cst_42 = arith.constant dense<0.000000e+00> : vector<16x64xf32>
    %53 = tpu.matmul %51, %52, %cst_42 {dimension_numbers = #tpu.dot_dimension_numbers<[1], [0], [0], [1], [0, 0, 1, 1], [], []>} : vector<16x64xbf16>, vector<64x64xbf16>, vector<16x64xf32> -> vector<16x64xf32>
    %54 = arith.addf %53, %6 : vector<16x64xf32>
    %cst_43 = arith.constant 0.000000e+00 : f32
    %55 = vector.broadcast %cst_43 : f32 to vector<16x64xf32>
    %56 = arith.cmpf oge, %54, %55 : vector<16x64xf32>
    %cst_44 = arith.constant 2.000000e-01 : f32
    %57 = vector.broadcast %cst_44 : f32 to vector<16x64xf32>
    %58 = arith.mulf %57, %54 : vector<16x64xf32>
    %59 = arith.select %56, %54, %58 : vector<16x64xi1>, vector<16x64xf32>
    %60 = arith.truncf %59 : vector<16x64xf32> to vector<16x64xbf16>
    %c0_45 = arith.constant 0 : index
    %c0_46 = arith.constant 0 : index
    %61 = vector.load %arg7[%c0_45, %c0_46] : memref<64x64xbf16, #tpu.memory_space<vmem>>, vector<64x64xbf16>
    %cst_47 = arith.constant dense<0.000000e+00> : vector<16x64xf32>
    %62 = tpu.matmul %60, %61, %cst_47 {dimension_numbers = #tpu.dot_dimension_numbers<[1], [0], [0], [1], [0, 0, 1, 1], [], []>} : vector<16x64xbf16>, vector<64x64xbf16>, vector<16x64xf32> -> vector<16x64xf32>
    %c0_48 = arith.constant 0 : index
    %c0_49 = arith.constant 0 : index
    %63 = vector.load %arg8[%c0_48, %c0_49] : memref<1x64xf32, #tpu.memory_space<vmem>>, vector<1x64xf32>
    %64 = vector.broadcast %63 : vector<1x64xf32> to vector<16x64xf32>
    %65 = arith.addf %62, %64 : vector<16x64xf32>
    %cst_50 = arith.constant 0.000000e+00 : f32
    %66 = vector.broadcast %cst_50 : f32 to vector<16x64xf32>
    %67 = arith.cmpf oge, %65, %66 : vector<16x64xf32>
    %cst_51 = arith.constant 2.000000e-01 : f32
    %68 = vector.broadcast %cst_51 : f32 to vector<16x64xf32>
    %69 = arith.mulf %68, %65 : vector<16x64xf32>
    %70 = arith.select %67, %65, %69 : vector<16x64xi1>, vector<16x64xf32>
    %71 = arith.maximumf %49, %70 : vector<16x64xf32>
    %c0_52 = arith.constant 0 : index
    %c3 = arith.constant 3 : index
    %c0_53 = arith.constant 0 : index
    %c0_54 = arith.constant 0 : index
    %72 = vector.load %arg2[%c0_52, %c3, %c0_53, %c0_54] : memref<1x4x16x64xbf16, #tpu.memory_space<vmem>>, vector<1x1x16x64xbf16>
    %73 = vector.shape_cast %72 : vector<1x1x16x64xbf16> to vector<16x64xbf16>
    %c0_55 = arith.constant 0 : index
    %c0_56 = arith.constant 0 : index
    %74 = vector.load %arg4[%c0_55, %c0_56] : memref<64x64xbf16, #tpu.memory_space<vmem>>, vector<64x64xbf16>
    %cst_57 = arith.constant dense<0.000000e+00> : vector<16x64xf32>
    %75 = tpu.matmul %73, %74, %cst_57 {dimension_numbers = #tpu.dot_dimension_numbers<[1], [0], [0], [1], [0, 0, 1, 1], [], []>} : vector<16x64xbf16>, vector<64x64xbf16>, vector<16x64xf32> -> vector<16x64xf32>
    %76 = arith.addf %75, %6 : vector<16x64xf32>
    %cst_58 = arith.constant 0.000000e+00 : f32
    %77 = vector.broadcast %cst_58 : f32 to vector<16x64xf32>
    %78 = arith.cmpf oge, %76, %77 : vector<16x64xf32>
    %cst_59 = arith.constant 2.000000e-01 : f32
    %79 = vector.broadcast %cst_59 : f32 to vector<16x64xf32>
    %80 = arith.mulf %79, %76 : vector<16x64xf32>
    %81 = arith.select %78, %76, %80 : vector<16x64xi1>, vector<16x64xf32>
    %82 = arith.truncf %81 : vector<16x64xf32> to vector<16x64xbf16>
    %c0_60 = arith.constant 0 : index
    %c0_61 = arith.constant 0 : index
    %83 = vector.load %arg7[%c0_60, %c0_61] : memref<64x64xbf16, #tpu.memory_space<vmem>>, vector<64x64xbf16>
    %cst_62 = arith.constant dense<0.000000e+00> : vector<16x64xf32>
    %84 = tpu.matmul %82, %83, %cst_62 {dimension_numbers = #tpu.dot_dimension_numbers<[1], [0], [0], [1], [0, 0, 1, 1], [], []>} : vector<16x64xbf16>, vector<64x64xbf16>, vector<16x64xf32> -> vector<16x64xf32>
    %c0_63 = arith.constant 0 : index
    %c0_64 = arith.constant 0 : index
    %85 = vector.load %arg8[%c0_63, %c0_64] : memref<1x64xf32, #tpu.memory_space<vmem>>, vector<1x64xf32>
    %86 = vector.broadcast %85 : vector<1x64xf32> to vector<16x64xf32>
    %87 = arith.addf %84, %86 : vector<16x64xf32>
    %cst_65 = arith.constant 0.000000e+00 : f32
    %88 = vector.broadcast %cst_65 : f32 to vector<16x64xf32>
    %89 = arith.cmpf oge, %87, %88 : vector<16x64xf32>
    %cst_66 = arith.constant 2.000000e-01 : f32
    %90 = vector.broadcast %cst_66 : f32 to vector<16x64xf32>
    %91 = arith.mulf %90, %87 : vector<16x64xf32>
    %92 = arith.select %89, %87, %91 : vector<16x64xi1>, vector<16x64xf32>
    %93 = arith.maximumf %71, %92 : vector<16x64xf32>
    %94 = arith.truncf %93 : vector<16x64xf32> to vector<16x64xbf16>
    %c0_67 = arith.constant 0 : index
    %c0_68 = arith.constant 0 : index
    %c0_69 = arith.constant 0 : index
    %95 = vector.load %arg9[%c0_67, %c0_68, %c0_69] : memref<1x16x64xbf16, #tpu.memory_space<vmem>>, vector<1x16x64xbf16>
    %96 = vector.shape_cast %95 : vector<1x16x64xbf16> to vector<16x64xbf16>
    %97 = vector.shape_cast %94 : vector<16x64xbf16> to vector<1x16x64xbf16>
    tpu.vector_store %arg9[%c0_67, %c0_68, %c0_69], %97 {strides = array<i32>} : memref<1x16x64xbf16, #tpu.memory_space<vmem>>, vector<1x16x64xbf16>,
    return
  }
  func.func @transform_0(%arg0: i32, %arg1: i32) -> (i32, i32, i32, i32) {
    %c0_i32 = arith.constant 0 : i32
    %c0_i32_0 = arith.constant 0 : i32
    %c0_i32_1 = arith.constant 0 : i32
    return %arg0, %c0_i32, %arg1, %c0_i32_0 : i32, i32, i32, i32
  }
  func.func @transform_1(%arg0: i32, %arg1: i32) -> (i32, i32, i32) {
    %c0_i32 = arith.constant 0 : i32
    %c0_i32_0 = arith.constant 0 : i32
    return %arg0, %arg1, %c0_i32 : i32, i32, i32
  }
  func.func @transform_2(%arg0: i32, %arg1: i32) -> (i32, i32) {
    %c0_i32 = arith.constant 0 : i32
    %c0_i32_0 = arith.constant 0 : i32
    %c0_i32_1 = arith.constant 0 : i32
    return %c0_i32, %c0_i32_0 : i32, i32
  }
  func.func @transform_3(%arg0: i32, %arg1: i32) -> (i32, i32) {
    %c0_i32 = arith.constant 0 : i32
    %c0_i32_0 = arith.constant 0 : i32
    %c0_i32_1 = arith.constant 0 : i32
    return %c0_i32, %c0_i32_0 : i32, i32
  }
  func.func @transform_4(%arg0: i32, %arg1: i32) -> (i32, i32) {
    %c0_i32 = arith.constant 0 : i32
    %c0_i32_0 = arith.constant 0 : i32
    %c0_i32_1 = arith.constant 0 : i32
    return %c0_i32, %c0_i32_0 : i32, i32
  }
  func.func @transform_5(%arg0: i32, %arg1: i32) -> (i32, i32) {
    %c0_i32 = arith.constant 0 : i32
    %c0_i32_0 = arith.constant 0 : i32
    %c0_i32_1 = arith.constant 0 : i32
    return %c0_i32, %c0_i32_0 : i32, i32
  }
  func.func @transform_6(%arg0: i32, %arg1: i32) -> (i32, i32) {
    %c0_i32 = arith.constant 0 : i32
    %c0_i32_0 = arith.constant 0 : i32
    %c0_i32_1 = arith.constant 0 : i32
    return %c0_i32, %c0_i32_0 : i32, i32
  }
  func.func @transform_7(%arg0: i32, %arg1: i32) -> (i32, i32, i32) {
    %c0_i32 = arith.constant 0 : i32
    %c0_i32_0 = arith.constant 0 : i32
    return %arg0, %arg1, %c0_i32 : i32, i32, i32
  }
}

module attributes {stable_mosaic.version = 11 : i64} {
  func.func @_edge_conv1_max_kernel(%arg0: i32, %arg1: i32, %arg2: memref<1x4x16x64xbf16, #tpu.memory_space<vmem>>, %arg3: memref<1x16x64xbf16, #tpu.memory_space<vmem>>, %arg4: memref<64x64xbf16, #tpu.memory_space<vmem>>, %arg5: memref<64x64xbf16, #tpu.memory_space<vmem>>, %arg6: memref<1x64xf32, #tpu.memory_space<vmem>>, %arg7: memref<1x16x64xbf16, #tpu.memory_space<vmem>>) attributes {dimension_semantics = [#tpu.dimension_semantics<parallel>, #tpu.dimension_semantics<parallel>], iteration_bounds = array<i64: 2, 1>, scalar_prefetch = 0 : i64, scratch_operands = 0 : i64, tpu.core_type = #tpu.core_type<tc>, window_params = [{transform_indices = @transform_0, window_bounds = array<i64: 1, 4, 16, 64>}, {transform_indices = @transform_1, window_bounds = array<i64: 1, 16, 64>}, {pipeline_mode = #tpu.pipeline_mode<synchronous>, transform_indices = @transform_2, window_bounds = array<i64: 64, 64>}, {pipeline_mode = #tpu.pipeline_mode<synchronous>, transform_indices = @transform_3, window_bounds = array<i64: 64, 64>}, {pipeline_mode = #tpu.pipeline_mode<synchronous>, transform_indices = @transform_4, window_bounds = array<i64: 1, 64>}, {transform_indices = @transform_5, window_bounds = array<i64: 1, 16, 64>}]} {
    %c0 = arith.constant 0 : index
    %c0_0 = arith.constant 0 : index
    %c0_1 = arith.constant 0 : index
    %0 = vector.load %arg3[%c0, %c0_0, %c0_1] : memref<1x16x64xbf16, #tpu.memory_space<vmem>>, vector<1x16x64xbf16>
    %1 = vector.shape_cast %0 : vector<1x16x64xbf16> to vector<16x64xbf16>
    %c0_2 = arith.constant 0 : index
    %c0_3 = arith.constant 0 : index
    %2 = vector.load %arg5[%c0_2, %c0_3] : memref<64x64xbf16, #tpu.memory_space<vmem>>, vector<64x64xbf16>
    %cst = arith.constant dense<0.000000e+00> : vector<16x64xf32>
    %3 = tpu.matmul %1, %2, %cst {dimension_numbers = #tpu.dot_dimension_numbers<[1], [0], [0], [1], [0, 0, 1, 1], [], []>} : vector<16x64xbf16>, vector<64x64xbf16>, vector<16x64xf32> -> vector<16x64xf32>
    %c0_4 = arith.constant 0 : index
    %c0_5 = arith.constant 0 : index
    %4 = vector.load %arg6[%c0_4, %c0_5] : memref<1x64xf32, #tpu.memory_space<vmem>>, vector<1x64xf32>
    %5 = vector.broadcast %4 : vector<1x64xf32> to vector<16x64xf32>
    %6 = arith.addf %3, %5 : vector<16x64xf32>
    %c0_6 = arith.constant 0 : index
    %c0_7 = arith.constant 0 : index
    %c0_8 = arith.constant 0 : index
    %c0_9 = arith.constant 0 : index
    %7 = vector.load %arg2[%c0_6, %c0_7, %c0_8, %c0_9] : memref<1x4x16x64xbf16, #tpu.memory_space<vmem>>, vector<1x1x16x64xbf16>
    %8 = vector.shape_cast %7 : vector<1x1x16x64xbf16> to vector<16x64xbf16>
    %c0_10 = arith.constant 0 : index
    %c0_11 = arith.constant 0 : index
    %9 = vector.load %arg4[%c0_10, %c0_11] : memref<64x64xbf16, #tpu.memory_space<vmem>>, vector<64x64xbf16>
    %cst_12 = arith.constant dense<0.000000e+00> : vector<16x64xf32>
    %10 = tpu.matmul %8, %9, %cst_12 {dimension_numbers = #tpu.dot_dimension_numbers<[1], [0], [0], [1], [0, 0, 1, 1], [], []>} : vector<16x64xbf16>, vector<64x64xbf16>, vector<16x64xf32> -> vector<16x64xf32>
    %c0_13 = arith.constant 0 : index
    %c1 = arith.constant 1 : index
    %c0_14 = arith.constant 0 : index
    %c0_15 = arith.constant 0 : index
    %11 = vector.load %arg2[%c0_13, %c1, %c0_14, %c0_15] : memref<1x4x16x64xbf16, #tpu.memory_space<vmem>>, vector<1x1x16x64xbf16>
    %12 = vector.shape_cast %11 : vector<1x1x16x64xbf16> to vector<16x64xbf16>
    %c0_16 = arith.constant 0 : index
    %c0_17 = arith.constant 0 : index
    %13 = vector.load %arg4[%c0_16, %c0_17] : memref<64x64xbf16, #tpu.memory_space<vmem>>, vector<64x64xbf16>
    %cst_18 = arith.constant dense<0.000000e+00> : vector<16x64xf32>
    %14 = tpu.matmul %12, %13, %cst_18 {dimension_numbers = #tpu.dot_dimension_numbers<[1], [0], [0], [1], [0, 0, 1, 1], [], []>} : vector<16x64xbf16>, vector<64x64xbf16>, vector<16x64xf32> -> vector<16x64xf32>
    %15 = arith.maximumf %10, %14 : vector<16x64xf32>
    %c0_19 = arith.constant 0 : index
    %c2 = arith.constant 2 : index
    %c0_20 = arith.constant 0 : index
    %c0_21 = arith.constant 0 : index
    %16 = vector.load %arg2[%c0_19, %c2, %c0_20, %c0_21] : memref<1x4x16x64xbf16, #tpu.memory_space<vmem>>, vector<1x1x16x64xbf16>
    %17 = vector.shape_cast %16 : vector<1x1x16x64xbf16> to vector<16x64xbf16>
    %c0_22 = arith.constant 0 : index
    %c0_23 = arith.constant 0 : index
    %18 = vector.load %arg4[%c0_22, %c0_23] : memref<64x64xbf16, #tpu.memory_space<vmem>>, vector<64x64xbf16>
    %cst_24 = arith.constant dense<0.000000e+00> : vector<16x64xf32>
    %19 = tpu.matmul %17, %18, %cst_24 {dimension_numbers = #tpu.dot_dimension_numbers<[1], [0], [0], [1], [0, 0, 1, 1], [], []>} : vector<16x64xbf16>, vector<64x64xbf16>, vector<16x64xf32> -> vector<16x64xf32>
    %20 = arith.maximumf %15, %19 : vector<16x64xf32>
    %c0_25 = arith.constant 0 : index
    %c3 = arith.constant 3 : index
    %c0_26 = arith.constant 0 : index
    %c0_27 = arith.constant 0 : index
    %21 = vector.load %arg2[%c0_25, %c3, %c0_26, %c0_27] : memref<1x4x16x64xbf16, #tpu.memory_space<vmem>>, vector<1x1x16x64xbf16>
    %22 = vector.shape_cast %21 : vector<1x1x16x64xbf16> to vector<16x64xbf16>
    %c0_28 = arith.constant 0 : index
    %c0_29 = arith.constant 0 : index
    %23 = vector.load %arg4[%c0_28, %c0_29] : memref<64x64xbf16, #tpu.memory_space<vmem>>, vector<64x64xbf16>
    %cst_30 = arith.constant dense<0.000000e+00> : vector<16x64xf32>
    %24 = tpu.matmul %22, %23, %cst_30 {dimension_numbers = #tpu.dot_dimension_numbers<[1], [0], [0], [1], [0, 0, 1, 1], [], []>} : vector<16x64xbf16>, vector<64x64xbf16>, vector<16x64xf32> -> vector<16x64xf32>
    %25 = arith.maximumf %20, %24 : vector<16x64xf32>
    %26 = arith.addf %25, %6 : vector<16x64xf32>
    %cst_31 = arith.constant 0.000000e+00 : f32
    %27 = vector.broadcast %cst_31 : f32 to vector<16x64xf32>
    %28 = arith.cmpf oge, %26, %27 : vector<16x64xf32>
    %cst_32 = arith.constant 2.000000e-01 : f32
    %29 = vector.broadcast %cst_32 : f32 to vector<16x64xf32>
    %30 = arith.mulf %29, %26 : vector<16x64xf32>
    %31 = arith.select %28, %26, %30 : vector<16x64xi1>, vector<16x64xf32>
    %32 = arith.truncf %31 : vector<16x64xf32> to vector<16x64xbf16>
    %c0_33 = arith.constant 0 : index
    %c0_34 = arith.constant 0 : index
    %c0_35 = arith.constant 0 : index
    %33 = vector.load %arg7[%c0_33, %c0_34, %c0_35] : memref<1x16x64xbf16, #tpu.memory_space<vmem>>, vector<1x16x64xbf16>
    %34 = vector.shape_cast %33 : vector<1x16x64xbf16> to vector<16x64xbf16>
    %35 = vector.shape_cast %32 : vector<16x64xbf16> to vector<1x16x64xbf16>
    tpu.vector_store %arg7[%c0_33, %c0_34, %c0_35], %35 {strides = array<i32>} : memref<1x16x64xbf16, #tpu.memory_space<vmem>>, vector<1x16x64xbf16>,
    return
  }
  func.func @transform_0(%arg0: i32, %arg1: i32) -> (i32, i32, i32, i32) {
    %c0_i32 = arith.constant 0 : i32
    %c0_i32_0 = arith.constant 0 : i32
    %c0_i32_1 = arith.constant 0 : i32
    return %arg0, %c0_i32, %arg1, %c0_i32_0 : i32, i32, i32, i32
  }
  func.func @transform_1(%arg0: i32, %arg1: i32) -> (i32, i32, i32) {
    %c0_i32 = arith.constant 0 : i32
    %c0_i32_0 = arith.constant 0 : i32
    return %arg0, %arg1, %c0_i32 : i32, i32, i32
  }
  func.func @transform_2(%arg0: i32, %arg1: i32) -> (i32, i32) {
    %c0_i32 = arith.constant 0 : i32
    %c0_i32_0 = arith.constant 0 : i32
    %c0_i32_1 = arith.constant 0 : i32
    return %c0_i32, %c0_i32_0 : i32, i32
  }
  func.func @transform_3(%arg0: i32, %arg1: i32) -> (i32, i32) {
    %c0_i32 = arith.constant 0 : i32
    %c0_i32_0 = arith.constant 0 : i32
    %c0_i32_1 = arith.constant 0 : i32
    return %c0_i32, %c0_i32_0 : i32, i32
  }
  func.func @transform_4(%arg0: i32, %arg1: i32) -> (i32, i32) {
    %c0_i32 = arith.constant 0 : i32
    %c0_i32_0 = arith.constant 0 : i32
    %c0_i32_1 = arith.constant 0 : i32
    return %c0_i32, %c0_i32_0 : i32, i32
  }
  func.func @transform_5(%arg0: i32, %arg1: i32) -> (i32, i32, i32) {
    %c0_i32 = arith.constant 0 : i32
    %c0_i32_0 = arith.constant 0 : i32
    return %arg0, %arg1, %c0_i32 : i32, i32, i32
  }
}

module attributes {stable_mosaic.version = 11 : i64} {
  func.func @_conv_max_n_kernel(%arg0: i32, %arg1: i32, %arg2: memref<1x16x192xbf16, #tpu.memory_space<vmem>>, %arg3: memref<192x1024xbf16, #tpu.memory_space<vmem>>, %arg4: memref<1x1024xf32, #tpu.memory_space<vmem>>, %arg5: memref<1x1x1024xf32, #tpu.memory_space<vmem>>) attributes {dimension_semantics = [#tpu.dimension_semantics<parallel>, #tpu.dimension_semantics<arbitrary>], iteration_bounds = array<i64: 2, 1>, scalar_prefetch = 0 : i64, scratch_operands = 0 : i64, tpu.core_type = #tpu.core_type<tc>, window_params = [{transform_indices = @transform_0, window_bounds = array<i64: 1, 16, 192>}, {pipeline_mode = #tpu.pipeline_mode<synchronous>, transform_indices = @transform_1, window_bounds = array<i64: 192, 1024>}, {pipeline_mode = #tpu.pipeline_mode<synchronous>, transform_indices = @transform_2, window_bounds = array<i64: 1, 1024>}, {transform_indices = @transform_3, window_bounds = array<i64: 1, 1, 1024>}]} {
    %c0 = arith.constant 0 : index
    %c0_0 = arith.constant 0 : index
    %c0_1 = arith.constant 0 : index
    %0 = vector.load %arg2[%c0, %c0_0, %c0_1] : memref<1x16x192xbf16, #tpu.memory_space<vmem>>, vector<1x16x192xbf16>
    %1 = vector.shape_cast %0 : vector<1x16x192xbf16> to vector<16x192xbf16>
    %c0_2 = arith.constant 0 : index
    %c0_3 = arith.constant 0 : index
    %2 = vector.load %arg3[%c0_2, %c0_3] : memref<192x1024xbf16, #tpu.memory_space<vmem>>, vector<192x1024xbf16>
    %cst = arith.constant dense<0.000000e+00> : vector<16x1024xf32>
    %3 = tpu.matmul %1, %2, %cst {dimension_numbers = #tpu.dot_dimension_numbers<[1], [0], [0], [1], [0, 0, 1, 1], [], []>} : vector<16x192xbf16>, vector<192x1024xbf16>, vector<16x1024xf32> -> vector<16x1024xf32>
    %c0_4 = arith.constant 0 : index
    %c0_5 = arith.constant 0 : index
    %4 = vector.load %arg4[%c0_4, %c0_5] : memref<1x1024xf32, #tpu.memory_space<vmem>>, vector<1x1024xf32>
    %5 = vector.broadcast %4 : vector<1x1024xf32> to vector<16x1024xf32>
    %6 = arith.addf %3, %5 : vector<16x1024xf32>
    %cst_6 = arith.constant 0.000000e+00 : f32
    %7 = vector.broadcast %cst_6 : f32 to vector<16x1024xf32>
    %8 = arith.cmpf oge, %6, %7 : vector<16x1024xf32>
    %cst_7 = arith.constant 2.000000e-01 : f32
    %9 = vector.broadcast %cst_7 : f32 to vector<16x1024xf32>
    %10 = arith.mulf %9, %6 : vector<16x1024xf32>
    %11 = arith.select %8, %6, %10 : vector<16x1024xi1>, vector<16x1024xf32>
    %cst_8 = arith.constant dense<0xFF800000> : vector<1024xf32>
    %12 = vector.multi_reduction <maximumf>, %11, %cst_8 [0] : vector<16x1024xf32> to vector<1024xf32>
    %13 = vector.shape_cast %12 : vector<1024xf32> to vector<1x1024xf32>
    %c0_i32 = arith.constant 0 : i32
    %14 = arith.cmpi eq, %arg1, %c0_i32 : i32
    %15 = arith.extui %14 : i1 to i32
    %c0_i32_9 = arith.constant 0 : i32
    %16 = arith.cmpi ne, %15, %c0_i32_9 : i32
    scf.if %16 {
      %c0_12 = arith.constant 0 : index
      %c0_13 = arith.constant 0 : index
      %c0_14 = arith.constant 0 : index
      %20 = vector.load %arg5[%c0_12, %c0_13, %c0_14] : memref<1x1x1024xf32, #tpu.memory_space<vmem>>, vector<1x1x1024xf32>
      %21 = vector.shape_cast %20 : vector<1x1x1024xf32> to vector<1x1024xf32>
      %22 = vector.shape_cast %13 : vector<1x1024xf32> to vector<1x1x1024xf32>
      tpu.vector_store %arg5[%c0_12, %c0_13, %c0_14], %22 {strides = array<i32>} : memref<1x1x1024xf32, #tpu.memory_space<vmem>>, vector<1x1x1024xf32>,
    } else {
    }
    %c0_i32_10 = arith.constant 0 : i32
    %17 = arith.cmpi sgt, %arg1, %c0_i32_10 : i32
    %18 = arith.extui %17 : i1 to i32
    %c0_i32_11 = arith.constant 0 : i32
    %19 = arith.cmpi ne, %18, %c0_i32_11 : i32
    scf.if %19 {
      %c0_12 = arith.constant 0 : index
      %c0_13 = arith.constant 0 : index
      %c0_14 = arith.constant 0 : index
      %20 = vector.load %arg5[%c0_12, %c0_13, %c0_14] : memref<1x1x1024xf32, #tpu.memory_space<vmem>>, vector<1x1x1024xf32>
      %21 = vector.shape_cast %20 : vector<1x1x1024xf32> to vector<1x1024xf32>
      %22 = arith.maximumf %21, %13 : vector<1x1024xf32>
      %c0_15 = arith.constant 0 : index
      %c0_16 = arith.constant 0 : index
      %c0_17 = arith.constant 0 : index
      %23 = vector.load %arg5[%c0_15, %c0_16, %c0_17] : memref<1x1x1024xf32, #tpu.memory_space<vmem>>, vector<1x1x1024xf32>
      %24 = vector.shape_cast %23 : vector<1x1x1024xf32> to vector<1x1024xf32>
      %25 = vector.shape_cast %22 : vector<1x1024xf32> to vector<1x1x1024xf32>
      tpu.vector_store %arg5[%c0_15, %c0_16, %c0_17], %25 {strides = array<i32>} : memref<1x1x1024xf32, #tpu.memory_space<vmem>>, vector<1x1x1024xf32>,
    } else {
    }
    return
  }
  func.func @transform_0(%arg0: i32, %arg1: i32) -> (i32, i32, i32) {
    %c0_i32 = arith.constant 0 : i32
    %c0_i32_0 = arith.constant 0 : i32
    return %arg0, %arg1, %c0_i32 : i32, i32, i32
  }
  func.func @transform_1(%arg0: i32, %arg1: i32) -> (i32, i32) {
    %c0_i32 = arith.constant 0 : i32
    %c0_i32_0 = arith.constant 0 : i32
    %c0_i32_1 = arith.constant 0 : i32
    return %c0_i32, %c0_i32_0 : i32, i32
  }
  func.func @transform_2(%arg0: i32, %arg1: i32) -> (i32, i32) {
    %c0_i32 = arith.constant 0 : i32
    %c0_i32_0 = arith.constant 0 : i32
    %c0_i32_1 = arith.constant 0 : i32
    return %c0_i32, %c0_i32_0 : i32, i32
  }
  func.func @transform_3(%arg0: i32, %arg1: i32) -> (i32, i32, i32) {
    %c0_i32 = arith.constant 0 : i32
    %c0_i32_0 = arith.constant 0 : i32
    %c0_i32_1 = arith.constant 0 : i32
    return %arg0, %c0_i32, %c0_i32_0 : i32, i32, i32
  }
}

module attributes {stable_mosaic.version = 11 : i64} {
  func.func @_global_bias_kernel(%arg0: i32, %arg1: memref<1x1x1024xf32, #tpu.memory_space<vmem>>, %arg2: memref<1x1x16xf32, #tpu.memory_space<vmem>>, %arg3: memref<16x64xbf16, #tpu.memory_space<vmem>>, %arg4: memref<1x64xf32, #tpu.memory_space<vmem>>, %arg5: memref<1024x256xbf16, #tpu.memory_space<vmem>>, %arg6: memref<64x256xbf16, #tpu.memory_space<vmem>>, %arg7: memref<1x256xf32, #tpu.memory_space<vmem>>, %arg8: memref<1x1x256xf32, #tpu.memory_space<vmem>>) attributes {dimension_semantics = [#tpu.dimension_semantics<parallel>], iteration_bounds = array<i64: 2>, scalar_prefetch = 0 : i64, scratch_operands = 0 : i64, tpu.core_type = #tpu.core_type<tc>, window_params = [{transform_indices = @transform_0, window_bounds = array<i64: 1, 1, 1024>}, {transform_indices = @transform_1, window_bounds = array<i64: 1, 1, 16>}, {pipeline_mode = #tpu.pipeline_mode<synchronous>, transform_indices = @transform_2, window_bounds = array<i64: 16, 64>}, {pipeline_mode = #tpu.pipeline_mode<synchronous>, transform_indices = @transform_3, window_bounds = array<i64: 1, 64>}, {pipeline_mode = #tpu.pipeline_mode<synchronous>, transform_indices = @transform_4, window_bounds = array<i64: 1024, 256>}, {pipeline_mode = #tpu.pipeline_mode<synchronous>, transform_indices = @transform_5, window_bounds = array<i64: 64, 256>}, {pipeline_mode = #tpu.pipeline_mode<synchronous>, transform_indices = @transform_6, window_bounds = array<i64: 1, 256>}, {transform_indices = @transform_7, window_bounds = array<i64: 1, 1, 256>}]} {
    %c0 = arith.constant 0 : index
    %c0_0 = arith.constant 0 : index
    %c0_1 = arith.constant 0 : index
    %0 = vector.load %arg2[%c0, %c0_0, %c0_1] : memref<1x1x16xf32, #tpu.memory_space<vmem>>, vector<1x1x16xf32>
    %1 = vector.shape_cast %0 : vector<1x1x16xf32> to vector<1x16xf32>
    %2 = arith.truncf %1 : vector<1x16xf32> to vector<1x16xbf16>
    %c0_2 = arith.constant 0 : index
    %c0_3 = arith.constant 0 : index
    %3 = vector.load %arg3[%c0_2, %c0_3] : memref<16x64xbf16, #tpu.memory_space<vmem>>, vector<16x64xbf16>
    %cst = arith.constant dense<0.000000e+00> : vector<1x64xf32>
    %4 = tpu.matmul %2, %3, %cst {dimension_numbers = #tpu.dot_dimension_numbers<[1], [0], [0], [1], [0, 0, 1, 1], [], []>} : vector<1x16xbf16>, vector<16x64xbf16>, vector<1x64xf32> -> vector<1x64xf32>
    %c0_4 = arith.constant 0 : index
    %c0_5 = arith.constant 0 : index
    %5 = vector.load %arg4[%c0_4, %c0_5] : memref<1x64xf32, #tpu.memory_space<vmem>>, vector<1x64xf32>
    %6 = arith.addf %4, %5 : vector<1x64xf32>
    %cst_6 = arith.constant 0.000000e+00 : f32
    %7 = vector.broadcast %cst_6 : f32 to vector<1x64xf32>
    %8 = arith.cmpf oge, %6, %7 : vector<1x64xf32>
    %cst_7 = arith.constant 2.000000e-01 : f32
    %9 = vector.broadcast %cst_7 : f32 to vector<1x64xf32>
    %10 = arith.mulf %9, %6 : vector<1x64xf32>
    %11 = arith.select %8, %6, %10 : vector<1x64xi1>, vector<1x64xf32>
    %c0_8 = arith.constant 0 : index
    %c0_9 = arith.constant 0 : index
    %c0_10 = arith.constant 0 : index
    %12 = vector.load %arg1[%c0_8, %c0_9, %c0_10] : memref<1x1x1024xf32, #tpu.memory_space<vmem>>, vector<1x1x1024xf32>
    %13 = vector.shape_cast %12 : vector<1x1x1024xf32> to vector<1x1024xf32>
    %14 = arith.truncf %13 : vector<1x1024xf32> to vector<1x1024xbf16>
    %c0_11 = arith.constant 0 : index
    %c0_12 = arith.constant 0 : index
    %15 = vector.load %arg5[%c0_11, %c0_12] : memref<1024x256xbf16, #tpu.memory_space<vmem>>, vector<1024x256xbf16>
    %cst_13 = arith.constant dense<0.000000e+00> : vector<1x256xf32>
    %16 = tpu.matmul %14, %15, %cst_13 {dimension_numbers = #tpu.dot_dimension_numbers<[1], [0], [0], [1], [0, 0, 1, 1], [], []>} : vector<1x1024xbf16>, vector<1024x256xbf16>, vector<1x256xf32> -> vector<1x256xf32>
    %17 = arith.truncf %11 : vector<1x64xf32> to vector<1x64xbf16>
    %c0_14 = arith.constant 0 : index
    %c0_15 = arith.constant 0 : index
    %18 = vector.load %arg6[%c0_14, %c0_15] : memref<64x256xbf16, #tpu.memory_space<vmem>>, vector<64x256xbf16>
    %cst_16 = arith.constant dense<0.000000e+00> : vector<1x256xf32>
    %19 = tpu.matmul %17, %18, %cst_16 {dimension_numbers = #tpu.dot_dimension_numbers<[1], [0], [0], [1], [0, 0, 1, 1], [], []>} : vector<1x64xbf16>, vector<64x256xbf16>, vector<1x256xf32> -> vector<1x256xf32>
    %20 = arith.addf %16, %19 : vector<1x256xf32>
    %c0_17 = arith.constant 0 : index
    %c0_18 = arith.constant 0 : index
    %21 = vector.load %arg7[%c0_17, %c0_18] : memref<1x256xf32, #tpu.memory_space<vmem>>, vector<1x256xf32>
    %22 = arith.addf %20, %21 : vector<1x256xf32>
    %c0_19 = arith.constant 0 : index
    %c0_20 = arith.constant 0 : index
    %c0_21 = arith.constant 0 : index
    %23 = vector.load %arg8[%c0_19, %c0_20, %c0_21] : memref<1x1x256xf32, #tpu.memory_space<vmem>>, vector<1x1x256xf32>
    %24 = vector.shape_cast %23 : vector<1x1x256xf32> to vector<1x256xf32>
    %25 = vector.shape_cast %22 : vector<1x256xf32> to vector<1x1x256xf32>
    tpu.vector_store %arg8[%c0_19, %c0_20, %c0_21], %25 {strides = array<i32>} : memref<1x1x256xf32, #tpu.memory_space<vmem>>, vector<1x1x256xf32>,
    return
  }
  func.func @transform_0(%arg0: i32) -> (i32, i32, i32) {
    %c0_i32 = arith.constant 0 : i32
    %c0_i32_0 = arith.constant 0 : i32
    %c0_i32_1 = arith.constant 0 : i32
    return %arg0, %c0_i32, %c0_i32_0 : i32, i32, i32
  }
  func.func @transform_1(%arg0: i32) -> (i32, i32, i32) {
    %c0_i32 = arith.constant 0 : i32
    %c0_i32_0 = arith.constant 0 : i32
    %c0_i32_1 = arith.constant 0 : i32
    return %arg0, %c0_i32, %c0_i32_0 : i32, i32, i32
  }
  func.func @transform_2(%arg0: i32) -> (i32, i32) {
    %c0_i32 = arith.constant 0 : i32
    %c0_i32_0 = arith.constant 0 : i32
    %c0_i32_1 = arith.constant 0 : i32
    return %c0_i32, %c0_i32_0 : i32, i32
  }
  func.func @transform_3(%arg0: i32) -> (i32, i32) {
    %c0_i32 = arith.constant 0 : i32
    %c0_i32_0 = arith.constant 0 : i32
    %c0_i32_1 = arith.constant 0 : i32
    return %c0_i32, %c0_i32_0 : i32, i32
  }
  func.func @transform_4(%arg0: i32) -> (i32, i32) {
    %c0_i32 = arith.constant 0 : i32
    %c0_i32_0 = arith.constant 0 : i32
    %c0_i32_1 = arith.constant 0 : i32
    return %c0_i32, %c0_i32_0 : i32, i32
  }
  func.func @transform_5(%arg0: i32) -> (i32, i32) {
    %c0_i32 = arith.constant 0 : i32
    %c0_i32_0 = arith.constant 0 : i32
    %c0_i32_1 = arith.constant 0 : i32
    return %c0_i32, %c0_i32_0 : i32, i32
  }
  func.func @transform_6(%arg0: i32) -> (i32, i32) {
    %c0_i32 = arith.constant 0 : i32
    %c0_i32_0 = arith.constant 0 : i32
    %c0_i32_1 = arith.constant 0 : i32
    return %c0_i32, %c0_i32_0 : i32, i32
  }
  func.func @transform_7(%arg0: i32) -> (i32, i32, i32) {
    %c0_i32 = arith.constant 0 : i32
    %c0_i32_0 = arith.constant 0 : i32
    %c0_i32_1 = arith.constant 0 : i32
    return %arg0, %c0_i32, %c0_i32_0 : i32, i32, i32
  }
}

module attributes {stable_mosaic.version = 11 : i64} {
  func.func @_head_kernel(%arg0: i32, %arg1: i32, %arg2: memref<1x1x256xf32, #tpu.memory_space<vmem>>, %arg3: memref<1x16x192xbf16, #tpu.memory_space<vmem>>, %arg4: memref<192x256xbf16, #tpu.memory_space<vmem>>, %arg5: memref<256x256xbf16, #tpu.memory_space<vmem>>, %arg6: memref<1x256xf32, #tpu.memory_space<vmem>>, %arg7: memref<256x128xbf16, #tpu.memory_space<vmem>>, %arg8: memref<1x128xf32, #tpu.memory_space<vmem>>, %arg9: memref<128x128xbf16, #tpu.memory_space<vmem>>, %arg10: memref<1x16x128xbf16, #tpu.memory_space<vmem>>) attributes {dimension_semantics = [#tpu.dimension_semantics<parallel>, #tpu.dimension_semantics<parallel>], iteration_bounds = array<i64: 2, 1>, scalar_prefetch = 0 : i64, scratch_operands = 0 : i64, tpu.core_type = #tpu.core_type<tc>, window_params = [{transform_indices = @transform_0, window_bounds = array<i64: 1, 1, 256>}, {transform_indices = @transform_1, window_bounds = array<i64: 1, 16, 192>}, {pipeline_mode = #tpu.pipeline_mode<synchronous>, transform_indices = @transform_2, window_bounds = array<i64: 192, 256>}, {pipeline_mode = #tpu.pipeline_mode<synchronous>, transform_indices = @transform_3, window_bounds = array<i64: 256, 256>}, {pipeline_mode = #tpu.pipeline_mode<synchronous>, transform_indices = @transform_4, window_bounds = array<i64: 1, 256>}, {pipeline_mode = #tpu.pipeline_mode<synchronous>, transform_indices = @transform_5, window_bounds = array<i64: 256, 128>}, {pipeline_mode = #tpu.pipeline_mode<synchronous>, transform_indices = @transform_6, window_bounds = array<i64: 1, 128>}, {pipeline_mode = #tpu.pipeline_mode<synchronous>, transform_indices = @transform_7, window_bounds = array<i64: 128, 128>}, {transform_indices = @transform_8, window_bounds = array<i64: 1, 16, 128>}]} {
    %c0 = arith.constant 0 : index
    %c0_0 = arith.constant 0 : index
    %c0_1 = arith.constant 0 : index
    %0 = vector.load %arg3[%c0, %c0_0, %c0_1] : memref<1x16x192xbf16, #tpu.memory_space<vmem>>, vector<1x16x192xbf16>
    %1 = vector.shape_cast %0 : vector<1x16x192xbf16> to vector<16x192xbf16>
    %c0_2 = arith.constant 0 : index
    %c0_3 = arith.constant 0 : index
    %2 = vector.load %arg4[%c0_2, %c0_3] : memref<192x256xbf16, #tpu.memory_space<vmem>>, vector<192x256xbf16>
    %cst = arith.constant dense<0.000000e+00> : vector<16x256xf32>
    %3 = tpu.matmul %1, %2, %cst {dimension_numbers = #tpu.dot_dimension_numbers<[1], [0], [0], [1], [0, 0, 1, 1], [], []>} : vector<16x192xbf16>, vector<192x256xbf16>, vector<16x256xf32> -> vector<16x256xf32>
    %c0_4 = arith.constant 0 : index
    %c0_5 = arith.constant 0 : index
    %c0_6 = arith.constant 0 : index
    %4 = vector.load %arg2[%c0_4, %c0_5, %c0_6] : memref<1x1x256xf32, #tpu.memory_space<vmem>>, vector<1x1x256xf32>
    %5 = vector.shape_cast %4 : vector<1x1x256xf32> to vector<1x256xf32>
    %6 = vector.broadcast %5 : vector<1x256xf32> to vector<16x256xf32>
    %7 = arith.addf %3, %6 : vector<16x256xf32>
    %cst_7 = arith.constant 0.000000e+00 : f32
    %8 = vector.broadcast %cst_7 : f32 to vector<16x256xf32>
    %9 = arith.cmpf oge, %7, %8 : vector<16x256xf32>
    %cst_8 = arith.constant 2.000000e-01 : f32
    %10 = vector.broadcast %cst_8 : f32 to vector<16x256xf32>
    %11 = arith.mulf %10, %7 : vector<16x256xf32>
    %12 = arith.select %9, %7, %11 : vector<16x256xi1>, vector<16x256xf32>
    %13 = arith.truncf %12 : vector<16x256xf32> to vector<16x256xbf16>
    %c0_9 = arith.constant 0 : index
    %c0_10 = arith.constant 0 : index
    %14 = vector.load %arg5[%c0_9, %c0_10] : memref<256x256xbf16, #tpu.memory_space<vmem>>, vector<256x256xbf16>
    %cst_11 = arith.constant dense<0.000000e+00> : vector<16x256xf32>
    %15 = tpu.matmul %13, %14, %cst_11 {dimension_numbers = #tpu.dot_dimension_numbers<[1], [0], [0], [1], [0, 0, 1, 1], [], []>} : vector<16x256xbf16>, vector<256x256xbf16>, vector<16x256xf32> -> vector<16x256xf32>
    %c0_12 = arith.constant 0 : index
    %c0_13 = arith.constant 0 : index
    %16 = vector.load %arg6[%c0_12, %c0_13] : memref<1x256xf32, #tpu.memory_space<vmem>>, vector<1x256xf32>
    %17 = vector.broadcast %16 : vector<1x256xf32> to vector<16x256xf32>
    %18 = arith.addf %15, %17 : vector<16x256xf32>
    %cst_14 = arith.constant 0.000000e+00 : f32
    %19 = vector.broadcast %cst_14 : f32 to vector<16x256xf32>
    %20 = arith.cmpf oge, %18, %19 : vector<16x256xf32>
    %cst_15 = arith.constant 2.000000e-01 : f32
    %21 = vector.broadcast %cst_15 : f32 to vector<16x256xf32>
    %22 = arith.mulf %21, %18 : vector<16x256xf32>
    %23 = arith.select %20, %18, %22 : vector<16x256xi1>, vector<16x256xf32>
    %24 = arith.truncf %23 : vector<16x256xf32> to vector<16x256xbf16>
    %c0_16 = arith.constant 0 : index
    %c0_17 = arith.constant 0 : index
    %25 = vector.load %arg7[%c0_16, %c0_17] : memref<256x128xbf16, #tpu.memory_space<vmem>>, vector<256x128xbf16>
    %cst_18 = arith.constant dense<0.000000e+00> : vector<16x128xf32>
    %26 = tpu.matmul %24, %25, %cst_18 {dimension_numbers = #tpu.dot_dimension_numbers<[1], [0], [0], [1], [0, 0, 1, 1], [], []>} : vector<16x256xbf16>, vector<256x128xbf16>, vector<16x128xf32> -> vector<16x128xf32>
    %c0_19 = arith.constant 0 : index
    %c0_20 = arith.constant 0 : index
    %27 = vector.load %arg8[%c0_19, %c0_20] : memref<1x128xf32, #tpu.memory_space<vmem>>, vector<1x128xf32>
    %28 = vector.broadcast %27 : vector<1x128xf32> to vector<16x128xf32>
    %29 = arith.addf %26, %28 : vector<16x128xf32>
    %cst_21 = arith.constant 0.000000e+00 : f32
    %30 = vector.broadcast %cst_21 : f32 to vector<16x128xf32>
    %31 = arith.cmpf oge, %29, %30 : vector<16x128xf32>
    %cst_22 = arith.constant 2.000000e-01 : f32
    %32 = vector.broadcast %cst_22 : f32 to vector<16x128xf32>
    %33 = arith.mulf %32, %29 : vector<16x128xf32>
    %34 = arith.select %31, %29, %33 : vector<16x128xi1>, vector<16x128xf32>
    %35 = arith.truncf %34 : vector<16x128xf32> to vector<16x128xbf16>
    %c0_23 = arith.constant 0 : index
    %c0_24 = arith.constant 0 : index
    %36 = vector.load %arg9[%c0_23, %c0_24] : memref<128x128xbf16, #tpu.memory_space<vmem>>, vector<128x128xbf16>
    %cst_25 = arith.constant dense<0.000000e+00> : vector<16x128xf32>
    %37 = tpu.matmul %35, %36, %cst_25 {dimension_numbers = #tpu.dot_dimension_numbers<[1], [0], [0], [1], [0, 0, 1, 1], [], []>} : vector<16x128xbf16>, vector<128x128xbf16>, vector<16x128xf32> -> vector<16x128xf32>
    %38 = arith.truncf %37 : vector<16x128xf32> to vector<16x128xbf16>
    %c0_26 = arith.constant 0 : index
    %c0_27 = arith.constant 0 : index
    %c0_28 = arith.constant 0 : index
    %39 = vector.load %arg10[%c0_26, %c0_27, %c0_28] : memref<1x16x128xbf16, #tpu.memory_space<vmem>>, vector<1x16x128xbf16>
    %40 = vector.shape_cast %39 : vector<1x16x128xbf16> to vector<16x128xbf16>
    %41 = vector.shape_cast %38 : vector<16x128xbf16> to vector<1x16x128xbf16>
    tpu.vector_store %arg10[%c0_26, %c0_27, %c0_28], %41 {strides = array<i32>} : memref<1x16x128xbf16, #tpu.memory_space<vmem>>, vector<1x16x128xbf16>,
    return
  }
  func.func @transform_0(%arg0: i32, %arg1: i32) -> (i32, i32, i32) {
    %c0_i32 = arith.constant 0 : i32
    %c0_i32_0 = arith.constant 0 : i32
    %c0_i32_1 = arith.constant 0 : i32
    return %arg0, %c0_i32, %c0_i32_0 : i32, i32, i32
  }
  func.func @transform_1(%arg0: i32, %arg1: i32) -> (i32, i32, i32) {
    %c0_i32 = arith.constant 0 : i32
    %c0_i32_0 = arith.constant 0 : i32
    return %arg0, %arg1, %c0_i32 : i32, i32, i32
  }
  func.func @transform_2(%arg0: i32, %arg1: i32) -> (i32, i32) {
    %c0_i32 = arith.constant 0 : i32
    %c0_i32_0 = arith.constant 0 : i32
    %c0_i32_1 = arith.constant 0 : i32
    return %c0_i32, %c0_i32_0 : i32, i32
  }
  func.func @transform_3(%arg0: i32, %arg1: i32) -> (i32, i32) {
    %c0_i32 = arith.constant 0 : i32
    %c0_i32_0 = arith.constant 0 : i32
    %c0_i32_1 = arith.constant 0 : i32
    return %c0_i32, %c0_i32_0 : i32, i32
  }
  func.func @transform_4(%arg0: i32, %arg1: i32) -> (i32, i32) {
    %c0_i32 = arith.constant 0 : i32
    %c0_i32_0 = arith.constant 0 : i32
    %c0_i32_1 = arith.constant 0 : i32
    return %c0_i32, %c0_i32_0 : i32, i32
  }
  func.func @transform_5(%arg0: i32, %arg1: i32) -> (i32, i32) {
    %c0_i32 = arith.constant 0 : i32
    %c0_i32_0 = arith.constant 0 : i32
    %c0_i32_1 = arith.constant 0 : i32
    return %c0_i32, %c0_i32_0 : i32, i32
  }
  func.func @transform_6(%arg0: i32, %arg1: i32) -> (i32, i32) {
    %c0_i32 = arith.constant 0 : i32
    %c0_i32_0 = arith.constant 0 : i32
    %c0_i32_1 = arith.constant 0 : i32
    return %c0_i32, %c0_i32_0 : i32, i32
  }
  func.func @transform_7(%arg0: i32, %arg1: i32) -> (i32, i32) {
    %c0_i32 = arith.constant 0 : i32
    %c0_i32_0 = arith.constant 0 : i32
    %c0_i32_1 = arith.constant 0 : i32
    return %c0_i32, %c0_i32_0 : i32, i32
  }
  func.func @transform_8(%arg0: i32, %arg1: i32) -> (i32, i32, i32) {
    %c0_i32 = arith.constant 0 : i32
    %c0_i32_0 = arith.constant 0 : i32
    return %arg0, %arg1, %c0_i32 : i32, i32, i32
  }
}

</mosaic_0001>

<bundles_post_ra>
// kernel: dgcnn_partseg_forward.14
= control target key start
LH: loop header
LB: loop body
LE: loop exit
PB: predicated region body
PF: predicated region fallthrough
CT: control target
= control target key end

     0   :  { %s568_s12 = smov 0   ;;  %s570_s13 = smov 0   ;;  %s620_s0 = inlined_call_operand.vmem [shape: f32[2,16,3], index: 0, kind: input, shape index: {}, may-alias: {0,1}]   ;;  %s621_s1 = inlined_call_operand.vmem [shape: f32[2,16,3], index: 1, kind: input, shape index: {}, may-alias: {0,1}]   ;;  %s622_s2 = inlined_call_operand.vmem [shape: f32[2,1,16], index: 2, kind: input, shape index: {}]   ;;  %s623_s3 = inlined_call_operand.vmem [shape: f32[2,16,16], index: 3, kind: output, shape index: {}]  }
   0x1   :  { %s572_s14 = smov 0  }
   0x2 LB: > { %s25_s15 = sadd.s32 1, %s542_s13  ;;  %p472_p0 = scmp.ge.s32.totalorder %s546_s14, 1  ;;  %s546_s14 = sphi %s572_s14, %s13_s14   ;;  %s542_s13 = sphi %s570_s13, %s625_s13   ;;  %s538_s12 = sphi %s568_s12, %s624_s12  }
   0x3   : > { %p27_p1 = scmp.ge.s32.totalorder %s25_s15, 2  ;;  %p176_p2 = scmp.lt.s32.totalorder %s546_s14, 3 }
   0x5   : > { %s627_s15 = smov (%p27_p1, %s25_s15), 0  ;;  %p177_p3 = pnand %p472_p0, %p176_p2 }
   0x6   : > { %p217_p4 = scmp.lt.s32.totalorder (!%p177_p3), %s538_s12, 1 }
   0x7   : > { %180 = sbr.rel (%p177_p3) target bundleno = 226 (0xe2), region = 32 }
   0xc   : > { %s629_s12 = smov (!%p217_p4, %s538_s12), 1  ;;  %vm248_vm0 = vcmask 23552   ;;  %vm357_vm1 = vcmask 130048  }
   0xd   : > { %s586_s16 = sshll.u32 %s629_s12, 4  ;;  %s233_s25 = scalar_lea.vmem %s622_s2, %s629_s12 }
   0xe   : > { %s230_s19 = scalar_lea.vmem %s621_s1, %s586_s16  ;;  %s224_s22 = scalar_lea.vmem %s620_s0, %s586_s16  ;;  %v483_v12 = vld [vmem:[%s233_s25] ss:$0 sm:$0xff] }
   0xf   : > { %v246_v0 = vld [vmem:[%s230_s19] sm:$0xff]  ;;  %v247_v1 = vld [vmem:[%s230_s19 + $0x8] sm:$0xff]  ;;  %s242_s28 = scalar_lea.vmem %s623_s3, %s586_s16 }
  0x10   : > { %493 = vmatprep.subr.msk.mxu0 %vm248_vm0, %v247_v1  ;;  %v244_v2 = vld [vmem:[%s224_s22] sm:$0xff]  ;;  %v245_v3 = vld [vmem:[%s224_s22 + $0x8] sm:$0xff] }
  0x11   : > { %494 = vmatpush3.xpose.msk.msra.mxu0 %vm248_vm0, %v247_v1  ;;  %497 = vmatprep.mubr.msk.f32.mxu0 %vm248_vm0, %v244_v2  ;;  %v336_v4 = vmul.f32 %v244_v2, %v244_v2  ;;  %v337_v5 = vmul.f32 %v245_v3, %v245_v3 }
  0x12   : > { %495 = vmatprep.subr.msk.mxu0 %vm248_vm0, %v246_v0 }
  0x13   : > { %v338_v6 = vsel %vm248_vm0, %v336_v4, 0.0  ;;  %v341_v7 = vsel %vm248_vm0, %v337_v5, 0.0 }
  0x14   : > { %339 = vadd.xlane.f32.xlu0 %v338_v6 }
  0x15   : > { %496 = vmatpush3.xpose.msk.msra.mxu0 %vm248_vm0, %v246_v0 }
  0x18   : > { %498 = vmatmul.mubr.msk.f32.vlgmr.msra.gmra.mxu0 %vm248_vm0, %v245_v3  ;;  %342 = vadd.xlane.f32.xlu0 %v341_v7 }
  0x9d   : > { %v340_v8 = vpop.xlane.xlu0 %339 }
  0xa1   : > { %v343_v10 = vpop.xlane.xlu0 %342 }
  0xd8   : > { %v499_v9 = vpop.f32.mrf.mxu0 }
  0xd9   : > { %v345_v11 = vmul.f32 2.0, %v499_v9 }
  0xda   : > { %v327_v13 = vpop.f32.mrf.mxu0 }
  0xdb   : > { %v347_v14 = vsub.f32 %v345_v11, %v343_v10  ;;  %v344_v15 = vmul.f32 2.0, %v327_v13 }
  0xdd   : > { %v356_v16 = vsub.f32 %v347_v14, %v483_v12  ;;  %v346_v17 = vsub.f32 %v344_v15, %v340_v8 }
  0xdf   : > { %359 = vst.msk [vmem:[%s242_s28 + $0x8] sm:$0xff] %vm357_vm1, %v356_v16  ;;  %v355_v18 = vsub.f32 %v346_v17, %v483_v12 }
  0xe1   : > { %358 = vst.msk [vmem:[%s242_s28] sm:$0xff] %vm357_vm1, %v355_v18 }
  0xe2 PF: > { %s13_s14 = sadd.s32 1, %s546_s14   ;;  %s624_s12 = smov %s542_s13 }
  0xe3   : > { %p10_p5 = scmp.ge.s32.totalorder %s13_s14, 4   ;;  %s625_s13 = smov %s627_s15 }
  0xe5   :  { %12 = sbr.rel (!%p10_p5) target bundleno = 2 (0x2), region = 68 }

// kernel: dgcnn_partseg_forward.15
= control target key start
LH: loop header
LB: loop body
LE: loop exit
PB: predicated region body
PF: predicated region fallthrough
CT: control target
= control target key end

     0   :  { %s1278_s24 = smov 0   ;;  %s1280_s25 = smov 0   ;;  %s1449_s0 = inlined_call_operand.vmem [shape: bf16[2,4,16,3], index: 0, kind: input, shape index: {}]   ;;  %s1450_s1 = inlined_call_operand.vmem [shape: f32[2,16,3], index: 1, kind: input, shape index: {}]   ;;  %s1451_s2 = inlined_call_operand.vmem [shape: bf16[3,64], index: 2, kind: input, shape index: {}]   ;;  %s1452_s3 = inlined_call_operand.vmem [shape: bf16[3,64], index: 3, kind: input, shape index: {}]   ;;  %s1453_s4 = inlined_call_operand.vmem [shape: f32[1,64], index: 4, kind: input, shape index: {}]   ;;  %s1454_s5 = inlined_call_operand.vmem [shape: bf16[64,128], index: 5, kind: input, shape index: {}]   ;;  %s1455_s6 = inlined_call_operand.vmem [shape: f32[1,128], index: 6, kind: input, shape index: {}]   ;;  %s1456_s7 = inlined_call_operand.vmem [shape: bf16[2,16,128], index: 7, kind: output, shape index: {}]  }
   0x1   :  { %s1282_s26 = smov 0  }
   0x2 LB: > { %s29_s27 = sadd.s32 1, %s1229_s25  ;;  %p1022_p0 = scmp.ge.s32.totalorder %s1233_s26, 1  ;;  %s1233_s26 = sphi %s1282_s26, %s17_s26   ;;  %s1229_s25 = sphi %s1280_s25, %s1458_s25   ;;  %s1225_s24 = sphi %s1278_s24, %s1457_s24  }
   0x3   : > { %p31_p1 = scmp.ge.s32.totalorder %s29_s27, 2  ;;  %p275_p2 = scmp.lt.s32.totalorder %s1233_s26, 3 }
   0x5   : > { %s1460_s27 = smov (%p31_p1, %s29_s27), 0  ;;  %p276_p3 = pnand %p1022_p0, %p275_p2 }
   0x6   : > { %p325_p4 = scmp.lt.s32.totalorder (!%p276_p3), %s1225_s24, 1 }
   0x7   : > { %279 = sbr.rel (%p276_p3) target bundleno = 651 (0x28b), region = 48 }
   0xc   : > { %vm370_vm0 = vcmask 1040384   ;;  %vm371_vm1 = vcmask 1041408   ;;  %v420_v0 = vld [vmem:[%s1451_s2] sm:$0x3]  ;;  %v1235_v1 = vmov 0.0   ;;  %v1236_v2 = vmov 65535  }
   0xd   : > { %1104 = vmatprep.subr.bf16.mxu1 %v1235_v1  ;;  %1098 = vmatprep.subr.bf16.mxu0 %v1235_v1  ;;  %v372_v3 = vsel %vm370_vm0, 4294967295, %v1236_v2  ;;  %v358_v4 = vld [vmem:[%s1452_s3] sm:$0x3]  ;;  %vm1237_vm2 = vmmov 0   ;;  %s1462_s24 = smov (!%p325_p4, %s1225_s24), 1  ;;  %v1328_v8 = vld [vmem:[%s1454_s5 + $0x18] sm:$0xff]  }
   0xe   : > { %v373_v5 = vsel %vm371_vm1, %v372_v3, 0  ;;  %1100 = vmatprep.mubr.msk.bf16.mxu0 %vm1237_vm2, %v1235_v1  ;;  %1106 = vmatprep.mubr.msk.bf16.mxu1 %vm1237_vm2, %v1235_v1  ;;  %s1058_s9 = sshll.u32 %s1462_s24, 5  ;;  %s1059_s10 = sshll.u32 %s1462_s24, 4  ;;  %vm366_vm3 = vcmask 23552   ;;  %v1350_v14 = vld [vmem:[%s1454_s5 + $0x10] sm:$0xff]   ;;  %v1359_v15 = vld [vmem:[%s1454_s5 + $0x8] sm:$0xff]  }
   0xf   : > { %v1308_v6 = vand.u32 %v420_v0, %v373_v5  ;;  %v375_v7 = vand.u32 %v373_v5, %v358_v4  ;;  %s1319_s13 = scalar_lea.vmem %s1449_s0, %s1058_s9  ;;  %s342_s16 = scalar_lea.vmem %s1450_s1, %s1059_s10  ;;  %v1368_v16 = vld [vmem:[%s1454_s5] sm:$0xff]   ;;  %vm519_vm6 = vcmask 523264  }
  0x10   : > { %v355_v9 = vld [vmem:[%s342_s16] sm:$0xff]  ;;  %v356_v10 = vld [vmem:[%s342_s16 + $0x8] sm:$0xff]  ;;  %v1209_v46 = vld [vmem:[%s1319_s13 + $0x10] sm:$0xff]   ;;  %s1060_s10 = sshll.u32 %s1462_s24, 3 }
  0x11   : > { %1105 = vmatpush3.bf16.msra.mxu1 %v1308_v6  ;;  %1099 = vmatpush3.bf16.msra.mxu0 %v375_v7  ;;  %v357_v11 = vpack.c.bf16 %v356_v10, %v355_v9  ;;  %v1203_v12 = vld [vmem:[%s1319_s13] sm:$0xff]   ;;  %v1204_v13 = vld [vmem:[%s1319_s13 + $0x8] sm:$0xff]   ;;  %v1210_v47 = vld [vmem:[%s1319_s13 + $0x18] sm:$0xff]   ;;  %s352_s13 = scalar_lea.vmem %s1456_s7, %s1060_s10 }
  0x12   : > { %1122 = vmatprep.subr.bf16.mxu1 %v1235_v1  ;;  %1110 = vmatprep.subr.bf16.mxu0 %v1235_v1  ;;  %v1029_v17 = vld [vmem:[%s1453_s4] ss:$0 sm:$0xff] }
  0x13   : > { %v1420_v48 = vld [vmem:[%s1455_s6] ss:$0 sm:$0xff] }
  0x14   : > { %1101 = vmatmul.mubr.msk.bf16.vlgmr.msra.gmra.mxu0 %vm366_vm3, %v357_v11  ;;  %1107 = vmatmul.mubr.msk.bf16.vlgmr.msra.gmra.mxu1 %vm366_vm3, %v1203_v12 }
  0x15   : > { %1123 = vmatpush3.bf16.msra.mxu1 %v1308_v6  ;;  %1124 = vmatprep.mubr.msk.bf16.mxu1 %vm1237_vm2, %v1235_v1 }
  0x16   : > { %1111 = vmatpush3.bf16.msra.mxu0 %v1328_v8  ;;  %1128 = vmatprep.subr.bf16.mxu1 %v1235_v1 }
  0x17   : > { %1112 = vmatprep.subr.bf16.mxu0 %v1235_v1  ;;  %1118 = vmatprep.mubr.msk.bf16.mxu0 %vm1237_vm2, %v1235_v1 }
  0x1a   : > { %1113 = vmatpush3.bf16.msra.mxu0 %v1350_v14 }
  0x1b   : > { %1114 = vmatprep.subr.bf16.mxu0 %v1235_v1 }
  0x1c   : > { %1125 = vmatmul.mubr.msk.bf16.vlgmr.msra.gmra.mxu1 %vm366_vm3, %v1204_v13 }
  0x1d   : > { %1129 = vmatpush3.bf16.msra.mxu1 %v1328_v8  ;;  %1136 = vmatprep.mubr.msk.bf16.mxu1 %vm1237_vm2, %v1235_v1 }
  0x1e   : > { %1130 = vmatprep.subr.bf16.mxu1 %v1235_v1  ;;  %1115 = vmatpush3.bf16.msra.mxu0 %v1359_v15 }
  0x1f   : > { %1116 = vmatprep.subr.bf16.mxu0 %v1235_v1 }
  0x21   : > { %1131 = vmatpush3.bf16.msra.mxu1 %v1350_v14 }
  0x22   : > { %1132 = vmatprep.subr.bf16.mxu1 %v1235_v1  ;;  %1117 = vmatpush3.bf16.msra.mxu0 %v1368_v16 }
  0x23   : > { %1140 = vmatprep.subr.bf16.mxu0 %v1235_v1 }
  0x25   : > { %1133 = vmatpush3.bf16.msra.mxu1 %v1359_v15 }
  0x26   : > { %1134 = vmatprep.subr.bf16.mxu1 %v1235_v1 }
  0x29   : > { %1135 = vmatpush3.bf16.msra.mxu1 %v1368_v16 }
  0x2a   : > { %1158 = vmatprep.subr.bf16.mxu1 %v1235_v1 }
  0xd4   : > { %v411_v18 = vpop.f32.mrf.mxu0  ;;  %v466_v19 = vpop.f32.mrf.mxu1 }
  0xd5   : > { %v1377_v20 = vadd.f32 %v1029_v17, %v411_v18 }
  0xd6   : > { %v1102_v21 = vpop.f32.mrf.mxu0  ;;  %v1108_v22 = vpop.f32.mrf.mxu1 }
  0xd7   : > { %v467_v23 = vadd.f32 %v466_v19, %v1377_v20 }
  0xd8   : > { %v414_v24 = vpop.f32.mrf.mxu0  ;;  %v469_v25 = vpop.f32.mrf.mxu1 }
  0xd9   : > { %v1380_v26 = vadd.f32 %v1029_v17, %v414_v24  ;;  %v475_v29 = vmul.f32 0.2, %v467_v23  ;;  %vm473_vm4 = vcmp.ge.f32.partialorder %v467_v23, 0.0 }
  0xda   : > { %v1103_v27 = vpop.f32.mrf.mxu0  ;;  %v1109_v28 = vpop.f32.mrf.mxu1 }
  0xdb   : > { %v470_v30 = vadd.f32 %v469_v25, %v1380_v26  ;;  %v477_v35 = vsel %vm473_vm4, %v467_v23, %v475_v29 }
  0xdc   : > { %v615_v31 = vpop.f32.mrf.mxu1 }
  0xdd   : > { %vm474_vm5 = vcmp.ge.f32.partialorder %v470_v30, 0.0  ;;  %v476_v32 = vmul.f32 0.2, %v470_v30  ;;  %v616_v33 = vadd.f32 %v615_v31, %v1377_v20 }
  0xde   : > { %v1126_v34 = vpop.f32.mrf.mxu1 }
  0xdf   : > { %v478_v36 = vsel %vm474_vm5, %v470_v30, %v476_v32  ;;  %v624_v39 = vmul.f32 0.2, %v616_v33  ;;  %vm622_vm7 = vcmp.ge.f32.partialorder %v616_v33, 0.0 }
  0xe0   : > { %v479_v37 = vpack.c.bf16 %v478_v36, %v477_v35  ;;  %v618_v38 = vpop.f32.mrf.mxu1 }
  0xe1   : > { %v619_v40 = vadd.f32 %v618_v38, %v1380_v26  ;;  %v626_v43 = vsel %vm622_vm7, %v616_v33, %v624_v39 }
  0xe2   : > { %1119 = vmatmul.mubr.msk.bf16.vlgmr.msra.gmra.mxu0 %vm519_vm6, %v479_v37  ;;  %v1127_v41 = vpop.f32.mrf.mxu1 }
  0xe3   : > { %vm623_vm8 = vcmp.ge.f32.partialorder %v619_v40, 0.0  ;;  %v625_v42 = vmul.f32 0.2, %v619_v40  ;;  %1141 = vmatpush3.bf16.msra.mxu0 %v1308_v6  ;;  %1142 = vmatprep.mubr.msk.bf16.mxu0 %vm1237_vm2, %v1235_v1 }
  0xe4   : > { %1146 = vmatprep.subr.bf16.mxu0 %v1235_v1 }
  0xe5   : > { %v627_v44 = vsel %vm623_vm8, %v619_v40, %v625_v42 }
  0xe6   : > { %v628_v45 = vpack.c.bf16 %v627_v44, %v626_v43 }
  0xe8   : > { %1137 = vmatmul.mubr.msk.bf16.vlgmr.msra.gmra.mxu1 %vm519_vm6, %v628_v45 }
  0xe9   : > { %1159 = vmatpush3.bf16.msra.mxu1 %v1308_v6  ;;  %1160 = vmatprep.mubr.msk.bf16.mxu1 %vm1237_vm2, %v1235_v1 }
  0xea   : > { %1143 = vmatmul.mubr.msk.bf16.vlgmr.msra.gmra.mxu0 %vm366_vm3, %v1209_v46  ;;  %1164 = vmatprep.subr.bf16.mxu1 %v1235_v1 }
  0xeb   : > { %1147 = vmatpush3.bf16.msra.mxu0 %v1328_v8  ;;  %1154 = vmatprep.mubr.msk.bf16.mxu0 %vm1237_vm2, %v1235_v1 }
  0xec   : > { %1148 = vmatprep.subr.bf16.mxu0 %v1235_v1 }
  0xef   : > { %1149 = vmatpush3.bf16.msra.mxu0 %v1350_v14 }
  0xf0   : > { %1161 = vmatmul.mubr.msk.bf16.vlgmr.msra.gmra.mxu1 %vm366_vm3, %v1210_v47  ;;  %1150 = vmatprep.subr.bf16.mxu0 %v1235_v1 }
  0xf1   : > { %1165 = vmatpush3.bf16.msra.mxu1 %v1328_v8  ;;  %1172 = vmatprep.mubr.msk.bf16.mxu1 %vm1237_vm2, %v1235_v1 }
  0xf2   : > { %1166 = vmatprep.subr.bf16.mxu1 %v1235_v1 }
  0xf3   : > { %1151 = vmatpush3.bf16.msra.mxu0 %v1359_v15 }
  0xf4   : > { %1152 = vmatprep.subr.bf16.mxu0 %v1235_v1 }
  0xf5   : > { %1167 = vmatpush3.bf16.msra.mxu1 %v1350_v14 }
  0xf6   : > { %1168 = vmatprep.subr.bf16.mxu1 %v1235_v1 }
  0xf7   : > { %1153 = vmatpush3.bf16.msra.mxu0 %v1368_v16 }
  0xf9   : > { %1169 = vmatpush3.bf16.msra.mxu1 %v1359_v15 }
  0xfa   : > { %1170 = vmatprep.subr.bf16.mxu1 %v1235_v1 }
  0xfd   : > { %1171 = vmatpush3.bf16.msra.mxu1 %v1368_v16 }
 0x1a2   : > { %v557_v49 = vpop.f32.mrf.mxu0 }
 0x1a3   : > { %v558_v51 = vadd.f32 %v1420_v48, %v557_v49 }
 0x1a4   : > { %v1120_v50 = vpop.f32.mrf.mxu0 }
 0x1a5   : > { %v566_v56 = vmul.f32 0.2, %v558_v51  ;;  %vm564_vm9 = vcmp.ge.f32.partialorder %v558_v51, 0.0 }
 0x1a6   : > { %v560_v52 = vpop.f32.mrf.mxu0 }
 0x1a7   : > { %v561_v53 = vadd.f32 %v1420_v48, %v560_v52  ;;  %v568_v1 = vsel %vm564_vm9, %v558_v51, %v566_v56 }
 0x1a8   : > { %v1121_v54 = vpop.f32.mrf.mxu0  ;;  %v666_v55 = vpop.f32.mrf.mxu1 }
 0x1a9   : > { %v667_v57 = vadd.f32 %v1420_v48, %v666_v55  ;;  %v567_v62 = vmul.f32 0.2, %v561_v53  ;;  %vm565_vm11 = vcmp.ge.f32.partialorder %v561_v53, 0.0 }
 0x1aa   : > { %v1138_v58 = vpop.f32.mrf.mxu1  ;;  %v726_v59 = vpop.f32.mrf.mxu0 }
 0x1ab   : > { %vm673_vm10 = vcmp.ge.f32.partialorder %v667_v57, 0.0  ;;  %v675_v60 = vmul.f32 0.2, %v667_v57  ;;  %v727_v61 = vadd.f32 %v726_v59, %v1377_v20  ;;  %v569_v10 = vsel %vm565_vm11, %v561_v53, %v567_v62 }
 0x1ac   : > { %v669_v63 = vpop.f32.mrf.mxu1  ;;  %v1144_v0 = vpop.f32.mrf.mxu0 }
 0x1ad   : > { %v677_v2 = vsel %vm673_vm10, %v667_v57, %v675_v60  ;;  %v670_v3 = vadd.f32 %v1420_v48, %v669_v63  ;;  %v735_v7 = vmul.f32 0.2, %v727_v61  ;;  %vm733_vm13 = vcmp.ge.f32.partialorder %v727_v61, 0.0 }
 0x1ae   : > { %v679_v4 = vmax.f32 %v568_v1, %v677_v2  ;;  %v1139_v5 = vpop.f32.mrf.mxu1  ;;  %v729_v6 = vpop.f32.mrf.mxu0 }
 0x1af   : > { %vm674_vm12 = vcmp.ge.f32.partialorder %v670_v3, 0.0  ;;  %v676_v8 = vmul.f32 0.2, %v670_v3  ;;  %v730_v9 = vadd.f32 %v729_v6, %v1380_v26  ;;  %v737_v18 = vsel %vm733_vm13, %v727_v61, %v735_v7 }
 0x1b0   : > { %v1145_v11 = vpop.f32.mrf.mxu0  ;;  %v837_v12 = vpop.f32.mrf.mxu1 }
 0x1b1   : > { %v678_v13 = vsel %vm674_vm12, %v670_v3, %v676_v8  ;;  %vm734_vm14 = vcmp.ge.f32.partialorder %v730_v9, 0.0  ;;  %v736_v14 = vmul.f32 0.2, %v730_v9  ;;  %v838_v15 = vadd.f32 %v837_v12, %v1377_v20 }
 0x1b2   : > { %v680_v16 = vmax.f32 %v569_v10, %v678_v13  ;;  %v1162_v17 = vpop.f32.mrf.mxu1 }
 0x1b3   : > { %v738_v19 = vsel %vm734_vm14, %v730_v9, %v736_v14  ;;  %v846_v23 = vmul.f32 0.2, %v838_v15  ;;  %vm844_vm15 = vcmp.ge.f32.partialorder %v838_v15, 0.0 }
 0x1b4   : > { %v739_v21 = vpack.c.bf16 %v738_v19, %v737_v18  ;;  %v840_v22 = vpop.f32.mrf.mxu1 }
 0x1b5   : > { %v841_v24 = vadd.f32 %v840_v22, %v1380_v26  ;;  %v848_v28 = vsel %vm844_vm15, %v838_v15, %v846_v23 }
 0x1b6   : > { %1155 = vmatmul.mubr.msk.bf16.vlgmr.msra.gmra.mxu0 %vm519_vm6, %v739_v21  ;;  %v1163_v25 = vpop.f32.mrf.mxu1 }
 0x1b7   : > { %vm845_vm0 = vcmp.ge.f32.partialorder %v841_v24, 0.0  ;;  %v847_v27 = vmul.f32 0.2, %v841_v24 }
 0x1b9   : > { %v849_v29 = vsel %vm845_vm0, %v841_v24, %v847_v27 }
 0x1ba   : > { %v850_v30 = vpack.c.bf16 %v849_v29, %v848_v28 }
 0x1bc   : > { %1173 = vmatmul.mubr.msk.bf16.vlgmr.msra.gmra.mxu1 %vm519_vm6, %v850_v30 }
 0x276   : > { %v777_v20 = vpop.f32.mrf.mxu0 }
 0x277   : > { %v778_v32 = vadd.f32 %v1420_v48, %v777_v20 }
 0x278   : > { %v1156_v31 = vpop.f32.mrf.mxu0 }
 0x279   : > { %v786_v36 = vmul.f32 0.2, %v778_v32  ;;  %vm784_vm1 = vcmp.ge.f32.partialorder %v778_v32, 0.0 }
 0x27a   : > { %v780_v33 = vpop.f32.mrf.mxu0 }
 0x27b   : > { %v781_v34 = vadd.f32 %v1420_v48, %v780_v33  ;;  %v788_v42 = vsel %vm784_vm1, %v778_v32, %v786_v36 }
 0x27c   : > { %v1157_v35 = vpop.f32.mrf.mxu0  ;;  %v888_v26 = vpop.f32.mrf.mxu1  ;;  %v790_v49 = vmax.f32 %v679_v4, %v788_v42 }
 0x27d   : > { %v787_v37 = vmul.f32 0.2, %v781_v34  ;;  %v889_v38 = vadd.f32 %v1420_v48, %v888_v26  ;;  %vm785_vm2 = vcmp.ge.f32.partialorder %v781_v34, 0.0 }
 0x27e   : > { %v1174_v39 = vpop.f32.mrf.mxu1 }
 0x27f   : > { %v897_v40 = vmul.f32 0.2, %v889_v38  ;;  %vm895_vm3 = vcmp.ge.f32.partialorder %v889_v38, 0.0  ;;  %v789_v43 = vsel %vm785_vm2, %v781_v34, %v787_v37 }
 0x280   : > { %v891_v41 = vpop.f32.mrf.mxu1  ;;  %v791_v50 = vmax.f32 %v680_v16, %v789_v43 }
 0x281   : > { %v892_v44 = vadd.f32 %v1420_v48, %v891_v41  ;;  %v899_v46 = vsel %vm895_vm3, %v889_v38, %v897_v40 }
 0x282   : > { %v1175_v45 = vpop.f32.mrf.mxu1  ;;  %v901_v52 = vmax.f32 %v790_v49, %v899_v46 }
 0x283   : > { %vm896_vm4 = vcmp.ge.f32.partialorder %v892_v44, 0.0  ;;  %v898_v47 = vmul.f32 0.2, %v892_v44 }
 0x285   : > { %v900_v51 = vsel %vm896_vm4, %v892_v44, %v898_v47 }
 0x286   : > { %v902_v53 = vmax.f32 %v791_v50, %v900_v51 }
 0x288   : > { %v1066_v54 = vpack.c.bf16 %v902_v53, %v901_v52 }
 0x28a   : > { %1067 = vst [vmem:[%s352_s13] sm:$0xff] %v1066_v54  }
 0x28b PF: > { %s17_s26 = sadd.s32 1, %s1233_s26   ;;  %s1457_s24 = smov %s1229_s25 }
 0x28c   : > { %p14_p5 = scmp.ge.s32.totalorder %s17_s26, 4   ;;  %s1458_s25 = smov %s1460_s27 }
 0x28e   :  { %16 = sbr.rel (!%p14_p5) target bundleno = 2 (0x2), region = 84 }

// kernel: dgcnn_partseg_forward.16
= control target key start
LH: loop header
LB: loop body
LE: loop exit
PB: predicated region body
PF: predicated region fallthrough
CT: control target
= control target key end

     0   :  { %s1252_s12 = smov 0   ;;  %s1254_s13 = smov 0   ;;  %s1516_s0 = inlined_call_operand.vmem [shape: bf16[2,16,128], index: 0, kind: input, shape index: {}]   ;;  %s1517_s1 = inlined_call_operand.vmem [shape: bf16[128,1024], index: 1, kind: input, shape index: {}]   ;;  %s1518_s2 = inlined_call_operand.vmem [shape: f32[1,1024], index: 2, kind: input, shape index: {}]   ;;  %s1519_s3 = inlined_call_operand.vmem [shape: f32[2,1,1024], index: 3, kind: output, shape index: {}]  }
   0x1   :  { %s1256_s14 = smov 0  }
   0x2 LB: > { %s25_s15 = sadd.s32 1, %s1224_s13  ;;  %p1107_p0 = scmp.ge.s32.totalorder %s1228_s14, 1  ;;  %s1228_s14 = sphi %s1256_s14, %s13_s14   ;;  %s1224_s13 = sphi %s1254_s13, %s1521_s13   ;;  %s1220_s12 = sphi %s1252_s12, %s1520_s12  }
   0x3   : > { %p27_p1 = scmp.ge.s32.totalorder %s25_s15, 2  ;;  %p156_p2 = scmp.lt.s32.totalorder %s1228_s14, 3 }
   0x5   : > { %s1523_s15 = smov (%p27_p1, %s25_s15), 0  ;;  %p157_p3 = pnand %p1107_p0, %p156_p2 }
   0x6   : > { %p184_p4 = scmp.lt.s32.totalorder (!%p157_p3), %s1220_s12, 1 }
   0x7   : > { %160 = sbr.rel (%p157_p3) target bundleno = 310 (0x136), region = 32 }
   0xc   : > { %v256_v0 = vld [vmem:[%s1517_s1 + $0x1c0] sm:$0xff]  ;;  %v257_v2 = vld [vmem:[%s1517_s1 + $0x1c8] sm:$0xff]  ;;  %v1230_v8 = vmov 0   ;;  %s1525_s12 = smov (!%p184_p4, %s1220_s12), 1  ;;  %v258_v63 = vld [vmem:[%s1517_s1 + $0x1d0] sm:$0xff] }
   0xd   : > { %v260_v1 = vld [vmem:[%s1517_s1 + $0x1e0] sm:$0xff]  ;;  %v261_v4 = vld [vmem:[%s1517_s1 + $0x1e8] sm:$0xff]  ;;  %664 = vmatprep.mubr.bf16.mxu0 %v1230_v8  ;;  %707 = vmatprep.mubr.bf16.mxu1 %v1230_v8  ;;  %s1178_s21 = sshll.u32 %s1525_s12, 3 }
   0xe   : > { %v1169_v3 = vcombine.high %v256_v0, %v260_v1  ;;  %v1168_v5 = vcombine.low %v256_v0, %v260_v1  ;;  %v248_v6 = vld [vmem:[%s1517_s1 + $0x180] sm:$0xff]  ;;  %v1171_v9 = vcombine.high %v257_v2, %v261_v4  ;;  %v1170_v10 = vcombine.low %v257_v2, %v261_v4  ;;  %v249_v12 = vld [vmem:[%s1517_s1 + $0x188] sm:$0xff]  ;;  %s1329_s28 = scalar_lea.vmem %s1516_s0, %s1178_s21  ;;  %v262_v0 = vld [vmem:[%s1517_s1 + $0x1f0] sm:$0xff]  ;;  %s196_s19 = scalar_lea.vmem %s1519_s3, %s1178_s21 }
   0xf   : > { %v252_v7 = vld [vmem:[%s1517_s1 + $0x1a0] sm:$0xff]  ;;  %v253_v13 = vld [vmem:[%s1517_s1 + $0x1a8] sm:$0xff]  ;;  %v259_v1 = vld [vmem:[%s1517_s1 + $0x1d8] sm:$0xff] }
  0x10   : > { %v1161_v11 = vcombine.high %v248_v6, %v252_v7  ;;  %v240_v14 = vld [vmem:[%s1517_s1 + $0x140] sm:$0xff]  ;;  %632 = vmatprep.subr.bf16.mxu0 %v1169_v3  ;;  %v1163_v15 = vcombine.high %v249_v12, %v253_v13  ;;  %v241_v17 = vld [vmem:[%s1517_s1 + $0x148] sm:$0xff]  ;;  %675 = vmatprep.subr.bf16.mxu1 %v1171_v9  ;;  %v1160_v19 = vcombine.low %v248_v6, %v252_v7  ;;  %v263_v2 = vld [vmem:[%s1517_s1 + $0x1f8] sm:$0xff] }
  0x11   : > { %v244_v16 = vld [vmem:[%s1517_s1 + $0x160] sm:$0xff]  ;;  %v245_v18 = vld [vmem:[%s1517_s1 + $0x168] sm:$0xff]  ;;  %633 = vmatpush1.bf16.msra.mxu0 %v1168_v5  ;;  %676 = vmatpush1.bf16.msra.mxu1 %v1170_v10  ;;  %v1162_v20 = vcombine.low %v249_v12, %v253_v13  ;;  %v1173_v5 = vcombine.high %v258_v63, %v262_v0  ;;  %v1175_v6 = vcombine.high %v259_v1, %v263_v2  ;;  %v250_v7 = vld [vmem:[%s1517_s1 + $0x190] sm:$0xff] }
  0x12   : > { %634 = vmatprep.subr.bf16.mxu0 %v1161_v11  ;;  %v1153_v21 = vcombine.high %v240_v14, %v244_v16  ;;  %677 = vmatprep.subr.bf16.mxu1 %v1163_v15  ;;  %v1155_v22 = vcombine.high %v241_v17, %v245_v18  ;;  %v232_v23 = vld [vmem:[%s1517_s1 + $0x100] sm:$0xff]  ;;  %v233_v25 = vld [vmem:[%s1517_s1 + $0x108] sm:$0xff]  ;;  %v1152_v27 = vcombine.low %v240_v14, %v244_v16  ;;  %v254_v9 = vld [vmem:[%s1517_s1 + $0x1b0] sm:$0xff] }
  0x13   : > { %v236_v24 = vld [vmem:[%s1517_s1 + $0x120] sm:$0xff]  ;;  %v237_v26 = vld [vmem:[%s1517_s1 + $0x128] sm:$0xff]  ;;  %v1154_v28 = vcombine.low %v241_v17, %v245_v18  ;;  %v251_v11 = vld [vmem:[%s1517_s1 + $0x198] sm:$0xff]  ;;  %v1172_v13 = vcombine.low %v258_v63, %v262_v0  ;;  %v1174_v14 = vcombine.low %v259_v1, %v263_v2  ;;  %v1165_v15 = vcombine.high %v250_v7, %v254_v9 }
  0x14   : > { %v1145_v29 = vcombine.high %v232_v23, %v236_v24  ;;  %v1147_v30 = vcombine.high %v233_v25, %v237_v26  ;;  %v224_v31 = vld [vmem:[%s1517_s1 + $0xc0] sm:$0xff]  ;;  %v225_v33 = vld [vmem:[%s1517_s1 + $0xc8] sm:$0xff]  ;;  %v1144_v35 = vcombine.low %v232_v23, %v236_v24  ;;  %v1146_v36 = vcombine.low %v233_v25, %v237_v26  ;;  %v255_v12 = vld [vmem:[%s1517_s1 + $0x1b8] sm:$0xff] }
  0x15   : > { %635 = vmatpush1.bf16.msra.mxu0 %v1160_v19  ;;  %678 = vmatpush1.bf16.msra.mxu1 %v1162_v20  ;;  %v228_v32 = vld [vmem:[%s1517_s1 + $0xe0] sm:$0xff]  ;;  %v229_v34 = vld [vmem:[%s1517_s1 + $0xe8] sm:$0xff]  ;;  %v1167_v16 = vcombine.high %v251_v11, %v255_v12  ;;  %v242_v17 = vld [vmem:[%s1517_s1 + $0x150] sm:$0xff]  ;;  %v266_v2 = vlaneseq }
  0x16   : > { %636 = vmatprep.subr.bf16.mxu0 %v1153_v21  ;;  %679 = vmatprep.subr.bf16.mxu1 %v1155_v22  ;;  %v1137_v37 = vcombine.high %v224_v31, %v228_v32  ;;  %v1139_v38 = vcombine.high %v225_v33, %v229_v34  ;;  %v216_v39 = vld [vmem:[%s1517_s1 + $0x80] sm:$0xff]  ;;  %v217_v41 = vld [vmem:[%s1517_s1 + $0x88] sm:$0xff]  ;;  %v1136_v43 = vcombine.low %v224_v31, %v228_v32  ;;  %v246_v18 = vld [vmem:[%s1517_s1 + $0x170] sm:$0xff] }
  0x17   : > { %v220_v40 = vld [vmem:[%s1517_s1 + $0xa0] sm:$0xff]  ;;  %v221_v42 = vld [vmem:[%s1517_s1 + $0xa8] sm:$0xff]  ;;  %v1138_v44 = vcombine.low %v225_v33, %v229_v34  ;;  %v243_v19 = vld [vmem:[%s1517_s1 + $0x158] sm:$0xff]  ;;  %v1164_v21 = vcombine.low %v250_v7, %v254_v9  ;;  %v1166_v22 = vcombine.low %v251_v11, %v255_v12  ;;  %v1157_v23 = vcombine.high %v242_v17, %v246_v18 }
  0x18   : > { %v1129_v45 = vcombine.high %v216_v39, %v220_v40  ;;  %v1131_v46 = vcombine.high %v217_v41, %v221_v42  ;;  %v208_v47 = vld [vmem:[%s1517_s1 + $0x40] sm:$0xff]  ;;  %v209_v49 = vld [vmem:[%s1517_s1 + $0x48] sm:$0xff]  ;;  %v1128_v51 = vcombine.low %v216_v39, %v220_v40  ;;  %v1130_v52 = vcombine.low %v217_v41, %v221_v42  ;;  %v247_v20 = vld [vmem:[%s1517_s1 + $0x178] sm:$0xff] }
  0x19   : > { %637 = vmatpush1.bf16.msra.mxu0 %v1152_v27  ;;  %680 = vmatpush1.bf16.msra.mxu1 %v1154_v28  ;;  %v212_v48 = vld [vmem:[%s1517_s1 + $0x60] sm:$0xff]  ;;  %v213_v50 = vld [vmem:[%s1517_s1 + $0x68] sm:$0xff]  ;;  %v1159_v24 = vcombine.high %v243_v19, %v247_v20  ;;  %v234_v25 = vld [vmem:[%s1517_s1 + $0x110] sm:$0xff] }
  0x1a   : > { %638 = vmatprep.subr.bf16.mxu0 %v1145_v29  ;;  %681 = vmatprep.subr.bf16.mxu1 %v1147_v30  ;;  %v1121_v53 = vcombine.high %v208_v47, %v212_v48  ;;  %v1123_v54 = vcombine.high %v209_v49, %v213_v50  ;;  %v200_v55 = vld [vmem:[%s1517_s1] sm:$0xff]  ;;  %v201_v57 = vld [vmem:[%s1517_s1 + $0x8] sm:$0xff]  ;;  %v1120_v59 = vcombine.low %v208_v47, %v212_v48  ;;  %v238_v26 = vld [vmem:[%s1517_s1 + $0x130] sm:$0xff] }
  0x1b   : > { %v204_v56 = vld [vmem:[%s1517_s1 + $0x20] sm:$0xff]  ;;  %v205_v58 = vld [vmem:[%s1517_s1 + $0x28] sm:$0xff]  ;;  %v1122_v60 = vcombine.low %v209_v49, %v213_v50  ;;  %v235_v27 = vld [vmem:[%s1517_s1 + $0x118] sm:$0xff]  ;;  %v1156_v29 = vcombine.low %v242_v17, %v246_v18  ;;  %v1158_v30 = vcombine.low %v243_v19, %v247_v20  ;;  %v1149_v31 = vcombine.high %v234_v25, %v238_v26 }
  0x1c   : > { %v1113_v61 = vcombine.high %v200_v55, %v204_v56  ;;  %v1115_v62 = vcombine.high %v201_v57, %v205_v58  ;;  %v1112_v3 = vcombine.low %v200_v55, %v204_v56  ;;  %v1114_v4 = vcombine.low %v201_v57, %v205_v58  ;;  %v1398_v10 = vld [vmem:[%s1329_s28] sm:$0xff]   ;;  %v239_v28 = vld [vmem:[%s1517_s1 + $0x138] sm:$0xff]  ;;  %v226_v33 = vld [vmem:[%s1517_s1 + $0xd0] sm:$0xff] }
  0x1d   : > { %639 = vmatpush1.bf16.msra.mxu0 %v1144_v35  ;;  %682 = vmatpush1.bf16.msra.mxu1 %v1146_v36  ;;  %v1151_v32 = vcombine.high %v235_v27, %v239_v28  ;;  %v230_v34 = vld [vmem:[%s1517_s1 + $0xf0] sm:$0xff]  ;;  %v231_v35 = vld [vmem:[%s1517_s1 + $0xf8] sm:$0xff]  ;;  %v1148_v36 = vcombine.low %v234_v25, %v238_v26 }
  0x1e   : > { %640 = vmatprep.subr.bf16.mxu0 %v1137_v37  ;;  %683 = vmatprep.subr.bf16.mxu1 %v1139_v38  ;;  %v1150_v37 = vcombine.low %v235_v27, %v239_v28  ;;  %v1141_v38 = vcombine.high %v226_v33, %v230_v34  ;;  %v218_v40 = vld [vmem:[%s1517_s1 + $0x90] sm:$0xff]  ;;  %v219_v42 = vld [vmem:[%s1517_s1 + $0x98] sm:$0xff] }
  0x1f   : > { %v222_v41 = vld [vmem:[%s1517_s1 + $0xb0] sm:$0xff]  ;;  %v211_v50 = vld [vmem:[%s1517_s1 + $0x58] sm:$0xff] }
  0x20   : > { %v210_v48 = vld [vmem:[%s1517_s1 + $0x50] sm:$0xff]  ;;  %v203_v58 = vld [vmem:[%s1517_s1 + $0x18] sm:$0xff] }
  0x21   : > { %641 = vmatpush1.bf16.msra.mxu0 %v1136_v43  ;;  %684 = vmatpush1.bf16.msra.mxu1 %v1138_v44  ;;  %v223_v43 = vld [vmem:[%s1517_s1 + $0xb8] sm:$0xff]  ;;  %v1140_v44 = vcombine.low %v226_v33, %v230_v34  ;;  %v214_v49 = vld [vmem:[%s1517_s1 + $0x70] sm:$0xff] }
  0x22   : > { %642 = vmatprep.subr.bf16.mxu0 %v1129_v45  ;;  %685 = vmatprep.subr.bf16.mxu1 %v1131_v46  ;;  %v1133_v46 = vcombine.high %v218_v40, %v222_v41  ;;  %v1135_v47 = vcombine.high %v219_v42, %v223_v43  ;;  %v202_v56 = vld [vmem:[%s1517_s1 + $0x10] sm:$0xff] }
  0x23   : > { %v206_v57 = vld [vmem:[%s1517_s1 + $0x30] sm:$0xff] }
  0x24   : > { %v1116_v0 = vcombine.low %v202_v56, %v206_v57 }
  0x25   : > { %643 = vmatpush1.bf16.msra.mxu0 %v1128_v51  ;;  %686 = vmatpush1.bf16.msra.mxu1 %v1130_v52  ;;  %v215_v51 = vld [vmem:[%s1517_s1 + $0x78] sm:$0xff]  ;;  %v1132_v52 = vcombine.low %v218_v40, %v222_v41 }
  0x26   : > { %644 = vmatprep.subr.bf16.mxu0 %v1121_v53  ;;  %687 = vmatprep.subr.bf16.mxu1 %v1123_v54  ;;  %v1134_v53 = vcombine.low %v219_v42, %v223_v43  ;;  %v1125_v54 = vcombine.high %v210_v48, %v214_v49  ;;  %v1127_v55 = vcombine.high %v211_v50, %v215_v51 }
  0x29   : > { %645 = vmatpush1.bf16.msra.mxu0 %v1120_v59  ;;  %688 = vmatpush1.bf16.msra.mxu1 %v1122_v60  ;;  %v207_v59 = vld [vmem:[%s1517_s1 + $0x38] sm:$0xff]  ;;  %v1124_v60 = vcombine.low %v210_v48, %v214_v49 }
  0x2a   : > { %646 = vmatprep.subr.bf16.mxu0 %v1113_v61  ;;  %689 = vmatprep.subr.bf16.mxu1 %v1115_v62  ;;  %v1126_v61 = vcombine.low %v211_v50, %v215_v51  ;;  %v1117_v62 = vcombine.high %v202_v56, %v206_v57  ;;  %v1119_v63 = vcombine.high %v203_v58, %v207_v59 }
  0x2b   : > { %v1118_v1 = vcombine.low %v203_v58, %v207_v59 }
  0x2d   : > { %647 = vmatpush1.bf16.msra.mxu0 %v1112_v3  ;;  %690 = vmatpush1.bf16.msra.mxu1 %v1114_v4  ;;  %v1484_v3 = vshrl.u32 %v266_v2, 7 }
  0x2e   : > { %718 = vmatprep.subr.bf16.mxu0 %v1173_v5  ;;  %761 = vmatprep.subr.bf16.mxu1 %v1175_v6 }
  0x2f   : > { %v268_v9 = vsub.s32 0, %v1484_v3  ;;  %v272_v11 = vsub.s32 1, %v1484_v3  ;;  %v280_v12 = vsub.s32 3, %v1484_v3  ;;  %v296_v56 = vsub.s32 7, %v1484_v3 }
  0x30   : > { %665 = vmatmul.mubr.bf16.vlgmr.msra.gmra.mxu0 %v1398_v10  ;;  %708 = vmatmul.mubr.bf16.vlgmr.msra.gmra.mxu1 %v1398_v10 }
  0x31   : > { %719 = vmatpush1.bf16.msra.mxu0 %v1172_v13  ;;  %762 = vmatpush1.bf16.msra.mxu1 %v1174_v14  ;;  %v264_v14 = vld [vmem:[%s1518_s2] sm:$0xff] }
  0x32   : > { %720 = vmatprep.subr.bf16.mxu0 %v1165_v15  ;;  %763 = vmatprep.subr.bf16.mxu1 %v1167_v16  ;;  %v269_v18 = vrot.slane %v264_v14, %v268_v9  ;;  %v273_v19 = vrot.slane %v264_v14, %v272_v11  ;;  %v281_v20 = vrot.slane %v264_v14, %v280_v12  ;;  %v1231_v12 = vmov 1966171168  }
  0x33   : > { %750 = vmatprep.mubr.bf16.mxu0 %v1230_v8  ;;  %793 = vmatprep.mubr.bf16.mxu1 %v1230_v8  ;;  %v227_v8 = vld [vmem:[%s1517_s1 + $0xd8] sm:$0xff] }
  0x34   : > { %v1143_v39 = vcombine.high %v227_v8, %v231_v35  ;;  %v1142_v45 = vcombine.low %v227_v8, %v231_v35 }
  0x35   : > { %721 = vmatpush1.bf16.msra.mxu0 %v1164_v21  ;;  %764 = vmatpush1.bf16.msra.mxu1 %v1166_v22 }
  0x36   : > { %722 = vmatprep.subr.bf16.mxu0 %v1157_v23  ;;  %765 = vmatprep.subr.bf16.mxu1 %v1159_v24 }
  0x39   : > { %723 = vmatpush1.bf16.msra.mxu0 %v1156_v29  ;;  %766 = vmatpush1.bf16.msra.mxu1 %v1158_v30 }
  0x3a   : > { %724 = vmatprep.subr.bf16.mxu0 %v1149_v31  ;;  %767 = vmatprep.subr.bf16.mxu1 %v1151_v32 }
  0x3d   : > { %725 = vmatpush1.bf16.msra.mxu0 %v1148_v36  ;;  %768 = vmatpush1.bf16.msra.mxu1 %v1150_v37 }
  0x3e   : > { %726 = vmatprep.subr.bf16.mxu0 %v1141_v38  ;;  %769 = vmatprep.subr.bf16.mxu1 %v1143_v39 }
  0x41   : > { %727 = vmatpush1.bf16.msra.mxu0 %v1140_v44  ;;  %770 = vmatpush1.bf16.msra.mxu1 %v1142_v45 }
  0x42   : > { %728 = vmatprep.subr.bf16.mxu0 %v1133_v46  ;;  %771 = vmatprep.subr.bf16.mxu1 %v1135_v47 }
  0x45   : > { %729 = vmatpush1.bf16.msra.mxu0 %v1132_v52  ;;  %772 = vmatpush1.bf16.msra.mxu1 %v1134_v53  ;;  %v284_v52 = vsub.s32 4, %v1484_v3  ;;  %v292_v53 = vsub.s32 6, %v1484_v3 }
  0x46   : > { %730 = vmatprep.subr.bf16.mxu0 %v1125_v54  ;;  %773 = vmatprep.subr.bf16.mxu1 %v1127_v55  ;;  %v288_v54 = vsub.s32 5, %v1484_v3 }
  0x49   : > { %731 = vmatpush1.bf16.msra.mxu0 %v1124_v60  ;;  %774 = vmatpush1.bf16.msra.mxu1 %v1126_v61  ;;  %v285_v60 = vrot.slane %v264_v14, %v284_v52  ;;  %v293_v61 = vrot.slane %v264_v14, %v292_v53 }
  0x4a   : > { %732 = vmatprep.subr.bf16.mxu0 %v1117_v62  ;;  %775 = vmatprep.subr.bf16.mxu1 %v1119_v63  ;;  %v289_v62 = vrot.slane %v264_v14, %v288_v54 }
  0x4d   : > { %733 = vmatpush1.bf16.msra.mxu0 %v1116_v0  ;;  %776 = vmatpush1.bf16.msra.mxu1 %v1118_v1  ;;  %v297_v1 = vrot.slane %v264_v14, %v296_v56 }
  0x50   : > { %751 = vmatmul.mubr.bf16.vlgmr.msra.gmra.mxu0 %v1398_v10  ;;  %794 = vmatmul.mubr.bf16.vlgmr.msra.gmra.mxu1 %v1398_v10  ;;  %v276_v10 = vsub.s32 2, %v1484_v3 }
  0x52   : > { %v277_v24 = vrot.slane %v264_v14, %v276_v10 }
  0xf0   : > { %v666_v4 = vpop.f32.mrf.mxu0  ;;  %v709_v5 = vpop.f32.mrf.mxu1 }
  0xf1   : > { %v667_v25 = vadd.f32 %v666_v4, %v269_v18  ;;  %v710_v32 = vadd.f32 %v709_v5, %v277_v24 }
  0xf2   : > { %v668_v6 = vpop.f32.mrf.mxu0  ;;  %v711_v7 = vpop.f32.mrf.mxu1 }
  0xf3   : > { %v669_v26 = vadd.f32 %v668_v6, %v273_v19  ;;  %v712_v27 = vadd.f32 %v711_v7, %v281_v20  ;;  %v820_v33 = vmul.f32 0.2, %v667_v25  ;;  %vm804_vm3 = vcmp.ge.f32.partialorder %v667_v25, 0.0 }
  0xf4   : > { %v670_v13 = vpop.f32.mrf.mxu0  ;;  %v713_v15 = vpop.f32.mrf.mxu1  ;;  %v822_v39 = vmul.f32 0.2, %v710_v32  ;;  %vm806_vm7 = vcmp.ge.f32.partialorder %v710_v32, 0.0 }
  0xf5   : > { %v671_v21 = vadd.f32 %v670_v13, %v269_v18  ;;  %v714_v28 = vadd.f32 %v713_v15, %v277_v24  ;;  %v821_v34 = vmul.f32 0.2, %v669_v26  ;;  %v823_v8 = vmul.f32 0.2, %v712_v27 }
  0xf6   : > { %v672_v16 = vpop.f32.mrf.mxu0  ;;  %v715_v17 = vpop.f32.mrf.mxu1  ;;  %vm805_vm4 = vcmp.ge.f32.partialorder %v669_v26, 0.0  ;;  %vm807_vm5 = vcmp.ge.f32.partialorder %v712_v27, 0.0  ;;  %v836_v40 = vsel %vm804_vm3, %v667_v25, %v820_v33  ;;  %v838_v47 = vsel %vm806_vm7, %v710_v32, %v822_v39 }
  0xf7   : > { %v673_v22 = vadd.f32 %v672_v16, %v273_v19  ;;  %v716_v23 = vadd.f32 %v715_v17, %v281_v20  ;;  %v828_v29 = vmul.f32 0.2, %v671_v21  ;;  %vm812_vm0 = vcmp.ge.f32.partialorder %v671_v21, 0.0 }
  0xf8   : > { %v830_v35 = vmul.f32 0.2, %v714_v28  ;;  %vm814_vm6 = vcmp.ge.f32.partialorder %v714_v28, 0.0  ;;  %v837_v41 = vsel %vm805_vm4, %v669_v26, %v821_v34  ;;  %v839_v42 = vsel %vm807_vm5, %v712_v27, %v823_v8 }
  0xf9   : > { %v829_v30 = vmul.f32 0.2, %v673_v22  ;;  %v831_v31 = vmul.f32 0.2, %v716_v23  ;;  %vm813_vm1 = vcmp.ge.f32.partialorder %v673_v22, 0.0  ;;  %vm815_vm2 = vcmp.ge.f32.partialorder %v716_v23, 0.0 }
  0xfa   : > { %v844_v36 = vsel %vm812_vm0, %v671_v21, %v828_v29  ;;  %v846_v44 = vsel %vm814_vm6, %v714_v28, %v830_v35  ;;  %v1497_v13 = vunpack.c.l.s4 %v1231_v12 }
  0xfb   : > { %v845_v37 = vsel %vm813_vm1, %v673_v22, %v829_v30  ;;  %v847_v38 = vsel %vm815_vm2, %v716_v23, %v831_v31  ;;  %v852_v43 = vmax.f32 %v836_v40, %v844_v36  ;;  %v866_v48 = vmax.f32 %v838_v47, %v846_v44 }
  0xfc   : > { %v859_v45 = vmax.f32 %v837_v41, %v845_v37  ;;  %v873_v46 = vmax.f32 %v839_v42, %v847_v38 }
  0xfd   : > { %v853_v49 = vrot.slane %v852_v43, 4  ;;  %v867_v55 = vrot.slane %v866_v48, 4 }
  0xfe   : > { %v860_v50 = vrot.slane %v859_v45, 4  ;;  %v874_v51 = vrot.slane %v873_v46, 4 }
  0xff   : > { %v854_v57 = vmax.f32 %v852_v43, %v853_v49  ;;  %v868_v63 = vmax.f32 %v866_v48, %v867_v55 }
 0x100   : > { %v861_v58 = vmax.f32 %v859_v45, %v860_v50  ;;  %v875_v59 = vmax.f32 %v873_v46, %v874_v51 }
 0x101   : > { %v855_v2 = vrot.slane %v854_v57, 2  ;;  %v869_v17 = vrot.slane %v868_v63, 2 }
 0x102   : > { %v862_v4 = vrot.slane %v861_v58, 2  ;;  %v876_v5 = vrot.slane %v875_v59, 2 }
 0x103   : > { %v856_v14 = vmax.f32 %v854_v57, %v855_v2  ;;  %v870_v40 = vmax.f32 %v868_v63, %v869_v17 }
 0x104   : > { %v863_v21 = vmax.f32 %v861_v58, %v862_v4  ;;  %v877_v22 = vmax.f32 %v875_v59, %v876_v5  ;;  %v926_v58 = vunpack.c.0.s8 %v1497_v13 }
 0x105   : > { %v857_v54 = vrot.slane %v856_v14, 1  ;;  %v871_v55 = vrot.slane %v870_v40, 1 }
 0x106   : > { %v864_v48 = vrot.slane %v863_v21, 1  ;;  %v878_v49 = vrot.slane %v877_v22, 1 }
 0x107   : > { %v858_v4 = vmax.f32 %v856_v14, %v857_v54  ;;  %v872_v5 = vmax.f32 %v870_v40, %v871_v55 }
 0x110   : > { %v752_v0 = vpop.f32.mrf.mxu0  ;;  %v795_v7 = vpop.f32.mrf.mxu1 }
 0x111   : > { %v753_v6 = vadd.f32 %v752_v0, %v285_v60  ;;  %v796_v9 = vadd.f32 %v795_v7, %v293_v61 }
 0x112   : > { %v754_v11 = vpop.f32.mrf.mxu0  ;;  %v797_v16 = vpop.f32.mrf.mxu1 }
 0x113   : > { %vm808_vm8 = vcmp.ge.f32.partialorder %v753_v6, 0.0  ;;  %v824_v15 = vmul.f32 0.2, %v753_v6  ;;  %v755_v10 = vadd.f32 %v754_v11, %v289_v62  ;;  %vm810_vm9 = vcmp.ge.f32.partialorder %v796_v9, 0.0 }
 0x114   : > { %v826_v18 = vmul.f32 0.2, %v796_v9  ;;  %v798_v19 = vadd.f32 %v797_v16, %v297_v1  ;;  %v756_v20 = vpop.f32.mrf.mxu0  ;;  %v799_v24 = vpop.f32.mrf.mxu1 }
 0x115   : > { %v757_v23 = vadd.f32 %v756_v20, %v285_v60  ;;  %v840_v25 = vsel %vm808_vm8, %v753_v6, %v824_v15  ;;  %vm809_vm10 = vcmp.ge.f32.partialorder %v755_v10, 0.0  ;;  %v825_v26 = vmul.f32 0.2, %v755_v10 }
 0x116   : > { %v800_v27 = vadd.f32 %v799_v24, %v293_v61  ;;  %v758_v28 = vpop.f32.mrf.mxu0  ;;  %v842_v29 = vsel %vm810_vm9, %v796_v9, %v826_v18  ;;  %v801_v32 = vpop.f32.mrf.mxu1  ;;  %v827_v33 = vmul.f32 0.2, %v798_v19  ;;  %vm811_vm13 = vcmp.ge.f32.partialorder %v798_v19, 0.0 }
 0x117   : > { %vm816_vm11 = vcmp.ge.f32.partialorder %v757_v23, 0.0  ;;  %v832_v30 = vmul.f32 0.2, %v757_v23  ;;  %v759_v31 = vadd.f32 %v758_v28, %v289_v62  ;;  %v802_v8 = vadd.f32 %v801_v32, %v297_v1 }
 0x118   : > { %vm818_vm12 = vcmp.ge.f32.partialorder %v800_v27, 0.0  ;;  %v834_v34 = vmul.f32 0.2, %v800_v27  ;;  %v841_v41 = vsel %vm809_vm10, %v755_v10, %v825_v26  ;;  %v843_v44 = vsel %vm811_vm13, %v798_v19, %v827_v33 }
 0x119   : > { %v848_v35 = vsel %vm816_vm11, %v757_v23, %v832_v30  ;;  %vm817_vm14 = vcmp.ge.f32.partialorder %v759_v31, 0.0  ;;  %v833_v36 = vmul.f32 0.2, %v759_v31  ;;  %vm819_vm15 = vcmp.ge.f32.partialorder %v802_v8, 0.0 }
 0x11a   : > { %v880_v37 = vmax.f32 %v840_v25, %v848_v35  ;;  %v850_v38 = vsel %vm818_vm12, %v800_v27, %v834_v34  ;;  %v835_v39 = vmul.f32 0.2, %v802_v8  ;;  %v865_v61 = vmax.f32 %v863_v21, %v864_v48 }
 0x11b   : > { %v894_v42 = vmax.f32 %v842_v29, %v850_v38  ;;  %v849_v43 = vsel %vm817_vm14, %v759_v31, %v833_v36  ;;  %v879_v62 = vmax.f32 %v877_v22, %v878_v49  ;;  %v929_v9 = vsub.s32 %v926_v58, %v1484_v3 }
 0x11c   : > { %v881_v45 = vrot.slane %v880_v37, 4  ;;  %v887_v46 = vmax.f32 %v841_v41, %v849_v43  ;;  %v851_v47 = vsel %vm819_vm15, %v802_v8, %v835_v39  ;;  %v920_v15 = vcombine.low %v858_v4, %v865_v61 }
 0x11d   : > { %v895_v50 = vrot.slane %v894_v42, 4  ;;  %v901_v51 = vmax.f32 %v843_v44, %v851_v47  ;;  %v921_v10 = vcombine.low %v872_v5, %v879_v62 }
 0x11e   : > { %v882_v52 = vmax.f32 %v880_v37, %v881_v45  ;;  %v888_v53 = vrot.slane %v887_v46, 4  ;;  %v930_v21 = vrot.slane %v920_v15, %v929_v9 }
 0x11f   : > { %v896_v56 = vmax.f32 %v894_v42, %v895_v50  ;;  %v902_v57 = vrot.slane %v901_v51, 4  ;;  %v937_v22 = vrot.slane %v921_v10, %v929_v9 }
 0x120   : > { %v883_v59 = vrot.slane %v882_v52, 2  ;;  %v889_v60 = vmax.f32 %v887_v46, %v888_v53 }
 0x121   : > { %v897_v63 = vrot.slane %v896_v56, 2  ;;  %v903_v0 = vmax.f32 %v901_v51, %v902_v57  ;;  %v952_v27 = vcombine.low %v930_v21, %v937_v22 }
 0x122   : > { %v884_v1 = vmax.f32 %v882_v52, %v883_v59  ;;  %v890_v2 = vrot.slane %v889_v60, 2 }
 0x123   : > { %v898_v6 = vmax.f32 %v896_v56, %v897_v63  ;;  %v904_v7 = vrot.slane %v903_v0, 2  ;;  %v960_v29 = vrot.slane %v952_v27, %v929_v9 }
 0x124   : > { %v885_v11 = vrot.slane %v884_v1, 1  ;;  %v891_v12 = vmax.f32 %v889_v60, %v890_v2 }
 0x125   : > { %v899_v16 = vrot.slane %v898_v6, 1  ;;  %v905_v13 = vmax.f32 %v903_v0, %v904_v7 }
 0x126   : > { %v892_v17 = vrot.slane %v891_v12, 1  ;;  %v886_v19 = vmax.f32 %v884_v1, %v885_v11 }
 0x127   : > { %v906_v18 = vrot.slane %v905_v13, 1  ;;  %v900_v23 = vmax.f32 %v898_v6, %v899_v16 }
 0x128   : > { %v893_v20 = vmax.f32 %v891_v12, %v892_v17 }
 0x129   : > { %v907_v14 = vmax.f32 %v905_v13, %v906_v18 }
 0x12a   : > { %v922_v24 = vcombine.low %v886_v19, %v893_v20 }
 0x12b   : > { %v923_v25 = vcombine.low %v900_v23, %v907_v14 }
 0x12c   : > { %v944_v26 = vrot.slane %v922_v24, %v929_v9 }
 0x12d   : > { %v951_v3 = vrot.slane %v923_v25, %v929_v9 }
 0x12f   : > { %v953_v28 = vcombine.low %v944_v26, %v951_v3 }
 0x131   : > { %v967_v30 = vrot.slane %v953_v28, %v929_v9 }
 0x133   : > { %v968_v31 = vcombine.low %v960_v29, %v967_v30 }
 0x135   : > { %970 = vst [vmem:[%s196_s19] sm:$0xff] %v968_v31 }
 0x136 PF: > { %s13_s14 = sadd.s32 1, %s1228_s14   ;;  %s1520_s12 = smov %s1224_s13 }
 0x137   : > { %p10_p5 = scmp.ge.s32.totalorder %s13_s14, 4   ;;  %s1521_s13 = smov %s1523_s15 }
 0x139   :  { %12 = sbr.rel (!%p10_p5) target bundleno = 2 (0x2), region = 70 }

// kernel: dgcnn_partseg_forward.18
= control target key start
LH: loop header
LB: loop body
LE: loop exit
PB: predicated region body
PF: predicated region fallthrough
CT: control target
= control target key end

     0   :  { %s478_s9 = smov 0   ;;  %s480_s10 = smov 0   ;;  %s511_s0 = inlined_call_operand.vmem [shape: f32[2,16,3], index: 0, kind: input, shape index: {}]   ;;  %s512_s1 = inlined_call_operand.vmem [shape: f32[2,3,3], index: 1, kind: input, shape index: {}]   ;;  %s513_s2 = inlined_call_operand.vmem [shape: f32[2,16,3], index: 2, kind: output, shape index: {}]  }
   0x1   :  { %s482_s11 = smov 0  }
   0x2 LB: > { %s24_s12 = sadd.s32 1, %s457_s10  ;;  %p394_p0 = scmp.ge.s32.totalorder %s461_s11, 1  ;;  %s461_s11 = sphi %s482_s11, %s12_s11   ;;  %s457_s10 = sphi %s480_s10, %s515_s10   ;;  %s453_s9 = sphi %s478_s9, %s514_s9  }
   0x3   : > { %p26_p1 = scmp.ge.s32.totalorder %s24_s12, 2  ;;  %p142_p2 = scmp.lt.s32.totalorder %s461_s11, 3 }
   0x5   : > { %s517_s12 = smov (%p26_p1, %s24_s12), 0  ;;  %p143_p3 = pnand %p394_p0, %p142_p2 }
   0x6   : > { %p177_p4 = scmp.lt.s32.totalorder (!%p143_p3), %s453_s9, 1 }
   0x7   : > { %146 = sbr.rel (%p143_p3) target bundleno = 214 (0xd6), region = 28 }
   0xc   : > { %s519_s9 = smov (!%p177_p4, %s453_s9), 1  ;;  %vm210_vm0 = vcmask 1042432   ;;  %vm203_vm1 = vcmask 23552  }
   0xd   : > { %s397_s13 = sshll.u32 %s519_s9, 2  ;;  %s405_s14 = sshll.u32 %s519_s9, 4 }
   0xe   : > { %s189_s17 = scalar_lea.vmem %s512_s1, %s397_s13  ;;  %s184_s20 = scalar_lea.vmem %s511_s0, %s405_s14 }
   0xf   : > { %v202_v0 = vld [vmem:[%s189_s17] sm:$0x7]  ;;  %v201_v2 = vld [vmem:[%s184_s20 + $0x8] sm:$0xff]  ;;  %s198_s23 = scalar_lea.vmem %s513_s2, %s405_s14 }
  0x10   : > { %v200_v1 = vld [vmem:[%s184_s20] sm:$0xff]  ;;  %410 = vmatprep.subr.msk.mxu0 %vm210_vm0, %v202_v0 }
  0x11   : > { %412 = vmatprep.mubr.msk.f32.mxu0 %vm203_vm1, %v200_v1  ;;  %411 = vmatpush3.msk.msra.mxu0 %vm210_vm0, %v202_v0 }
  0x12   : > { %413 = vmatmul.mubr.msk.f32.vlgmr.msra.gmra.mxu0 %vm203_vm1, %v201_v2 }
  0xd2   : > { %v414_v3 = vpop.f32.mrf.mxu0 }
  0xd3   : > { %290 = vst.msk [vmem:[%s198_s23 + $0x8] sm:$0xff] %vm203_vm1, %v414_v3 }
  0xd4   : > { %v280_v4 = vpop.f32.mrf.mxu0 }
  0xd5   : > { %289 = vst.msk [vmem:[%s198_s23] sm:$0xff] %vm203_vm1, %v280_v4 }
  0xd6 PF: > { %s12_s11 = sadd.s32 1, %s461_s11   ;;  %s514_s9 = smov %s457_s10 }
  0xd7   : > { %p9_p5 = scmp.ge.s32.totalorder %s12_s11, 4   ;;  %s515_s10 = smov %s517_s12 }
  0xd9   :  { %11 = sbr.rel (!%p9_p5) target bundleno = 2 (0x2), region = 61 }

// kernel: dgcnn_partseg_forward.21
= control target key start
LH: loop header
LB: loop body
LE: loop exit
PB: predicated region body
PF: predicated region fallthrough
CT: control target
= control target key end

     0   :  { %s544_s12 = smov 0   ;;  %s546_s13 = smov 0   ;;  %s583_s0 = inlined_call_operand.vmem [shape: bf16[2,16,64], index: 0, kind: input, shape index: {}, may-alias: {0,1}]   ;;  %s584_s1 = inlined_call_operand.vmem [shape: bf16[2,16,64], index: 1, kind: input, shape index: {}, may-alias: {0,1}]   ;;  %s585_s2 = inlined_call_operand.vmem [shape: f32[2,1,16], index: 2, kind: input, shape index: {}]   ;;  %s586_s3 = inlined_call_operand.vmem [shape: f32[2,16,16], index: 3, kind: output, shape index: {}]  }
   0x1   :  { %s548_s14 = smov 0  }
   0x2 LB: > { %s25_s15 = sadd.s32 1, %s516_s13  ;;  %p445_p0 = scmp.ge.s32.totalorder %s520_s14, 1  ;;  %s520_s14 = sphi %s548_s14, %s13_s14   ;;  %s516_s13 = sphi %s546_s13, %s588_s13   ;;  %s512_s12 = sphi %s544_s12, %s587_s12  }
   0x3   : > { %p27_p1 = scmp.ge.s32.totalorder %s25_s15, 2  ;;  %p176_p2 = scmp.lt.s32.totalorder %s520_s14, 3 }
   0x5   : > { %s590_s15 = smov (%p27_p1, %s25_s15), 0  ;;  %p177_p3 = pnand %p445_p0, %p176_p2 }
   0x6   : > { %p217_p4 = scmp.lt.s32.totalorder (!%p177_p3), %s512_s12, 1 }
   0x7   : > { %180 = sbr.rel (%p177_p3) target bundleno = 229 (0xe5), region = 32 }
   0xc   : > { %v522_v0 = vmov 0.0   ;;  %vm523_vm0 = vmmov 0   ;;  %s592_s12 = smov (!%p217_p4, %s512_s12), 1  ;;  %vm259_vm1 = vcmask 523264   ;;  %vm330_vm2 = vcmask 130048  }
   0xd   : > { %463 = vmatprep.subr.bf16.mxu0 %v522_v0  ;;  %465 = vmatprep.mubr.msk.bf16.mxu0 %vm523_vm0, %v522_v0  ;;  %s458_s16 = sshll.u32 %s592_s12, 3  ;;  %s233_s25 = scalar_lea.vmem %s585_s2, %s592_s12 }
   0xe   : > { %s224_s19 = scalar_lea.vmem %s583_s0, %s458_s16  ;;  %s230_s22 = scalar_lea.vmem %s584_s1, %s458_s16  ;;  %v455_v13 = vld [vmem:[%s233_s25] ss:$0 sm:$0xff] }
   0xf   : > { %v245_v1 = vld [vmem:[%s224_s19] sm:$0xff]   ;;  %s460_s26 = sshll.u32 %s592_s12, 4 }
  0x10   : > { %v495_v2 = vld [vmem:[%s230_s22] sm:$0xff]   ;;  %v307_v3 = vunpack.c.l.bf16 %v245_v1  ;;  %v308_v4 = vunpack.c.h.bf16 %v245_v1  ;;  %s242_s29 = scalar_lea.vmem %s586_s3, %s460_s26 }
  0x11   : > { %v264_v5 = vsel %vm259_vm1, %v495_v2, 0 }
  0x12   : > { %v309_v6 = vmul.f32 %v307_v3, %v307_v3  ;;  %v310_v7 = vmul.f32 %v308_v4, %v308_v4  ;;  %464 = vmatpush3.bf16.xpose.msra.mxu0 %v264_v5 }
  0x14   : > { %v311_v8 = vsel %vm259_vm1, %v309_v6, 0.0  ;;  %v314_v9 = vsel %vm259_vm1, %v310_v7, 0.0 }
  0x15   : > { %312 = vadd.xlane.f32.xlu0 %v311_v8 }
  0x19   : > { %315 = vadd.xlane.f32.xlu0 %v314_v9  ;;  %466 = vmatmul.mubr.msk.bf16.vlgmr.msra.gmra.mxu0 %vm259_vm1, %v245_v1 }
  0x9e   : > { %v313_v10 = vpop.xlane.xlu0 %312 }
  0xa2   : > { %v316_v17 = vpop.xlane.xlu0 %315 }
  0xd9   : > { %v300_v11 = vpop.f32.mrf.mxu0 }
  0xda   : > { %v317_v12 = vmul.f32 2.0, %v300_v11 }
  0xdb   : > { %v467_v14 = vpop.f32.mrf.mxu0 }
  0xdc   : > { %v319_v15 = vsub.f32 %v317_v12, %v313_v10 }
  0xdd   : > { %v303_v16 = vpop.f32.mrf.mxu0 }
  0xde   : > { %v328_v18 = vsub.f32 %v319_v15, %v455_v13  ;;  %v318_v19 = vmul.f32 2.0, %v303_v16 }
  0xdf   : > { %v468_v20 = vpop.f32.mrf.mxu0 }
  0xe0   : > { %331 = vst.msk [vmem:[%s242_s29] sm:$0xff] %vm330_vm2, %v328_v18  ;;  %v320_v21 = vsub.f32 %v318_v19, %v316_v17 }
  0xe2   : > { %v329_v22 = vsub.f32 %v320_v21, %v455_v13 }
  0xe4   : > { %332 = vst.msk [vmem:[%s242_s29 + $0x8] sm:$0xff] %vm330_vm2, %v329_v22 }
  0xe5 PF: > { %s13_s14 = sadd.s32 1, %s520_s14   ;;  %s587_s12 = smov %s516_s13 }
  0xe6   : > { %p10_p5 = scmp.ge.s32.totalorder %s13_s14, 4   ;;  %s588_s13 = smov %s590_s15 }
  0xe8   :  { %12 = sbr.rel (!%p10_p5) target bundleno = 2 (0x2), region = 68 }

// kernel: dgcnn_partseg_forward.17
= control target key start
LH: loop header
LB: loop body
LE: loop exit
PB: predicated region body
PF: predicated region fallthrough
CT: control target
= control target key end

     0   :  { %12 = vsyncpa [#allocation3], 0  ;;  %s3548_s24 = smov [#allocation2]   ;;  %s3936_s0 = inlined_call_operand.vmem [shape: f32[2,1024], index: 0, kind: input, shape index: {}]   ;;  %s3937_s1 = inlined_call_operand.hbm [shape: bf16[1024,512], index: 1, kind: input, shape index: {}]   ;;  %s3938_s2 = inlined_call_operand.vmem [shape: f32[1,512], index: 2, kind: input, shape index: {}]   ;;  %s3939_s3 = inlined_call_operand.vmem [shape: bf16[512,256], index: 3, kind: input, shape index: {}]   ;;  %s3940_s4 = inlined_call_operand.vmem [shape: f32[1,256], index: 4, kind: input, shape index: {}]   ;;  %s3941_s5 = inlined_call_operand.vmem [shape: bf16[256,9], index: 5, kind: input, shape index: {}]   ;;  %s3942_s6 = inlined_call_operand.vmem [shape: f32[1,9], index: 6, kind: input, shape index: {}]   ;;  %s3943_s7 = inlined_call_operand.vmem [shape: f32[2,9], index: 7, kind: output, shape index: {}]  }
   0x1   :  { %s20_s25 = sshll.u32 %s3548_s24, 4  ;;  %s21_s25 = int_to_ptr.vmem [resolvable:$true] %s20_s25 }
   0x2   :  { %s3534_s26 = scalar_lea.vmem %s21_s25, 32768  ;;  %p3539_p1 = scmp.lt.s32.totalorder %s21_s25, %s21_s25 }
   0x3   :  { %p3535_p0 = scmp.ne.s32.totalorder %s21_s25, %s3534_s26  ;;  %p3540_p2 = scmp.lt.s32.totalorder %s3534_s26, %s3534_s26 }
   0x5   :  { %p3541_p3 = por %p3540_p2, %p3539_p1 }
   0x7   :  { %p3542_p4 = pnand %p3541_p3, %p3535_p0 }
   0x9   :  { %3545 = shalt.err (!%p3542_p4)
}
   0xa   :  { %s3549_s27 = smov 256   ;;  %s3550_s28 = smov 16  }
   0xb   :  { %26 = dma.hbm_to_vmem [thread:$0]  %s3937_s1, 32768, %s21_s25, [#allocation3], %s3549_s27, %s3549_s27, %s3550_s28  }
   0xc   :  { %3546 = dma.done.wait [#allocation3], 32768  }
   0xd   :  { %3547 = vsyncadd [#allocation3], 4294934528  ;;  %v3028_v0 = vld [vmem:[#allocation2 + $0xe4] ss:$16 sps:$4 sm:$0xff]   ;;  %v3032_v2 = vld [vmem:[#allocation2 + $0xe0] ss:$16 sps:$4 sm:$0xff]   ;;  %v49_v38 = vlaneseq }
   0xe   :  { %v3030_v1 = vld [vmem:[#allocation2 + $0x2e4] ss:$16 sps:$4 sm:$0xff]   ;;  %1653 = vmatprep.subr.bf16.mxu0 %v3028_v0  ;;  %v3033_v3 = vld [vmem:[#allocation2 + $0x2e0] ss:$16 sps:$4 sm:$0xff]   ;;  %v3551_v36 = vmov 1983009808  }
   0xf   :  { %1694 = vmatprep.subr.bf16.mxu1 %v3030_v1  ;;  %v3034_v4 = vld [vmem:[#allocation2 + $0xc4] ss:$16 sps:$4 sm:$0xff]   ;;  %1654 = vmatpush1.bf16.msra.mxu0 %v3032_v2  ;;  %v3038_v6 = vld [vmem:[#allocation2 + $0xc0] ss:$16 sps:$4 sm:$0xff]   ;;  %v47_v37 = vunpack.c.l.s4 %v3551_v36  ;;  %v3595_v43 = vshrl.u32 %v49_v38, 7  ;;  %vm2658_vm6 = vcmask 66560  }
  0x10   :  { %1695 = vmatpush1.bf16.msra.mxu1 %v3033_v3  ;;  %v3036_v5 = vld [vmem:[#allocation2 + $0x2c4] ss:$16 sps:$4 sm:$0xff]   ;;  %1655 = vmatprep.subr.bf16.mxu0 %v3034_v4  ;;  %v3039_v7 = vld [vmem:[#allocation2 + $0x2c0] ss:$16 sps:$4 sm:$0xff]  }
  0x11   :  { %1696 = vmatprep.subr.bf16.mxu1 %v3036_v5  ;;  %v3040_v8 = vld [vmem:[#allocation2 + $0xa4] ss:$16 sps:$4 sm:$0xff]   ;;  %v3044_v10 = vld [vmem:[#allocation2 + $0xa0] ss:$16 sps:$4 sm:$0xff]   ;;  %v48_v42 = vunpack.c.0.s8 %v47_v37 }
  0x12   :  { %v3042_v9 = vld [vmem:[#allocation2 + $0x2a4] ss:$16 sps:$4 sm:$0xff]   ;;  %v3045_v11 = vld [vmem:[#allocation2 + $0x2a0] ss:$16 sps:$4 sm:$0xff]  }
  0x13   :  { %1656 = vmatpush1.bf16.msra.mxu0 %v3038_v6  ;;  %v3046_v12 = vld [vmem:[#allocation2 + $0x84] ss:$16 sps:$4 sm:$0xff]   ;;  %v3050_v14 = vld [vmem:[#allocation2 + $0x80] ss:$16 sps:$4 sm:$0xff]   ;;  %v3598_v49 = vsub.s32 %v48_v42, %v3595_v43  ;;  %v42_v42 = vld [vmem:[%s3936_s0 + $0x8] sm:$0xff] }
  0x14   :  { %1697 = vmatpush1.bf16.msra.mxu1 %v3039_v7  ;;  %1657 = vmatprep.subr.bf16.mxu0 %v3040_v8  ;;  %v3048_v13 = vld [vmem:[#allocation2 + $0x284] ss:$16 sps:$4 sm:$0xff]   ;;  %v3051_v15 = vld [vmem:[#allocation2 + $0x280] ss:$16 sps:$4 sm:$0xff]  }
  0x15   :  { %1698 = vmatprep.subr.bf16.mxu1 %v3042_v9  ;;  %v3052_v16 = vld [vmem:[#allocation2 + $0x64] ss:$16 sps:$4 sm:$0xff]   ;;  %v3056_v18 = vld [vmem:[#allocation2 + $0x60] ss:$16 sps:$4 sm:$0xff]  }
  0x16   :  { %v3054_v17 = vld [vmem:[#allocation2 + $0x264] ss:$16 sps:$4 sm:$0xff]   ;;  %v3057_v19 = vld [vmem:[#allocation2 + $0x260] ss:$16 sps:$4 sm:$0xff]  }
  0x17   :  { %1658 = vmatpush1.bf16.msra.mxu0 %v3044_v10  ;;  %v3058_v20 = vld [vmem:[#allocation2 + $0x44] ss:$16 sps:$4 sm:$0xff]   ;;  %v3062_v22 = vld [vmem:[#allocation2 + $0x40] ss:$16 sps:$4 sm:$0xff]  }
  0x18   :  { %1699 = vmatpush1.bf16.msra.mxu1 %v3045_v11  ;;  %1659 = vmatprep.subr.bf16.mxu0 %v3046_v12  ;;  %v3060_v21 = vld [vmem:[#allocation2 + $0x244] ss:$16 sps:$4 sm:$0xff]   ;;  %v3063_v23 = vld [vmem:[#allocation2 + $0x240] ss:$16 sps:$4 sm:$0xff]  }
  0x19   :  { %1700 = vmatprep.subr.bf16.mxu1 %v3048_v13  ;;  %v3064_v24 = vld [vmem:[#allocation2 + $0x24] ss:$16 sps:$4 sm:$0xff]   ;;  %v3068_v26 = vld [vmem:[#allocation2 + $0x20] ss:$16 sps:$4 sm:$0xff]  }
  0x1a   :  { %v3066_v25 = vld [vmem:[#allocation2 + $0x224] ss:$16 sps:$4 sm:$0xff]   ;;  %v3069_v27 = vld [vmem:[#allocation2 + $0x220] ss:$16 sps:$4 sm:$0xff]  }
  0x1b   :  { %1660 = vmatpush1.bf16.msra.mxu0 %v3050_v14  ;;  %v3070_v28 = vld [vmem:[#allocation2 + $0x4] ss:$16 sps:$4 sm:$0xff]   ;;  %v3074_v30 = vld [vmem:[#allocation2] ss:$16 sps:$4 sm:$0xff]  }
  0x1c   :  { %1701 = vmatpush1.bf16.msra.mxu1 %v3051_v15  ;;  %1661 = vmatprep.subr.bf16.mxu0 %v3052_v16  ;;  %v3072_v29 = vld [vmem:[#allocation2 + $0x204] ss:$16 sps:$4 sm:$0xff]   ;;  %v3075_v31 = vld [vmem:[#allocation2 + $0x200] ss:$16 sps:$4 sm:$0xff]  }
  0x1d   :  { %1702 = vmatprep.subr.bf16.mxu1 %v3054_v17  ;;  %v3076_v32 = vld [vmem:[#allocation2 + $0x1e4] ss:$16 sps:$4 sm:$0xff]   ;;  %v3080_v34 = vld [vmem:[#allocation2 + $0x1e0] ss:$16 sps:$4 sm:$0xff]  }
  0x1e   :  { %v3078_v33 = vld [vmem:[#allocation2 + $0x3e4] ss:$16 sps:$4 sm:$0xff]   ;;  %v3081_v35 = vld [vmem:[#allocation2 + $0x3e0] ss:$16 sps:$4 sm:$0xff]  }
  0x1f   :  { %1662 = vmatpush1.bf16.msra.mxu0 %v3056_v18  ;;  %v3082_v39 = vld [vmem:[#allocation2 + $0x1c4] ss:$16 sps:$4 sm:$0xff]   ;;  %v3086_v41 = vld [vmem:[#allocation2 + $0x1c0] ss:$16 sps:$4 sm:$0xff]  }
  0x20   :  { %1703 = vmatpush1.bf16.msra.mxu1 %v3057_v19  ;;  %1663 = vmatprep.subr.bf16.mxu0 %v3058_v20  ;;  %v3084_v40 = vld [vmem:[#allocation2 + $0x3c4] ss:$16 sps:$4 sm:$0xff]   ;;  %v3087_v44 = vld [vmem:[#allocation2 + $0x3c0] ss:$16 sps:$4 sm:$0xff]  }
  0x21   :  { %1704 = vmatprep.subr.bf16.mxu1 %v3060_v21  ;;  %v3088_v45 = vld [vmem:[#allocation2 + $0x1a4] ss:$16 sps:$4 sm:$0xff]   ;;  %v3092_v47 = vld [vmem:[#allocation2 + $0x1a0] ss:$16 sps:$4 sm:$0xff]  }
  0x22   :  { %v3090_v46 = vld [vmem:[#allocation2 + $0x3a4] ss:$16 sps:$4 sm:$0xff]   ;;  %v3093_v48 = vld [vmem:[#allocation2 + $0x3a0] ss:$16 sps:$4 sm:$0xff]  }
  0x23   :  { %1664 = vmatpush1.bf16.msra.mxu0 %v3062_v22  ;;  %v3094_v50 = vld [vmem:[#allocation2 + $0x184] ss:$16 sps:$4 sm:$0xff]   ;;  %v3098_v53 = vld [vmem:[#allocation2 + $0x180] ss:$16 sps:$4 sm:$0xff]  }
  0x24   :  { %1705 = vmatpush1.bf16.msra.mxu1 %v3063_v23  ;;  %1665 = vmatprep.subr.bf16.mxu0 %v3064_v24  ;;  %v3096_v51 = vld [vmem:[#allocation2 + $0x384] ss:$16 sps:$4 sm:$0xff]   ;;  %v3099_v56 = vld [vmem:[#allocation2 + $0x380] ss:$16 sps:$4 sm:$0xff]  }
  0x25   :  { %1706 = vmatprep.subr.bf16.mxu1 %v3066_v25  ;;  %v41_v52 = vld [vmem:[%s3936_s0] sm:$0xff] }
  0x26   :  { %v52_v54 = vrot.slane %v41_v52, %v3598_v49  ;;  %v45_v55 = vcombine.high %v41_v52, %v41_v52  ;;  %v3100_v57 = vld [vmem:[#allocation2 + $0x164] ss:$16 sps:$4 sm:$0xff]   ;;  %v3104_v61 = vld [vmem:[#allocation2 + $0x160] ss:$16 sps:$4 sm:$0xff]  }
  0x27   :  { %1666 = vmatpush1.bf16.msra.mxu0 %v3068_v26  ;;  %v3102_v58 = vld [vmem:[#allocation2 + $0x364] ss:$16 sps:$4 sm:$0xff]   ;;  %v3105_v0 = vld [vmem:[#allocation2 + $0x360] ss:$16 sps:$4 sm:$0xff]  }
  0x28   :  { %1707 = vmatpush1.bf16.msra.mxu1 %v3069_v27  ;;  %1667 = vmatprep.subr.bf16.mxu0 %v3070_v28  ;;  %v60_v59 = vcombine.high %v52_v54, %v52_v54  ;;  %v59_v60 = vrot.slane %v45_v55, %v3598_v49  ;;  %v3106_v1 = vld [vmem:[#allocation2 + $0x144] ss:$16 sps:$4 sm:$0xff]   ;;  %v3110_v4 = vld [vmem:[#allocation2 + $0x140] ss:$16 sps:$4 sm:$0xff]   ;;  %v3611_v16 = vpack.c.bf16 %v52_v54, %v52_v54 }
  0x29   :  { %1708 = vmatprep.subr.bf16.mxu1 %v3072_v29  ;;  %v3108_v2 = vld [vmem:[#allocation2 + $0x344] ss:$16 sps:$4 sm:$0xff]   ;;  %v3111_v5 = vld [vmem:[#allocation2 + $0x340] ss:$16 sps:$4 sm:$0xff]  }
  0x2a   :  { %v3605_v62 = vpack.c.bf16 %v60_v59, %v60_v59  ;;  %v61_v63 = vcombine.high %v59_v60, %v59_v60  ;;  %v3112_v6 = vld [vmem:[#allocation2 + $0x124] ss:$16 sps:$4 sm:$0xff]   ;;  %v3116_v8 = vld [vmem:[#allocation2 + $0x120] ss:$16 sps:$4 sm:$0xff]   ;;  %v3613_v17 = vpack.c.bf16 %v59_v60, %v59_v60 }
  0x2b   :  { %1668 = vmatpush1.bf16.msra.mxu0 %v3074_v30  ;;  %v3114_v7 = vld [vmem:[#allocation2 + $0x324] ss:$16 sps:$4 sm:$0xff]   ;;  %v3117_v9 = vld [vmem:[#allocation2 + $0x320] ss:$16 sps:$4 sm:$0xff]  }
  0x2c   :  { %1709 = vmatpush1.bf16.msra.mxu1 %v3075_v31  ;;  %1669 = vmatprep.subr.bf16.mxu0 %v3076_v32  ;;  %v3607_v3 = vpack.c.bf16 %v61_v63, %v61_v63  ;;  %v3118_v10 = vld [vmem:[#allocation2 + $0x104] ss:$16 sps:$4 sm:$0xff]   ;;  %v3122_v12 = vld [vmem:[#allocation2 + $0x100] ss:$16 sps:$4 sm:$0xff]  }
  0x2d   :  { %1710 = vmatprep.subr.bf16.mxu1 %v3078_v33  ;;  %1685 = vmatprep.mubr.bf16.mxu0 %v3605_v62  ;;  %v3120_v11 = vld [vmem:[#allocation2 + $0x304] ss:$16 sps:$4 sm:$0xff]   ;;  %v3123_v13 = vld [vmem:[#allocation2 + $0x300] ss:$16 sps:$4 sm:$0xff]  }
  0x2e   :  { %1726 = vmatprep.mubr.bf16.mxu1 %v3607_v3  ;;  %v3127_v14 = vld [vmem:[#allocation2 + $0x4e4] ss:$16 sps:$4 sm:$0xff]   ;;  %v3125_v18 = vld [vmem:[#allocation2 + $0x4e0] ss:$16 sps:$4 sm:$0xff]  }
  0x2f   :  { %1670 = vmatpush2.bf16.msra.mxu0 %v3080_v34  ;;  %v3130_v15 = vld [vmem:[#allocation2 + $0x6e4] ss:$16 sps:$4 sm:$0xff]   ;;  %v3128_v19 = vld [vmem:[#allocation2 + $0x6e0] ss:$16 sps:$4 sm:$0xff]  }
  0x30   :  { %1711 = vmatpush2.bf16.msra.mxu1 %v3081_v35  ;;  %1671 = vmatprep.subr.bf16.mxu0 %v3082_v39  ;;  %v3133_v20 = vld [vmem:[#allocation2 + $0x4c4] ss:$16 sps:$4 sm:$0xff]   ;;  %v3131_v22 = vld [vmem:[#allocation2 + $0x4c0] ss:$16 sps:$4 sm:$0xff]  }
  0x31   :  { %1712 = vmatprep.subr.bf16.mxu1 %v3084_v40  ;;  %v3136_v21 = vld [vmem:[#allocation2 + $0x6c4] ss:$16 sps:$4 sm:$0xff]   ;;  %v3134_v23 = vld [vmem:[#allocation2 + $0x6c0] ss:$16 sps:$4 sm:$0xff]  }
  0x32   :  { %v3139_v24 = vld [vmem:[#allocation2 + $0x4a4] ss:$16 sps:$4 sm:$0xff]   ;;  %v3137_v26 = vld [vmem:[#allocation2 + $0x4a0] ss:$16 sps:$4 sm:$0xff]  }
  0x33   :  { %1672 = vmatpush2.bf16.msra.mxu0 %v3086_v41  ;;  %v3142_v25 = vld [vmem:[#allocation2 + $0x6a4] ss:$16 sps:$4 sm:$0xff]   ;;  %v3140_v27 = vld [vmem:[#allocation2 + $0x6a0] ss:$16 sps:$4 sm:$0xff]  }
  0x34   :  { %1713 = vmatpush2.bf16.msra.mxu1 %v3087_v44  ;;  %1673 = vmatprep.subr.bf16.mxu0 %v3088_v45  ;;  %v3145_v28 = vld [vmem:[#allocation2 + $0x484] ss:$16 sps:$4 sm:$0xff]   ;;  %v3143_v30 = vld [vmem:[#allocation2 + $0x480] ss:$16 sps:$4 sm:$0xff]   ;;  %v3621_v44 = vrot.slane %v42_v42, %v3598_v49  ;;  %v62_v45 = vcombine.high %v42_v42, %v42_v42  ;;  %v3237_v42 = vld [vmem:[#allocation2 + $0x2a8] ss:$16 sps:$4 sm:$0xff]  }
  0x35   :  { %1714 = vmatprep.subr.bf16.mxu1 %v3090_v46  ;;  %v3148_v29 = vld [vmem:[#allocation2 + $0x684] ss:$16 sps:$4 sm:$0xff]   ;;  %v3146_v31 = vld [vmem:[#allocation2 + $0x680] ss:$16 sps:$4 sm:$0xff]  }
  0x36   :  { %v3151_v32 = vld [vmem:[#allocation2 + $0x464] ss:$16 sps:$4 sm:$0xff]   ;;  %v3149_v34 = vld [vmem:[#allocation2 + $0x460] ss:$16 sps:$4 sm:$0xff]  }
  0x37   :  { %1674 = vmatpush2.bf16.msra.mxu0 %v3092_v47  ;;  %v3154_v33 = vld [vmem:[#allocation2 + $0x664] ss:$16 sps:$4 sm:$0xff]   ;;  %v3152_v35 = vld [vmem:[#allocation2 + $0x660] ss:$16 sps:$4 sm:$0xff]  }
  0x38   :  { %1715 = vmatpush2.bf16.msra.mxu1 %v3093_v48  ;;  %1675 = vmatprep.subr.bf16.mxu0 %v3094_v50  ;;  %v3157_v36 = vld [vmem:[#allocation2 + $0x444] ss:$16 sps:$4 sm:$0xff]   ;;  %v3155_v38 = vld [vmem:[#allocation2 + $0x440] ss:$16 sps:$4 sm:$0xff]   ;;  %v77_v48 = vcombine.high %v3621_v44, %v3621_v44  ;;  %v3626_v50 = vrot.slane %v62_v45, %v3598_v49  ;;  %v3245_v45 = vld [vmem:[#allocation2 + $0x28c] ss:$16 sps:$4 sm:$0xff]  }
  0x39   :  { %1716 = vmatprep.subr.bf16.mxu1 %v3096_v51  ;;  %v3160_v37 = vld [vmem:[#allocation2 + $0x644] ss:$16 sps:$4 sm:$0xff]   ;;  %v3158_v39 = vld [vmem:[#allocation2 + $0x640] ss:$16 sps:$4 sm:$0xff]  }
  0x3a   :  { %v3163_v40 = vld [vmem:[#allocation2 + $0x424] ss:$16 sps:$4 sm:$0xff]   ;;  %v3161_v46 = vld [vmem:[#allocation2 + $0x420] ss:$16 sps:$4 sm:$0xff]   ;;  %v78_v54 = vcombine.high %v3626_v50, %v3626_v50 }
  0x3b   :  { %1676 = vmatpush2.bf16.msra.mxu0 %v3098_v53  ;;  %v3166_v41 = vld [vmem:[#allocation2 + $0x624] ss:$16 sps:$4 sm:$0xff]   ;;  %v3164_v47 = vld [vmem:[#allocation2 + $0x620] ss:$16 sps:$4 sm:$0xff]   ;;  %v3628_v53 = vpack.c.bf16 %v77_v48, %v77_v48  ;;  %v3248_v48 = vld [vmem:[#allocation2 + $0x6c] ss:$16 sps:$4 sm:$0xff]  }
  0x3c   :  { %1717 = vmatpush2.bf16.msra.mxu1 %v3099_v56  ;;  %1677 = vmatprep.subr.bf16.mxu0 %v3100_v57  ;;  %v3169_v51 = vld [vmem:[#allocation2 + $0x404] ss:$16 sps:$4 sm:$0xff]   ;;  %v3167_v55 = vld [vmem:[#allocation2 + $0x400] ss:$16 sps:$4 sm:$0xff]   ;;  %v3632_v57 = vpack.c.bf16 %v78_v54, %v78_v54  ;;  %v3252_v54 = vld [vmem:[#allocation2 + $0x48] ss:$16 sps:$4 sm:$0xff]  }
  0x3d   :  { %1718 = vmatprep.subr.bf16.mxu1 %v3102_v58  ;;  %v3172_v52 = vld [vmem:[#allocation2 + $0x604] ss:$16 sps:$4 sm:$0xff]   ;;  %v3170_v56 = vld [vmem:[#allocation2 + $0x600] ss:$16 sps:$4 sm:$0xff]  }
  0x3e   :  { %v3175_v58 = vld [vmem:[#allocation2 + $0x5e4] ss:$16 sps:$4 sm:$0xff]   ;;  %v3173_v59 = vld [vmem:[#allocation2 + $0x5e0] ss:$16 sps:$4 sm:$0xff]  }
  0x3f   :  { %1678 = vmatpush2.bf16.msra.mxu0 %v3104_v61  ;;  %v3178_v49 = vld [vmem:[#allocation2 + $0x7e4] ss:$16 sps:$4 sm:$0xff]   ;;  %v3176_v60 = vld [vmem:[#allocation2 + $0x7e0] ss:$16 sps:$4 sm:$0xff]  }
  0x40   :  { %1719 = vmatpush2.bf16.msra.mxu1 %v3105_v0  ;;  %1679 = vmatprep.subr.bf16.mxu0 %v3106_v1  ;;  %v3181_v61 = vld [vmem:[#allocation2 + $0x5c4] ss:$16 sps:$4 sm:$0xff]   ;;  %v3179_v0 = vld [vmem:[#allocation2 + $0x5c0] ss:$16 sps:$4 sm:$0xff]  }
  0x41   :  { %1720 = vmatprep.subr.bf16.mxu1 %v3108_v2  ;;  %v3184_v63 = vld [vmem:[#allocation2 + $0x7c4] ss:$16 sps:$4 sm:$0xff]   ;;  %v3182_v1 = vld [vmem:[#allocation2 + $0x7c0] ss:$16 sps:$4 sm:$0xff]  }
  0x42   :  { %v3187_v2 = vld [vmem:[#allocation2 + $0x5a4] ss:$16 sps:$4 sm:$0xff]  }
  0x43   :  { %1680 = vmatpush2.bf16.msra.mxu0 %v3110_v4  ;;  %v3190_v4 = vld [vmem:[#allocation2 + $0x7a4] ss:$16 sps:$4 sm:$0xff]  }
  0x44   :  { %1721 = vmatpush2.bf16.msra.mxu1 %v3111_v5  ;;  %1681 = vmatprep.subr.bf16.mxu0 %v3112_v6  ;;  %v3185_v5 = vld [vmem:[#allocation2 + $0x5a0] ss:$16 sps:$4 sm:$0xff]  }
  0x45   :  { %1722 = vmatprep.subr.bf16.mxu1 %v3114_v7  ;;  %v3188_v6 = vld [vmem:[#allocation2 + $0x7a0] ss:$16 sps:$4 sm:$0xff]   ;;  %v3193_v7 = vld [vmem:[#allocation2 + $0x584] ss:$16 sps:$4 sm:$0xff]  }
  0x47   :  { %1682 = vmatpush2.bf16.msra.mxu0 %v3116_v8  ;;  %v3196_v8 = vld [vmem:[#allocation2 + $0x784] ss:$16 sps:$4 sm:$0xff]  }
  0x48   :  { %1723 = vmatpush2.bf16.msra.mxu1 %v3117_v9  ;;  %1683 = vmatprep.subr.bf16.mxu0 %v3118_v10  ;;  %v3191_v9 = vld [vmem:[#allocation2 + $0x580] ss:$16 sps:$4 sm:$0xff]  }
  0x49   :  { %1724 = vmatprep.subr.bf16.mxu1 %v3120_v11  ;;  %v3194_v10 = vld [vmem:[#allocation2 + $0x780] ss:$16 sps:$4 sm:$0xff]   ;;  %v3199_v11 = vld [vmem:[#allocation2 + $0x564] ss:$16 sps:$4 sm:$0xff]  }
  0x4b   :  { %1684 = vmatpush2.bf16.msra.mxu0 %v3122_v12  ;;  %v3202_v12 = vld [vmem:[#allocation2 + $0x764] ss:$16 sps:$4 sm:$0xff]  }
  0x4c   :  { %1725 = vmatpush2.bf16.msra.mxu1 %v3123_v13  ;;  %1735 = vmatprep.subr.bf16.mxu0 %v3127_v14  ;;  %v3197_v13 = vld [vmem:[#allocation2 + $0x560] ss:$16 sps:$4 sm:$0xff]  }
  0x4d   :  { %1776 = vmatprep.subr.bf16.mxu1 %v3130_v15  ;;  %v3200_v14 = vld [vmem:[#allocation2 + $0x760] ss:$16 sps:$4 sm:$0xff]   ;;  %v3205_v15 = vld [vmem:[#allocation2 + $0x544] ss:$16 sps:$4 sm:$0xff]  }
  0x4e   :  { %1686 = vmatmul.mubr.bf16.vlgmr.msra.gmra.mxu0 %v3611_v16 }
  0x4f   :  { %1727 = vmatmul.mubr.bf16.vlgmr.msra.gmra.mxu1 %v3613_v17  ;;  %1736 = vmatpush1.bf16.msra.mxu0 %v3125_v18  ;;  %v3208_v18 = vld [vmem:[#allocation2 + $0x744] ss:$16 sps:$4 sm:$0xff]  }
  0x50   :  { %1777 = vmatpush1.bf16.msra.mxu1 %v3128_v19  ;;  %1737 = vmatprep.subr.bf16.mxu0 %v3133_v20  ;;  %v3203_v19 = vld [vmem:[#allocation2 + $0x540] ss:$16 sps:$4 sm:$0xff]  }
  0x51   :  { %1778 = vmatprep.subr.bf16.mxu1 %v3136_v21  ;;  %1767 = vmatprep.mubr.bf16.mxu0 %v3628_v53  ;;  %v3206_v20 = vld [vmem:[#allocation2 + $0x740] ss:$16 sps:$4 sm:$0xff]   ;;  %v3211_v21 = vld [vmem:[#allocation2 + $0x524] ss:$16 sps:$4 sm:$0xff]  }
  0x52   :  { %1808 = vmatprep.mubr.bf16.mxu1 %v3632_v57 }
  0x53   :  { %1738 = vmatpush1.bf16.msra.mxu0 %v3131_v22  ;;  %v3214_v22 = vld [vmem:[#allocation2 + $0x724] ss:$16 sps:$4 sm:$0xff]  }
  0x54   :  { %1779 = vmatpush1.bf16.msra.mxu1 %v3134_v23  ;;  %1739 = vmatprep.subr.bf16.mxu0 %v3139_v24  ;;  %v3209_v23 = vld [vmem:[#allocation2 + $0x520] ss:$16 sps:$4 sm:$0xff]  }
  0x55   :  { %1780 = vmatprep.subr.bf16.mxu1 %v3142_v25  ;;  %v3212_v24 = vld [vmem:[#allocation2 + $0x720] ss:$16 sps:$4 sm:$0xff]   ;;  %v3217_v25 = vld [vmem:[#allocation2 + $0x504] ss:$16 sps:$4 sm:$0xff]  }
  0x57   :  { %1740 = vmatpush1.bf16.msra.mxu0 %v3137_v26  ;;  %v3220_v26 = vld [vmem:[#allocation2 + $0x704] ss:$16 sps:$4 sm:$0xff]  }
  0x58   :  { %1781 = vmatpush1.bf16.msra.mxu1 %v3140_v27  ;;  %1741 = vmatprep.subr.bf16.mxu0 %v3145_v28  ;;  %v3215_v27 = vld [vmem:[#allocation2 + $0x500] ss:$16 sps:$4 sm:$0xff]  }
  0x59   :  { %1782 = vmatprep.subr.bf16.mxu1 %v3148_v29  ;;  %v3218_v28 = vld [vmem:[#allocation2 + $0x700] ss:$16 sps:$4 sm:$0xff]   ;;  %v3224_v29 = vld [vmem:[#allocation2 + $0xec] ss:$16 sps:$4 sm:$0xff]  }
  0x5b   :  { %1742 = vmatpush1.bf16.msra.mxu0 %v3143_v30  ;;  %v3227_v30 = vld [vmem:[#allocation2 + $0x2ec] ss:$16 sps:$4 sm:$0xff]  }
  0x5c   :  { %1783 = vmatpush1.bf16.msra.mxu1 %v3146_v31  ;;  %1743 = vmatprep.subr.bf16.mxu0 %v3151_v32  ;;  %v3638_v31 = vpack.c.bf16 %v3621_v44, %v3621_v44  ;;  %v3642_v32 = vpack.c.bf16 %v3626_v50, %v3626_v50  ;;  %v3242_v44 = vld [vmem:[#allocation2 + $0x8c] ss:$16 sps:$4 sm:$0xff]  }
  0x5d   :  { %1784 = vmatprep.subr.bf16.mxu1 %v3154_v33  ;;  %v3222_v33 = vld [vmem:[#allocation2 + $0xe8] ss:$16 sps:$4 sm:$0xff]   ;;  %v3251_v50 = vld [vmem:[#allocation2 + $0x26c] ss:$16 sps:$4 sm:$0xff]  }
  0x5f   :  { %1744 = vmatpush1.bf16.msra.mxu0 %v3149_v34  ;;  %v3225_v34 = vld [vmem:[#allocation2 + $0x2e8] ss:$16 sps:$4 sm:$0xff]  }
  0x60   :  { %1785 = vmatpush1.bf16.msra.mxu1 %v3152_v35  ;;  %1745 = vmatprep.subr.bf16.mxu0 %v3157_v36  ;;  %v3230_v35 = vld [vmem:[#allocation2 + $0xcc] ss:$16 sps:$4 sm:$0xff]  }
  0x61   :  { %1786 = vmatprep.subr.bf16.mxu1 %v3160_v37  ;;  %v3233_v36 = vld [vmem:[#allocation2 + $0x2cc] ss:$16 sps:$4 sm:$0xff]   ;;  %v3228_v37 = vld [vmem:[#allocation2 + $0xc8] ss:$16 sps:$4 sm:$0xff]  }
  0x63   :  { %1746 = vmatpush1.bf16.msra.mxu0 %v3155_v38  ;;  %v3231_v38 = vld [vmem:[#allocation2 + $0x2c8] ss:$16 sps:$4 sm:$0xff]  }
  0x64   :  { %1787 = vmatpush1.bf16.msra.mxu1 %v3158_v39  ;;  %1747 = vmatprep.subr.bf16.mxu0 %v3163_v40  ;;  %v3236_v39 = vld [vmem:[#allocation2 + $0xac] ss:$16 sps:$4 sm:$0xff]  }
  0x65   :  { %1788 = vmatprep.subr.bf16.mxu1 %v3166_v41  ;;  %v3239_v40 = vld [vmem:[#allocation2 + $0x2ac] ss:$16 sps:$4 sm:$0xff]   ;;  %v3234_v41 = vld [vmem:[#allocation2 + $0xa8] ss:$16 sps:$4 sm:$0xff]  }
  0x67   :  { %1748 = vmatpush1.bf16.msra.mxu0 %v3161_v46  ;;  %v3240_v46 = vld [vmem:[#allocation2 + $0x88] ss:$16 sps:$4 sm:$0xff]  }
  0x68   :  { %1789 = vmatpush1.bf16.msra.mxu1 %v3164_v47  ;;  %1749 = vmatprep.subr.bf16.mxu0 %v3169_v51  ;;  %v3243_v47 = vld [vmem:[#allocation2 + $0x288] ss:$16 sps:$4 sm:$0xff]   ;;  %v3254_v51 = vld [vmem:[#allocation2 + $0x4c] ss:$16 sps:$4 sm:$0xff]  }
  0x69   :  { %1790 = vmatprep.subr.bf16.mxu1 %v3172_v52  ;;  %v3257_v52 = vld [vmem:[#allocation2 + $0x24c] ss:$16 sps:$4 sm:$0xff]  }
  0x6b   :  { %1750 = vmatpush1.bf16.msra.mxu0 %v3167_v55  ;;  %v3255_v55 = vld [vmem:[#allocation2 + $0x248] ss:$16 sps:$4 sm:$0xff]  }
  0x6c   :  { %1791 = vmatpush1.bf16.msra.mxu1 %v3170_v56  ;;  %1751 = vmatprep.subr.bf16.mxu0 %v3175_v58  ;;  %v3260_v56 = vld [vmem:[#allocation2 + $0x2c] ss:$16 sps:$4 sm:$0xff]  }
  0x6d   :  { %1792 = vmatprep.subr.bf16.mxu1 %v3178_v49  ;;  %v3263_v58 = vld [vmem:[#allocation2 + $0x22c] ss:$16 sps:$4 sm:$0xff]   ;;  %v3258_v49 = vld [vmem:[#allocation2 + $0x28] ss:$16 sps:$4 sm:$0xff]  }
  0x6f   :  { %1752 = vmatpush2.bf16.msra.mxu0 %v3173_v59  ;;  %v3261_v59 = vld [vmem:[#allocation2 + $0x228] ss:$16 sps:$4 sm:$0xff]  }
  0x70   :  { %1793 = vmatpush2.bf16.msra.mxu1 %v3176_v60  ;;  %1753 = vmatprep.subr.bf16.mxu0 %v3181_v61  ;;  %v3266_v60 = vld [vmem:[#allocation2 + $0xc] ss:$16 sps:$4 sm:$0xff]  }
  0x71   :  { %1794 = vmatprep.subr.bf16.mxu1 %v3184_v63  ;;  %v3269_v61 = vld [vmem:[#allocation2 + $0x20c] ss:$16 sps:$4 sm:$0xff]   ;;  %v3264_v63 = vld [vmem:[#allocation2 + $0x8] ss:$16 sps:$4 sm:$0xff]  }
  0x73   :  { %1754 = vmatpush2.bf16.msra.mxu0 %v3179_v0  ;;  %v3267_v0 = vld [vmem:[#allocation2 + $0x208] ss:$16 sps:$4 sm:$0xff]  }
  0x74   :  { %1795 = vmatpush2.bf16.msra.mxu1 %v3182_v1  ;;  %1755 = vmatprep.subr.bf16.mxu0 %v3187_v2  ;;  %v3272_v1 = vld [vmem:[#allocation2 + $0x1ec] ss:$16 sps:$4 sm:$0xff]  }
  0x75   :  { %1796 = vmatprep.subr.bf16.mxu1 %v3190_v4  ;;  %v3275_v2 = vld [vmem:[#allocation2 + $0x3ec] ss:$16 sps:$4 sm:$0xff]   ;;  %v3270_v4 = vld [vmem:[#allocation2 + $0x1e8] ss:$16 sps:$4 sm:$0xff]  }
  0x77   :  { %1756 = vmatpush2.bf16.msra.mxu0 %v3185_v5  ;;  %v3273_v5 = vld [vmem:[#allocation2 + $0x3e8] ss:$16 sps:$4 sm:$0xff]  }
  0x78   :  { %1797 = vmatpush2.bf16.msra.mxu1 %v3188_v6  ;;  %1757 = vmatprep.subr.bf16.mxu0 %v3193_v7  ;;  %v3278_v6 = vld [vmem:[#allocation2 + $0x1cc] ss:$16 sps:$4 sm:$0xff]  }
  0x79   :  { %1798 = vmatprep.subr.bf16.mxu1 %v3196_v8  ;;  %v3281_v7 = vld [vmem:[#allocation2 + $0x3cc] ss:$16 sps:$4 sm:$0xff]   ;;  %v3276_v8 = vld [vmem:[#allocation2 + $0x1c8] ss:$16 sps:$4 sm:$0xff]  }
  0x7b   :  { %1758 = vmatpush2.bf16.msra.mxu0 %v3191_v9  ;;  %v3279_v9 = vld [vmem:[#allocation2 + $0x3c8] ss:$16 sps:$4 sm:$0xff]  }
  0x7c   :  { %1799 = vmatpush2.bf16.msra.mxu1 %v3194_v10  ;;  %1759 = vmatprep.subr.bf16.mxu0 %v3199_v11  ;;  %v3284_v10 = vld [vmem:[#allocation2 + $0x1ac] ss:$16 sps:$4 sm:$0xff]  }
  0x7d   :  { %1800 = vmatprep.subr.bf16.mxu1 %v3202_v12  ;;  %v3287_v11 = vld [vmem:[#allocation2 + $0x3ac] ss:$16 sps:$4 sm:$0xff]   ;;  %v3282_v12 = vld [vmem:[#allocation2 + $0x1a8] ss:$16 sps:$4 sm:$0xff]  }
  0x7f   :  { %1760 = vmatpush2.bf16.msra.mxu0 %v3197_v13  ;;  %v3285_v13 = vld [vmem:[#allocation2 + $0x3a8] ss:$16 sps:$4 sm:$0xff]  }
  0x80   :  { %1801 = vmatpush2.bf16.msra.mxu1 %v3200_v14  ;;  %1761 = vmatprep.subr.bf16.mxu0 %v3205_v15  ;;  %v3290_v14 = vld [vmem:[#allocation2 + $0x18c] ss:$16 sps:$4 sm:$0xff]  }
  0x81   :  { %1802 = vmatprep.subr.bf16.mxu1 %v3208_v18  ;;  %v3293_v15 = vld [vmem:[#allocation2 + $0x38c] ss:$16 sps:$4 sm:$0xff]   ;;  %v3288_v18 = vld [vmem:[#allocation2 + $0x188] ss:$16 sps:$4 sm:$0xff]  }
  0x83   :  { %1762 = vmatpush2.bf16.msra.mxu0 %v3203_v19  ;;  %v3291_v19 = vld [vmem:[#allocation2 + $0x388] ss:$16 sps:$4 sm:$0xff]  }
  0x84   :  { %1803 = vmatpush2.bf16.msra.mxu1 %v3206_v20  ;;  %1763 = vmatprep.subr.bf16.mxu0 %v3211_v21  ;;  %v3296_v20 = vld [vmem:[#allocation2 + $0x16c] ss:$16 sps:$4 sm:$0xff]  }
  0x85   :  { %1804 = vmatprep.subr.bf16.mxu1 %v3214_v22  ;;  %v3299_v21 = vld [vmem:[#allocation2 + $0x36c] ss:$16 sps:$4 sm:$0xff]   ;;  %v3294_v22 = vld [vmem:[#allocation2 + $0x168] ss:$16 sps:$4 sm:$0xff]  }
  0x87   :  { %1764 = vmatpush2.bf16.msra.mxu0 %v3209_v23  ;;  %v3297_v23 = vld [vmem:[#allocation2 + $0x368] ss:$16 sps:$4 sm:$0xff]  }
  0x88   :  { %1805 = vmatpush2.bf16.msra.mxu1 %v3212_v24  ;;  %1765 = vmatprep.subr.bf16.mxu0 %v3217_v25  ;;  %v3302_v24 = vld [vmem:[#allocation2 + $0x14c] ss:$16 sps:$4 sm:$0xff]  }
  0x89   :  { %1806 = vmatprep.subr.bf16.mxu1 %v3220_v26  ;;  %v3305_v25 = vld [vmem:[#allocation2 + $0x34c] ss:$16 sps:$4 sm:$0xff]   ;;  %v3300_v26 = vld [vmem:[#allocation2 + $0x148] ss:$16 sps:$4 sm:$0xff]  }
  0x8b   :  { %1766 = vmatpush2.bf16.msra.mxu0 %v3215_v27  ;;  %v3303_v27 = vld [vmem:[#allocation2 + $0x348] ss:$16 sps:$4 sm:$0xff]  }
  0x8c   :  { %1807 = vmatpush2.bf16.msra.mxu1 %v3218_v28  ;;  %1817 = vmatprep.subr.bf16.mxu0 %v3224_v29  ;;  %v3308_v28 = vld [vmem:[#allocation2 + $0x12c] ss:$16 sps:$4 sm:$0xff]  }
  0x8d   :  { %1858 = vmatprep.subr.bf16.mxu1 %v3227_v30  ;;  %v3311_v29 = vld [vmem:[#allocation2 + $0x32c] ss:$16 sps:$4 sm:$0xff]   ;;  %v3306_v30 = vld [vmem:[#allocation2 + $0x128] ss:$16 sps:$4 sm:$0xff]  }
  0x8e   :  { %1768 = vmatmul.mubr.bf16.vlgmr.msra.gmra.mxu0 %v3638_v31 }
  0x8f   :  { %1809 = vmatmul.mubr.bf16.vlgmr.msra.gmra.mxu1 %v3642_v32  ;;  %1818 = vmatpush1.bf16.msra.mxu0 %v3222_v33  ;;  %v3309_v33 = vld [vmem:[#allocation2 + $0x328] ss:$16 sps:$4 sm:$0xff]  }
  0x90   :  { %1859 = vmatpush1.bf16.msra.mxu1 %v3225_v34  ;;  %1819 = vmatprep.subr.bf16.mxu0 %v3230_v35  ;;  %v3314_v34 = vld [vmem:[#allocation2 + $0x10c] ss:$16 sps:$4 sm:$0xff]  }
  0x91   :  { %1860 = vmatprep.subr.bf16.mxu1 %v3233_v36  ;;  %1849 = vmatprep.mubr.bf16.mxu0 %v3605_v62  ;;  %v3246_v62 = vld [vmem:[#allocation2 + $0x68] ss:$16 sps:$4 sm:$0xff]   ;;  %v3317_v35 = vld [vmem:[#allocation2 + $0x30c] ss:$16 sps:$4 sm:$0xff]  }
  0x92   :  { %1890 = vmatprep.mubr.bf16.mxu1 %v3607_v3  ;;  %v3249_v3 = vld [vmem:[#allocation2 + $0x268] ss:$16 sps:$4 sm:$0xff]  }
  0x93   :  { %1820 = vmatpush1.bf16.msra.mxu0 %v3228_v37  ;;  %v3312_v36 = vld [vmem:[#allocation2 + $0x108] ss:$16 sps:$4 sm:$0xff]  }
  0x94   :  { %1861 = vmatpush1.bf16.msra.mxu1 %v3231_v38  ;;  %1821 = vmatprep.subr.bf16.mxu0 %v3236_v39  ;;  %v3315_v37 = vld [vmem:[#allocation2 + $0x308] ss:$16 sps:$4 sm:$0xff]   ;;  %v3320_v38 = vld [vmem:[#allocation2 + $0x4ec] ss:$16 sps:$4 sm:$0xff]  }
  0x95   :  { %1862 = vmatprep.subr.bf16.mxu1 %v3239_v40  ;;  %v3323_v39 = vld [vmem:[#allocation2 + $0x6ec] ss:$16 sps:$4 sm:$0xff]   ;;  %v3318_v40 = vld [vmem:[#allocation2 + $0x4e8] ss:$16 sps:$4 sm:$0xff]  }
  0x97   :  { %1822 = vmatpush1.bf16.msra.mxu0 %v3234_v41  ;;  %v3321_v41 = vld [vmem:[#allocation2 + $0x6e8] ss:$16 sps:$4 sm:$0xff]  }
  0x98   :  { %1863 = vmatpush1.bf16.msra.mxu1 %v3237_v42  ;;  %1823 = vmatprep.subr.bf16.mxu0 %v3242_v44  ;;  %v3326_v42 = vld [vmem:[#allocation2 + $0x4cc] ss:$16 sps:$4 sm:$0xff]  }
  0x99   :  { %1864 = vmatprep.subr.bf16.mxu1 %v3245_v45  ;;  %v3329_v44 = vld [vmem:[#allocation2 + $0x6cc] ss:$16 sps:$4 sm:$0xff]   ;;  %v3324_v45 = vld [vmem:[#allocation2 + $0x4c8] ss:$16 sps:$4 sm:$0xff]  }
  0x9b   :  { %1824 = vmatpush1.bf16.msra.mxu0 %v3240_v46  ;;  %v3327_v46 = vld [vmem:[#allocation2 + $0x6c8] ss:$16 sps:$4 sm:$0xff]  }
  0x9c   :  { %1865 = vmatpush1.bf16.msra.mxu1 %v3243_v47  ;;  %1825 = vmatprep.subr.bf16.mxu0 %v3248_v48  ;;  %v3332_v47 = vld [vmem:[#allocation2 + $0x4ac] ss:$16 sps:$4 sm:$0xff]  }
  0x9d   :  { %1866 = vmatprep.subr.bf16.mxu1 %v3251_v50  ;;  %v3335_v48 = vld [vmem:[#allocation2 + $0x6ac] ss:$16 sps:$4 sm:$0xff]   ;;  %v3330_v50 = vld [vmem:[#allocation2 + $0x4a8] ss:$16 sps:$4 sm:$0xff]  }
  0x9f   :  { %1826 = vmatpush1.bf16.msra.mxu0 %v3246_v62  ;;  %v3333_v62 = vld [vmem:[#allocation2 + $0x6a8] ss:$16 sps:$4 sm:$0xff]  }
  0xa0   :  { %1867 = vmatpush1.bf16.msra.mxu1 %v3249_v3  ;;  %1827 = vmatprep.subr.bf16.mxu0 %v3254_v51  ;;  %v3338_v3 = vld [vmem:[#allocation2 + $0x48c] ss:$16 sps:$4 sm:$0xff]  }
  0xa1   :  { %1868 = vmatprep.subr.bf16.mxu1 %v3257_v52  ;;  %v3341_v51 = vld [vmem:[#allocation2 + $0x68c] ss:$16 sps:$4 sm:$0xff]  }
  0xa2   :  { %v3344_v52 = vld [vmem:[#allocation2 + $0x46c] ss:$16 sps:$4 sm:$0xff]  }
  0xa3   :  { %1828 = vmatpush1.bf16.msra.mxu0 %v3252_v54  ;;  %v3347_v54 = vld [vmem:[#allocation2 + $0x66c] ss:$16 sps:$4 sm:$0xff]  }
  0xa4   :  { %1869 = vmatpush1.bf16.msra.mxu1 %v3255_v55  ;;  %1829 = vmatprep.subr.bf16.mxu0 %v3260_v56  ;;  %v3342_v55 = vld [vmem:[#allocation2 + $0x468] ss:$16 sps:$4 sm:$0xff]  }
  0xa5   :  { %1870 = vmatprep.subr.bf16.mxu1 %v3263_v58  ;;  %v3345_v56 = vld [vmem:[#allocation2 + $0x668] ss:$16 sps:$4 sm:$0xff]   ;;  %v3350_v58 = vld [vmem:[#allocation2 + $0x44c] ss:$16 sps:$4 sm:$0xff]  }
  0xa7   :  { %1830 = vmatpush1.bf16.msra.mxu0 %v3258_v49  ;;  %v3351_v49 = vld [vmem:[#allocation2 + $0x648] ss:$16 sps:$4 sm:$0xff]  }
  0xa8   :  { %1871 = vmatpush1.bf16.msra.mxu1 %v3261_v59  ;;  %1831 = vmatprep.subr.bf16.mxu0 %v3266_v60  ;;  %v3356_v59 = vld [vmem:[#allocation2 + $0x42c] ss:$16 sps:$4 sm:$0xff]  }
  0xa9   :  { %1872 = vmatprep.subr.bf16.mxu1 %v3269_v61  ;;  %v3359_v60 = vld [vmem:[#allocation2 + $0x62c] ss:$16 sps:$4 sm:$0xff]   ;;  %v3354_v61 = vld [vmem:[#allocation2 + $0x428] ss:$16 sps:$4 sm:$0xff]  }
  0xab   :  { %1832 = vmatpush1.bf16.msra.mxu0 %v3264_v63  ;;  %v3357_v63 = vld [vmem:[#allocation2 + $0x628] ss:$16 sps:$4 sm:$0xff]  }
  0xac   :  { %1873 = vmatpush1.bf16.msra.mxu1 %v3267_v0  ;;  %1833 = vmatprep.subr.bf16.mxu0 %v3272_v1  ;;  %v3362_v0 = vld [vmem:[#allocation2 + $0x40c] ss:$16 sps:$4 sm:$0xff]  }
  0xad   :  { %1874 = vmatprep.subr.bf16.mxu1 %v3275_v2  ;;  %v3365_v1 = vld [vmem:[#allocation2 + $0x60c] ss:$16 sps:$4 sm:$0xff]   ;;  %v3360_v2 = vld [vmem:[#allocation2 + $0x408] ss:$16 sps:$4 sm:$0xff]  }
  0xaf   :  { %1834 = vmatpush2.bf16.msra.mxu0 %v3270_v4  ;;  %v3363_v4 = vld [vmem:[#allocation2 + $0x608] ss:$16 sps:$4 sm:$0xff]  }
  0xb0   :  { %1875 = vmatpush2.bf16.msra.mxu1 %v3273_v5  ;;  %1835 = vmatprep.subr.bf16.mxu0 %v3278_v6  ;;  %v3368_v5 = vld [vmem:[#allocation2 + $0x5ec] ss:$16 sps:$4 sm:$0xff]  }
  0xb1   :  { %1876 = vmatprep.subr.bf16.mxu1 %v3281_v7  ;;  %v3371_v6 = vld [vmem:[#allocation2 + $0x7ec] ss:$16 sps:$4 sm:$0xff]   ;;  %v3366_v7 = vld [vmem:[#allocation2 + $0x5e8] ss:$16 sps:$4 sm:$0xff]  }
  0xb3   :  { %1836 = vmatpush2.bf16.msra.mxu0 %v3276_v8  ;;  %v3369_v8 = vld [vmem:[#allocation2 + $0x7e8] ss:$16 sps:$4 sm:$0xff]  }
  0xb4   :  { %1877 = vmatpush2.bf16.msra.mxu1 %v3279_v9  ;;  %1837 = vmatprep.subr.bf16.mxu0 %v3284_v10  ;;  %v3374_v9 = vld [vmem:[#allocation2 + $0x5cc] ss:$16 sps:$4 sm:$0xff]  }
  0xb5   :  { %1878 = vmatprep.subr.bf16.mxu1 %v3287_v11  ;;  %v3377_v10 = vld [vmem:[#allocation2 + $0x7cc] ss:$16 sps:$4 sm:$0xff]   ;;  %v3372_v11 = vld [vmem:[#allocation2 + $0x5c8] ss:$16 sps:$4 sm:$0xff]  }
  0xb7   :  { %1838 = vmatpush2.bf16.msra.mxu0 %v3282_v12  ;;  %v3375_v12 = vld [vmem:[#allocation2 + $0x7c8] ss:$16 sps:$4 sm:$0xff]  }
  0xb8   :  { %1879 = vmatpush2.bf16.msra.mxu1 %v3285_v13  ;;  %1839 = vmatprep.subr.bf16.mxu0 %v3290_v14  ;;  %v3380_v13 = vld [vmem:[#allocation2 + $0x5ac] ss:$16 sps:$4 sm:$0xff]  }
  0xb9   :  { %1880 = vmatprep.subr.bf16.mxu1 %v3293_v15  ;;  %v3383_v14 = vld [vmem:[#allocation2 + $0x7ac] ss:$16 sps:$4 sm:$0xff]   ;;  %v3378_v15 = vld [vmem:[#allocation2 + $0x5a8] ss:$16 sps:$4 sm:$0xff]  }
  0xbb   :  { %1840 = vmatpush2.bf16.msra.mxu0 %v3288_v18  ;;  %v3381_v18 = vld [vmem:[#allocation2 + $0x7a8] ss:$16 sps:$4 sm:$0xff]  }
  0xbc   :  { %1881 = vmatpush2.bf16.msra.mxu1 %v3291_v19  ;;  %1841 = vmatprep.subr.bf16.mxu0 %v3296_v20  ;;  %v3386_v19 = vld [vmem:[#allocation2 + $0x58c] ss:$16 sps:$4 sm:$0xff]  }
  0xbd   :  { %1882 = vmatprep.subr.bf16.mxu1 %v3299_v21  ;;  %v3389_v20 = vld [vmem:[#allocation2 + $0x78c] ss:$16 sps:$4 sm:$0xff]   ;;  %v3384_v21 = vld [vmem:[#allocation2 + $0x588] ss:$16 sps:$4 sm:$0xff]  }
  0xbf   :  { %1842 = vmatpush2.bf16.msra.mxu0 %v3294_v22  ;;  %v3387_v22 = vld [vmem:[#allocation2 + $0x788] ss:$16 sps:$4 sm:$0xff]  }
  0xc0   :  { %1883 = vmatpush2.bf16.msra.mxu1 %v3297_v23  ;;  %1843 = vmatprep.subr.bf16.mxu0 %v3302_v24  ;;  %v3392_v23 = vld [vmem:[#allocation2 + $0x56c] ss:$16 sps:$4 sm:$0xff]  }
  0xc1   :  { %1884 = vmatprep.subr.bf16.mxu1 %v3305_v25  ;;  %v3395_v24 = vld [vmem:[#allocation2 + $0x76c] ss:$16 sps:$4 sm:$0xff]   ;;  %v3390_v25 = vld [vmem:[#allocation2 + $0x568] ss:$16 sps:$4 sm:$0xff]  }
  0xc3   :  { %1844 = vmatpush2.bf16.msra.mxu0 %v3300_v26  ;;  %v3393_v26 = vld [vmem:[#allocation2 + $0x768] ss:$16 sps:$4 sm:$0xff]  }
  0xc4   :  { %1885 = vmatpush2.bf16.msra.mxu1 %v3303_v27  ;;  %1845 = vmatprep.subr.bf16.mxu0 %v3308_v28  ;;  %v3398_v27 = vld [vmem:[#allocation2 + $0x54c] ss:$16 sps:$4 sm:$0xff]  }
  0xc5   :  { %1886 = vmatprep.subr.bf16.mxu1 %v3311_v29  ;;  %v3401_v28 = vld [vmem:[#allocation2 + $0x74c] ss:$16 sps:$4 sm:$0xff]   ;;  %v3396_v29 = vld [vmem:[#allocation2 + $0x548] ss:$16 sps:$4 sm:$0xff]  }
  0xc7   :  { %1846 = vmatpush2.bf16.msra.mxu0 %v3306_v30  ;;  %v3399_v30 = vld [vmem:[#allocation2 + $0x748] ss:$16 sps:$4 sm:$0xff]  }
  0xc8   :  { %1887 = vmatpush2.bf16.msra.mxu1 %v3309_v33  ;;  %1847 = vmatprep.subr.bf16.mxu0 %v3314_v34  ;;  %v3404_v33 = vld [vmem:[#allocation2 + $0x52c] ss:$16 sps:$4 sm:$0xff]  }
  0xc9   :  { %1888 = vmatprep.subr.bf16.mxu1 %v3317_v35  ;;  %v3407_v34 = vld [vmem:[#allocation2 + $0x72c] ss:$16 sps:$4 sm:$0xff]   ;;  %v3402_v35 = vld [vmem:[#allocation2 + $0x528] ss:$16 sps:$4 sm:$0xff]  }
  0xcb   :  { %1848 = vmatpush2.bf16.msra.mxu0 %v3312_v36  ;;  %v3405_v36 = vld [vmem:[#allocation2 + $0x728] ss:$16 sps:$4 sm:$0xff]  }
  0xcc   :  { %1889 = vmatpush2.bf16.msra.mxu1 %v3315_v37  ;;  %1899 = vmatprep.subr.bf16.mxu0 %v3320_v38  ;;  %v3410_v37 = vld [vmem:[#allocation2 + $0x50c] ss:$16 sps:$4 sm:$0xff]  }
  0xcd   :  { %1940 = vmatprep.subr.bf16.mxu1 %v3323_v39  ;;  %v3413_v38 = vld [vmem:[#allocation2 + $0x70c] ss:$16 sps:$4 sm:$0xff]   ;;  %v3408_v39 = vld [vmem:[#allocation2 + $0x508] ss:$16 sps:$4 sm:$0xff]  }
  0xce   :  { %1850 = vmatmul.mubr.bf16.vlgmr.msra.gmra.mxu0 %v3611_v16  ;;  %v3336_v16 = vld [vmem:[#allocation2 + $0x488] ss:$16 sps:$4 sm:$0xff]  }
  0xcf   :  { %1891 = vmatmul.mubr.bf16.vlgmr.msra.gmra.mxu1 %v3613_v17  ;;  %1900 = vmatpush1.bf16.msra.mxu0 %v3318_v40  ;;  %v3339_v17 = vld [vmem:[#allocation2 + $0x688] ss:$16 sps:$4 sm:$0xff]  }
  0xd0   :  { %1941 = vmatpush1.bf16.msra.mxu1 %v3321_v41  ;;  %1901 = vmatprep.subr.bf16.mxu0 %v3326_v42  ;;  %v3411_v40 = vld [vmem:[#allocation2 + $0x708] ss:$16 sps:$4 sm:$0xff]   ;;  %v3416_v41 = vld [vmem:[%s3939_s3 + $0x74] ss:$8 sps:$4 sm:$0xff]  }
  0xd1   :  { %1942 = vmatprep.subr.bf16.mxu1 %v3329_v44  ;;  %1931 = vmatprep.mubr.bf16.mxu0 %v3628_v53  ;;  %v3353_v53 = vld [vmem:[#allocation2 + $0x64c] ss:$16 sps:$4 sm:$0xff]   ;;  %v3414_v42 = vld [vmem:[%s3939_s3 + $0x70] ss:$8 sps:$4 sm:$0xff]  }
  0xd2   :  { %1972 = vmatprep.mubr.bf16.mxu1 %v3632_v57  ;;  %v3348_v57 = vld [vmem:[#allocation2 + $0x448] ss:$16 sps:$4 sm:$0xff]   ;;  %v3419_v44 = vld [vmem:[%s3939_s3 + $0x64] ss:$8 sps:$4 sm:$0xff]  }
  0xd3   :  { %1902 = vmatpush1.bf16.msra.mxu0 %v3324_v45 }
  0xd4   :  { %1943 = vmatpush1.bf16.msra.mxu1 %v3327_v46  ;;  %1903 = vmatprep.subr.bf16.mxu0 %v3332_v47  ;;  %v3417_v47 = vld [vmem:[%s3939_s3 + $0x60] ss:$8 sps:$4 sm:$0xff]  }
  0xd5   :  { %1944 = vmatprep.subr.bf16.mxu1 %v3335_v48 }
  0xd7   :  { %1904 = vmatpush1.bf16.msra.mxu0 %v3330_v50 }
  0xd8   :  { %1945 = vmatpush1.bf16.msra.mxu1 %v3333_v62  ;;  %1905 = vmatprep.subr.bf16.mxu0 %v3338_v3  ;;  %v3422_v62 = vld [vmem:[%s3939_s3 + $0x54] ss:$8 sps:$4 sm:$0xff]  }
  0xd9   :  { %1946 = vmatprep.subr.bf16.mxu1 %v3341_v51 }
  0xdb   :  { %1906 = vmatpush1.bf16.msra.mxu0 %v3336_v16 }
  0xdc   :  { %1947 = vmatpush1.bf16.msra.mxu1 %v3339_v17  ;;  %1907 = vmatprep.subr.bf16.mxu0 %v3344_v52  ;;  %v3425_v17 = vld [vmem:[%s3939_s3 + $0x44] ss:$8 sps:$4 sm:$0xff]   ;;  %v3462_v52 = vld [vmem:[%s3939_s3 + $0x170] ss:$8 sps:$4 sm:$0xff]  }
  0xdd   :  { %1948 = vmatprep.subr.bf16.mxu1 %v3347_v54  ;;  %v3464_v54 = vld [vmem:[%s3939_s3 + $0x174] ss:$8 sps:$4 sm:$0xff]  }
  0xdf   :  { %1908 = vmatpush1.bf16.msra.mxu0 %v3342_v55  ;;  %v3467_v55 = vld [vmem:[%s3939_s3 + $0x164] ss:$8 sps:$4 sm:$0xff]  }
  0xe0   :  { %1949 = vmatpush1.bf16.msra.mxu1 %v3345_v56  ;;  %1909 = vmatprep.subr.bf16.mxu0 %v3350_v58  ;;  %v3423_v56 = vld [vmem:[%s3939_s3 + $0x40] ss:$8 sps:$4 sm:$0xff]  }
  0xe1   :  { %1950 = vmatprep.subr.bf16.mxu1 %v3353_v53  ;;  %v3465_v58 = vld [vmem:[%s3939_s3 + $0x160] ss:$8 sps:$4 sm:$0xff]   ;;  %v3428_v53 = vld [vmem:[%s3939_s3 + $0x34] ss:$8 sps:$4 sm:$0xff]  }
  0xe3   :  { %1910 = vmatpush1.bf16.msra.mxu0 %v3348_v57  ;;  %v3470_v57 = vld [vmem:[%s3939_s3 + $0x154] ss:$8 sps:$4 sm:$0xff]  }
  0xe4   :  { %1951 = vmatpush1.bf16.msra.mxu1 %v3351_v49  ;;  %1911 = vmatprep.subr.bf16.mxu0 %v3356_v59  ;;  %v3426_v49 = vld [vmem:[%s3939_s3 + $0x30] ss:$8 sps:$4 sm:$0xff]  }
  0xe5   :  { %1952 = vmatprep.subr.bf16.mxu1 %v3359_v60  ;;  %v3468_v59 = vld [vmem:[%s3939_s3 + $0x150] ss:$8 sps:$4 sm:$0xff]   ;;  %v3431_v60 = vld [vmem:[%s3939_s3 + $0x24] ss:$8 sps:$4 sm:$0xff]  }
  0xe7   :  { %1912 = vmatpush1.bf16.msra.mxu0 %v3354_v61  ;;  %v3473_v61 = vld [vmem:[%s3939_s3 + $0x144] ss:$8 sps:$4 sm:$0xff]  }
  0xe8   :  { %1953 = vmatpush1.bf16.msra.mxu1 %v3357_v63  ;;  %1913 = vmatprep.subr.bf16.mxu0 %v3362_v0  ;;  %v3429_v63 = vld [vmem:[%s3939_s3 + $0x20] ss:$8 sps:$4 sm:$0xff]  }
  0xe9   :  { %1954 = vmatprep.subr.bf16.mxu1 %v3365_v1  ;;  %v3471_v0 = vld [vmem:[%s3939_s3 + $0x140] ss:$8 sps:$4 sm:$0xff]   ;;  %v3434_v1 = vld [vmem:[%s3939_s3 + $0x14] ss:$8 sps:$4 sm:$0xff]  }
  0xeb   :  { %1914 = vmatpush1.bf16.msra.mxu0 %v3360_v2  ;;  %v3476_v2 = vld [vmem:[%s3939_s3 + $0x134] ss:$8 sps:$4 sm:$0xff]  }
  0xec   :  { %1955 = vmatpush1.bf16.msra.mxu1 %v3363_v4  ;;  %1915 = vmatprep.subr.bf16.mxu0 %v3368_v5  ;;  %v3432_v4 = vld [vmem:[%s3939_s3 + $0x10] ss:$8 sps:$4 sm:$0xff]  }
  0xed   :  { %1956 = vmatprep.subr.bf16.mxu1 %v3371_v6  ;;  %v3474_v5 = vld [vmem:[%s3939_s3 + $0x130] ss:$8 sps:$4 sm:$0xff]   ;;  %v3437_v6 = vld [vmem:[%s3939_s3 + $0x4] ss:$8 sps:$4 sm:$0xff]  }
  0xef   :  { %1916 = vmatpush2.bf16.msra.mxu0 %v3366_v7  ;;  %v3479_v7 = vld [vmem:[%s3939_s3 + $0x124] ss:$8 sps:$4 sm:$0xff]  }
  0xf0   :  { %1957 = vmatpush2.bf16.msra.mxu1 %v3369_v8  ;;  %1917 = vmatprep.subr.bf16.mxu0 %v3374_v9  ;;  %v3435_v8 = vld [vmem:[%s3939_s3] ss:$8 sps:$4 sm:$0xff]  }
  0xf1   :  { %1958 = vmatprep.subr.bf16.mxu1 %v3377_v10  ;;  %v3477_v9 = vld [vmem:[%s3939_s3 + $0x120] ss:$8 sps:$4 sm:$0xff]   ;;  %v3440_v10 = vld [vmem:[%s3939_s3 + $0xf4] ss:$8 sps:$4 sm:$0xff]  }
  0xf3   :  { %1918 = vmatpush2.bf16.msra.mxu0 %v3372_v11  ;;  %v3482_v11 = vld [vmem:[%s3939_s3 + $0x114] ss:$8 sps:$4 sm:$0xff]  }
  0xf4   :  { %1959 = vmatpush2.bf16.msra.mxu1 %v3375_v12  ;;  %1919 = vmatprep.subr.bf16.mxu0 %v3380_v13  ;;  %v3438_v12 = vld [vmem:[%s3939_s3 + $0xf0] ss:$8 sps:$4 sm:$0xff]  }
  0xf5   :  { %1960 = vmatprep.subr.bf16.mxu1 %v3383_v14  ;;  %v3480_v13 = vld [vmem:[%s3939_s3 + $0x110] ss:$8 sps:$4 sm:$0xff]   ;;  %v3443_v14 = vld [vmem:[%s3939_s3 + $0xe4] ss:$8 sps:$4 sm:$0xff]  }
  0xf7   :  { %1920 = vmatpush2.bf16.msra.mxu0 %v3378_v15  ;;  %v3485_v15 = vld [vmem:[%s3939_s3 + $0x104] ss:$8 sps:$4 sm:$0xff]  }
  0xf8   :  { %1961 = vmatpush2.bf16.msra.mxu1 %v3381_v18  ;;  %1921 = vmatprep.subr.bf16.mxu0 %v3386_v19  ;;  %v3441_v18 = vld [vmem:[%s3939_s3 + $0xe0] ss:$8 sps:$4 sm:$0xff]  }
  0xf9   :  { %1962 = vmatprep.subr.bf16.mxu1 %v3389_v20  ;;  %v3483_v19 = vld [vmem:[%s3939_s3 + $0x100] ss:$8 sps:$4 sm:$0xff]   ;;  %v3446_v20 = vld [vmem:[%s3939_s3 + $0xd4] ss:$8 sps:$4 sm:$0xff]  }
  0xfb   :  { %1922 = vmatpush2.bf16.msra.mxu0 %v3384_v21  ;;  %v3488_v21 = vld [vmem:[%s3939_s3 + $0x1f4] ss:$8 sps:$4 sm:$0xff]  }
  0xfc   :  { %1963 = vmatpush2.bf16.msra.mxu1 %v3387_v22  ;;  %1923 = vmatprep.subr.bf16.mxu0 %v3392_v23  ;;  %v3444_v22 = vld [vmem:[%s3939_s3 + $0xd0] ss:$8 sps:$4 sm:$0xff]  }
  0xfd   :  { %1964 = vmatprep.subr.bf16.mxu1 %v3395_v24  ;;  %v3486_v23 = vld [vmem:[%s3939_s3 + $0x1f0] ss:$8 sps:$4 sm:$0xff]   ;;  %v3449_v24 = vld [vmem:[%s3939_s3 + $0xc4] ss:$8 sps:$4 sm:$0xff]  }
  0xff   :  { %1924 = vmatpush2.bf16.msra.mxu0 %v3390_v25  ;;  %v3491_v25 = vld [vmem:[%s3939_s3 + $0x1e4] ss:$8 sps:$4 sm:$0xff]  }
 0x100   :  { %1965 = vmatpush2.bf16.msra.mxu1 %v3393_v26  ;;  %1925 = vmatprep.subr.bf16.mxu0 %v3398_v27  ;;  %v3447_v26 = vld [vmem:[%s3939_s3 + $0xc0] ss:$8 sps:$4 sm:$0xff]  }
 0x101   :  { %1966 = vmatprep.subr.bf16.mxu1 %v3401_v28  ;;  %v3489_v27 = vld [vmem:[%s3939_s3 + $0x1e0] ss:$8 sps:$4 sm:$0xff]   ;;  %v3452_v28 = vld [vmem:[%s3939_s3 + $0xb4] ss:$8 sps:$4 sm:$0xff]  }
 0x103   :  { %1926 = vmatpush2.bf16.msra.mxu0 %v3396_v29  ;;  %v3494_v29 = vld [vmem:[%s3939_s3 + $0x1d4] ss:$8 sps:$4 sm:$0xff]  }
 0x104   :  { %1967 = vmatpush2.bf16.msra.mxu1 %v3399_v30  ;;  %1927 = vmatprep.subr.bf16.mxu0 %v3404_v33  ;;  %v3450_v30 = vld [vmem:[%s3939_s3 + $0xb0] ss:$8 sps:$4 sm:$0xff]  }
 0x105   :  { %1968 = vmatprep.subr.bf16.mxu1 %v3407_v34  ;;  %v3492_v33 = vld [vmem:[%s3939_s3 + $0x1d0] ss:$8 sps:$4 sm:$0xff]   ;;  %v3455_v34 = vld [vmem:[%s3939_s3 + $0xa4] ss:$8 sps:$4 sm:$0xff]  }
 0x107   :  { %1928 = vmatpush2.bf16.msra.mxu0 %v3402_v35  ;;  %v3497_v35 = vld [vmem:[%s3939_s3 + $0x1c4] ss:$8 sps:$4 sm:$0xff]  }
 0x108   :  { %1969 = vmatpush2.bf16.msra.mxu1 %v3405_v36  ;;  %1929 = vmatprep.subr.bf16.mxu0 %v3410_v37  ;;  %v3453_v36 = vld [vmem:[%s3939_s3 + $0xa0] ss:$8 sps:$4 sm:$0xff]  }
 0x109   :  { %1970 = vmatprep.subr.bf16.mxu1 %v3413_v38  ;;  %v3495_v37 = vld [vmem:[%s3939_s3 + $0x1c0] ss:$8 sps:$4 sm:$0xff]   ;;  %v3458_v38 = vld [vmem:[%s3939_s3 + $0x94] ss:$8 sps:$4 sm:$0xff]  }
 0x10b   :  { %1930 = vmatpush2.bf16.msra.mxu0 %v3408_v39  ;;  %v3500_v39 = vld [vmem:[%s3939_s3 + $0x1b4] ss:$8 sps:$4 sm:$0xff]  }
 0x10c   :  { %1971 = vmatpush2.bf16.msra.mxu1 %v3411_v40  ;;  %2393 = vmatprep.subr.bf16.mxu0 %v3416_v41  ;;  %v355_v40 = vsub.s32 0, %v3595_v43  ;;  %v3828_v41 = vld [vmem:[%s3938_s2] sm:$0xf] }
 0x10d   :  { %2434 = vmatprep.subr.bf16.mxu1 %v3464_v54 }
 0x10e   :  { %v3661_v45 = vpop.f32.mrf.mxu0  ;;  %1932 = vmatmul.mubr.bf16.vlgmr.msra.gmra.mxu0 %v3638_v31  ;;  %v3420_v31 = vld [vmem:[%s3939_s3 + $0x50] ss:$8 sps:$4 sm:$0xff]  }
 0x10f   :  { %v3663_v46 = vpop.f32.mrf.mxu1  ;;  %1973 = vmatmul.mubr.bf16.vlgmr.msra.gmra.mxu1 %v3642_v32  ;;  %2394 = vmatpush1.bf16.msra.mxu0 %v3414_v42  ;;  %v359_v42 = vsub.s32 1, %v3595_v43 }
 0x110   :  { %v3670_v48 = vpop.f32.mrf.mxu0  ;;  %2395 = vmatprep.subr.bf16.mxu0 %v3419_v44  ;;  %2435 = vmatpush1.bf16.msra.mxu1 %v3462_v52  ;;  %v3456_v44 = vld [vmem:[%s3939_s3 + $0x90] ss:$8 sps:$4 sm:$0xff]   ;;  %v3503_v52 = vld [vmem:[%s3939_s3 + $0x1a4] ss:$8 sps:$4 sm:$0xff]  }
 0x111   :  { %v3672_v50 = vpop.f32.mrf.mxu1  ;;  %2436 = vmatprep.subr.bf16.mxu1 %v3467_v55 }
 0x112   :  { %v1691_v3 = vpop.f32.mrf.mxu0 }
 0x113   :  { %v1732_v51 = vpop.f32.mrf.mxu1  ;;  %2396 = vmatpush1.bf16.msra.mxu0 %v3417_v47  ;;  %v3498_v47 = vld [vmem:[%s3939_s3 + $0x1b0] ss:$8 sps:$4 sm:$0xff]   ;;  %v356_v3 = vrot.slane %v3828_v41, %v355_v40 }
 0x114   :  { %v1692_v32 = vpop.f32.mrf.mxu0  ;;  %2397 = vmatprep.subr.bf16.mxu0 %v3422_v62  ;;  %2437 = vmatpush1.bf16.msra.mxu1 %v3465_v58  ;;  %v3461_v62 = vld [vmem:[%s3939_s3 + $0x84] ss:$8 sps:$4 sm:$0xff]   ;;  %v360_v51 = vrot.slane %v3828_v41, %v359_v42 }
 0x115   :  { %v1733_v16 = vpop.f32.mrf.mxu1  ;;  %2438 = vmatprep.subr.bf16.mxu1 %v3470_v57  ;;  %v1688_v32 = vadd.f32 %v3661_v45, %v356_v3 }
 0x116   :  { %v1690_v16 = vadd.f32 %v3670_v48, %v360_v51 }
 0x117   :  { %2398 = vmatpush1.bf16.msra.mxu0 %v3420_v31  ;;  %v3459_v31 = vld [vmem:[%s3939_s3 + $0x80] ss:$8 sps:$4 sm:$0xff]  }
 0x118   :  { %2399 = vmatprep.subr.bf16.mxu0 %v3425_v17  ;;  %2439 = vmatpush1.bf16.msra.mxu1 %v3468_v59  ;;  %v1729_v17 = vadd.f32 %v3663_v46, %v1688_v32  ;;  %v1731_v58 = vadd.f32 %v3672_v50, %v1690_v16  ;;  %v3506_v46 = vld [vmem:[%s3939_s3 + $0x194] ss:$8 sps:$4 sm:$0xff]  }
 0x119   :  { %2440 = vmatprep.subr.bf16.mxu1 %v3473_v61  ;;  %v3504_v61 = vld [vmem:[%s3939_s3 + $0x190] ss:$8 sps:$4 sm:$0xff]  }
 0x11b   :  { %2400 = vmatpush1.bf16.msra.mxu0 %v3423_v56  ;;  %v3501_v56 = vld [vmem:[%s3939_s3 + $0x1a0] ss:$8 sps:$4 sm:$0xff]  }
 0x11c   :  { %2401 = vmatprep.subr.bf16.mxu0 %v3428_v53  ;;  %2441 = vmatpush1.bf16.msra.mxu1 %v3471_v0 }
 0x11d   :  { %2442 = vmatprep.subr.bf16.mxu1 %v3476_v2 }
 0x11f   :  { %2402 = vmatpush1.bf16.msra.mxu0 %v3426_v49 }
 0x120   :  { %2403 = vmatprep.subr.bf16.mxu0 %v3431_v60  ;;  %2443 = vmatpush1.bf16.msra.mxu1 %v3474_v5 }
 0x121   :  { %2444 = vmatprep.subr.bf16.mxu1 %v3479_v7 }
 0x123   :  { %2404 = vmatpush1.bf16.msra.mxu0 %v3429_v63 }
 0x124   :  { %2405 = vmatprep.subr.bf16.mxu0 %v3434_v1  ;;  %2445 = vmatpush1.bf16.msra.mxu1 %v3477_v9 }
 0x125   :  { %2446 = vmatprep.subr.bf16.mxu1 %v3482_v11 }
 0x127   :  { %2406 = vmatpush1.bf16.msra.mxu0 %v3432_v4  ;;  %v3509_v4 = vld [vmem:[%s3939_s3 + $0x184] ss:$8 sps:$4 sm:$0xff]  }
 0x128   :  { %2407 = vmatprep.subr.bf16.mxu0 %v3437_v6  ;;  %2447 = vmatpush1.bf16.msra.mxu1 %v3480_v13  ;;  %v3507_v6 = vld [vmem:[%s3939_s3 + $0x180] ss:$8 sps:$4 sm:$0xff]  }
 0x129   :  { %2448 = vmatprep.subr.bf16.mxu1 %v3485_v15 }
 0x12b   :  { %2408 = vmatpush1.bf16.msra.mxu0 %v3435_v8 }
 0x12c   :  { %2409 = vmatprep.subr.bf16.mxu0 %v3440_v10  ;;  %2449 = vmatpush1.bf16.msra.mxu1 %v3483_v19 }
 0x12d   :  { %2450 = vmatprep.subr.bf16.mxu1 %v3488_v21  ;;  %v3511_v21 = vld [vmem:[%s3941_s5 + $0x38] sm:$0xff]  }
 0x12f   :  { %2410 = vmatpush2.bf16.msra.mxu0 %v3438_v12 }
 0x130   :  { %2411 = vmatprep.subr.bf16.mxu0 %v3443_v14  ;;  %2451 = vmatpush2.bf16.msra.mxu1 %v3486_v23  ;;  %v3513_v23 = vld [vmem:[%s3941_s5 + $0x30] sm:$0xff]  }
 0x131   :  { %2452 = vmatprep.subr.bf16.mxu1 %v3491_v25  ;;  %v3515_v25 = vld [vmem:[%s3941_s5 + $0x28] sm:$0xff]  }
 0x133   :  { %2412 = vmatpush2.bf16.msra.mxu0 %v3441_v18 }
 0x134   :  { %2413 = vmatprep.subr.bf16.mxu0 %v3446_v20  ;;  %2453 = vmatpush2.bf16.msra.mxu1 %v3489_v27  ;;  %v3510_v20 = vld [vmem:[%s3941_s5 + $0x78] sm:$0xff]   ;;  %v3517_v27 = vld [vmem:[%s3941_s5 + $0x20] sm:$0xff]  }
 0x135   :  { %2454 = vmatprep.subr.bf16.mxu1 %v3494_v29  ;;  %v3519_v29 = vld [vmem:[%s3941_s5 + $0x18] sm:$0xff]  }
 0x137   :  { %2414 = vmatpush2.bf16.msra.mxu0 %v3444_v22  ;;  %v3512_v22 = vld [vmem:[%s3941_s5 + $0x70] sm:$0xff]  }
 0x138   :  { %2415 = vmatprep.subr.bf16.mxu0 %v3449_v24  ;;  %2455 = vmatpush2.bf16.msra.mxu1 %v3492_v33  ;;  %v3514_v24 = vld [vmem:[%s3941_s5 + $0x68] sm:$0xff]   ;;  %v363_v33 = vsub.s32 2, %v3595_v43 }
 0x139   :  { %2456 = vmatprep.subr.bf16.mxu1 %v3497_v35 }
 0x13a   :  { %v364_v35 = vrot.slane %v3828_v41, %v363_v33 }
 0x13b   :  { %2416 = vmatpush2.bf16.msra.mxu0 %v3447_v26  ;;  %v3516_v26 = vld [vmem:[%s3941_s5 + $0x60] sm:$0xff]  }
 0x13c   :  { %2417 = vmatprep.subr.bf16.mxu0 %v3452_v28  ;;  %2457 = vmatpush2.bf16.msra.mxu1 %v3495_v37  ;;  %v3518_v28 = vld [vmem:[%s3941_s5 + $0x58] sm:$0xff]  }
 0x13d   :  { %2458 = vmatprep.subr.bf16.mxu1 %v3500_v39 }
 0x13f   :  { %2418 = vmatpush2.bf16.msra.mxu0 %v3450_v30  ;;  %v3520_v30 = vld [vmem:[%s3941_s5 + $0x50] sm:$0xff]  }
 0x140   :  { %2419 = vmatprep.subr.bf16.mxu0 %v3455_v34  ;;  %2459 = vmatpush2.bf16.msra.mxu1 %v3498_v47  ;;  %v367_v34 = vsub.s32 3, %v3595_v43 }
 0x141   :  { %2460 = vmatprep.subr.bf16.mxu1 %v3503_v52 }
 0x143   :  { %2420 = vmatpush2.bf16.msra.mxu0 %v3453_v36  ;;  %v368_v36 = vrot.slane %v3828_v41, %v367_v34 }
 0x144   :  { %2421 = vmatprep.subr.bf16.mxu0 %v3458_v38  ;;  %2461 = vmatpush2.bf16.msra.mxu1 %v3501_v56 }
 0x145   :  { %2462 = vmatprep.subr.bf16.mxu1 %v3506_v46 }
 0x147   :  { %2422 = vmatpush2.bf16.msra.mxu0 %v3456_v44 }
 0x148   :  { %2423 = vmatprep.subr.bf16.mxu0 %v3461_v62  ;;  %2463 = vmatpush2.bf16.msra.mxu1 %v3504_v61  ;;  %v3523_v61 = vld [vmem:[%s3941_s5 + $0x8] sm:$0xff]  }
 0x149   :  { %2464 = vmatprep.subr.bf16.mxu1 %v3509_v4 }
 0x14b   :  { %2424 = vmatpush2.bf16.msra.mxu0 %v3459_v31 }
 0x14c   :  { %2465 = vmatpush2.bf16.msra.mxu1 %v3507_v6  ;;  %3002 = vmatprep.subr.bf16.mxu0 %v3510_v20 }
 0x14e   :  { %v1769_v54 = vpop.f32.mrf.mxu0 }
 0x14f   :  { %v1810_v55 = vpop.f32.mrf.mxu1  ;;  %v1770_v53 = vadd.f32 %v1769_v54, %v1729_v17 }
 0x150   :  { %v1771_v45 = vpop.f32.mrf.mxu0 }
 0x151   :  { %v1812_v57 = vpop.f32.mrf.mxu1  ;;  %v1811_v48 = vadd.f32 %v1810_v55, %v1770_v53  ;;  %v1772_v49 = vadd.f32 %v1771_v45, %v1731_v58 }
 0x152   :  { %v1773_v59 = vpop.f32.mrf.mxu0 }
 0x153   :  { %v1814_v60 = vpop.f32.mrf.mxu1  ;;  %vm1981_vm0 = vcmp.ge.f32.partialorder %v1811_v48, 0.0  ;;  %v1985_v63 = vmul.f32 0.2, %v1811_v48  ;;  %v1813_v50 = vadd.f32 %v1812_v57, %v1772_v49  ;;  %v3521_v49 = vld [vmem:[%s3941_s5 + $0x10] sm:$0xff]   ;;  %v3522_v59 = vld [vmem:[%s3941_s5 + $0x48] sm:$0xff]  }
 0x154   :  { %v1774_v0 = vpop.f32.mrf.mxu0 }
 0x155   :  { %v1815_v1 = vpop.f32.mrf.mxu1  ;;  %vm1982_vm1 = vcmp.ge.f32.partialorder %v1813_v50, 0.0  ;;  %v1986_v2 = vmul.f32 0.2, %v1813_v50  ;;  %v1989_v5 = vsel %vm1981_vm0, %v1811_v48, %v1985_v63 }
 0x156   :  { %v1993_v9 = vpack.c.bf16 %v1989_v5, %v1989_v5  ;;  %v3525_v1 = vld [vmem:[%s3941_s5] sm:$0xff]  }
 0x157   :  { %v1990_v7 = vsel %vm1982_vm1, %v1813_v50, %v1986_v2  ;;  %v3524_v50 = vld [vmem:[%s3941_s5 + $0x40] sm:$0xff]  }
 0x158   :  { %v1994_v8 = vpack.c.bf16 %v1990_v7, %v1990_v7  ;;  %v2061_v2 = vld [vmem:[%s3940_s4] sm:$0x3] }
 0x159   :  { %v2066_v4 = vrot.slane %v2061_v2, %v355_v40  ;;  %v2070_v5 = vrot.slane %v2061_v2, %v359_v42  ;;  %v2985_v40 = vld [vmem:[%s3942_s6] ss:$0 sm:$0xff] }
 0x15a   :  { %2425 = vmatprep.mubr.bf16.mxu0 %v1994_v8 }
 0x15b   :  { %2426 = vmatmul.mubr.bf16.vlgmr.msra.gmra.mxu0 %v1993_v9 }
 0x15c   :  { %3003 = vmatpush3.bf16.msra.mxu0 %v3511_v21 }
 0x15d   :  { %3004 = vmatprep.subr.bf16.mxu0 %v3512_v22 }
 0x160   :  { %3005 = vmatpush3.bf16.msra.mxu0 %v3513_v23 }
 0x161   :  { %3006 = vmatprep.subr.bf16.mxu0 %v3514_v24 }
 0x164   :  { %3007 = vmatpush3.bf16.msra.mxu0 %v3515_v25 }
 0x165   :  { %3008 = vmatprep.subr.bf16.mxu0 %v3516_v26 }
 0x168   :  { %3009 = vmatpush3.bf16.msra.mxu0 %v3517_v27 }
 0x169   :  { %3010 = vmatprep.subr.bf16.mxu0 %v3518_v28 }
 0x16c   :  { %3011 = vmatpush3.bf16.msra.mxu0 %v3519_v29 }
 0x16d   :  { %3012 = vmatprep.subr.bf16.mxu0 %v3520_v30 }
 0x170   :  { %3013 = vmatpush3.bf16.msra.mxu0 %v3521_v49 }
 0x171   :  { %3014 = vmatprep.subr.bf16.mxu0 %v3522_v59 }
 0x174   :  { %3015 = vmatpush3.bf16.msra.mxu0 %v3523_v61 }
 0x175   :  { %3016 = vmatprep.subr.bf16.mxu0 %v3524_v50 }
 0x178   :  { %3017 = vmatpush3.bf16.msra.mxu0 %v3525_v1 }
 0x18e   :  { %v1851_v10 = vpop.f32.mrf.mxu0 }
 0x18f   :  { %v1892_v11 = vpop.f32.mrf.mxu1  ;;  %v1852_v37 = vadd.f32 %v1851_v10, %v364_v35 }
 0x190   :  { %v1853_v12 = vpop.f32.mrf.mxu0 }
 0x191   :  { %v1894_v13 = vpop.f32.mrf.mxu1  ;;  %v1854_v38 = vadd.f32 %v1853_v12, %v368_v36  ;;  %v1893_v39 = vadd.f32 %v1892_v11, %v1852_v37 }
 0x192   :  { %v1855_v14 = vpop.f32.mrf.mxu0 }
 0x193   :  { %v1896_v15 = vpop.f32.mrf.mxu1  ;;  %v1895_v62 = vadd.f32 %v1894_v13, %v1854_v38 }
 0x194   :  { %v1856_v18 = vpop.f32.mrf.mxu0 }
 0x195   :  { %v1897_v19 = vpop.f32.mrf.mxu1 }
 0x1ce   :  { %v1933_v44 = vpop.f32.mrf.mxu0 }
 0x1cf   :  { %v1974_v47 = vpop.f32.mrf.mxu1  ;;  %v1934_v3 = vadd.f32 %v1933_v44, %v1893_v39 }
 0x1d0   :  { %v1935_v51 = vpop.f32.mrf.mxu0 }
 0x1d1   :  { %v1976_v31 = vpop.f32.mrf.mxu1  ;;  %v1975_v32 = vadd.f32 %v1974_v47, %v1934_v3  ;;  %v1936_v16 = vadd.f32 %v1935_v51, %v1895_v62 }
 0x1d2   :  { %v1937_v17 = vpop.f32.mrf.mxu0 }
 0x1d3   :  { %v1978_v52 = vpop.f32.mrf.mxu1  ;;  %vm1983_vm2 = vcmp.ge.f32.partialorder %v1975_v32, 0.0  ;;  %v1987_v54 = vmul.f32 0.2, %v1975_v32  ;;  %v1977_v55 = vadd.f32 %v1976_v31, %v1936_v16 }
 0x1d4   :  { %v1938_v56 = vpop.f32.mrf.mxu0 }
 0x1d5   :  { %v1979_v58 = vpop.f32.mrf.mxu1  ;;  %vm1984_vm3 = vcmp.ge.f32.partialorder %v1977_v55, 0.0  ;;  %v1988_v41 = vmul.f32 0.2, %v1977_v55  ;;  %v1991_v53 = vsel %vm1983_vm2, %v1975_v32, %v1987_v54 }
 0x1d6   :  { %v1995_v48 = vpack.c.bf16 %v1991_v53, %v1991_v53 }
 0x1d7   :  { %v1992_v45 = vsel %vm1984_vm3, %v1977_v55, %v1988_v41 }
 0x1d8   :  { %v1996_v57 = vpack.c.bf16 %v1992_v45, %v1992_v45 }
 0x1da   :  { %2466 = vmatprep.mubr.bf16.mxu1 %v1996_v57 }
 0x1db   :  { %2467 = vmatmul.mubr.bf16.vlgmr.msra.gmra.mxu1 %v1995_v48 }
 0x21b   :  { %v2427_v46 = vpop.f32.mrf.mxu0 }
 0x21c   :  { %v2428_v6 = vadd.f32 %v2427_v46, %v2066_v4 }
 0x21d   :  { %v2429_v60 = vpop.f32.mrf.mxu0 }
 0x21e   :  { %v2430_v8 = vadd.f32 %v2429_v60, %v2070_v5 }
 0x21f   :  { %v2431_v63 = vpop.f32.mrf.mxu0 }
 0x221   :  { %v2432_v0 = vpop.f32.mrf.mxu0 }
 0x29b   :  { %v2468_v7 = vpop.f32.mrf.mxu1 }
 0x29c   :  { %v2469_v9 = vadd.f32 %v2468_v7, %v2428_v6 }
 0x29d   :  { %v2470_v10 = vpop.f32.mrf.mxu1 }
 0x29e   :  { %vm2475_vm4 = vcmp.ge.f32.partialorder %v2469_v9, 0.0  ;;  %v2477_v11 = vmul.f32 0.2, %v2469_v9  ;;  %v2471_v12 = vadd.f32 %v2470_v10, %v2430_v8 }
 0x29f   :  { %v2472_v13 = vpop.f32.mrf.mxu1 }
 0x2a0   :  { %vm2476_vm5 = vcmp.ge.f32.partialorder %v2471_v12, 0.0  ;;  %v2478_v14 = vmul.f32 0.2, %v2471_v12  ;;  %v2479_v15 = vsel %vm2475_vm4, %v2469_v9, %v2477_v11 }
 0x2a1   :  { %v2473_v18 = vpop.f32.mrf.mxu1  ;;  %v2481_v21 = vpack.c.bf16 %v2479_v15, %v2479_v15 }
 0x2a2   :  { %v2480_v19 = vsel %vm2476_vm5, %v2471_v12, %v2478_v14 }
 0x2a3   :  { %v2482_v20 = vpack.c.bf16 %v2480_v19, %v2480_v19 }
 0x2a5   :  { %2650 = vmatprep.mubr.bf16.mxu0 %v2482_v20 }
 0x2a6   :  { %2651 = vmatmul.mubr.bf16.vlgmr.msra.gmra.mxu0 %v2481_v21 }
 0x366   :  { %v3018_v43 = vpop.f32.mrf.mxu0 }
 0x368   :  { %v3019_v42 = vpop.f32.mrf.mxu0 }
 0x369   :  { %v3020_v22 = vadd.f32 %v3019_v42, %v3018_v43 }
 0x36a   :  { %v3021_v23 = vpop.f32.mrf.mxu0 }
 0x36b   :  { %v2653_v24 = vadd.f32 %v3020_v22, %v2985_v40 }
 0x36c   :  { %v3022_v25 = vpop.f32.mrf.mxu0 }
 0x36d   :  { %2659 = vst.msk [vmem:[%s3943_s7] sm:$0x3] %vm2658_vm6, %v2653_v24 }
 0x36e   :  { %2664 = vsyncpa [#allocation3], 1 }

// kernel: dgcnn_partseg_forward.20
= control target key start
LH: loop header
LB: loop body
LE: loop exit
PB: predicated region body
PF: predicated region fallthrough
CT: control target
= control target key end

     0   :  { %s1274_s24 = smov 0   ;;  %s1276_s25 = smov 0   ;;  %s1445_s0 = inlined_call_operand.vmem [shape: bf16[2,4,16,3], index: 0, kind: input, shape index: {}]   ;;  %s1446_s1 = inlined_call_operand.vmem [shape: f32[2,16,3], index: 1, kind: input, shape index: {}]   ;;  %s1447_s2 = inlined_call_operand.vmem [shape: bf16[3,64], index: 2, kind: input, shape index: {}]   ;;  %s1448_s3 = inlined_call_operand.vmem [shape: bf16[3,64], index: 3, kind: input, shape index: {}]   ;;  %s1449_s4 = inlined_call_operand.vmem [shape: f32[1,64], index: 4, kind: input, shape index: {}]   ;;  %s1450_s5 = inlined_call_operand.vmem [shape: bf16[64,64], index: 5, kind: input, shape index: {}]   ;;  %s1451_s6 = inlined_call_operand.vmem [shape: f32[1,64], index: 6, kind: input, shape index: {}]   ;;  %s1452_s7 = inlined_call_operand.vmem [shape: bf16[2,16,64], index: 7, kind: output, shape index: {}]  }
   0x1   :  { %s1278_s26 = smov 0  }
   0x2 LB: > { %s29_s27 = sadd.s32 1, %s1225_s25  ;;  %p1023_p0 = scmp.ge.s32.totalorder %s1229_s26, 1  ;;  %s1229_s26 = sphi %s1278_s26, %s17_s26   ;;  %s1225_s25 = sphi %s1276_s25, %s1454_s25   ;;  %s1221_s24 = sphi %s1274_s24, %s1453_s24  }
   0x3   : > { %p31_p1 = scmp.ge.s32.totalorder %s29_s27, 2  ;;  %p275_p2 = scmp.lt.s32.totalorder %s1229_s26, 3 }
   0x5   : > { %s1456_s27 = smov (%p31_p1, %s29_s27), 0  ;;  %p276_p3 = pnand %p1023_p0, %p275_p2 }
   0x6   : > { %p325_p4 = scmp.lt.s32.totalorder (!%p276_p3), %s1221_s24, 1 }
   0x7   : > { %279 = sbr.rel (%p276_p3) target bundleno = 651 (0x28b), region = 48 }
   0xc   : > { %vm370_vm0 = vcmask 1040384   ;;  %vm371_vm1 = vcmask 1041408   ;;  %v420_v0 = vld [vmem:[%s1447_s2] sm:$0x3]  ;;  %v1231_v1 = vmov 0.0   ;;  %v1232_v2 = vmov 65535  }
   0xd   : > { %1100 = vmatprep.subr.bf16.mxu1 %v1231_v1  ;;  %1094 = vmatprep.subr.bf16.mxu0 %v1231_v1  ;;  %v372_v3 = vsel %vm370_vm0, 4294967295, %v1232_v2  ;;  %v358_v4 = vld [vmem:[%s1448_s3] sm:$0x3]  ;;  %vm1233_vm2 = vmmov 0   ;;  %s1458_s24 = smov (!%p325_p4, %s1221_s24), 1  ;;  %v1324_v8 = vld [vmem:[%s1450_s5 + $0x18] sm:$0xff]  }
   0xe   : > { %v373_v5 = vsel %vm371_vm1, %v372_v3, 0  ;;  %1096 = vmatprep.mubr.msk.bf16.mxu0 %vm1233_vm2, %v1231_v1  ;;  %1102 = vmatprep.mubr.msk.bf16.mxu1 %vm1233_vm2, %v1231_v1  ;;  %s1059_s9 = sshll.u32 %s1458_s24, 5  ;;  %s1060_s10 = sshll.u32 %s1458_s24, 4  ;;  %vm366_vm3 = vcmask 23552   ;;  %v1346_v14 = vld [vmem:[%s1450_s5 + $0x10] sm:$0xff]   ;;  %v1355_v15 = vld [vmem:[%s1450_s5 + $0x8] sm:$0xff]  }
   0xf   : > { %v1304_v6 = vand.u32 %v420_v0, %v373_v5  ;;  %v375_v7 = vand.u32 %v373_v5, %v358_v4  ;;  %s1315_s13 = scalar_lea.vmem %s1445_s0, %s1059_s9  ;;  %s342_s16 = scalar_lea.vmem %s1446_s1, %s1060_s10  ;;  %v1364_v16 = vld [vmem:[%s1450_s5] sm:$0xff]   ;;  %vm519_vm6 = vcmask 523264  }
  0x10   : > { %v355_v9 = vld [vmem:[%s342_s16] sm:$0xff]  ;;  %v356_v10 = vld [vmem:[%s342_s16 + $0x8] sm:$0xff]  ;;  %v1205_v46 = vld [vmem:[%s1315_s13 + $0x10] sm:$0xff]   ;;  %s1061_s10 = sshll.u32 %s1458_s24, 3 }
  0x11   : > { %1101 = vmatpush3.bf16.msra.mxu1 %v1304_v6  ;;  %1095 = vmatpush3.bf16.msra.mxu0 %v375_v7  ;;  %v357_v11 = vpack.c.bf16 %v356_v10, %v355_v9  ;;  %v1199_v12 = vld [vmem:[%s1315_s13] sm:$0xff]   ;;  %v1200_v13 = vld [vmem:[%s1315_s13 + $0x8] sm:$0xff]   ;;  %v1206_v47 = vld [vmem:[%s1315_s13 + $0x18] sm:$0xff]   ;;  %s352_s13 = scalar_lea.vmem %s1452_s7, %s1061_s10 }
  0x12   : > { %1118 = vmatprep.subr.bf16.mxu1 %v1231_v1  ;;  %1106 = vmatprep.subr.bf16.mxu0 %v1231_v1  ;;  %v1030_v17 = vld [vmem:[%s1449_s4] ss:$0 sm:$0xff] }
  0x13   : > { %v1416_v48 = vld [vmem:[%s1451_s6] ss:$0 sm:$0xff] }
  0x14   : > { %1097 = vmatmul.mubr.msk.bf16.vlgmr.msra.gmra.mxu0 %vm366_vm3, %v357_v11  ;;  %1103 = vmatmul.mubr.msk.bf16.vlgmr.msra.gmra.mxu1 %vm366_vm3, %v1199_v12 }
  0x15   : > { %1119 = vmatpush3.bf16.msra.mxu1 %v1304_v6  ;;  %1120 = vmatprep.mubr.msk.bf16.mxu1 %vm1233_vm2, %v1231_v1 }
  0x16   : > { %1107 = vmatpush3.bf16.msra.mxu0 %v1324_v8  ;;  %1124 = vmatprep.subr.bf16.mxu1 %v1231_v1 }
  0x17   : > { %1108 = vmatprep.subr.bf16.mxu0 %v1231_v1  ;;  %1114 = vmatprep.mubr.msk.bf16.mxu0 %vm1233_vm2, %v1231_v1 }
  0x1a   : > { %1109 = vmatpush3.bf16.msra.mxu0 %v1346_v14 }
  0x1b   : > { %1110 = vmatprep.subr.bf16.mxu0 %v1231_v1 }
  0x1c   : > { %1121 = vmatmul.mubr.msk.bf16.vlgmr.msra.gmra.mxu1 %vm366_vm3, %v1200_v13 }
  0x1d   : > { %1125 = vmatpush3.bf16.msra.mxu1 %v1324_v8  ;;  %1132 = vmatprep.mubr.msk.bf16.mxu1 %vm1233_vm2, %v1231_v1 }
  0x1e   : > { %1126 = vmatprep.subr.bf16.mxu1 %v1231_v1  ;;  %1111 = vmatpush3.bf16.msra.mxu0 %v1355_v15 }
  0x1f   : > { %1112 = vmatprep.subr.bf16.mxu0 %v1231_v1 }
  0x21   : > { %1127 = vmatpush3.bf16.msra.mxu1 %v1346_v14 }
  0x22   : > { %1128 = vmatprep.subr.bf16.mxu1 %v1231_v1  ;;  %1113 = vmatpush3.bf16.msra.mxu0 %v1364_v16 }
  0x23   : > { %1136 = vmatprep.subr.bf16.mxu0 %v1231_v1 }
  0x25   : > { %1129 = vmatpush3.bf16.msra.mxu1 %v1355_v15 }
  0x26   : > { %1130 = vmatprep.subr.bf16.mxu1 %v1231_v1 }
  0x29   : > { %1131 = vmatpush3.bf16.msra.mxu1 %v1364_v16 }
  0x2a   : > { %1154 = vmatprep.subr.bf16.mxu1 %v1231_v1 }
  0xd4   : > { %v411_v18 = vpop.f32.mrf.mxu0  ;;  %v466_v19 = vpop.f32.mrf.mxu1 }
  0xd5   : > { %v1373_v20 = vadd.f32 %v1030_v17, %v411_v18 }
  0xd6   : > { %v1098_v21 = vpop.f32.mrf.mxu0  ;;  %v1104_v22 = vpop.f32.mrf.mxu1 }
  0xd7   : > { %v467_v23 = vadd.f32 %v466_v19, %v1373_v20 }
  0xd8   : > { %v414_v24 = vpop.f32.mrf.mxu0  ;;  %v469_v25 = vpop.f32.mrf.mxu1 }
  0xd9   : > { %v1376_v26 = vadd.f32 %v1030_v17, %v414_v24  ;;  %v475_v29 = vmul.f32 0.2, %v467_v23  ;;  %vm473_vm4 = vcmp.ge.f32.partialorder %v467_v23, 0.0 }
  0xda   : > { %v1099_v27 = vpop.f32.mrf.mxu0  ;;  %v1105_v28 = vpop.f32.mrf.mxu1 }
  0xdb   : > { %v470_v30 = vadd.f32 %v469_v25, %v1376_v26  ;;  %v477_v35 = vsel %vm473_vm4, %v467_v23, %v475_v29  ;;  %vm911_vm4 = vcmask 519168  }
  0xdc   : > { %v615_v31 = vpop.f32.mrf.mxu1 }
  0xdd   : > { %vm474_vm5 = vcmp.ge.f32.partialorder %v470_v30, 0.0  ;;  %v476_v32 = vmul.f32 0.2, %v470_v30  ;;  %v616_v33 = vadd.f32 %v615_v31, %v1373_v20 }
  0xde   : > { %v1122_v34 = vpop.f32.mrf.mxu1 }
  0xdf   : > { %v478_v36 = vsel %vm474_vm5, %v470_v30, %v476_v32  ;;  %v624_v39 = vmul.f32 0.2, %v616_v33  ;;  %vm622_vm7 = vcmp.ge.f32.partialorder %v616_v33, 0.0 }
  0xe0   : > { %v479_v37 = vpack.c.bf16 %v478_v36, %v477_v35  ;;  %v618_v38 = vpop.f32.mrf.mxu1 }
  0xe1   : > { %v619_v40 = vadd.f32 %v618_v38, %v1376_v26  ;;  %v626_v43 = vsel %vm622_vm7, %v616_v33, %v624_v39 }
  0xe2   : > { %1115 = vmatmul.mubr.msk.bf16.vlgmr.msra.gmra.mxu0 %vm519_vm6, %v479_v37  ;;  %v1123_v41 = vpop.f32.mrf.mxu1 }
  0xe3   : > { %vm623_vm8 = vcmp.ge.f32.partialorder %v619_v40, 0.0  ;;  %v625_v42 = vmul.f32 0.2, %v619_v40  ;;  %1137 = vmatpush3.bf16.msra.mxu0 %v1304_v6  ;;  %1138 = vmatprep.mubr.msk.bf16.mxu0 %vm1233_vm2, %v1231_v1 }
  0xe4   : > { %1142 = vmatprep.subr.bf16.mxu0 %v1231_v1 }
  0xe5   : > { %v627_v44 = vsel %vm623_vm8, %v619_v40, %v625_v42 }
  0xe6   : > { %v628_v45 = vpack.c.bf16 %v627_v44, %v626_v43 }
  0xe8   : > { %1133 = vmatmul.mubr.msk.bf16.vlgmr.msra.gmra.mxu1 %vm519_vm6, %v628_v45 }
  0xe9   : > { %1155 = vmatpush3.bf16.msra.mxu1 %v1304_v6  ;;  %1156 = vmatprep.mubr.msk.bf16.mxu1 %vm1233_vm2, %v1231_v1 }
  0xea   : > { %1139 = vmatmul.mubr.msk.bf16.vlgmr.msra.gmra.mxu0 %vm366_vm3, %v1205_v46  ;;  %1160 = vmatprep.subr.bf16.mxu1 %v1231_v1 }
  0xeb   : > { %1143 = vmatpush3.bf16.msra.mxu0 %v1324_v8  ;;  %1150 = vmatprep.mubr.msk.bf16.mxu0 %vm1233_vm2, %v1231_v1 }
  0xec   : > { %1144 = vmatprep.subr.bf16.mxu0 %v1231_v1 }
  0xef   : > { %1145 = vmatpush3.bf16.msra.mxu0 %v1346_v14 }
  0xf0   : > { %1157 = vmatmul.mubr.msk.bf16.vlgmr.msra.gmra.mxu1 %vm366_vm3, %v1206_v47  ;;  %1146 = vmatprep.subr.bf16.mxu0 %v1231_v1 }
  0xf1   : > { %1161 = vmatpush3.bf16.msra.mxu1 %v1324_v8  ;;  %1168 = vmatprep.mubr.msk.bf16.mxu1 %vm1233_vm2, %v1231_v1 }
  0xf2   : > { %1162 = vmatprep.subr.bf16.mxu1 %v1231_v1 }
  0xf3   : > { %1147 = vmatpush3.bf16.msra.mxu0 %v1355_v15 }
  0xf4   : > { %1148 = vmatprep.subr.bf16.mxu0 %v1231_v1 }
  0xf5   : > { %1163 = vmatpush3.bf16.msra.mxu1 %v1346_v14 }
  0xf6   : > { %1164 = vmatprep.subr.bf16.mxu1 %v1231_v1 }
  0xf7   : > { %1149 = vmatpush3.bf16.msra.mxu0 %v1364_v16 }
  0xf9   : > { %1165 = vmatpush3.bf16.msra.mxu1 %v1355_v15 }
  0xfa   : > { %1166 = vmatprep.subr.bf16.mxu1 %v1231_v1 }
  0xfd   : > { %1167 = vmatpush3.bf16.msra.mxu1 %v1364_v16 }
 0x1a2   : > { %v557_v49 = vpop.f32.mrf.mxu0 }
 0x1a3   : > { %v558_v51 = vadd.f32 %v1416_v48, %v557_v49 }
 0x1a4   : > { %v1116_v50 = vpop.f32.mrf.mxu0 }
 0x1a5   : > { %v566_v56 = vmul.f32 0.2, %v558_v51  ;;  %vm564_vm9 = vcmp.ge.f32.partialorder %v558_v51, 0.0 }
 0x1a6   : > { %v560_v52 = vpop.f32.mrf.mxu0 }
 0x1a7   : > { %v561_v53 = vadd.f32 %v1416_v48, %v560_v52  ;;  %v568_v1 = vsel %vm564_vm9, %v558_v51, %v566_v56 }
 0x1a8   : > { %v1117_v54 = vpop.f32.mrf.mxu0  ;;  %v666_v55 = vpop.f32.mrf.mxu1 }
 0x1a9   : > { %v667_v57 = vadd.f32 %v1416_v48, %v666_v55  ;;  %v567_v62 = vmul.f32 0.2, %v561_v53  ;;  %vm565_vm11 = vcmp.ge.f32.partialorder %v561_v53, 0.0 }
 0x1aa   : > { %v1134_v58 = vpop.f32.mrf.mxu1  ;;  %v726_v59 = vpop.f32.mrf.mxu0 }
 0x1ab   : > { %vm673_vm10 = vcmp.ge.f32.partialorder %v667_v57, 0.0  ;;  %v675_v60 = vmul.f32 0.2, %v667_v57  ;;  %v727_v61 = vadd.f32 %v726_v59, %v1373_v20  ;;  %v569_v10 = vsel %vm565_vm11, %v561_v53, %v567_v62 }
 0x1ac   : > { %v669_v63 = vpop.f32.mrf.mxu1  ;;  %v1140_v0 = vpop.f32.mrf.mxu0 }
 0x1ad   : > { %v677_v2 = vsel %vm673_vm10, %v667_v57, %v675_v60  ;;  %v670_v3 = vadd.f32 %v1416_v48, %v669_v63  ;;  %v735_v7 = vmul.f32 0.2, %v727_v61  ;;  %vm733_vm13 = vcmp.ge.f32.partialorder %v727_v61, 0.0 }
 0x1ae   : > { %v679_v4 = vmax.f32 %v568_v1, %v677_v2  ;;  %v1135_v5 = vpop.f32.mrf.mxu1  ;;  %v729_v6 = vpop.f32.mrf.mxu0 }
 0x1af   : > { %vm674_vm12 = vcmp.ge.f32.partialorder %v670_v3, 0.0  ;;  %v676_v8 = vmul.f32 0.2, %v670_v3  ;;  %v730_v9 = vadd.f32 %v729_v6, %v1376_v26  ;;  %v737_v18 = vsel %vm733_vm13, %v727_v61, %v735_v7 }
 0x1b0   : > { %v1141_v11 = vpop.f32.mrf.mxu0  ;;  %v837_v12 = vpop.f32.mrf.mxu1 }
 0x1b1   : > { %v678_v13 = vsel %vm674_vm12, %v670_v3, %v676_v8  ;;  %vm734_vm14 = vcmp.ge.f32.partialorder %v730_v9, 0.0  ;;  %v736_v14 = vmul.f32 0.2, %v730_v9  ;;  %v838_v15 = vadd.f32 %v837_v12, %v1373_v20 }
 0x1b2   : > { %v680_v16 = vmax.f32 %v569_v10, %v678_v13  ;;  %v1158_v17 = vpop.f32.mrf.mxu1 }
 0x1b3   : > { %v738_v19 = vsel %vm734_vm14, %v730_v9, %v736_v14  ;;  %v846_v23 = vmul.f32 0.2, %v838_v15  ;;  %vm844_vm15 = vcmp.ge.f32.partialorder %v838_v15, 0.0 }
 0x1b4   : > { %v739_v21 = vpack.c.bf16 %v738_v19, %v737_v18  ;;  %v840_v22 = vpop.f32.mrf.mxu1 }
 0x1b5   : > { %v841_v24 = vadd.f32 %v840_v22, %v1376_v26  ;;  %v848_v28 = vsel %vm844_vm15, %v838_v15, %v846_v23 }
 0x1b6   : > { %1151 = vmatmul.mubr.msk.bf16.vlgmr.msra.gmra.mxu0 %vm519_vm6, %v739_v21  ;;  %v1159_v25 = vpop.f32.mrf.mxu1 }
 0x1b7   : > { %vm845_vm0 = vcmp.ge.f32.partialorder %v841_v24, 0.0  ;;  %v847_v27 = vmul.f32 0.2, %v841_v24 }
 0x1b9   : > { %v849_v29 = vsel %vm845_vm0, %v841_v24, %v847_v27 }
 0x1ba   : > { %v850_v30 = vpack.c.bf16 %v849_v29, %v848_v28 }
 0x1bc   : > { %1169 = vmatmul.mubr.msk.bf16.vlgmr.msra.gmra.mxu1 %vm519_vm6, %v850_v30 }
 0x276   : > { %v777_v20 = vpop.f32.mrf.mxu0 }
 0x277   : > { %v778_v31 = vadd.f32 %v1416_v48, %v777_v20 }
 0x278   : > { %v1152_v32 = vpop.f32.mrf.mxu0 }
 0x279   : > { %v786_v33 = vmul.f32 0.2, %v778_v31  ;;  %vm784_vm1 = vcmp.ge.f32.partialorder %v778_v31, 0.0 }
 0x27a   : > { %v780_v34 = vpop.f32.mrf.mxu0 }
 0x27b   : > { %v781_v26 = vadd.f32 %v1416_v48, %v780_v34  ;;  %v788_v37 = vsel %vm784_vm1, %v778_v31, %v786_v33 }
 0x27c   : > { %v1153_v35 = vpop.f32.mrf.mxu0  ;;  %v888_v36 = vpop.f32.mrf.mxu1  ;;  %v790_v42 = vmax.f32 %v679_v4, %v788_v37 }
 0x27d   : > { %v787_v38 = vmul.f32 0.2, %v781_v26  ;;  %v889_v39 = vadd.f32 %v1416_v48, %v888_v36  ;;  %vm785_vm2 = vcmp.ge.f32.partialorder %v781_v26, 0.0 }
 0x27e   : > { %v1170_v40 = vpop.f32.mrf.mxu1 }
 0x27f   : > { %vm895_vm3 = vcmp.ge.f32.partialorder %v889_v39, 0.0  ;;  %v897_v41 = vmul.f32 0.2, %v889_v39  ;;  %v789_v44 = vsel %vm785_vm2, %v781_v26, %v787_v38 }
 0x280   : > { %v891_v43 = vpop.f32.mrf.mxu1  ;;  %v791_v51 = vmax.f32 %v680_v16, %v789_v44 }
 0x281   : > { %v899_v45 = vsel %vm895_vm3, %v889_v39, %v897_v41  ;;  %v892_v46 = vadd.f32 %v1416_v48, %v891_v43 }
 0x282   : > { %v901_v47 = vmax.f32 %v790_v42, %v899_v45  ;;  %v1171_v49 = vpop.f32.mrf.mxu1 }
 0x283   : > { %vm896_vm5 = vcmp.ge.f32.partialorder %v892_v46, 0.0  ;;  %v898_v50 = vmul.f32 0.2, %v892_v46 }
 0x284   : > { %v1062_v52 = vpack.c.bf16 %v901_v47, %v901_v47 }
 0x285   : > { %v900_v53 = vsel %vm896_vm5, %v892_v46, %v898_v50 }
 0x286   : > { %912 = vst.msk [vmem:[%s352_s13] sm:$0xf] %vm911_vm4, %v1062_v52  ;;  %v902_v54 = vmax.f32 %v791_v51, %v900_v53 }
 0x288   : > { %v1063_v55 = vpack.c.bf16 %v902_v54, %v902_v54 }
 0x28a   : > { %913 = vst.msk [vmem:[%s352_s13 + $0x4] sm:$0xf] %vm911_vm4, %v1063_v55 }
 0x28b PF: > { %s17_s26 = sadd.s32 1, %s1229_s26   ;;  %s1453_s24 = smov %s1225_s25 }
 0x28c   : > { %p14_p5 = scmp.ge.s32.totalorder %s17_s26, 4   ;;  %s1454_s25 = smov %s1456_s27 }
 0x28e   :  { %16 = sbr.rel (!%p14_p5) target bundleno = 2 (0x2), region = 84 }

// kernel: dgcnn_partseg_forward.22
= control target key start
LH: loop header
LB: loop body
LE: loop exit
PB: predicated region body
PF: predicated region fallthrough
CT: control target
= control target key end

     0   :  { %s1390_s24 = smov 0   ;;  %s1392_s25 = smov 0   ;;  %s1587_s0 = inlined_call_operand.vmem [shape: bf16[2,4,16,64], index: 0, kind: input, shape index: {}]   ;;  %s1588_s1 = inlined_call_operand.vmem [shape: bf16[2,16,64], index: 1, kind: input, shape index: {}]   ;;  %s1589_s2 = inlined_call_operand.vmem [shape: bf16[64,64], index: 2, kind: input, shape index: {}]   ;;  %s1590_s3 = inlined_call_operand.vmem [shape: bf16[64,64], index: 3, kind: input, shape index: {}]   ;;  %s1591_s4 = inlined_call_operand.vmem [shape: f32[1,64], index: 4, kind: input, shape index: {}]   ;;  %s1592_s5 = inlined_call_operand.vmem [shape: bf16[64,64], index: 5, kind: input, shape index: {}]   ;;  %s1593_s6 = inlined_call_operand.vmem [shape: f32[1,64], index: 6, kind: input, shape index: {}]   ;;  %s1594_s7 = inlined_call_operand.vmem [shape: bf16[2,16,64], index: 7, kind: output, shape index: {}]  }
   0x1   :  { %s1394_s26 = smov 0  }
   0x2 LB: > { %s29_s27 = sadd.s32 1, %s1342_s25  ;;  %p1078_p0 = scmp.ge.s32.totalorder %s1346_s26, 1  ;;  %s1346_s26 = sphi %s1394_s26, %s17_s26   ;;  %s1342_s25 = sphi %s1392_s25, %s1596_s25   ;;  %s1338_s24 = sphi %s1390_s24, %s1595_s24  }
   0x3   : > { %p31_p1 = scmp.ge.s32.totalorder %s29_s27, 2  ;;  %p275_p2 = scmp.lt.s32.totalorder %s1346_s26, 3 }
   0x5   : > { %s1598_s27 = smov (%p31_p1, %s29_s27), 0  ;;  %p276_p3 = pnand %p1078_p0, %p275_p2 }
   0x6   : > { %p325_p4 = scmp.lt.s32.totalorder (!%p276_p3), %s1338_s24, 1 }
   0x7   : > { %279 = sbr.rel (%p276_p3) target bundleno = 490 (0x1ea), region = 48 }
   0xc   : > { %v1307_v0 = vld [vmem:[%s1590_s3 + $0x18] sm:$0xff]   ;;  %v1348_v1 = vmov 0.0   ;;  %v1309_v3 = vld [vmem:[%s1590_s3 + $0x10] sm:$0xff]   ;;  %vm1349_vm0 = vmmov 0   ;;  %s1600_s24 = smov (!%p325_p4, %s1338_s24), 1  ;;  %v1311_v5 = vld [vmem:[%s1590_s3 + $0x8] sm:$0xff]  }
   0xd   : > { %1173 = vmatprep.subr.bf16.mxu0 %v1348_v1  ;;  %1185 = vmatprep.subr.bf16.mxu1 %v1348_v1  ;;  %v1416_v2 = vld [vmem:[%s1589_s2 + $0x18] sm:$0xff]   ;;  %v1310_v4 = vld [vmem:[%s1589_s2 + $0x10] sm:$0xff]   ;;  %s1123_s15 = sshll.u32 %s1600_s24, 5  ;;  %v1312_v6 = vld [vmem:[%s1589_s2 + $0x8] sm:$0xff]   ;;  %s1124_s21 = sshll.u32 %s1600_s24, 3  ;;  %vm401_vm1 = vcmask 523264  }
   0xe   : > { %1174 = vmatpush3.bf16.msra.mxu0 %v1307_v0  ;;  %1181 = vmatprep.mubr.msk.bf16.mxu0 %vm1349_vm0, %v1348_v1  ;;  %s1444_s20 = scalar_lea.vmem %s1587_s0, %s1123_s15  ;;  %s342_s28 = scalar_lea.vmem %s1588_s1, %s1124_s21  ;;  %v1313_v7 = vld [vmem:[%s1590_s3] sm:$0xff]   ;;  %v1465_v11 = vld [vmem:[%s1592_s5 + $0x18] sm:$0xff]   ;;  %v1504_v15 = vld [vmem:[%s1592_s5 + $0x10] sm:$0xff]  }
   0xf   : > { %1186 = vmatpush3.bf16.msra.mxu1 %v1416_v2  ;;  %1175 = vmatprep.subr.bf16.mxu0 %v1348_v1  ;;  %v1314_v8 = vld [vmem:[%s1589_s2] sm:$0xff]   ;;  %v1317_v12 = vld [vmem:[%s1444_s20 + $0x8] sm:$0xff]   ;;  %v1318_v13 = vld [vmem:[%s1444_s20 + $0x10] sm:$0xff]   ;;  %s352_s29 = scalar_lea.vmem %s1594_s7, %s1124_s21 }
  0x10   : > { %1187 = vmatprep.subr.bf16.mxu1 %v1348_v1  ;;  %1193 = vmatprep.mubr.msk.bf16.mxu1 %vm1349_vm0, %v1348_v1  ;;  %v1316_v9 = vld [vmem:[%s1444_s20] sm:$0xff]   ;;  %v1319_v14 = vld [vmem:[%s1444_s20 + $0x18] sm:$0xff]   ;;  %v1511_v16 = vld [vmem:[%s1592_s5 + $0x8] sm:$0xff]  }
  0x11   : > { %v1315_v10 = vld [vmem:[%s342_s28] sm:$0xff]  }
  0x12   : > { %1176 = vmatpush3.bf16.msra.mxu0 %v1309_v3  ;;  %v1518_v17 = vld [vmem:[%s1592_s5] sm:$0xff]  }
  0x13   : > { %1188 = vmatpush3.bf16.msra.mxu1 %v1310_v4  ;;  %1177 = vmatprep.subr.bf16.mxu0 %v1348_v1  ;;  %v1085_v18 = vld [vmem:[%s1591_s4] ss:$0 sm:$0xff] }
  0x14   : > { %1189 = vmatprep.subr.bf16.mxu1 %v1348_v1 }
  0x16   : > { %1178 = vmatpush3.bf16.msra.mxu0 %v1311_v5 }
  0x17   : > { %1190 = vmatpush3.bf16.msra.mxu1 %v1312_v6  ;;  %1179 = vmatprep.subr.bf16.mxu0 %v1348_v1 }
  0x18   : > { %1191 = vmatprep.subr.bf16.mxu1 %v1348_v1 }
  0x1a   : > { %1180 = vmatpush3.bf16.msra.mxu0 %v1313_v7 }
  0x1b   : > { %1192 = vmatpush3.bf16.msra.mxu1 %v1314_v8  ;;  %1197 = vmatprep.subr.bf16.mxu0 %v1348_v1 }
  0x1c   : > { %1209 = vmatprep.subr.bf16.mxu1 %v1348_v1 }
  0x1d   : > { %1182 = vmatmul.mubr.msk.bf16.vlgmr.msra.gmra.mxu0 %vm401_vm1, %v1315_v10 }
  0x1e   : > { %1194 = vmatmul.mubr.msk.bf16.vlgmr.msra.gmra.mxu1 %vm401_vm1, %v1316_v9  ;;  %1198 = vmatpush3.bf16.msra.mxu0 %v1465_v11 }
  0x1f   : > { %1210 = vmatpush3.bf16.msra.mxu1 %v1416_v2  ;;  %1217 = vmatprep.mubr.msk.bf16.mxu1 %vm1349_vm0, %v1348_v1 }
  0x20   : > { %1211 = vmatprep.subr.bf16.mxu1 %v1348_v1  ;;  %1199 = vmatprep.subr.bf16.mxu0 %v1348_v1 }
  0x21   : > { %1205 = vmatprep.mubr.msk.bf16.mxu0 %vm1349_vm0, %v1348_v1 }
  0x22   : > { %1200 = vmatpush3.bf16.msra.mxu0 %v1504_v15 }
  0x23   : > { %1212 = vmatpush3.bf16.msra.mxu1 %v1310_v4  ;;  %1201 = vmatprep.subr.bf16.mxu0 %v1348_v1 }
  0x24   : > { %1213 = vmatprep.subr.bf16.mxu1 %v1348_v1 }
  0x26   : > { %1202 = vmatpush3.bf16.msra.mxu0 %v1511_v16 }
  0x27   : > { %1214 = vmatpush3.bf16.msra.mxu1 %v1312_v6  ;;  %1203 = vmatprep.subr.bf16.mxu0 %v1348_v1 }
  0x28   : > { %1215 = vmatprep.subr.bf16.mxu1 %v1348_v1 }
  0x2a   : > { %1204 = vmatpush3.bf16.msra.mxu0 %v1518_v17 }
  0x2b   : > { %1216 = vmatpush3.bf16.msra.mxu1 %v1314_v8  ;;  %1221 = vmatprep.subr.bf16.mxu0 %v1348_v1 }
  0x2c   : > { %1233 = vmatprep.subr.bf16.mxu1 %v1348_v1 }
  0x2e   : > { %1218 = vmatmul.mubr.msk.bf16.vlgmr.msra.gmra.mxu1 %vm401_vm1, %v1317_v12 }
  0x2f   : > { %1234 = vmatpush3.bf16.msra.mxu1 %v1416_v2  ;;  %1241 = vmatprep.mubr.msk.bf16.mxu1 %vm1349_vm0, %v1348_v1 }
  0x30   : > { %1235 = vmatprep.subr.bf16.mxu1 %v1348_v1 }
  0x33   : > { %1236 = vmatpush3.bf16.msra.mxu1 %v1310_v4 }
  0x34   : > { %1237 = vmatprep.subr.bf16.mxu1 %v1348_v1 }
  0x37   : > { %1238 = vmatpush3.bf16.msra.mxu1 %v1312_v6 }
  0x38   : > { %1239 = vmatprep.subr.bf16.mxu1 %v1348_v1 }
  0x3b   : > { %1240 = vmatpush3.bf16.msra.mxu1 %v1314_v8 }
  0x3c   : > { %1257 = vmatprep.subr.bf16.mxu1 %v1348_v1 }
  0x3e   : > { %1242 = vmatmul.mubr.msk.bf16.vlgmr.msra.gmra.mxu1 %vm401_vm1, %v1318_v13 }
  0x3f   : > { %1258 = vmatpush3.bf16.msra.mxu1 %v1416_v2  ;;  %1265 = vmatprep.mubr.msk.bf16.mxu1 %vm1349_vm0, %v1348_v1 }
  0x40   : > { %1259 = vmatprep.subr.bf16.mxu1 %v1348_v1 }
  0x43   : > { %1260 = vmatpush3.bf16.msra.mxu1 %v1310_v4 }
  0x44   : > { %1261 = vmatprep.subr.bf16.mxu1 %v1348_v1 }
  0x47   : > { %1262 = vmatpush3.bf16.msra.mxu1 %v1312_v6 }
  0x48   : > { %1263 = vmatprep.subr.bf16.mxu1 %v1348_v1 }
  0x4b   : > { %1264 = vmatpush3.bf16.msra.mxu1 %v1314_v8 }
  0x4e   : > { %1266 = vmatmul.mubr.msk.bf16.vlgmr.msra.gmra.mxu1 %vm401_vm1, %v1319_v14 }
  0xdd   : > { %v439_v19 = vpop.f32.mrf.mxu0 }
  0xde   : > { %v1525_v20 = vadd.f32 %v1085_v18, %v439_v19  ;;  %v522_v21 = vpop.f32.mrf.mxu1 }
  0xdf   : > { %v1183_v22 = vpop.f32.mrf.mxu0 }
  0xe0   : > { %v523_v23 = vadd.f32 %v522_v21, %v1525_v20  ;;  %v1195_v24 = vpop.f32.mrf.mxu1 }
  0xe1   : > { %v442_v25 = vpop.f32.mrf.mxu0 }
  0xe2   : > { %v1528_v26 = vadd.f32 %v1085_v18, %v442_v25  ;;  %v525_v27 = vpop.f32.mrf.mxu1  ;;  %v531_v29 = vmul.f32 0.2, %v523_v23  ;;  %vm529_vm2 = vcmp.ge.f32.partialorder %v523_v23, 0.0 }
  0xe3   : > { %v1184_v28 = vpop.f32.mrf.mxu0 }
  0xe4   : > { %v526_v30 = vadd.f32 %v525_v27, %v1528_v26  ;;  %v1196_v31 = vpop.f32.mrf.mxu1  ;;  %v533_v33 = vsel %vm529_vm2, %v523_v23, %v531_v29 }
  0xe6   : > { %vm530_vm3 = vcmp.ge.f32.partialorder %v526_v30, 0.0  ;;  %v532_v32 = vmul.f32 0.2, %v526_v30 }
  0xe8   : > { %v534_v34 = vsel %vm530_vm3, %v526_v30, %v532_v32 }
  0xe9   : > { %v535_v35 = vpack.c.bf16 %v534_v34, %v533_v33 }
  0xeb   : > { %1206 = vmatmul.mubr.msk.bf16.vlgmr.msra.gmra.mxu0 %vm401_vm1, %v535_v35 }
  0xec   : > { %1222 = vmatpush3.bf16.msra.mxu0 %v1465_v11  ;;  %1229 = vmatprep.mubr.msk.bf16.mxu0 %vm1349_vm0, %v1348_v1 }
  0xed   : > { %1223 = vmatprep.subr.bf16.mxu0 %v1348_v1 }
  0xee   : > { %v670_v36 = vpop.f32.mrf.mxu1 }
  0xef   : > { %v671_v37 = vadd.f32 %v670_v36, %v1525_v20 }
  0xf0   : > { %v1219_v38 = vpop.f32.mrf.mxu1  ;;  %1224 = vmatpush3.bf16.msra.mxu0 %v1504_v15 }
  0xf1   : > { %1225 = vmatprep.subr.bf16.mxu0 %v1348_v1  ;;  %v679_v40 = vmul.f32 0.2, %v671_v37  ;;  %vm677_vm4 = vcmp.ge.f32.partialorder %v671_v37, 0.0 }
  0xf2   : > { %v673_v39 = vpop.f32.mrf.mxu1 }
  0xf3   : > { %v674_v41 = vadd.f32 %v673_v39, %v1528_v26  ;;  %v681_v44 = vsel %vm677_vm4, %v671_v37, %v679_v40 }
  0xf4   : > { %v1220_v42 = vpop.f32.mrf.mxu1  ;;  %1226 = vmatpush3.bf16.msra.mxu0 %v1511_v16 }
  0xf5   : > { %vm678_vm5 = vcmp.ge.f32.partialorder %v674_v41, 0.0  ;;  %v680_v43 = vmul.f32 0.2, %v674_v41  ;;  %1227 = vmatprep.subr.bf16.mxu0 %v1348_v1 }
  0xf7   : > { %v682_v45 = vsel %vm678_vm5, %v674_v41, %v680_v43 }
  0xf8   : > { %v683_v46 = vpack.c.bf16 %v682_v45, %v681_v44  ;;  %1228 = vmatpush3.bf16.msra.mxu0 %v1518_v17 }
  0xf9   : > { %1245 = vmatprep.subr.bf16.mxu0 %v1348_v1 }
  0xfb   : > { %1230 = vmatmul.mubr.msk.bf16.vlgmr.msra.gmra.mxu0 %vm401_vm1, %v683_v46 }
  0xfc   : > { %1246 = vmatpush3.bf16.msra.mxu0 %v1465_v11  ;;  %1253 = vmatprep.mubr.msk.bf16.mxu0 %vm1349_vm0, %v1348_v1 }
  0xfd   : > { %1247 = vmatprep.subr.bf16.mxu0 %v1348_v1 }
  0xfe   : > { %v781_v47 = vpop.f32.mrf.mxu1 }
  0xff   : > { %v782_v48 = vadd.f32 %v781_v47, %v1525_v20 }
 0x100   : > { %v1243_v49 = vpop.f32.mrf.mxu1  ;;  %1248 = vmatpush3.bf16.msra.mxu0 %v1504_v15 }
 0x101   : > { %1249 = vmatprep.subr.bf16.mxu0 %v1348_v1  ;;  %v790_v51 = vmul.f32 0.2, %v782_v48  ;;  %vm788_vm6 = vcmp.ge.f32.partialorder %v782_v48, 0.0 }
 0x102   : > { %v784_v50 = vpop.f32.mrf.mxu1 }
 0x103   : > { %v785_v52 = vadd.f32 %v784_v50, %v1528_v26  ;;  %v792_v55 = vsel %vm788_vm6, %v782_v48, %v790_v51 }
 0x104   : > { %v1244_v53 = vpop.f32.mrf.mxu1  ;;  %1250 = vmatpush3.bf16.msra.mxu0 %v1511_v16 }
 0x105   : > { %vm789_vm7 = vcmp.ge.f32.partialorder %v785_v52, 0.0  ;;  %v791_v54 = vmul.f32 0.2, %v785_v52  ;;  %1251 = vmatprep.subr.bf16.mxu0 %v1348_v1 }
 0x107   : > { %v793_v56 = vsel %vm789_vm7, %v785_v52, %v791_v54 }
 0x108   : > { %v794_v57 = vpack.c.bf16 %v793_v56, %v792_v55  ;;  %1252 = vmatpush3.bf16.msra.mxu0 %v1518_v17 }
 0x109   : > { %1269 = vmatprep.subr.bf16.mxu0 %v1348_v1 }
 0x10b   : > { %1254 = vmatmul.mubr.msk.bf16.vlgmr.msra.gmra.mxu0 %vm401_vm1, %v794_v57 }
 0x10c   : > { %1270 = vmatpush3.bf16.msra.mxu0 %v1465_v11  ;;  %1277 = vmatprep.mubr.msk.bf16.mxu0 %vm1349_vm0, %v1348_v1 }
 0x10d   : > { %1271 = vmatprep.subr.bf16.mxu0 %v1348_v1 }
 0x10e   : > { %v892_v58 = vpop.f32.mrf.mxu1 }
 0x10f   : > { %v893_v59 = vadd.f32 %v892_v58, %v1525_v20 }
 0x110   : > { %v1267_v60 = vpop.f32.mrf.mxu1  ;;  %1272 = vmatpush3.bf16.msra.mxu0 %v1504_v15 }
 0x111   : > { %1273 = vmatprep.subr.bf16.mxu0 %v1348_v1  ;;  %v901_v62 = vmul.f32 0.2, %v893_v59  ;;  %vm899_vm8 = vcmp.ge.f32.partialorder %v893_v59, 0.0 }
 0x112   : > { %v895_v61 = vpop.f32.mrf.mxu1 }
 0x113   : > { %v896_v63 = vadd.f32 %v895_v61, %v1528_v26  ;;  %v903_v3 = vsel %vm899_vm8, %v893_v59, %v901_v62 }
 0x114   : > { %v1268_v0 = vpop.f32.mrf.mxu1  ;;  %1274 = vmatpush3.bf16.msra.mxu0 %v1511_v16 }
 0x115   : > { %vm900_vm9 = vcmp.ge.f32.partialorder %v896_v63, 0.0  ;;  %v902_v2 = vmul.f32 0.2, %v896_v63  ;;  %1275 = vmatprep.subr.bf16.mxu0 %v1348_v1  ;;  %v1098_v1 = vld [vmem:[%s1593_s6] ss:$0 sm:$0xff] }
 0x117   : > { %v904_v4 = vsel %vm900_vm9, %v896_v63, %v902_v2 }
 0x118   : > { %v905_v5 = vpack.c.bf16 %v904_v4, %v903_v3  ;;  %1276 = vmatpush3.bf16.msra.mxu0 %v1518_v17 }
 0x11b   : > { %1278 = vmatmul.mubr.msk.bf16.vlgmr.msra.gmra.mxu0 %vm401_vm1, %v905_v5  ;;  %vm966_vm1 = vcmask 519168  }
 0x1ab   : > { %v612_v6 = vpop.f32.mrf.mxu0 }
 0x1ac   : > { %v613_v17 = vadd.f32 %v1098_v1, %v612_v6 }
 0x1ad   : > { %v1207_v7 = vpop.f32.mrf.mxu0 }
 0x1ae   : > { %v621_v23 = vmul.f32 0.2, %v613_v17  ;;  %vm619_vm11 = vcmp.ge.f32.partialorder %v613_v17, 0.0 }
 0x1af   : > { %v615_v8 = vpop.f32.mrf.mxu0 }
 0x1b0   : > { %v616_v24 = vadd.f32 %v1098_v1, %v615_v8  ;;  %v623_v29 = vsel %vm619_vm11, %v613_v17, %v621_v23 }
 0x1b1   : > { %v1208_v9 = vpop.f32.mrf.mxu0 }
 0x1b2   : > { %v622_v31 = vmul.f32 0.2, %v616_v24  ;;  %vm620_vm14 = vcmp.ge.f32.partialorder %v616_v24, 0.0 }
 0x1b4   : > { %v624_v41 = vsel %vm620_vm14, %v616_v24, %v622_v31 }
 0x1bb   : > { %v721_v10 = vpop.f32.mrf.mxu0 }
 0x1bc   : > { %v722_v19 = vadd.f32 %v1098_v1, %v721_v10 }
 0x1bd   : > { %v1231_v11 = vpop.f32.mrf.mxu0 }
 0x1be   : > { %v730_v21 = vmul.f32 0.2, %v722_v19  ;;  %vm728_vm10 = vcmp.ge.f32.partialorder %v722_v19, 0.0 }
 0x1bf   : > { %v724_v12 = vpop.f32.mrf.mxu0 }
 0x1c0   : > { %v725_v22 = vadd.f32 %v1098_v1, %v724_v12  ;;  %v732_v27 = vsel %vm728_vm10, %v722_v19, %v730_v21 }
 0x1c1   : > { %v1232_v13 = vpop.f32.mrf.mxu0  ;;  %v734_v35 = vmax.f32 %v623_v29, %v732_v27 }
 0x1c2   : > { %v731_v28 = vmul.f32 0.2, %v725_v22  ;;  %vm729_vm13 = vcmp.ge.f32.partialorder %v725_v22, 0.0 }
 0x1c4   : > { %v733_v37 = vsel %vm729_vm13, %v725_v22, %v731_v28 }
 0x1c5   : > { %v735_v45 = vmax.f32 %v624_v41, %v733_v37 }
 0x1cb   : > { %v832_v14 = vpop.f32.mrf.mxu0 }
 0x1cc   : > { %v833_v20 = vadd.f32 %v1098_v1, %v832_v14 }
 0x1cd   : > { %v1255_v15 = vpop.f32.mrf.mxu0 }
 0x1ce   : > { %v841_v25 = vmul.f32 0.2, %v833_v20  ;;  %vm839_vm12 = vcmp.ge.f32.partialorder %v833_v20, 0.0 }
 0x1cf   : > { %v835_v16 = vpop.f32.mrf.mxu0 }
 0x1d0   : > { %v836_v26 = vadd.f32 %v1098_v1, %v835_v16  ;;  %v843_v32 = vsel %vm839_vm12, %v833_v20, %v841_v25 }
 0x1d1   : > { %v1256_v18 = vpop.f32.mrf.mxu0  ;;  %v845_v39 = vmax.f32 %v734_v35, %v843_v32 }
 0x1d2   : > { %v842_v33 = vmul.f32 0.2, %v836_v26  ;;  %vm840_vm15 = vcmp.ge.f32.partialorder %v836_v26, 0.0 }
 0x1d4   : > { %v844_v42 = vsel %vm840_vm15, %v836_v26, %v842_v33 }
 0x1d5   : > { %v846_v49 = vmax.f32 %v735_v45, %v844_v42 }
 0x1db   : > { %v943_v30 = vpop.f32.mrf.mxu0 }
 0x1dc   : > { %v944_v34 = vadd.f32 %v1098_v1, %v943_v30 }
 0x1dd   : > { %v1279_v36 = vpop.f32.mrf.mxu0 }
 0x1de   : > { %vm950_vm0 = vcmp.ge.f32.partialorder %v944_v34, 0.0  ;;  %v952_v38 = vmul.f32 0.2, %v944_v34 }
 0x1df   : > { %v946_v40 = vpop.f32.mrf.mxu0 }
 0x1e0   : > { %v954_v43 = vsel %vm950_vm0, %v944_v34, %v952_v38  ;;  %v947_v44 = vadd.f32 %v1098_v1, %v946_v40 }
 0x1e1   : > { %v956_v46 = vmax.f32 %v845_v39, %v954_v43  ;;  %v1280_v47 = vpop.f32.mrf.mxu0 }
 0x1e2   : > { %vm951_vm2 = vcmp.ge.f32.partialorder %v947_v44, 0.0  ;;  %v953_v48 = vmul.f32 0.2, %v947_v44 }
 0x1e3   : > { %v1126_v50 = vpack.c.bf16 %v956_v46, %v956_v46 }
 0x1e4   : > { %v955_v51 = vsel %vm951_vm2, %v947_v44, %v953_v48 }
 0x1e5   : > { %967 = vst.msk [vmem:[%s352_s29] sm:$0xf] %vm966_vm1, %v1126_v50  ;;  %v957_v52 = vmax.f32 %v846_v49, %v955_v51 }
 0x1e7   : > { %v1127_v53 = vpack.c.bf16 %v957_v52, %v957_v52 }
 0x1e9   : > { %968 = vst.msk [vmem:[%s352_s29 + $0x4] sm:$0xf] %vm966_vm1, %v1127_v53 }
 0x1ea PF: > { %s17_s26 = sadd.s32 1, %s1346_s26   ;;  %s1595_s24 = smov %s1342_s25 }
 0x1eb   : > { %p14_p5 = scmp.ge.s32.totalorder %s17_s26, 4   ;;  %s1596_s25 = smov %s1598_s27 }
 0x1ed   :  { %16 = sbr.rel (!%p14_p5) target bundleno = 2 (0x2), region = 84 }

// kernel: dgcnn_partseg_forward.24
= control target key start
LH: loop header
LB: loop body
LE: loop exit
PB: predicated region body
PF: predicated region fallthrough
CT: control target
= control target key end

     0   :  { %s986_s18 = smov 0   ;;  %s988_s19 = smov 0   ;;  %s1098_s0 = inlined_call_operand.vmem [shape: bf16[2,4,16,64], index: 0, kind: input, shape index: {}]   ;;  %s1099_s1 = inlined_call_operand.vmem [shape: bf16[2,16,64], index: 1, kind: input, shape index: {}]   ;;  %s1100_s2 = inlined_call_operand.vmem [shape: bf16[64,64], index: 2, kind: input, shape index: {}]   ;;  %s1101_s3 = inlined_call_operand.vmem [shape: bf16[64,64], index: 3, kind: input, shape index: {}]   ;;  %s1102_s4 = inlined_call_operand.vmem [shape: f32[1,64], index: 4, kind: input, shape index: {}]   ;;  %s1103_s5 = inlined_call_operand.vmem [shape: bf16[2,16,64], index: 5, kind: output, shape index: {}]  }
   0x1   :  { %s990_s20 = smov 0  }
   0x2 LB: > { %s27_s21 = sadd.s32 1, %s948_s19  ;;  %p765_p0 = scmp.ge.s32.totalorder %s952_s20, 1  ;;  %s952_s20 = sphi %s990_s20, %s15_s20   ;;  %s948_s19 = sphi %s988_s19, %s1105_s19   ;;  %s944_s18 = sphi %s986_s18, %s1104_s18  }
   0x3   : > { %p29_p1 = scmp.ge.s32.totalorder %s27_s21, 2  ;;  %p225_p2 = scmp.lt.s32.totalorder %s952_s20, 3 }
   0x5   : > { %s1107_s21 = smov (%p29_p1, %s27_s21), 0  ;;  %p226_p3 = pnand %p765_p0, %p225_p2 }
   0x6   : > { %p271_p4 = scmp.lt.s32.totalorder (!%p226_p3), %s944_s18, 1 }
   0x7   : > { %229 = sbr.rel (%p226_p3) target bundleno = 268 (0x10c), region = 40 }
   0xc   : > { %v917_v0 = vld [vmem:[%s1101_s3 + $0x18] sm:$0xff]   ;;  %v954_v1 = vmov 0.0   ;;  %v919_v3 = vld [vmem:[%s1101_s3 + $0x10] sm:$0xff]   ;;  %vm955_vm0 = vmmov 0   ;;  %s1109_s18 = smov (!%p271_p4, %s944_s18), 1  ;;  %v921_v5 = vld [vmem:[%s1101_s3 + $0x8] sm:$0xff]  }
   0xd   : > { %831 = vmatprep.subr.bf16.mxu0 %v954_v1  ;;  %843 = vmatprep.subr.bf16.mxu1 %v954_v1  ;;  %v918_v2 = vld [vmem:[%s1100_s2 + $0x18] sm:$0xff]   ;;  %v920_v4 = vld [vmem:[%s1100_s2 + $0x10] sm:$0xff]   ;;  %s801_s7 = sshll.u32 %s1109_s18, 5  ;;  %v922_v6 = vld [vmem:[%s1100_s2 + $0x8] sm:$0xff]   ;;  %s802_s13 = sshll.u32 %s1109_s18, 3  ;;  %vm347_vm1 = vcmask 523264  }
   0xe   : > { %832 = vmatpush3.bf16.msra.mxu0 %v917_v0  ;;  %839 = vmatprep.mubr.msk.bf16.mxu0 %vm955_vm0, %v954_v1  ;;  %s1037_s12 = scalar_lea.vmem %s1098_s0, %s801_s7  ;;  %s288_s16 = scalar_lea.vmem %s1099_s1, %s802_s13  ;;  %v923_v7 = vld [vmem:[%s1101_s3] sm:$0xff]   ;;  %vm653_vm3 = vcmask 519168  }
   0xf   : > { %844 = vmatpush3.bf16.msra.mxu1 %v918_v2  ;;  %833 = vmatprep.subr.bf16.mxu0 %v954_v1  ;;  %v924_v8 = vld [vmem:[%s1100_s2] sm:$0xff]   ;;  %v927_v11 = vld [vmem:[%s1037_s12 + $0x8] sm:$0xff]   ;;  %v928_v12 = vld [vmem:[%s1037_s12 + $0x10] sm:$0xff]   ;;  %s298_s29 = scalar_lea.vmem %s1103_s5, %s802_s13 }
  0x10   : > { %845 = vmatprep.subr.bf16.mxu1 %v954_v1  ;;  %851 = vmatprep.mubr.msk.bf16.mxu1 %vm955_vm0, %v954_v1  ;;  %v925_v9 = vld [vmem:[%s288_s16] sm:$0xff]   ;;  %v929_v13 = vld [vmem:[%s1037_s12 + $0x18] sm:$0xff]  }
  0x11   : > { %v926_v10 = vld [vmem:[%s1037_s12] sm:$0xff]  }
  0x12   : > { %834 = vmatpush3.bf16.msra.mxu0 %v919_v3  ;;  %v772_v31 = vld [vmem:[%s1102_s4] ss:$0 sm:$0xff] }
  0x13   : > { %846 = vmatpush3.bf16.msra.mxu1 %v920_v4  ;;  %835 = vmatprep.subr.bf16.mxu0 %v954_v1 }
  0x14   : > { %847 = vmatprep.subr.bf16.mxu1 %v954_v1 }
  0x16   : > { %836 = vmatpush3.bf16.msra.mxu0 %v921_v5 }
  0x17   : > { %848 = vmatpush3.bf16.msra.mxu1 %v922_v6  ;;  %837 = vmatprep.subr.bf16.mxu0 %v954_v1 }
  0x18   : > { %849 = vmatprep.subr.bf16.mxu1 %v954_v1 }
  0x1a   : > { %838 = vmatpush3.bf16.msra.mxu0 %v923_v7 }
  0x1b   : > { %850 = vmatpush3.bf16.msra.mxu1 %v924_v8  ;;  %855 = vmatprep.subr.bf16.mxu0 %v954_v1 }
  0x1c   : > { %867 = vmatprep.subr.bf16.mxu1 %v954_v1 }
  0x1d   : > { %840 = vmatmul.mubr.msk.bf16.vlgmr.msra.gmra.mxu0 %vm347_vm1, %v925_v9 }
  0x1e   : > { %856 = vmatpush3.bf16.msra.mxu0 %v918_v2  ;;  %852 = vmatmul.mubr.msk.bf16.vlgmr.msra.gmra.mxu1 %vm347_vm1, %v926_v10 }
  0x1f   : > { %868 = vmatpush3.bf16.msra.mxu1 %v918_v2  ;;  %857 = vmatprep.subr.bf16.mxu0 %v954_v1 }
  0x20   : > { %869 = vmatprep.subr.bf16.mxu1 %v954_v1  ;;  %863 = vmatprep.mubr.msk.bf16.mxu0 %vm955_vm0, %v954_v1 }
  0x21   : > { %875 = vmatprep.mubr.msk.bf16.mxu1 %vm955_vm0, %v954_v1 }
  0x22   : > { %858 = vmatpush3.bf16.msra.mxu0 %v920_v4 }
  0x23   : > { %870 = vmatpush3.bf16.msra.mxu1 %v920_v4  ;;  %859 = vmatprep.subr.bf16.mxu0 %v954_v1 }
  0x24   : > { %871 = vmatprep.subr.bf16.mxu1 %v954_v1 }
  0x26   : > { %860 = vmatpush3.bf16.msra.mxu0 %v922_v6 }
  0x27   : > { %872 = vmatpush3.bf16.msra.mxu1 %v922_v6  ;;  %861 = vmatprep.subr.bf16.mxu0 %v954_v1 }
  0x28   : > { %873 = vmatprep.subr.bf16.mxu1 %v954_v1 }
  0x2a   : > { %862 = vmatpush3.bf16.msra.mxu0 %v924_v8 }
  0x2b   : > { %874 = vmatpush3.bf16.msra.mxu1 %v924_v8  ;;  %879 = vmatprep.subr.bf16.mxu0 %v954_v1 }
  0x2d   : > { %864 = vmatmul.mubr.msk.bf16.vlgmr.msra.gmra.mxu0 %vm347_vm1, %v927_v11 }
  0x2e   : > { %880 = vmatpush3.bf16.msra.mxu0 %v918_v2  ;;  %876 = vmatmul.mubr.msk.bf16.vlgmr.msra.gmra.mxu1 %vm347_vm1, %v928_v12 }
  0x2f   : > { %881 = vmatprep.subr.bf16.mxu0 %v954_v1  ;;  %887 = vmatprep.mubr.msk.bf16.mxu0 %vm955_vm0, %v954_v1 }
  0x32   : > { %882 = vmatpush3.bf16.msra.mxu0 %v920_v4 }
  0x33   : > { %883 = vmatprep.subr.bf16.mxu0 %v954_v1 }
  0x36   : > { %884 = vmatpush3.bf16.msra.mxu0 %v922_v6 }
  0x37   : > { %885 = vmatprep.subr.bf16.mxu0 %v954_v1 }
  0x3a   : > { %886 = vmatpush3.bf16.msra.mxu0 %v924_v8 }
  0x3d   : > { %888 = vmatmul.mubr.msk.bf16.vlgmr.msra.gmra.mxu0 %vm347_vm1, %v929_v13 }
  0xdd   : > { %v385_v14 = vpop.f32.mrf.mxu0 }
  0xde   : > { %v468_v15 = vpop.f32.mrf.mxu1  ;;  %v386_v35 = vadd.f32 %v772_v31, %v385_v14 }
  0xdf   : > { %v841_v16 = vpop.f32.mrf.mxu0 }
  0xe0   : > { %v853_v17 = vpop.f32.mrf.mxu1 }
  0xe1   : > { %v388_v18 = vpop.f32.mrf.mxu0 }
  0xe2   : > { %v471_v19 = vpop.f32.mrf.mxu1  ;;  %v389_v41 = vadd.f32 %v772_v31, %v388_v18 }
  0xe3   : > { %v842_v20 = vpop.f32.mrf.mxu0 }
  0xe4   : > { %v854_v21 = vpop.f32.mrf.mxu1 }
  0xed   : > { %v520_v22 = vpop.f32.mrf.mxu0 }
  0xee   : > { %v574_v23 = vpop.f32.mrf.mxu1  ;;  %v527_v30 = vmax.f32 %v468_v15, %v520_v22 }
  0xef   : > { %v865_v24 = vpop.f32.mrf.mxu0 }
  0xf0   : > { %v877_v25 = vpop.f32.mrf.mxu1  ;;  %v581_v32 = vmax.f32 %v527_v30, %v574_v23 }
  0xf1   : > { %v523_v26 = vpop.f32.mrf.mxu0 }
  0xf2   : > { %v577_v27 = vpop.f32.mrf.mxu1  ;;  %v528_v33 = vmax.f32 %v471_v19, %v523_v26 }
  0xf3   : > { %v866_v28 = vpop.f32.mrf.mxu0 }
  0xf4   : > { %v878_v29 = vpop.f32.mrf.mxu1  ;;  %v582_v38 = vmax.f32 %v528_v33, %v577_v27 }
  0xfd   : > { %v628_v34 = vpop.f32.mrf.mxu0 }
  0xfe   : > { %v635_v36 = vmax.f32 %v581_v32, %v628_v34 }
  0xff   : > { %v889_v37 = vpop.f32.mrf.mxu0 }
 0x100   : > { %v637_v39 = vadd.f32 %v635_v36, %v386_v35 }
 0x101   : > { %v631_v40 = vpop.f32.mrf.mxu0 }
 0x102   : > { %vm639_vm2 = vcmp.ge.f32.partialorder %v637_v39, 0.0  ;;  %v641_v42 = vmul.f32 0.2, %v637_v39  ;;  %v636_v43 = vmax.f32 %v582_v38, %v631_v40 }
 0x103   : > { %v890_v44 = vpop.f32.mrf.mxu0 }
 0x104   : > { %v643_v45 = vsel %vm639_vm2, %v637_v39, %v641_v42  ;;  %v638_v46 = vadd.f32 %v636_v43, %v389_v41 }
 0x105   : > { %v804_v47 = vpack.c.bf16 %v643_v45, %v643_v45 }
 0x106   : > { %vm640_vm4 = vcmp.ge.f32.partialorder %v638_v46, 0.0  ;;  %v642_v48 = vmul.f32 0.2, %v638_v46 }
 0x107   : > { %654 = vst.msk [vmem:[%s298_s29] sm:$0xf] %vm653_vm3, %v804_v47 }
 0x108   : > { %v644_v49 = vsel %vm640_vm4, %v638_v46, %v642_v48 }
 0x109   : > { %v805_v50 = vpack.c.bf16 %v644_v49, %v644_v49 }
 0x10b   : > { %655 = vst.msk [vmem:[%s298_s29 + $0x4] sm:$0xf] %vm653_vm3, %v805_v50 }
 0x10c PF: > { %s15_s20 = sadd.s32 1, %s952_s20   ;;  %s1104_s18 = smov %s948_s19 }
 0x10d   : > { %p12_p5 = scmp.ge.s32.totalorder %s15_s20, 4   ;;  %s1105_s19 = smov %s1107_s21 }
 0x10f   :  { %14 = sbr.rel (!%p12_p5) target bundleno = 2 (0x2), region = 76 }

// kernel: dgcnn_partseg_forward.25
= control target key start
LH: loop header
LB: loop body
LE: loop exit
PB: predicated region body
PF: predicated region fallthrough
CT: control target
= control target key end

     0   :  { %s1494_s12 = smov 0   ;;  %s1496_s13 = smov 0   ;;  %s1863_s0 = inlined_call_operand.vmem [shape: bf16[2,16,192], index: 0, kind: input, shape index: {}]   ;;  %s1864_s1 = inlined_call_operand.vmem [shape: bf16[192,1024], index: 1, kind: input, shape index: {}]   ;;  %s1865_s2 = inlined_call_operand.vmem [shape: f32[1,1024], index: 2, kind: input, shape index: {}]   ;;  %s1866_s3 = inlined_call_operand.vmem [shape: f32[2,1,1024], index: 3, kind: output, shape index: {}]  }
   0x1   :  { %s1498_s14 = smov 0  }
   0x2 LB: > { %s25_s15 = sadd.s32 1, %s1467_s13  ;;  %p1312_p0 = scmp.ge.s32.totalorder %s1471_s14, 1  ;;  %s1471_s14 = sphi %s1498_s14, %s13_s14   ;;  %s1467_s13 = sphi %s1496_s13, %s1868_s13   ;;  %s1463_s12 = sphi %s1494_s12, %s1867_s12  }
   0x3   : > { %p27_p1 = scmp.ge.s32.totalorder %s25_s15, 2  ;;  %p157_p2 = scmp.lt.s32.totalorder %s1471_s14, 3 }
   0x5   : > { %s1870_s15 = smov (%p27_p1, %s25_s15), 0  ;;  %p158_p3 = pnand %p1312_p0, %p157_p2 }
   0x6   : > { %p186_p4 = scmp.lt.s32.totalorder (!%p158_p3), %s1463_s12, 1 }
   0x7   : > { %161 = sbr.rel (%p158_p3) target bundleno = 342 (0x156), region = 32 }
   0xc   : > { %v259_v0 = vld [vmem:[%s1864_s1 + $0x1c0] sm:$0xff]  ;;  %v260_v2 = vld [vmem:[%s1864_s1 + $0x1c8] sm:$0xff]  ;;  %s1872_s12 = smov (!%p186_p4, %s1463_s12), 1  ;;  %vm830_vm0 = vcmask 523264  }
   0xd   : > { %v263_v1 = vld [vmem:[%s1864_s1 + $0x1e0] sm:$0xff]  ;;  %v264_v4 = vld [vmem:[%s1864_s1 + $0x1e8] sm:$0xff]  ;;  %s1420_s29 = sshll.u32 %s1872_s12, 4  ;;  %s1315_s5 = sshll.u32 %s1872_s12, 3 }
   0xe   : > { %v1375_v3 = vcombine.high %v259_v0, %v263_v1  ;;  %v1374_v5 = vcombine.low %v259_v0, %v263_v1  ;;  %v251_v6 = vld [vmem:[%s1864_s1 + $0x180] sm:$0xff]  ;;  %v1377_v8 = vcombine.high %v260_v2, %v264_v4  ;;  %v1376_v9 = vcombine.low %v260_v2, %v264_v4  ;;  %v252_v11 = vld [vmem:[%s1864_s1 + $0x188] sm:$0xff]  ;;  %s1584_s9 = scalar_lea.vmem %s1863_s0, %s1420_s29  ;;  %s199_s8 = scalar_lea.vmem %s1866_s3, %s1315_s5 }
   0xf   : > { %v255_v7 = vld [vmem:[%s1864_s1 + $0x1a0] sm:$0xff]  ;;  %v256_v12 = vld [vmem:[%s1864_s1 + $0x1a8] sm:$0xff] }
  0x10   : > { %v1367_v10 = vcombine.high %v251_v6, %v255_v7  ;;  %v243_v13 = vld [vmem:[%s1864_s1 + $0x140] sm:$0xff]  ;;  %834 = vmatprep.subr.bf16.mxu0 %v1375_v3  ;;  %v1369_v14 = vcombine.high %v252_v11, %v256_v12  ;;  %v244_v16 = vld [vmem:[%s1864_s1 + $0x148] sm:$0xff]  ;;  %877 = vmatprep.subr.bf16.mxu1 %v1377_v8  ;;  %v1366_v18 = vcombine.low %v251_v6, %v255_v7 }
  0x11   : > { %v247_v15 = vld [vmem:[%s1864_s1 + $0x160] sm:$0xff]  ;;  %v248_v17 = vld [vmem:[%s1864_s1 + $0x168] sm:$0xff]  ;;  %835 = vmatpush1.bf16.msra.mxu0 %v1374_v5  ;;  %878 = vmatpush1.bf16.msra.mxu1 %v1376_v9  ;;  %v1368_v19 = vcombine.low %v252_v11, %v256_v12 }
  0x12   : > { %836 = vmatprep.subr.bf16.mxu0 %v1367_v10  ;;  %v1359_v20 = vcombine.high %v243_v13, %v247_v15  ;;  %879 = vmatprep.subr.bf16.mxu1 %v1369_v14  ;;  %v1361_v21 = vcombine.high %v244_v16, %v248_v17  ;;  %v235_v22 = vld [vmem:[%s1864_s1 + $0x100] sm:$0xff]  ;;  %v236_v24 = vld [vmem:[%s1864_s1 + $0x108] sm:$0xff]  ;;  %v1358_v26 = vcombine.low %v243_v13, %v247_v15 }
  0x13   : > { %v239_v23 = vld [vmem:[%s1864_s1 + $0x120] sm:$0xff]  ;;  %v240_v25 = vld [vmem:[%s1864_s1 + $0x128] sm:$0xff]  ;;  %v1360_v27 = vcombine.low %v244_v16, %v248_v17 }
  0x14   : > { %v1351_v28 = vcombine.high %v235_v22, %v239_v23  ;;  %v1353_v29 = vcombine.high %v236_v24, %v240_v25  ;;  %v227_v30 = vld [vmem:[%s1864_s1 + $0xc0] sm:$0xff]  ;;  %v228_v32 = vld [vmem:[%s1864_s1 + $0xc8] sm:$0xff]  ;;  %v1350_v34 = vcombine.low %v235_v22, %v239_v23  ;;  %v1352_v35 = vcombine.low %v236_v24, %v240_v25 }
  0x15   : > { %837 = vmatpush1.bf16.msra.mxu0 %v1366_v18  ;;  %880 = vmatpush1.bf16.msra.mxu1 %v1368_v19  ;;  %v231_v31 = vld [vmem:[%s1864_s1 + $0xe0] sm:$0xff]  ;;  %v232_v33 = vld [vmem:[%s1864_s1 + $0xe8] sm:$0xff] }
  0x16   : > { %838 = vmatprep.subr.bf16.mxu0 %v1359_v20  ;;  %881 = vmatprep.subr.bf16.mxu1 %v1361_v21  ;;  %v1343_v36 = vcombine.high %v227_v30, %v231_v31  ;;  %v1345_v37 = vcombine.high %v228_v32, %v232_v33  ;;  %v219_v38 = vld [vmem:[%s1864_s1 + $0x80] sm:$0xff]  ;;  %v220_v40 = vld [vmem:[%s1864_s1 + $0x88] sm:$0xff]  ;;  %v1342_v42 = vcombine.low %v227_v30, %v231_v31  ;;  %v261_v31 = vld [vmem:[%s1864_s1 + $0x1d0] sm:$0xff] }
  0x17   : > { %v223_v39 = vld [vmem:[%s1864_s1 + $0xa0] sm:$0xff]  ;;  %v224_v41 = vld [vmem:[%s1864_s1 + $0xa8] sm:$0xff]  ;;  %v1344_v44 = vcombine.low %v228_v32, %v232_v33  ;;  %v265_v32 = vld [vmem:[%s1864_s1 + $0x1f0] sm:$0xff] }
  0x18   : > { %v1599_v43 = vld [vmem:[%s1584_s9 + $0x4] ss:$8 sps:$4 sm:$0xff]   ;;  %v1335_v45 = vcombine.high %v219_v38, %v223_v39  ;;  %v1337_v46 = vcombine.high %v220_v40, %v224_v41  ;;  %v1334_v51 = vcombine.low %v219_v38, %v223_v39  ;;  %v1336_v52 = vcombine.low %v220_v40, %v224_v41  ;;  %v262_v33 = vld [vmem:[%s1864_s1 + $0x1d8] sm:$0xff]  ;;  %v253_v39 = vld [vmem:[%s1864_s1 + $0x190] sm:$0xff] }
  0x19   : > { %839 = vmatpush1.bf16.msra.mxu0 %v1358_v26  ;;  %882 = vmatpush1.bf16.msra.mxu1 %v1360_v27  ;;  %v211_v47 = vld [vmem:[%s1864_s1 + $0x40] sm:$0xff]  ;;  %v212_v49 = vld [vmem:[%s1864_s1 + $0x48] sm:$0xff]  ;;  %v257_v40 = vld [vmem:[%s1864_s1 + $0x1b0] sm:$0xff] }
  0x1a   : > { %840 = vmatprep.subr.bf16.mxu0 %v1351_v28  ;;  %883 = vmatprep.subr.bf16.mxu1 %v1353_v29  ;;  %v215_v48 = vld [vmem:[%s1864_s1 + $0x60] sm:$0xff]  ;;  %v216_v50 = vld [vmem:[%s1864_s1 + $0x68] sm:$0xff] }
  0x1b   : > { %1414 = vmatprep.mubr.msk.bf16.mxu0 %vm830_vm0, %v1599_v43  ;;  %1415 = vmatprep.mubr.msk.bf16.mxu1 %vm830_vm0, %v1599_v43  ;;  %v1327_v53 = vcombine.high %v211_v47, %v215_v48  ;;  %v1329_v54 = vcombine.high %v212_v49, %v216_v50  ;;  %v203_v55 = vld [vmem:[%s1864_s1] sm:$0xff]  ;;  %v204_v57 = vld [vmem:[%s1864_s1 + $0x8] sm:$0xff]  ;;  %v1326_v59 = vcombine.low %v211_v47, %v215_v48 }
  0x1c   : > { %v207_v56 = vld [vmem:[%s1864_s1 + $0x20] sm:$0xff]  ;;  %v208_v58 = vld [vmem:[%s1864_s1 + $0x28] sm:$0xff]  ;;  %v1328_v60 = vcombine.low %v212_v49, %v216_v50  ;;  %v1371_v47 = vcombine.high %v253_v39, %v257_v40  ;;  %v245_v49 = vld [vmem:[%s1864_s1 + $0x150] sm:$0xff] }
  0x1d   : > { %841 = vmatpush1.bf16.msra.mxu0 %v1350_v34  ;;  %884 = vmatpush1.bf16.msra.mxu1 %v1352_v35  ;;  %v1319_v61 = vcombine.high %v203_v55, %v207_v56  ;;  %v1321_v62 = vcombine.high %v204_v57, %v208_v58  ;;  %v291_v63 = vld [vmem:[%s1864_s1 + $0x2c0] sm:$0xff]  ;;  %v292_v1 = vld [vmem:[%s1864_s1 + $0x2c8] sm:$0xff]  ;;  %v1318_v3 = vcombine.low %v203_v55, %v207_v56  ;;  %v266_v34 = vld [vmem:[%s1864_s1 + $0x1f8] sm:$0xff] }
  0x1e   : > { %842 = vmatprep.subr.bf16.mxu0 %v1343_v36  ;;  %885 = vmatprep.subr.bf16.mxu1 %v1345_v37  ;;  %v295_v0 = vld [vmem:[%s1864_s1 + $0x2e0] sm:$0xff]  ;;  %v296_v2 = vld [vmem:[%s1864_s1 + $0x2e8] sm:$0xff]  ;;  %v1320_v4 = vcombine.low %v204_v57, %v208_v58  ;;  %v1379_v37 = vcombine.high %v261_v31, %v265_v32  ;;  %v1381_v38 = vcombine.high %v262_v33, %v266_v34  ;;  %v249_v50 = vld [vmem:[%s1864_s1 + $0x170] sm:$0xff] }
  0x1f   : > { %v1407_v5 = vcombine.high %v291_v63, %v295_v0  ;;  %v1409_v6 = vcombine.high %v292_v1, %v296_v2  ;;  %v283_v7 = vld [vmem:[%s1864_s1 + $0x280] sm:$0xff]  ;;  %v284_v9 = vld [vmem:[%s1864_s1 + $0x288] sm:$0xff]  ;;  %v1406_v11 = vcombine.low %v291_v63, %v295_v0  ;;  %v1408_v12 = vcombine.low %v292_v1, %v296_v2  ;;  %v237_v57 = vld [vmem:[%s1864_s1 + $0x110] sm:$0xff] }
  0x20   : > { %v287_v8 = vld [vmem:[%s1864_s1 + $0x2a0] sm:$0xff]  ;;  %v288_v10 = vld [vmem:[%s1864_s1 + $0x2a8] sm:$0xff]  ;;  %v1363_v55 = vcombine.high %v245_v49, %v249_v50  ;;  %v241_v58 = vld [vmem:[%s1864_s1 + $0x130] sm:$0xff] }
  0x21   : > { %843 = vmatpush1.bf16.msra.mxu0 %v1342_v42  ;;  %886 = vmatpush1.bf16.msra.mxu1 %v1344_v44  ;;  %v1399_v13 = vcombine.high %v283_v7, %v287_v8  ;;  %v1401_v14 = vcombine.high %v284_v9, %v288_v10  ;;  %v275_v15 = vld [vmem:[%s1864_s1 + $0x240] sm:$0xff]  ;;  %v276_v17 = vld [vmem:[%s1864_s1 + $0x248] sm:$0xff]  ;;  %v1398_v19 = vcombine.low %v283_v7, %v287_v8  ;;  %v254_v42 = vld [vmem:[%s1864_s1 + $0x198] sm:$0xff] }
  0x22   : > { %844 = vmatprep.subr.bf16.mxu0 %v1335_v45  ;;  %887 = vmatprep.subr.bf16.mxu1 %v1337_v46  ;;  %v279_v16 = vld [vmem:[%s1864_s1 + $0x260] sm:$0xff]  ;;  %v280_v18 = vld [vmem:[%s1864_s1 + $0x268] sm:$0xff]  ;;  %v1400_v20 = vcombine.low %v284_v9, %v288_v10  ;;  %v258_v44 = vld [vmem:[%s1864_s1 + $0x1b8] sm:$0xff]  ;;  %v1378_v45 = vcombine.low %v261_v31, %v265_v32  ;;  %v1380_v46 = vcombine.low %v262_v33, %v266_v34 }
  0x23   : > { %v1391_v21 = vcombine.high %v275_v15, %v279_v16  ;;  %v1393_v22 = vcombine.high %v276_v17, %v280_v18  ;;  %v267_v23 = vld [vmem:[%s1864_s1 + $0x200] sm:$0xff]  ;;  %v268_v25 = vld [vmem:[%s1864_s1 + $0x208] sm:$0xff]  ;;  %v1390_v27 = vcombine.low %v275_v15, %v279_v16  ;;  %v1392_v28 = vcombine.low %v276_v17, %v280_v18  ;;  %v229_v1 = vld [vmem:[%s1864_s1 + $0xd0] sm:$0xff] }
  0x24   : > { %v271_v24 = vld [vmem:[%s1864_s1 + $0x220] sm:$0xff]  ;;  %v272_v26 = vld [vmem:[%s1864_s1 + $0x228] sm:$0xff]  ;;  %v1373_v48 = vcombine.high %v254_v42, %v258_v44  ;;  %v1355_v63 = vcombine.high %v237_v57, %v241_v58  ;;  %v233_v2 = vld [vmem:[%s1864_s1 + $0xf0] sm:$0xff] }
  0x25   : > { %845 = vmatpush1.bf16.msra.mxu0 %v1334_v51  ;;  %888 = vmatpush1.bf16.msra.mxu1 %v1336_v52  ;;  %v1383_v29 = vcombine.high %v267_v23, %v271_v24  ;;  %v1385_v30 = vcombine.high %v268_v25, %v272_v26  ;;  %v1382_v35 = vcombine.low %v267_v23, %v271_v24  ;;  %v1696_v41 = vld [vmem:[%s1584_s9] ss:$8 sps:$4 sm:$0xff]   ;;  %v246_v51 = vld [vmem:[%s1864_s1 + $0x158] sm:$0xff]  ;;  %v221_v8 = vld [vmem:[%s1864_s1 + $0x90] sm:$0xff] }
  0x26   : > { %846 = vmatprep.subr.bf16.mxu0 %v1327_v53  ;;  %889 = vmatprep.subr.bf16.mxu1 %v1329_v54  ;;  %v1384_v36 = vcombine.low %v268_v25, %v272_v26  ;;  %v250_v52 = vld [vmem:[%s1864_s1 + $0x178] sm:$0xff]  ;;  %v1370_v53 = vcombine.low %v253_v39, %v257_v40  ;;  %v1372_v54 = vcombine.low %v254_v42, %v258_v44  ;;  %v225_v9 = vld [vmem:[%s1864_s1 + $0xb0] sm:$0xff] }
  0x27   : > { %v1365_v56 = vcombine.high %v246_v51, %v250_v52  ;;  %v222_v10 = vld [vmem:[%s1864_s1 + $0x98] sm:$0xff]  ;;  %v213_v16 = vld [vmem:[%s1864_s1 + $0x50] sm:$0xff] }
  0x28   : > { %v217_v17 = vld [vmem:[%s1864_s1 + $0x70] sm:$0xff]  ;;  %v214_v18 = vld [vmem:[%s1864_s1 + $0x58] sm:$0xff] }
  0x29   : > { %847 = vmatpush1.bf16.msra.mxu0 %v1326_v59  ;;  %890 = vmatpush1.bf16.msra.mxu1 %v1328_v60  ;;  %v238_v59 = vld [vmem:[%s1864_s1 + $0x118] sm:$0xff]  ;;  %v205_v24 = vld [vmem:[%s1864_s1 + $0x10] sm:$0xff] }
  0x2a   : > { %848 = vmatprep.subr.bf16.mxu0 %v1319_v61  ;;  %891 = vmatprep.subr.bf16.mxu1 %v1321_v62  ;;  %v242_v60 = vld [vmem:[%s1864_s1 + $0x138] sm:$0xff]  ;;  %v1362_v61 = vcombine.low %v245_v49, %v249_v50  ;;  %v1364_v62 = vcombine.low %v246_v51, %v250_v52  ;;  %v209_v25 = vld [vmem:[%s1864_s1 + $0x30] sm:$0xff] }
  0x2b   : > { %v1357_v0 = vcombine.high %v238_v59, %v242_v60  ;;  %v206_v26 = vld [vmem:[%s1864_s1 + $0x18] sm:$0xff]  ;;  %v293_v32 = vld [vmem:[%s1864_s1 + $0x2d0] sm:$0xff] }
  0x2c   : > { %v297_v33 = vld [vmem:[%s1864_s1 + $0x2f0] sm:$0xff]  ;;  %v294_v34 = vld [vmem:[%s1864_s1 + $0x2d8] sm:$0xff] }
  0x2d   : > { %849 = vmatpush1.bf16.msra.mxu0 %v1318_v3  ;;  %892 = vmatpush1.bf16.msra.mxu1 %v1320_v4  ;;  %v234_v3 = vld [vmem:[%s1864_s1 + $0xf8] sm:$0xff]  ;;  %v1354_v4 = vcombine.low %v237_v57, %v241_v58  ;;  %v285_v40 = vld [vmem:[%s1864_s1 + $0x290] sm:$0xff] }
  0x2e   : > { %858 = vmatprep.subr.bf16.mxu0 %v1407_v5  ;;  %901 = vmatprep.subr.bf16.mxu1 %v1409_v6  ;;  %v1356_v5 = vcombine.low %v238_v59, %v242_v60  ;;  %v1347_v6 = vcombine.high %v229_v1, %v233_v2  ;;  %v289_v42 = vld [vmem:[%s1864_s1 + $0x2b0] sm:$0xff]  ;;  %v286_v44 = vld [vmem:[%s1864_s1 + $0x298] sm:$0xff] }
  0x2f   : > { %v277_v50 = vld [vmem:[%s1864_s1 + $0x250] sm:$0xff]  ;;  %v278_v52 = vld [vmem:[%s1864_s1 + $0x258] sm:$0xff] }
  0x30   : > { %v281_v51 = vld [vmem:[%s1864_s1 + $0x270] sm:$0xff]  ;;  %v270_v60 = vld [vmem:[%s1864_s1 + $0x218] sm:$0xff] }
  0x31   : > { %859 = vmatpush2.bf16.msra.mxu0 %v1406_v11  ;;  %902 = vmatpush2.bf16.msra.mxu1 %v1408_v12  ;;  %v226_v11 = vld [vmem:[%s1864_s1 + $0xb8] sm:$0xff]  ;;  %v1346_v12 = vcombine.low %v229_v1, %v233_v2  ;;  %v269_v58 = vld [vmem:[%s1864_s1 + $0x210] sm:$0xff] }
  0x32   : > { %860 = vmatprep.subr.bf16.mxu0 %v1399_v13  ;;  %903 = vmatprep.subr.bf16.mxu1 %v1401_v14  ;;  %v1339_v14 = vcombine.high %v221_v8, %v225_v9  ;;  %v1341_v15 = vcombine.high %v222_v10, %v226_v11  ;;  %v273_v59 = vld [vmem:[%s1864_s1 + $0x230] sm:$0xff] }
  0x33   : > { %v1386_v2 = vcombine.low %v269_v58, %v273_v59 }
  0x35   : > { %861 = vmatpush2.bf16.msra.mxu0 %v1398_v19  ;;  %904 = vmatpush2.bf16.msra.mxu1 %v1400_v20  ;;  %v218_v19 = vld [vmem:[%s1864_s1 + $0x78] sm:$0xff]  ;;  %v1338_v20 = vcombine.low %v221_v8, %v225_v9 }
  0x36   : > { %862 = vmatprep.subr.bf16.mxu0 %v1391_v21  ;;  %905 = vmatprep.subr.bf16.mxu1 %v1393_v22  ;;  %v1340_v21 = vcombine.low %v222_v10, %v226_v11  ;;  %v1331_v22 = vcombine.high %v213_v16, %v217_v17  ;;  %v1333_v23 = vcombine.high %v214_v18, %v218_v19 }
  0x39   : > { %863 = vmatpush2.bf16.msra.mxu0 %v1390_v27  ;;  %906 = vmatpush2.bf16.msra.mxu1 %v1392_v28  ;;  %v210_v27 = vld [vmem:[%s1864_s1 + $0x38] sm:$0xff]  ;;  %v1330_v28 = vcombine.low %v213_v16, %v217_v17 }
  0x3a   : > { %864 = vmatprep.subr.bf16.mxu0 %v1383_v29  ;;  %907 = vmatprep.subr.bf16.mxu1 %v1385_v30  ;;  %v1332_v29 = vcombine.low %v214_v18, %v218_v19  ;;  %v1323_v30 = vcombine.high %v205_v24, %v209_v25  ;;  %v1325_v31 = vcombine.high %v206_v26, %v210_v27 }
  0x3d   : > { %865 = vmatpush2.bf16.msra.mxu0 %v1382_v35  ;;  %908 = vmatpush2.bf16.msra.mxu1 %v1384_v36  ;;  %v298_v35 = vld [vmem:[%s1864_s1 + $0x2f8] sm:$0xff]  ;;  %v1322_v36 = vcombine.low %v205_v24, %v209_v25 }
  0x3e   : > { %920 = vmatprep.subr.bf16.mxu0 %v1379_v37  ;;  %963 = vmatprep.subr.bf16.mxu1 %v1381_v38  ;;  %v1324_v37 = vcombine.low %v206_v26, %v210_v27  ;;  %v1411_v38 = vcombine.high %v293_v32, %v297_v33  ;;  %v1413_v39 = vcombine.high %v294_v34, %v298_v35 }
  0x40   : > { %867 = vmatmul.mubr.bf16.vlgmr.msra.gmra.mxu0 %v1696_v41  ;;  %910 = vmatmul.mubr.bf16.vlgmr.msra.gmra.mxu1 %v1696_v41 }
  0x41   : > { %921 = vmatpush1.bf16.msra.mxu0 %v1378_v45  ;;  %964 = vmatpush1.bf16.msra.mxu1 %v1380_v46  ;;  %v290_v45 = vld [vmem:[%s1864_s1 + $0x2b8] sm:$0xff]  ;;  %v1410_v46 = vcombine.low %v293_v32, %v297_v33 }
  0x42   : > { %922 = vmatprep.subr.bf16.mxu0 %v1371_v47  ;;  %965 = vmatprep.subr.bf16.mxu1 %v1373_v48  ;;  %v1412_v47 = vcombine.low %v294_v34, %v298_v35  ;;  %v1403_v48 = vcombine.high %v285_v40, %v289_v42  ;;  %v1405_v49 = vcombine.high %v286_v44, %v290_v45 }
  0x43   : > { %1416 = vmatprep.mubr.msk.bf16.mxu0 %vm830_vm0, %v1599_v43  ;;  %1417 = vmatprep.mubr.msk.bf16.mxu1 %vm830_vm0, %v1599_v43  ;;  %v230_v43 = vld [vmem:[%s1864_s1 + $0xd8] sm:$0xff] }
  0x44   : > { %v1349_v7 = vcombine.high %v230_v43, %v234_v3  ;;  %v1348_v13 = vcombine.low %v230_v43, %v234_v3 }
  0x45   : > { %923 = vmatpush1.bf16.msra.mxu0 %v1370_v53  ;;  %966 = vmatpush1.bf16.msra.mxu1 %v1372_v54  ;;  %v282_v53 = vld [vmem:[%s1864_s1 + $0x278] sm:$0xff]  ;;  %v1402_v54 = vcombine.low %v285_v40, %v289_v42 }
  0x46   : > { %924 = vmatprep.subr.bf16.mxu0 %v1363_v55  ;;  %967 = vmatprep.subr.bf16.mxu1 %v1365_v56  ;;  %v1404_v55 = vcombine.low %v286_v44, %v290_v45  ;;  %v1395_v56 = vcombine.high %v277_v50, %v281_v51  ;;  %v1397_v57 = vcombine.high %v278_v52, %v282_v53 }
  0x49   : > { %925 = vmatpush1.bf16.msra.mxu0 %v1362_v61  ;;  %968 = vmatpush1.bf16.msra.mxu1 %v1364_v62  ;;  %v274_v61 = vld [vmem:[%s1864_s1 + $0x238] sm:$0xff]  ;;  %v1394_v62 = vcombine.low %v277_v50, %v281_v51 }
  0x4a   : > { %926 = vmatprep.subr.bf16.mxu0 %v1355_v63  ;;  %969 = vmatprep.subr.bf16.mxu1 %v1357_v0  ;;  %v1396_v63 = vcombine.low %v278_v52, %v282_v53  ;;  %v1387_v0 = vcombine.high %v269_v58, %v273_v59  ;;  %v1389_v1 = vcombine.high %v270_v60, %v274_v61 }
  0x4b   : > { %v1388_v43 = vcombine.low %v270_v60, %v274_v61 }
  0x4d   : > { %927 = vmatpush1.bf16.msra.mxu0 %v1354_v4  ;;  %970 = vmatpush1.bf16.msra.mxu1 %v1356_v5  ;;  %v301_v5 = vlaneseq }
  0x4e   : > { %928 = vmatprep.subr.bf16.mxu0 %v1347_v6  ;;  %971 = vmatprep.subr.bf16.mxu1 %v1349_v7 }
  0x4f   : > { %v1832_v8 = vshrl.u32 %v301_v5, 7 }
  0x51   : > { %929 = vmatpush1.bf16.msra.mxu0 %v1346_v12  ;;  %972 = vmatpush1.bf16.msra.mxu1 %v1348_v13  ;;  %v303_v11 = vsub.s32 0, %v1832_v8  ;;  %v307_v12 = vsub.s32 1, %v1832_v8  ;;  %v315_v13 = vsub.s32 3, %v1832_v8  ;;  %v331_v58 = vsub.s32 7, %v1832_v8 }
  0x52   : > { %930 = vmatprep.subr.bf16.mxu0 %v1339_v14  ;;  %973 = vmatprep.subr.bf16.mxu1 %v1341_v15  ;;  %v299_v14 = vld [vmem:[%s1865_s2] sm:$0xff] }
  0x53   : > { %v304_v17 = vrot.slane %v299_v14, %v303_v11  ;;  %v308_v18 = vrot.slane %v299_v14, %v307_v12  ;;  %v316_v19 = vrot.slane %v299_v14, %v315_v13  ;;  %v1473_v11 = vmov 1966171168  }
  0x54   : > { %v1845_v12 = vunpack.c.l.s4 %v1473_v11 }
  0x55   : > { %931 = vmatpush1.bf16.msra.mxu0 %v1338_v20  ;;  %974 = vmatpush1.bf16.msra.mxu1 %v1340_v21 }
  0x56   : > { %932 = vmatprep.subr.bf16.mxu0 %v1331_v22  ;;  %975 = vmatprep.subr.bf16.mxu1 %v1333_v23 }
  0x59   : > { %933 = vmatpush1.bf16.msra.mxu0 %v1330_v28  ;;  %976 = vmatpush1.bf16.msra.mxu1 %v1332_v29 }
  0x5a   : > { %934 = vmatprep.subr.bf16.mxu0 %v1323_v30  ;;  %977 = vmatprep.subr.bf16.mxu1 %v1325_v31 }
  0x5d   : > { %935 = vmatpush1.bf16.msra.mxu0 %v1322_v36  ;;  %978 = vmatpush1.bf16.msra.mxu1 %v1324_v37 }
  0x5e   : > { %944 = vmatprep.subr.bf16.mxu0 %v1411_v38  ;;  %987 = vmatprep.subr.bf16.mxu1 %v1413_v39 }
  0x61   : > { %945 = vmatpush2.bf16.msra.mxu0 %v1410_v46  ;;  %988 = vmatpush2.bf16.msra.mxu1 %v1412_v47 }
  0x62   : > { %946 = vmatprep.subr.bf16.mxu0 %v1403_v48  ;;  %989 = vmatprep.subr.bf16.mxu1 %v1405_v49 }
  0x65   : > { %947 = vmatpush2.bf16.msra.mxu0 %v1402_v54  ;;  %990 = vmatpush2.bf16.msra.mxu1 %v1404_v55  ;;  %v319_v54 = vsub.s32 4, %v1832_v8  ;;  %v327_v55 = vsub.s32 6, %v1832_v8 }
  0x66   : > { %948 = vmatprep.subr.bf16.mxu0 %v1395_v56  ;;  %991 = vmatprep.subr.bf16.mxu1 %v1397_v57  ;;  %v323_v56 = vsub.s32 5, %v1832_v8 }
  0x69   : > { %949 = vmatpush2.bf16.msra.mxu0 %v1394_v62  ;;  %992 = vmatpush2.bf16.msra.mxu1 %v1396_v63  ;;  %v320_v62 = vrot.slane %v299_v14, %v319_v54  ;;  %v328_v63 = vrot.slane %v299_v14, %v327_v55 }
  0x6a   : > { %950 = vmatprep.subr.bf16.mxu0 %v1387_v0  ;;  %993 = vmatprep.subr.bf16.mxu1 %v1389_v1  ;;  %v324_v0 = vrot.slane %v299_v14, %v323_v56 }
  0x6d   : > { %951 = vmatpush2.bf16.msra.mxu0 %v1386_v2  ;;  %994 = vmatpush2.bf16.msra.mxu1 %v1388_v43  ;;  %v332_v43 = vrot.slane %v299_v14, %v331_v58 }
  0x70   : > { %953 = vmatmul.mubr.bf16.vlgmr.msra.gmra.mxu0 %v1696_v41  ;;  %996 = vmatmul.mubr.bf16.vlgmr.msra.gmra.mxu1 %v1696_v41  ;;  %v311_v41 = vsub.s32 2, %v1832_v8 }
  0x72   : > { %v312_v23 = vrot.slane %v299_v14, %v311_v41 }
 0x100   : > { %v868_v3 = vpop.f32.mrf.mxu0  ;;  %v911_v4 = vpop.f32.mrf.mxu1 }
 0x101   : > { %v869_v24 = vadd.f32 %v868_v3, %v304_v17  ;;  %v912_v31 = vadd.f32 %v911_v4, %v312_v23 }
 0x102   : > { %v870_v6 = vpop.f32.mrf.mxu0  ;;  %v913_v7 = vpop.f32.mrf.mxu1 }
 0x103   : > { %v871_v25 = vadd.f32 %v870_v6, %v308_v18  ;;  %v914_v26 = vadd.f32 %v913_v7, %v316_v19  ;;  %v1022_v32 = vmul.f32 0.2, %v869_v24  ;;  %vm1006_vm4 = vcmp.ge.f32.partialorder %v869_v24, 0.0 }
 0x104   : > { %v872_v9 = vpop.f32.mrf.mxu0  ;;  %v915_v10 = vpop.f32.mrf.mxu1  ;;  %v1024_v39 = vmul.f32 0.2, %v912_v31  ;;  %vm1008_vm8 = vcmp.ge.f32.partialorder %v912_v31, 0.0 }
 0x105   : > { %v873_v20 = vadd.f32 %v872_v9, %v304_v17  ;;  %v916_v27 = vadd.f32 %v915_v10, %v312_v23  ;;  %v1023_v33 = vmul.f32 0.2, %v871_v25  ;;  %v1025_v34 = vmul.f32 0.2, %v914_v26 }
 0x106   : > { %v874_v15 = vpop.f32.mrf.mxu0  ;;  %v917_v16 = vpop.f32.mrf.mxu1  ;;  %vm1007_vm5 = vcmp.ge.f32.partialorder %v871_v25, 0.0  ;;  %vm1009_vm6 = vcmp.ge.f32.partialorder %v914_v26, 0.0  ;;  %v1038_v40 = vsel %vm1006_vm4, %v869_v24, %v1022_v32  ;;  %v1040_v49 = vsel %vm1008_vm8, %v912_v31, %v1024_v39 }
 0x107   : > { %v875_v21 = vadd.f32 %v874_v15, %v308_v18  ;;  %v918_v22 = vadd.f32 %v917_v16, %v316_v19  ;;  %v1030_v28 = vmul.f32 0.2, %v873_v20  ;;  %vm1014_vm1 = vcmp.ge.f32.partialorder %v873_v20, 0.0 }
 0x108   : > { %v1032_v35 = vmul.f32 0.2, %v916_v27  ;;  %vm1016_vm7 = vcmp.ge.f32.partialorder %v916_v27, 0.0  ;;  %v1039_v42 = vsel %vm1007_vm5, %v871_v25, %v1023_v33  ;;  %v1041_v44 = vsel %vm1009_vm6, %v914_v26, %v1025_v34 }
 0x109   : > { %v1031_v29 = vmul.f32 0.2, %v875_v21  ;;  %v1033_v30 = vmul.f32 0.2, %v918_v22  ;;  %vm1015_vm2 = vcmp.ge.f32.partialorder %v875_v21, 0.0  ;;  %vm1017_vm3 = vcmp.ge.f32.partialorder %v918_v22, 0.0 }
 0x10a   : > { %v1046_v36 = vsel %vm1014_vm1, %v873_v20, %v1030_v28  ;;  %v1048_v46 = vsel %vm1016_vm7, %v916_v27, %v1032_v35 }
 0x10b   : > { %v1047_v37 = vsel %vm1015_vm2, %v875_v21, %v1031_v29  ;;  %v1049_v38 = vsel %vm1017_vm3, %v918_v22, %v1033_v30  ;;  %v1054_v45 = vmax.f32 %v1038_v40, %v1046_v36  ;;  %v1068_v50 = vmax.f32 %v1040_v49, %v1048_v46 }
 0x10c   : > { %v1061_v47 = vmax.f32 %v1039_v42, %v1047_v37  ;;  %v1075_v48 = vmax.f32 %v1041_v44, %v1049_v38 }
 0x10d   : > { %v1055_v51 = vrot.slane %v1054_v45, 4  ;;  %v1069_v57 = vrot.slane %v1068_v50, 4 }
 0x10e   : > { %v1062_v52 = vrot.slane %v1061_v47, 4  ;;  %v1076_v53 = vrot.slane %v1075_v48, 4 }
 0x10f   : > { %v1056_v59 = vmax.f32 %v1054_v45, %v1055_v51  ;;  %v1070_v1 = vmax.f32 %v1068_v50, %v1069_v57 }
 0x110   : > { %v1063_v60 = vmax.f32 %v1061_v47, %v1062_v52  ;;  %v1077_v61 = vmax.f32 %v1075_v48, %v1076_v53 }
 0x111   : > { %v1057_v3 = vrot.slane %v1056_v59, 2  ;;  %v1071_v16 = vrot.slane %v1070_v1, 2 }
 0x112   : > { %v1064_v4 = vrot.slane %v1063_v60, 2  ;;  %v1078_v5 = vrot.slane %v1077_v61, 2 }
 0x113   : > { %v1058_v14 = vmax.f32 %v1056_v59, %v1057_v3  ;;  %v1072_v40 = vmax.f32 %v1070_v1, %v1071_v16 }
 0x114   : > { %v1065_v20 = vmax.f32 %v1063_v60, %v1064_v4  ;;  %v1079_v21 = vmax.f32 %v1077_v61, %v1078_v5  ;;  %v1128_v60 = vunpack.c.0.s8 %v1845_v12 }
 0x115   : > { %v1059_v56 = vrot.slane %v1058_v14, 1  ;;  %v1073_v57 = vrot.slane %v1072_v40, 1 }
 0x116   : > { %v1066_v50 = vrot.slane %v1065_v20, 1  ;;  %v1080_v51 = vrot.slane %v1079_v21, 1 }
 0x117   : > { %v1060_v4 = vmax.f32 %v1058_v14, %v1059_v56  ;;  %v1074_v5 = vmax.f32 %v1072_v40, %v1073_v57 }
 0x130   : > { %v954_v2 = vpop.f32.mrf.mxu0  ;;  %v997_v7 = vpop.f32.mrf.mxu1 }
 0x131   : > { %v955_v6 = vadd.f32 %v954_v2, %v320_v62  ;;  %v998_v9 = vadd.f32 %v997_v7, %v328_v63 }
 0x132   : > { %v956_v10 = vpop.f32.mrf.mxu0  ;;  %v999_v15 = vpop.f32.mrf.mxu1 }
 0x133   : > { %vm1010_vm9 = vcmp.ge.f32.partialorder %v955_v6, 0.0  ;;  %v1026_v13 = vmul.f32 0.2, %v955_v6  ;;  %v957_v41 = vadd.f32 %v956_v10, %v324_v0  ;;  %vm1012_vm10 = vcmp.ge.f32.partialorder %v998_v9, 0.0 }
 0x134   : > { %v1028_v17 = vmul.f32 0.2, %v998_v9  ;;  %v1000_v18 = vadd.f32 %v999_v15, %v332_v43  ;;  %v958_v19 = vpop.f32.mrf.mxu0  ;;  %v1001_v23 = vpop.f32.mrf.mxu1 }
 0x135   : > { %v959_v22 = vadd.f32 %v958_v19, %v320_v62  ;;  %v1042_v24 = vsel %vm1010_vm9, %v955_v6, %v1026_v13  ;;  %vm1011_vm11 = vcmp.ge.f32.partialorder %v957_v41, 0.0  ;;  %v1027_v25 = vmul.f32 0.2, %v957_v41 }
 0x136   : > { %v1002_v26 = vadd.f32 %v1001_v23, %v328_v63  ;;  %v960_v27 = vpop.f32.mrf.mxu0  ;;  %v1044_v28 = vsel %vm1012_vm10, %v998_v9, %v1028_v17  ;;  %v1003_v31 = vpop.f32.mrf.mxu1  ;;  %v1029_v32 = vmul.f32 0.2, %v1000_v18  ;;  %vm1013_vm14 = vcmp.ge.f32.partialorder %v1000_v18, 0.0 }
 0x137   : > { %vm1018_vm12 = vcmp.ge.f32.partialorder %v959_v22, 0.0  ;;  %v1034_v29 = vmul.f32 0.2, %v959_v22  ;;  %v961_v30 = vadd.f32 %v960_v27, %v324_v0  ;;  %v1004_v34 = vadd.f32 %v1003_v31, %v332_v43 }
 0x138   : > { %vm1020_vm13 = vcmp.ge.f32.partialorder %v1002_v26, 0.0  ;;  %v1036_v33 = vmul.f32 0.2, %v1002_v26  ;;  %v1043_v42 = vsel %vm1011_vm11, %v957_v41, %v1027_v25  ;;  %v1045_v46 = vsel %vm1013_vm14, %v1000_v18, %v1029_v32 }
 0x139   : > { %v1050_v35 = vsel %vm1018_vm12, %v959_v22, %v1034_v29  ;;  %vm1019_vm15 = vcmp.ge.f32.partialorder %v961_v30, 0.0  ;;  %v1035_v36 = vmul.f32 0.2, %v961_v30  ;;  %vm1021_vm0 = vcmp.ge.f32.partialorder %v1004_v34, 0.0 }
 0x13a   : > { %v1082_v37 = vmax.f32 %v1042_v24, %v1050_v35  ;;  %v1052_v38 = vsel %vm1020_vm13, %v1002_v26, %v1036_v33  ;;  %v1037_v39 = vmul.f32 0.2, %v1004_v34  ;;  %v1067_v63 = vmax.f32 %v1065_v20, %v1066_v50 }
 0x13b   : > { %v1096_v44 = vmax.f32 %v1044_v28, %v1052_v38  ;;  %v1051_v45 = vsel %vm1019_vm15, %v961_v30, %v1035_v36  ;;  %v1081_v0 = vmax.f32 %v1079_v21, %v1080_v51  ;;  %v1131_v9 = vsub.s32 %v1128_v60, %v1832_v8 }
 0x13c   : > { %v1083_v47 = vrot.slane %v1082_v37, 4  ;;  %v1089_v48 = vmax.f32 %v1043_v42, %v1051_v45  ;;  %v1053_v49 = vsel %vm1021_vm0, %v1004_v34, %v1037_v39  ;;  %v1122_v13 = vcombine.low %v1060_v4, %v1067_v63 }
 0x13d   : > { %v1097_v52 = vrot.slane %v1096_v44, 4  ;;  %v1103_v53 = vmax.f32 %v1045_v46, %v1053_v49  ;;  %v1123_v41 = vcombine.low %v1074_v5, %v1081_v0 }
 0x13e   : > { %v1084_v54 = vmax.f32 %v1082_v37, %v1083_v47  ;;  %v1090_v55 = vrot.slane %v1089_v48, 4  ;;  %v1132_v20 = vrot.slane %v1122_v13, %v1131_v9 }
 0x13f   : > { %v1098_v58 = vmax.f32 %v1096_v44, %v1097_v52  ;;  %v1104_v59 = vrot.slane %v1103_v53, 4  ;;  %v1139_v21 = vrot.slane %v1123_v41, %v1131_v9 }
 0x140   : > { %v1085_v61 = vrot.slane %v1084_v54, 2  ;;  %v1091_v62 = vmax.f32 %v1089_v48, %v1090_v55 }
 0x141   : > { %v1099_v1 = vrot.slane %v1098_v58, 2  ;;  %v1105_v2 = vmax.f32 %v1103_v53, %v1104_v59  ;;  %v1154_v26 = vcombine.low %v1132_v20, %v1139_v21 }
 0x142   : > { %v1086_v43 = vmax.f32 %v1084_v54, %v1085_v61  ;;  %v1092_v3 = vrot.slane %v1091_v62, 2 }
 0x143   : > { %v1100_v6 = vmax.f32 %v1098_v58, %v1099_v1  ;;  %v1106_v7 = vrot.slane %v1105_v2, 2  ;;  %v1162_v28 = vrot.slane %v1154_v26, %v1131_v9 }
 0x144   : > { %v1087_v10 = vrot.slane %v1086_v43, 1  ;;  %v1093_v11 = vmax.f32 %v1091_v62, %v1092_v3 }
 0x145   : > { %v1101_v12 = vrot.slane %v1100_v6, 1  ;;  %v1107_v15 = vmax.f32 %v1105_v2, %v1106_v7 }
 0x146   : > { %v1094_v16 = vrot.slane %v1093_v11, 1  ;;  %v1088_v18 = vmax.f32 %v1086_v43, %v1087_v10 }
 0x147   : > { %v1108_v17 = vrot.slane %v1107_v15, 1  ;;  %v1102_v22 = vmax.f32 %v1100_v6, %v1101_v12 }
 0x148   : > { %v1095_v19 = vmax.f32 %v1093_v11, %v1094_v16 }
 0x149   : > { %v1109_v14 = vmax.f32 %v1107_v15, %v1108_v17 }
 0x14a   : > { %v1124_v23 = vcombine.low %v1088_v18, %v1095_v19 }
 0x14b   : > { %v1125_v24 = vcombine.low %v1102_v22, %v1109_v14 }
 0x14c   : > { %v1146_v25 = vrot.slane %v1124_v23, %v1131_v9 }
 0x14d   : > { %v1153_v8 = vrot.slane %v1125_v24, %v1131_v9 }
 0x14f   : > { %v1155_v27 = vcombine.low %v1146_v25, %v1153_v8 }
 0x151   : > { %v1169_v29 = vrot.slane %v1155_v27, %v1131_v9 }
 0x153   : > { %v1170_v30 = vcombine.low %v1162_v28, %v1169_v29 }
 0x155   : > { %1172 = vst [vmem:[%s199_s8] sm:$0xff] %v1170_v30 }
 0x156 PF: > { %s13_s14 = sadd.s32 1, %s1471_s14   ;;  %s1867_s12 = smov %s1467_s13 }
 0x157   : > { %p10_p5 = scmp.ge.s32.totalorder %s13_s14, 4   ;;  %s1868_s13 = smov %s1870_s15 }
 0x159   :  { %12 = sbr.rel (!%p10_p5) target bundleno = 2 (0x2), region = 70 }

// kernel: dgcnn_partseg_forward.26
= control target key start
LH: loop header
LB: loop body
LE: loop exit
PB: predicated region body
PF: predicated region fallthrough
CT: control target
= control target key end

     0   :  { %s1947_s24 = smov 0   ;;  %s2426_s0 = inlined_call_operand.vmem [shape: f32[2,1,1024], index: 0, kind: input, shape index: {}]   ;;  %s2427_s1 = inlined_call_operand.vmem [shape: f32[2,1,16], index: 1, kind: input, shape index: {}]   ;;  %s2428_s2 = inlined_call_operand.vmem [shape: bf16[16,64], index: 2, kind: input, shape index: {}]   ;;  %s2429_s3 = inlined_call_operand.vmem [shape: f32[1,64], index: 3, kind: input, shape index: {}]   ;;  %s2430_s4 = inlined_call_operand.vmem [shape: bf16[1024,256], index: 4, kind: input, shape index: {}]   ;;  %s2431_s5 = inlined_call_operand.vmem [shape: bf16[64,256], index: 5, kind: input, shape index: {}]   ;;  %s2432_s6 = inlined_call_operand.vmem [shape: f32[1,256], index: 6, kind: input, shape index: {}]   ;;  %s2433_s7 = inlined_call_operand.vmem [shape: f32[2,1,256], index: 7, kind: output, shape index: {}]  }
   0x1 LB: > { %s1522_s25 = sadd.s32 4294967295, %s1901_s24   ;;  %p1526_p0 = scmp.ge.s32.totalorder %s1901_s24, 1  ;;  %s1901_s24 = sphi %s1947_s24, %s17_s24  }
   0x2   : > { %p244_p1 = scmp.lt.s32.totalorder %s1901_s24, 3 }
   0x4   : > { %p245_p2 = pnand %p1526_p0, %p244_p1 }
   0x5   : > { %p277_p3 = scmp.lt.s32.totalorder (!%p245_p2), %s1522_s25, 1 }
   0x6   : > { %248 = sbr.rel (%p245_p2) target bundleno = 550 (0x226), region = 48 }
   0xb   : > { %v1690_v0 = vld [vmem:[%s2428_s2] sm:$0xff]   ;;  %v1903_v1 = vmov 0.0   ;;  %vm1904_vm0 = vmmov 0   ;;  %v1693_v2 = vld [vmem:[%s2430_s4 + $0x74] ss:$8 sps:$4 sm:$0xff]   ;;  %s2435_s25 = smov (!%p277_p3, %s1522_s25), 1  ;;  %v349_v37 = vlaneseq }
   0xc   : > { %1672 = vmatprep.subr.bf16.mxu0 %v1903_v1  ;;  %1674 = vmatprep.mubr.msk.bf16.mxu0 %vm1904_vm0, %v1903_v1  ;;  %s283_s9 = scalar_lea.vmem %s2427_s1, %s2435_s25  ;;  %vm300_vm1 = vcmask 130048   ;;  %v1691_v4 = vld [vmem:[%s2430_s4 + $0x70] ss:$8 sps:$4 sm:$0xff]   ;;  %v1696_v6 = vld [vmem:[%s2430_s4 + $0x64] ss:$8 sps:$4 sm:$0xff]   ;;  %s1527_s11 = sshll.u32 %s2435_s25, 3 }
   0xd   : > { %1673 = vmatpush3.bf16.msra.mxu0 %v1690_v0  ;;  %v289_v3 = vld [vmem:[%s283_s9] sm:$0x1]  ;;  %v1699_v8 = vld [vmem:[%s2430_s4 + $0x54] ss:$8 sps:$4 sm:$0xff]   ;;  %v1697_v9 = vld [vmem:[%s2430_s4 + $0x50] ss:$8 sps:$4 sm:$0xff]   ;;  %s280_s14 = scalar_lea.vmem %s2426_s0, %s1527_s11 }
   0xe   : > { %1259 = vmatprep.subr.bf16.mxu0 %v1693_v2  ;;  %v290_v5 = vpack.c.bf16 %v289_v3, %v289_v3  ;;  %v1694_v7 = vld [vmem:[%s2430_s4 + $0x60] ss:$8 sps:$4 sm:$0xff]   ;;  %v1702_v10 = vld [vmem:[%s2430_s4 + $0x44] ss:$8 sps:$4 sm:$0xff]   ;;  %v1727_v12 = vld [vmem:[%s2431_s5 + $0x34] ss:$8 sps:$4 sm:$0xff]  }
   0xf   : > { %v1700_v11 = vld [vmem:[%s2430_s4 + $0x40] ss:$8 sps:$4 sm:$0xff]   ;;  %v1729_v13 = vld [vmem:[%s2431_s5 + $0x30] ss:$8 sps:$4 sm:$0xff]   ;;  %v1705_v14 = vld [vmem:[%s2430_s4 + $0x34] ss:$8 sps:$4 sm:$0xff]   ;;  %586 = vmatprep.subr.bf16.mxu1 %v1727_v12 }
  0x10   : > { %1675 = vmatmul.mubr.msk.bf16.vlgmr.msra.gmra.mxu0 %vm300_vm1, %v290_v5  ;;  %587 = vmatpush1.bf16.msra.mxu1 %v1729_v13  ;;  %v1733_v15 = vld [vmem:[%s2431_s5 + $0x24] ss:$8 sps:$4 sm:$0xff]   ;;  %v1735_v16 = vld [vmem:[%s2431_s5 + $0x20] ss:$8 sps:$4 sm:$0xff]   ;;  %v1703_v17 = vld [vmem:[%s2430_s4 + $0x30] ss:$8 sps:$4 sm:$0xff]  }
  0x11   : > { %1260 = vmatpush1.bf16.msra.mxu0 %v1691_v4  ;;  %v1708_v18 = vld [vmem:[%s2430_s4 + $0x24] ss:$8 sps:$4 sm:$0xff]   ;;  %588 = vmatprep.subr.bf16.mxu1 %v1733_v15  ;;  %v1739_v19 = vld [vmem:[%s2431_s5 + $0x14] ss:$8 sps:$4 sm:$0xff]   ;;  %v1706_v20 = vld [vmem:[%s2430_s4 + $0x20] ss:$8 sps:$4 sm:$0xff]  }
  0x12   : > { %1261 = vmatprep.subr.bf16.mxu0 %v1696_v6  ;;  %v1711_v21 = vld [vmem:[%s2430_s4 + $0x14] ss:$8 sps:$4 sm:$0xff]   ;;  %v1709_v22 = vld [vmem:[%s2430_s4 + $0x10] ss:$8 sps:$4 sm:$0xff]   ;;  %v1714_v23 = vld [vmem:[%s2430_s4 + $0x4] ss:$8 sps:$4 sm:$0xff]  }
  0x13   : > { %v1712_v24 = vld [vmem:[%s2430_s4] ss:$8 sps:$4 sm:$0xff]   ;;  %v1717_v25 = vld [vmem:[%s2430_s4 + $0xf4] ss:$8 sps:$4 sm:$0xff]   ;;  %v1715_v26 = vld [vmem:[%s2430_s4 + $0xf0] ss:$8 sps:$4 sm:$0xff]  }
  0x14   : > { %589 = vmatpush1.bf16.msra.mxu1 %v1735_v16  ;;  %v1720_v27 = vld [vmem:[%s2430_s4 + $0xe4] ss:$8 sps:$4 sm:$0xff]   ;;  %v1718_v28 = vld [vmem:[%s2430_s4 + $0xe0] ss:$8 sps:$4 sm:$0xff]   ;;  %v1723_v29 = vld [vmem:[%s2430_s4 + $0xd4] ss:$8 sps:$4 sm:$0xff]  }
  0x15   : > { %1262 = vmatpush1.bf16.msra.mxu0 %v1694_v7  ;;  %590 = vmatprep.subr.bf16.mxu1 %v1739_v19  ;;  %v1721_v30 = vld [vmem:[%s2430_s4 + $0xd0] ss:$8 sps:$4 sm:$0xff]   ;;  %v1726_v31 = vld [vmem:[%s2430_s4 + $0xc4] ss:$8 sps:$4 sm:$0xff]   ;;  %v1724_v32 = vld [vmem:[%s2430_s4 + $0xc0] ss:$8 sps:$4 sm:$0xff]  }
  0x16   : > { %1263 = vmatprep.subr.bf16.mxu0 %v1699_v8  ;;  %v1732_v33 = vld [vmem:[%s2430_s4 + $0xb4] ss:$8 sps:$4 sm:$0xff]   ;;  %v1730_v34 = vld [vmem:[%s2430_s4 + $0xb0] ss:$8 sps:$4 sm:$0xff]   ;;  %v1738_v35 = vld [vmem:[%s2430_s4 + $0xa4] ss:$8 sps:$4 sm:$0xff]  }
  0x17   : > { %v1736_v36 = vld [vmem:[%s2430_s4 + $0xa0] ss:$8 sps:$4 sm:$0xff]   ;;  %v1741_v38 = vld [vmem:[%s2431_s5 + $0x10] ss:$8 sps:$4 sm:$0xff]   ;;  %v1744_v39 = vld [vmem:[%s2430_s4 + $0x94] ss:$8 sps:$4 sm:$0xff]  }
  0x18   : > { %v1742_v40 = vld [vmem:[%s2430_s4 + $0x90] ss:$8 sps:$4 sm:$0xff]   ;;  %v2077_v41 = vshrl.u32 %v349_v37, 7  ;;  %v2079_v42 = vld [vmem:[%s280_s14] sm:$0xff]  ;;  %591 = vmatpush1.bf16.msra.mxu1 %v1741_v38  ;;  %v1753_v52 = vld [vmem:[%s2430_s4 + $0x174] ss:$8 sps:$4 sm:$0xff]  }
  0x19   : > { %1264 = vmatpush1.bf16.msra.mxu0 %v1697_v9  ;;  %v1745_v43 = vld [vmem:[%s2431_s5 + $0x4] ss:$8 sps:$4 sm:$0xff]   ;;  %v1747_v45 = vld [vmem:[%s2431_s5] ss:$8 sps:$4 sm:$0xff]   ;;  %v1905_v54 = vmov 0   ;;  %vm574_vm3 = vcmask 523264  }
  0x1a   : > { %1265 = vmatprep.subr.bf16.mxu0 %v1702_v10  ;;  %v355_v44 = vsub.s32 1, %v2077_v41  ;;  %v1750_v46 = vld [vmem:[%s2430_s4 + $0x84] ss:$8 sps:$4 sm:$0xff]   ;;  %v351_v47 = vsub.s32 0, %v2077_v41  ;;  %592 = vmatprep.subr.bf16.mxu1 %v1745_v43  ;;  %v1748_v48 = vld [vmem:[%s2430_s4 + $0x80] ss:$8 sps:$4 sm:$0xff]  }
  0x1b   : > { %610 = vmatprep.mubr.bf16.mxu1 %v1905_v54  ;;  %v1756_v55 = vld [vmem:[%s2430_s4 + $0x274] ss:$8 sps:$4 sm:$0xff]   ;;  %v1754_v56 = vld [vmem:[%s2430_s4 + $0x270] ss:$8 sps:$4 sm:$0xff]   ;;  %v1762_v57 = vld [vmem:[%s2430_s4 + $0x264] ss:$8 sps:$4 sm:$0xff]  }
  0x1c   : > { %v356_v49 = vrot.slane %v2079_v42, %v355_v44  ;;  %593 = vmatpush1.bf16.msra.mxu1 %v1747_v45  ;;  %v352_v50 = vrot.slane %v2079_v42, %v351_v47  ;;  %v1760_v58 = vld [vmem:[%s2430_s4 + $0x260] ss:$8 sps:$4 sm:$0xff]   ;;  %v1768_v59 = vld [vmem:[%s2430_s4 + $0x254] ss:$8 sps:$4 sm:$0xff]   ;;  %v1766_v60 = vld [vmem:[%s2430_s4 + $0x250] ss:$8 sps:$4 sm:$0xff]  }
  0x1d   : > { %1266 = vmatpush1.bf16.msra.mxu0 %v1700_v11  ;;  %1300 = vmatprep.subr.bf16.mxu1 %v1753_v52  ;;  %v1774_v61 = vld [vmem:[%s2430_s4 + $0x244] ss:$8 sps:$4 sm:$0xff]   ;;  %v1772_v62 = vld [vmem:[%s2430_s4 + $0x240] ss:$8 sps:$4 sm:$0xff]   ;;  %v1780_v63 = vld [vmem:[%s2430_s4 + $0x234] ss:$8 sps:$4 sm:$0xff]  }
  0x1e   : > { %1267 = vmatprep.subr.bf16.mxu0 %v1705_v14  ;;  %v390_v51 = vpack.c.bf16 %v356_v49, %v356_v49  ;;  %v389_v53 = vpack.c.bf16 %v352_v50, %v352_v50  ;;  %v1778_v0 = vld [vmem:[%s2430_s4 + $0x230] ss:$8 sps:$4 sm:$0xff]   ;;  %v1786_v1 = vld [vmem:[%s2430_s4 + $0x224] ss:$8 sps:$4 sm:$0xff]   ;;  %v1784_v2 = vld [vmem:[%s2430_s4 + $0x220] ss:$8 sps:$4 sm:$0xff]  }
  0x1f   : > { %v1792_v3 = vld [vmem:[%s2430_s4 + $0x214] ss:$8 sps:$4 sm:$0xff]   ;;  %v1790_v4 = vld [vmem:[%s2430_s4 + $0x210] ss:$8 sps:$4 sm:$0xff]   ;;  %v1798_v5 = vld [vmem:[%s2430_s4 + $0x204] ss:$8 sps:$4 sm:$0xff]  }
  0x20   : > { %1291 = vmatprep.mubr.bf16.mxu0 %v390_v51  ;;  %v1796_v6 = vld [vmem:[%s2430_s4 + $0x200] ss:$8 sps:$4 sm:$0xff]   ;;  %v1804_v7 = vld [vmem:[%s2430_s4 + $0x2f4] ss:$8 sps:$4 sm:$0xff]   ;;  %v1802_v8 = vld [vmem:[%s2430_s4 + $0x2f0] ss:$8 sps:$4 sm:$0xff]  }
  0x21   : > { %1268 = vmatpush1.bf16.msra.mxu0 %v1703_v17  ;;  %v1810_v9 = vld [vmem:[%s2430_s4 + $0x2e4] ss:$8 sps:$4 sm:$0xff]   ;;  %v1808_v10 = vld [vmem:[%s2430_s4 + $0x2e0] ss:$8 sps:$4 sm:$0xff]   ;;  %v1816_v11 = vld [vmem:[%s2430_s4 + $0x2d4] ss:$8 sps:$4 sm:$0xff]  }
  0x22   : > { %1269 = vmatprep.subr.bf16.mxu0 %v1708_v18  ;;  %v1814_v12 = vld [vmem:[%s2430_s4 + $0x2d0] ss:$8 sps:$4 sm:$0xff]   ;;  %v1822_v13 = vld [vmem:[%s2430_s4 + $0x2c4] ss:$8 sps:$4 sm:$0xff]   ;;  %v1820_v14 = vld [vmem:[%s2430_s4 + $0x2c0] ss:$8 sps:$4 sm:$0xff]  }
  0x23   : > { %v1828_v15 = vld [vmem:[%s2430_s4 + $0x2b4] ss:$8 sps:$4 sm:$0xff]   ;;  %v1826_v16 = vld [vmem:[%s2430_s4 + $0x2b0] ss:$8 sps:$4 sm:$0xff]   ;;  %v1834_v17 = vld [vmem:[%s2430_s4 + $0x2a4] ss:$8 sps:$4 sm:$0xff]  }
  0x24   : > { %v1832_v18 = vld [vmem:[%s2430_s4 + $0x2a0] ss:$8 sps:$4 sm:$0xff]   ;;  %v1840_v19 = vld [vmem:[%s2430_s4 + $0x294] ss:$8 sps:$4 sm:$0xff]   ;;  %v1763_v50 = vld [vmem:[%s2430_s4 + $0x150] ss:$8 sps:$4 sm:$0xff]  }
  0x25   : > { %1270 = vmatpush1.bf16.msra.mxu0 %v1706_v20  ;;  %v1838_v20 = vld [vmem:[%s2430_s4 + $0x290] ss:$8 sps:$4 sm:$0xff]   ;;  %v1765_v49 = vld [vmem:[%s2430_s4 + $0x154] ss:$8 sps:$4 sm:$0xff]   ;;  %v1771_v51 = vld [vmem:[%s2430_s4 + $0x144] ss:$8 sps:$4 sm:$0xff]  }
  0x26   : > { %1271 = vmatprep.subr.bf16.mxu0 %v1711_v21  ;;  %v371_v21 = vsub.s32 5, %v2077_v41  ;;  %v1769_v52 = vld [vmem:[%s2430_s4 + $0x140] ss:$8 sps:$4 sm:$0xff]   ;;  %v1775_v54 = vld [vmem:[%s2430_s4 + $0x130] ss:$8 sps:$4 sm:$0xff]   ;;  %s1528_s15 = sshll.u32 %s2435_s25, 1 }
  0x27   : > { %s287_s18 = scalar_lea.vmem %s2433_s7, %s1528_s15  ;;  %vm1457_vm4 = vcmp.lt.s32.totalorder %v349_v37, 256 }
  0x29   : > { %1272 = vmatpush1.bf16.msra.mxu0 %v1709_v22  ;;  %v1846_v22 = vld [vmem:[%s2430_s4 + $0x284] ss:$8 sps:$4 sm:$0xff]  }
  0x2a   : > { %1273 = vmatprep.subr.bf16.mxu0 %v1714_v23  ;;  %v367_v23 = vsub.s32 4, %v2077_v41 }
  0x2d   : > { %1274 = vmatpush1.bf16.msra.mxu0 %v1712_v24  ;;  %v1844_v24 = vld [vmem:[%s2430_s4 + $0x280] ss:$8 sps:$4 sm:$0xff]  }
  0x2e   : > { %1275 = vmatprep.subr.bf16.mxu0 %v1717_v25  ;;  %v372_v25 = vrot.slane %v2079_v42, %v371_v21  ;;  %v1852_v21 = vld [vmem:[%s2430_s4 + $0x364] ss:$8 sps:$4 sm:$0xff]  }
  0x31   : > { %1276 = vmatpush2.bf16.msra.mxu0 %v1715_v26  ;;  %v368_v26 = vrot.slane %v2079_v42, %v367_v23  ;;  %v1850_v23 = vld [vmem:[%s2430_s4 + $0x360] ss:$8 sps:$4 sm:$0xff]  }
  0x32   : > { %1277 = vmatprep.subr.bf16.mxu0 %v1720_v27  ;;  %v394_v27 = vpack.c.bf16 %v372_v25, %v372_v25 }
  0x35   : > { %1278 = vmatpush2.bf16.msra.mxu0 %v1718_v28  ;;  %v393_v28 = vpack.c.bf16 %v368_v26, %v368_v26 }
  0x36   : > { %1279 = vmatprep.subr.bf16.mxu0 %v1723_v29  ;;  %v363_v29 = vsub.s32 3, %v2077_v41 }
  0x39   : > { %1280 = vmatpush2.bf16.msra.mxu0 %v1721_v30  ;;  %v293_v30 = vld [vmem:[%s2429_s3] sm:$0x1] }
  0x3a   : > { %1281 = vmatprep.subr.bf16.mxu0 %v1726_v31 }
  0x3d   : > { %1282 = vmatpush2.bf16.msra.mxu0 %v1724_v32 }
  0x3e   : > { %1283 = vmatprep.subr.bf16.mxu0 %v1732_v33  ;;  %v364_v33 = vrot.slane %v2079_v42, %v363_v29 }
  0x41   : > { %1284 = vmatpush2.bf16.msra.mxu0 %v1730_v34 }
  0x42   : > { %1285 = vmatprep.subr.bf16.mxu0 %v1738_v35 }
  0x45   : > { %1286 = vmatpush2.bf16.msra.mxu0 %v1736_v36 }
  0x46   : > { %1287 = vmatprep.subr.bf16.mxu0 %v1744_v39  ;;  %v1751_v39 = vld [vmem:[%s2430_s4 + $0x170] ss:$8 sps:$4 sm:$0xff]  }
  0x49   : > { %1288 = vmatpush2.bf16.msra.mxu0 %v1742_v40  ;;  %v392_v40 = vpack.c.bf16 %v364_v33, %v364_v33  ;;  %v1864_v33 = vld [vmem:[%s2430_s4 + $0x324] ss:$8 sps:$4 sm:$0xff]  }
  0x4a   : > { %1289 = vmatprep.subr.bf16.mxu0 %v1750_v46  ;;  %v1759_v46 = vld [vmem:[%s2430_s4 + $0x164] ss:$8 sps:$4 sm:$0xff]  }
  0x4d   : > { %1290 = vmatpush2.bf16.msra.mxu0 %v1748_v48  ;;  %v1757_v48 = vld [vmem:[%s2430_s4 + $0x160] ss:$8 sps:$4 sm:$0xff]  }
  0x4e   : > { %1341 = vmatprep.subr.bf16.mxu0 %v1756_v55  ;;  %v1783_v55 = vld [vmem:[%s2430_s4 + $0x124] ss:$8 sps:$4 sm:$0xff]  }
  0x50   : > { %1292 = vmatmul.mubr.bf16.vlgmr.msra.gmra.mxu0 %v389_v53  ;;  %v1777_v53 = vld [vmem:[%s2430_s4 + $0x134] ss:$8 sps:$4 sm:$0xff]  }
  0x51   : > { %1342 = vmatpush1.bf16.msra.mxu0 %v1754_v56  ;;  %1373 = vmatprep.mubr.bf16.mxu0 %v394_v27  ;;  %v1781_v56 = vld [vmem:[%s2430_s4 + $0x120] ss:$8 sps:$4 sm:$0xff]   ;;  %v1853_v27 = vld [vmem:[%s2430_s4 + $0x350] ss:$8 sps:$4 sm:$0xff]  }
  0x52   : > { %1343 = vmatprep.subr.bf16.mxu0 %v1762_v57  ;;  %v1789_v57 = vld [vmem:[%s2430_s4 + $0x114] ss:$8 sps:$4 sm:$0xff]  }
  0x55   : > { %1344 = vmatpush1.bf16.msra.mxu0 %v1760_v58  ;;  %v1787_v58 = vld [vmem:[%s2430_s4 + $0x110] ss:$8 sps:$4 sm:$0xff]  }
  0x56   : > { %1345 = vmatprep.subr.bf16.mxu0 %v1768_v59  ;;  %v1795_v59 = vld [vmem:[%s2430_s4 + $0x104] ss:$8 sps:$4 sm:$0xff]  }
  0x59   : > { %1346 = vmatpush1.bf16.msra.mxu0 %v1766_v60  ;;  %v1793_v60 = vld [vmem:[%s2430_s4 + $0x100] ss:$8 sps:$4 sm:$0xff]  }
  0x5a   : > { %1347 = vmatprep.subr.bf16.mxu0 %v1774_v61  ;;  %v1801_v61 = vld [vmem:[%s2430_s4 + $0x1f4] ss:$8 sps:$4 sm:$0xff]  }
  0x5d   : > { %1348 = vmatpush1.bf16.msra.mxu0 %v1772_v62  ;;  %v1799_v62 = vld [vmem:[%s2430_s4 + $0x1f0] ss:$8 sps:$4 sm:$0xff]  }
  0x5e   : > { %1349 = vmatprep.subr.bf16.mxu0 %v1780_v63  ;;  %v1807_v63 = vld [vmem:[%s2430_s4 + $0x1e4] ss:$8 sps:$4 sm:$0xff]  }
  0x61   : > { %1350 = vmatpush1.bf16.msra.mxu0 %v1778_v0  ;;  %v1805_v0 = vld [vmem:[%s2430_s4 + $0x1e0] ss:$8 sps:$4 sm:$0xff]  }
  0x62   : > { %1351 = vmatprep.subr.bf16.mxu0 %v1786_v1  ;;  %v1813_v1 = vld [vmem:[%s2430_s4 + $0x1d4] ss:$8 sps:$4 sm:$0xff]  }
  0x65   : > { %1352 = vmatpush1.bf16.msra.mxu0 %v1784_v2  ;;  %v1811_v2 = vld [vmem:[%s2430_s4 + $0x1d0] ss:$8 sps:$4 sm:$0xff]  }
  0x66   : > { %1353 = vmatprep.subr.bf16.mxu0 %v1792_v3  ;;  %v1819_v3 = vld [vmem:[%s2430_s4 + $0x1c4] ss:$8 sps:$4 sm:$0xff]  }
  0x69   : > { %1354 = vmatpush1.bf16.msra.mxu0 %v1790_v4  ;;  %v1817_v4 = vld [vmem:[%s2430_s4 + $0x1c0] ss:$8 sps:$4 sm:$0xff]  }
  0x6a   : > { %1355 = vmatprep.subr.bf16.mxu0 %v1798_v5  ;;  %v1825_v5 = vld [vmem:[%s2430_s4 + $0x1b4] ss:$8 sps:$4 sm:$0xff]  }
  0x6d   : > { %1356 = vmatpush1.bf16.msra.mxu0 %v1796_v6  ;;  %v1823_v6 = vld [vmem:[%s2430_s4 + $0x1b0] ss:$8 sps:$4 sm:$0xff]  }
  0x6e   : > { %1357 = vmatprep.subr.bf16.mxu0 %v1804_v7  ;;  %v1831_v7 = vld [vmem:[%s2430_s4 + $0x1a4] ss:$8 sps:$4 sm:$0xff]  }
  0x71   : > { %1358 = vmatpush2.bf16.msra.mxu0 %v1802_v8  ;;  %v1829_v8 = vld [vmem:[%s2430_s4 + $0x1a0] ss:$8 sps:$4 sm:$0xff]  }
  0x72   : > { %1359 = vmatprep.subr.bf16.mxu0 %v1810_v9  ;;  %v1837_v9 = vld [vmem:[%s2430_s4 + $0x194] ss:$8 sps:$4 sm:$0xff]  }
  0x75   : > { %1360 = vmatpush2.bf16.msra.mxu0 %v1808_v10  ;;  %v359_v10 = vsub.s32 2, %v2077_v41 }
  0x76   : > { %1361 = vmatprep.subr.bf16.mxu0 %v1816_v11  ;;  %v1835_v11 = vld [vmem:[%s2430_s4 + $0x190] ss:$8 sps:$4 sm:$0xff]  }
  0x79   : > { %1362 = vmatpush2.bf16.msra.mxu0 %v1814_v12  ;;  %v379_v12 = vsub.s32 7, %v2077_v41 }
  0x7a   : > { %1363 = vmatprep.subr.bf16.mxu0 %v1822_v13  ;;  %v1843_v13 = vld [vmem:[%s2430_s4 + $0x184] ss:$8 sps:$4 sm:$0xff]  }
  0x7d   : > { %1364 = vmatpush2.bf16.msra.mxu0 %v1820_v14  ;;  %v360_v14 = vrot.slane %v2079_v42, %v359_v10 }
  0x7e   : > { %1365 = vmatprep.subr.bf16.mxu0 %v1828_v15  ;;  %v1841_v15 = vld [vmem:[%s2430_s4 + $0x180] ss:$8 sps:$4 sm:$0xff]  }
  0x81   : > { %1366 = vmatpush2.bf16.msra.mxu0 %v1826_v16  ;;  %v380_v16 = vrot.slane %v2079_v42, %v379_v12 }
  0x82   : > { %1367 = vmatprep.subr.bf16.mxu0 %v1834_v17  ;;  %v1849_v17 = vld [vmem:[%s2430_s4 + $0x374] ss:$8 sps:$4 sm:$0xff]  }
  0x85   : > { %1368 = vmatpush2.bf16.msra.mxu0 %v1832_v18  ;;  %v391_v18 = vpack.c.bf16 %v360_v14, %v360_v14  ;;  %v1423_v14 = vld [vmem:[%s2432_s6] sm:$0x3] }
  0x86   : > { %1369 = vmatprep.subr.bf16.mxu0 %v1840_v19  ;;  %v1847_v19 = vld [vmem:[%s2430_s4 + $0x370] ss:$8 sps:$4 sm:$0xff]  }
  0x89   : > { %1370 = vmatpush2.bf16.msra.mxu0 %v1838_v20  ;;  %v396_v20 = vpack.c.bf16 %v380_v16, %v380_v16 }
  0x8a   : > { %1371 = vmatprep.subr.bf16.mxu0 %v1846_v22 }
  0x8d   : > { %1372 = vmatpush2.bf16.msra.mxu0 %v1844_v24  ;;  %v1855_v24 = vld [vmem:[%s2430_s4 + $0x354] ss:$8 sps:$4 sm:$0xff]  }
  0x90   : > { %1374 = vmatmul.mubr.bf16.vlgmr.msra.gmra.mxu0 %v393_v28  ;;  %v1858_v28 = vld [vmem:[%s2430_s4 + $0x344] ss:$8 sps:$4 sm:$0xff]  }
  0xd0   : > { %v338_v31 = vpop.f32.mrf.mxu0 }
  0xd1   : > { %v339_v32 = vadd.f32 %v338_v31, %v293_v30  ;;  %v1856_v30 = vld [vmem:[%s2430_s4 + $0x340] ss:$8 sps:$4 sm:$0xff]   ;;  %v1861_v31 = vld [vmem:[%s2430_s4 + $0x334] ss:$8 sps:$4 sm:$0xff]  }
  0xd2   : > { %v1676_v34 = vpop.f32.mrf.mxu0 }
  0xd3   : > { %vm344_vm2 = vcmp.ge.f32.partialorder %v339_v32, 0.0  ;;  %v345_v35 = vmul.f32 0.2, %v339_v32  ;;  %v1862_v34 = vld [vmem:[%s2430_s4 + $0x320] ss:$8 sps:$4 sm:$0xff]  }
  0xd4   : > { %v341_v36 = vpop.f32.mrf.mxu0 }
  0xd5   : > { %v346_v38 = vsel %vm344_vm2, %v339_v32, %v345_v35  ;;  %v1859_v32 = vld [vmem:[%s2430_s4 + $0x330] ss:$8 sps:$4 sm:$0xff]   ;;  %v1867_v35 = vld [vmem:[%s2430_s4 + $0x314] ss:$8 sps:$4 sm:$0xff]  }
  0xd6   : > { %v525_v43 = vpack.c.bf16 %v346_v38, %v346_v38  ;;  %v1677_v45 = vpop.f32.mrf.mxu0  ;;  %v1865_v36 = vld [vmem:[%s2430_s4 + $0x310] ss:$8 sps:$4 sm:$0xff]   ;;  %v1870_v38 = vld [vmem:[%s2430_s4 + $0x304] ss:$8 sps:$4 sm:$0xff]  }
  0xd7   : > { %v1876_v45 = vld [vmem:[%s2430_s4 + $0x3e4] ss:$8 sps:$4 sm:$0xff]  }
  0xd8   : > { %1539 = vmatmul.mubr.msk.bf16.vlgmr.msra.gmra.mxu1 %vm574_vm3, %v525_v43  ;;  %v1871_v43 = vld [vmem:[%s2430_s4 + $0x3f0] ss:$8 sps:$4 sm:$0xff]  }
  0xd9   : > { %1301 = vmatpush1.bf16.msra.mxu1 %v1751_v39  ;;  %1332 = vmatprep.mubr.bf16.mxu1 %v392_v40  ;;  %v1868_v39 = vld [vmem:[%s2430_s4 + $0x300] ss:$8 sps:$4 sm:$0xff]   ;;  %v1873_v40 = vld [vmem:[%s2430_s4 + $0x3f4] ss:$8 sps:$4 sm:$0xff]  }
  0xda   : > { %1302 = vmatprep.subr.bf16.mxu1 %v1759_v46  ;;  %v1874_v46 = vld [vmem:[%s2430_s4 + $0x3e0] ss:$8 sps:$4 sm:$0xff]  }
  0xdd   : > { %1303 = vmatpush1.bf16.msra.mxu1 %v1757_v48  ;;  %v1879_v48 = vld [vmem:[%s2430_s4 + $0x3d4] ss:$8 sps:$4 sm:$0xff]  }
  0xde   : > { %1304 = vmatprep.subr.bf16.mxu1 %v1765_v49  ;;  %v1877_v49 = vld [vmem:[%s2430_s4 + $0x3d0] ss:$8 sps:$4 sm:$0xff]  }
  0xe1   : > { %1305 = vmatpush1.bf16.msra.mxu1 %v1763_v50  ;;  %v1882_v50 = vld [vmem:[%s2430_s4 + $0x3c4] ss:$8 sps:$4 sm:$0xff]  }
  0xe2   : > { %1306 = vmatprep.subr.bf16.mxu1 %v1771_v51  ;;  %v1880_v51 = vld [vmem:[%s2430_s4 + $0x3c0] ss:$8 sps:$4 sm:$0xff]  }
  0xe5   : > { %1307 = vmatpush1.bf16.msra.mxu1 %v1769_v52  ;;  %v1885_v52 = vld [vmem:[%s2430_s4 + $0x3b4] ss:$8 sps:$4 sm:$0xff]  }
  0xe6   : > { %1308 = vmatprep.subr.bf16.mxu1 %v1777_v53  ;;  %v1883_v53 = vld [vmem:[%s2430_s4 + $0x3b0] ss:$8 sps:$4 sm:$0xff]  }
  0xe9   : > { %1309 = vmatpush1.bf16.msra.mxu1 %v1775_v54  ;;  %v1888_v54 = vld [vmem:[%s2430_s4 + $0x3a4] ss:$8 sps:$4 sm:$0xff]  }
  0xea   : > { %1310 = vmatprep.subr.bf16.mxu1 %v1783_v55  ;;  %v1886_v55 = vld [vmem:[%s2430_s4 + $0x3a0] ss:$8 sps:$4 sm:$0xff]  }
  0xed   : > { %1311 = vmatpush1.bf16.msra.mxu1 %v1781_v56  ;;  %v1891_v56 = vld [vmem:[%s2430_s4 + $0x394] ss:$8 sps:$4 sm:$0xff]  }
  0xee   : > { %1312 = vmatprep.subr.bf16.mxu1 %v1789_v57  ;;  %v375_v57 = vsub.s32 6, %v2077_v41 }
  0xf1   : > { %1313 = vmatpush1.bf16.msra.mxu1 %v1787_v58  ;;  %v1889_v58 = vld [vmem:[%s2430_s4 + $0x390] ss:$8 sps:$4 sm:$0xff]  }
  0xf2   : > { %1314 = vmatprep.subr.bf16.mxu1 %v1795_v59  ;;  %v1894_v59 = vld [vmem:[%s2430_s4 + $0x384] ss:$8 sps:$4 sm:$0xff]  }
  0xf5   : > { %1315 = vmatpush1.bf16.msra.mxu1 %v1793_v60  ;;  %v376_v60 = vrot.slane %v2079_v42, %v375_v57 }
  0xf6   : > { %1316 = vmatprep.subr.bf16.mxu1 %v1801_v61  ;;  %v1892_v61 = vld [vmem:[%s2430_s4 + $0x380] ss:$8 sps:$4 sm:$0xff]  }
  0xf9   : > { %1317 = vmatpush2.bf16.msra.mxu1 %v1799_v62  ;;  %v395_v62 = vpack.c.bf16 %v376_v60, %v376_v60 }
  0xfa   : > { %1318 = vmatprep.subr.bf16.mxu1 %v1807_v63 }
  0xfd   : > { %1319 = vmatpush2.bf16.msra.mxu1 %v1805_v0 }
  0xfe   : > { %1320 = vmatprep.subr.bf16.mxu1 %v1813_v1 }
 0x101   : > { %1321 = vmatpush2.bf16.msra.mxu1 %v1811_v2 }
 0x102   : > { %1322 = vmatprep.subr.bf16.mxu1 %v1819_v3 }
 0x105   : > { %1323 = vmatpush2.bf16.msra.mxu1 %v1817_v4 }
 0x106   : > { %1324 = vmatprep.subr.bf16.mxu1 %v1825_v5 }
 0x109   : > { %1325 = vmatpush2.bf16.msra.mxu1 %v1823_v6 }
 0x10a   : > { %1326 = vmatprep.subr.bf16.mxu1 %v1831_v7 }
 0x10d   : > { %1327 = vmatpush2.bf16.msra.mxu1 %v1829_v8 }
 0x10e   : > { %1328 = vmatprep.subr.bf16.mxu1 %v1837_v9 }
 0x110   : > { %v2315_v22 = vpop.f32.mrf.mxu0 }
 0x111   : > { %1329 = vmatpush2.bf16.msra.mxu1 %v1835_v11 }
 0x112   : > { %1330 = vmatprep.subr.bf16.mxu1 %v1843_v13  ;;  %v2323_v25 = vpop.f32.mrf.mxu0 }
 0x114   : > { %v1297_v26 = vpop.f32.mrf.mxu0 }
 0x115   : > { %1331 = vmatpush2.bf16.msra.mxu1 %v1841_v15  ;;  %v1906_v15 = vmov 1966171168  }
 0x116   : > { %1382 = vmatprep.subr.bf16.mxu1 %v1849_v17  ;;  %v1298_v29 = vpop.f32.mrf.mxu0  ;;  %v1441_v16 = vunpack.c.l.s4 %v1906_v15 }
 0x118   : > { %1333 = vmatmul.mubr.bf16.vlgmr.msra.gmra.mxu1 %v391_v18 }
 0x119   : > { %1383 = vmatpush1.bf16.msra.mxu1 %v1847_v19  ;;  %1414 = vmatprep.mubr.bf16.mxu1 %v396_v20  ;;  %v1428_v19 = vrot.slane %v1423_v14, %v351_v47 }
 0x11a   : > { %1384 = vmatprep.subr.bf16.mxu1 %v1852_v21 }
 0x11d   : > { %1385 = vmatpush1.bf16.msra.mxu1 %v1850_v23  ;;  %v1442_v23 = vunpack.c.0.s8 %v1441_v16 }
 0x11e   : > { %1386 = vmatprep.subr.bf16.mxu1 %v1855_v24 }
 0x11f   : > { %v1445_v29 = vsub.s32 %v1442_v23, %v2077_v41 }
 0x121   : > { %1387 = vmatpush1.bf16.msra.mxu1 %v1853_v27 }
 0x122   : > { %1388 = vmatprep.subr.bf16.mxu1 %v1858_v28 }
 0x125   : > { %1389 = vmatpush1.bf16.msra.mxu1 %v1856_v30 }
 0x126   : > { %1390 = vmatprep.subr.bf16.mxu1 %v1861_v31 }
 0x129   : > { %1391 = vmatpush1.bf16.msra.mxu1 %v1859_v32 }
 0x12a   : > { %1392 = vmatprep.subr.bf16.mxu1 %v1864_v33 }
 0x12d   : > { %1393 = vmatpush1.bf16.msra.mxu1 %v1862_v34 }
 0x12e   : > { %1394 = vmatprep.subr.bf16.mxu1 %v1867_v35 }
 0x131   : > { %1395 = vmatpush1.bf16.msra.mxu1 %v1865_v36 }
 0x132   : > { %1396 = vmatprep.subr.bf16.mxu1 %v1870_v38 }
 0x135   : > { %1397 = vmatpush1.bf16.msra.mxu1 %v1868_v39 }
 0x136   : > { %1398 = vmatprep.subr.bf16.mxu1 %v1873_v40 }
 0x139   : > { %1399 = vmatpush2.bf16.msra.mxu1 %v1871_v43 }
 0x13a   : > { %1400 = vmatprep.subr.bf16.mxu1 %v1876_v45 }
 0x13d   : > { %1401 = vmatpush2.bf16.msra.mxu1 %v1874_v46 }
 0x13e   : > { %1402 = vmatprep.subr.bf16.mxu1 %v1879_v48 }
 0x141   : > { %1403 = vmatpush2.bf16.msra.mxu1 %v1877_v49 }
 0x142   : > { %1404 = vmatprep.subr.bf16.mxu1 %v1882_v50 }
 0x145   : > { %1405 = vmatpush2.bf16.msra.mxu1 %v1880_v51 }
 0x146   : > { %1406 = vmatprep.subr.bf16.mxu1 %v1885_v52 }
 0x149   : > { %1407 = vmatpush2.bf16.msra.mxu1 %v1883_v53 }
 0x14a   : > { %1408 = vmatprep.subr.bf16.mxu1 %v1888_v54 }
 0x14d   : > { %1409 = vmatpush2.bf16.msra.mxu1 %v1886_v55 }
 0x14e   : > { %1410 = vmatprep.subr.bf16.mxu1 %v1891_v56 }
 0x150   : > { %v1375_v63 = vpop.f32.mrf.mxu0 }
 0x151   : > { %1411 = vmatpush2.bf16.msra.mxu1 %v1889_v58 }
 0x152   : > { %1412 = vmatprep.subr.bf16.mxu1 %v1894_v59  ;;  %v1377_v0 = vpop.f32.mrf.mxu0 }
 0x154   : > { %v1379_v1 = vpop.f32.mrf.mxu0 }
 0x155   : > { %1413 = vmatpush2.bf16.msra.mxu1 %v1892_v61 }
 0x156   : > { %v1380_v2 = vpop.f32.mrf.mxu0 }
 0x158   : > { %1415 = vmatmul.mubr.bf16.vlgmr.msra.gmra.mxu1 %v395_v62 }
 0x198   : > { %v612_v3 = vpop.f32.mrf.mxu1 }
 0x199   : > { %v1294_v10 = vadd.f32 %v2315_v22, %v612_v3  ;;  %v1432_v22 = vrot.slane %v1423_v14, %v355_v44 }
 0x19a   : > { %v614_v4 = vpop.f32.mrf.mxu1 }
 0x19b   : > { %v1296_v11 = vadd.f32 %v2323_v25, %v614_v4 }
 0x19c   : > { %v616_v5 = vpop.f32.mrf.mxu1 }
 0x19e   : > { %v617_v6 = vpop.f32.mrf.mxu1 }
 0x1d8   : > { %v1334_v7 = vpop.f32.mrf.mxu1 }
 0x1d9   : > { %v1335_v12 = vadd.f32 %v1334_v7, %v1294_v10 }
 0x1da   : > { %v1336_v8 = vpop.f32.mrf.mxu1 }
 0x1db   : > { %v1337_v13 = vadd.f32 %v1336_v8, %v1296_v11  ;;  %v1376_v17 = vadd.f32 %v1375_v63, %v1335_v12 }
 0x1dc   : > { %v1338_v42 = vpop.f32.mrf.mxu1 }
 0x1dd   : > { %v1378_v20 = vadd.f32 %v1377_v0, %v1337_v13 }
 0x1de   : > { %v1339_v9 = vpop.f32.mrf.mxu1 }
 0x218   : > { %v1416_v18 = vpop.f32.mrf.mxu1 }
 0x219   : > { %v1417_v21 = vadd.f32 %v1416_v18, %v1376_v17 }
 0x21a   : > { %v1418_v24 = vpop.f32.mrf.mxu1 }
 0x21b   : > { %v1419_v25 = vadd.f32 %v1418_v24, %v1378_v20  ;;  %v1435_v27 = vadd.f32 %v1428_v19, %v1417_v21 }
 0x21c   : > { %v1420_v26 = vpop.f32.mrf.mxu1 }
 0x21d   : > { %v1436_v28 = vadd.f32 %v1432_v22, %v1419_v25 }
 0x21e   : > { %v1421_v30 = vpop.f32.mrf.mxu1 }
 0x21f   : > { %v1439_v31 = vcombine.low %v1435_v27, %v1436_v28 }
 0x221   : > { %v1446_v32 = vrot.slane %v1439_v31, %v1445_v29 }
 0x223   : > { %v1453_v47 = vrot.slane %v1446_v32, %v1445_v29 }
 0x225   : > { %1459 = vst.msk [vmem:[%s287_s18] sm:$0x3] %vm1457_vm4, %v1453_v47 }
 0x226 PF: > { %s17_s24 = sadd.s32 1, %s1901_s24  }
 0x227   : > { %p14_p4 = scmp.ge.s32.totalorder %s17_s24, 4  }
 0x229   :  { %16 = sbr.rel (!%p14_p4) target bundleno = 1 (0x1), region = 81 }

// kernel: dgcnn_partseg_forward.27
= control target key start
LH: loop header
LB: loop body
LE: loop exit
PB: predicated region body
PF: predicated region fallthrough
CT: control target
= control target key end

     0   :  { %s1621_s27 = smov 0   ;;  %s1623_s28 = smov 0   ;;  %s1912_s0 = inlined_call_operand.vmem [shape: f32[2,1,256], index: 0, kind: input, shape index: {}]   ;;  %s1913_s1 = inlined_call_operand.vmem [shape: bf16[2,16,192], index: 1, kind: input, shape index: {}]   ;;  %s1914_s2 = inlined_call_operand.vmem [shape: bf16[192,256], index: 2, kind: input, shape index: {}]   ;;  %s1915_s3 = inlined_call_operand.vmem [shape: bf16[256,256], index: 3, kind: input, shape index: {}]   ;;  %s1916_s4 = inlined_call_operand.vmem [shape: f32[1,256], index: 4, kind: input, shape index: {}]   ;;  %s1917_s5 = inlined_call_operand.vmem [shape: bf16[256,128], index: 5, kind: input, shape index: {}]   ;;  %s1918_s6 = inlined_call_operand.vmem [shape: f32[1,128], index: 6, kind: input, shape index: {}]   ;;  %s1919_s7 = inlined_call_operand.vmem [shape: bf16[128,128], index: 7, kind: input, shape index: {}]   ;;  %s1920_s8 = inlined_call_operand.vmem [shape: bf16[2,16,128], index: 8, kind: output, shape index: {}]  }
   0x1   :  { %s1625_s29 = smov 0  }
   0x2 LB: > { %s30_s30 = sadd.s32 1, %s1568_s28  ;;  %p1259_p0 = scmp.ge.s32.totalorder %s1572_s29, 1  ;;  %s1572_s29 = sphi %s1625_s29, %s18_s29   ;;  %s1568_s28 = sphi %s1623_s28, %s1922_s28   ;;  %s1564_s27 = sphi %s1621_s27, %s1921_s27  }
   0x3   : > { %p32_p1 = scmp.ge.s32.totalorder %s30_s30, 2  ;;  %p293_p2 = scmp.lt.s32.totalorder %s1572_s29, 3 }
   0x5   : > { %s1924_s30 = smov (%p32_p1, %s30_s30), 0  ;;  %p294_p3 = pnand %p1259_p0, %p293_p2 }
   0x6   : > { %p340_p4 = scmp.lt.s32.totalorder (!%p294_p3), %s1564_s27, 1 }
   0x7   : > { %297 = sbr.rel (%p294_p3) target bundleno = 883 (0x373), region = 52 }
   0xc   : > { %v1439_v0 = vld [vmem:[%s1914_s2 + $0x74] ss:$8 sps:$4 sm:$0xff]   ;;  %v1441_v1 = vld [vmem:[%s1914_s2 + $0x70] ss:$8 sps:$4 sm:$0xff]   ;;  %v1442_v2 = vld [vmem:[%s1914_s2 + $0x64] ss:$8 sps:$4 sm:$0xff]  }
   0xd   : > { %537 = vmatprep.subr.bf16.mxu0 %v1439_v0  ;;  %v1444_v3 = vld [vmem:[%s1914_s2 + $0x60] ss:$8 sps:$4 sm:$0xff]   ;;  %v1445_v4 = vld [vmem:[%s1914_s2 + $0x54] ss:$8 sps:$4 sm:$0xff]   ;;  %v1447_v5 = vld [vmem:[%s1914_s2 + $0x50] ss:$8 sps:$4 sm:$0xff]  }
   0xe   : > { %538 = vmatpush1.bf16.msra.mxu0 %v1441_v1  ;;  %s1926_s27 = smov (!%p340_p4, %s1564_s27), 1  ;;  %v1448_v6 = vld [vmem:[%s1914_s2 + $0x44] ss:$8 sps:$4 sm:$0xff]   ;;  %v1450_v7 = vld [vmem:[%s1914_s2 + $0x40] ss:$8 sps:$4 sm:$0xff]   ;;  %vm533_vm0 = vcmask 523264  }
   0xf   : > { %539 = vmatprep.subr.bf16.mxu0 %v1442_v2  ;;  %s1353_s25 = sshll.u32 %s1926_s27, 4  ;;  %v1451_v8 = vld [vmem:[%s1914_s2 + $0x34] ss:$8 sps:$4 sm:$0xff]   ;;  %v1453_v9 = vld [vmem:[%s1914_s2 + $0x30] ss:$8 sps:$4 sm:$0xff]   ;;  %v1530_v62 = vld [vmem:[%s1917_s5 + $0x68] sm:$0xff]  }
  0x10   : > { %s1672_s12 = scalar_lea.vmem %s1913_s1, %s1353_s25  ;;  %v1454_v10 = vld [vmem:[%s1914_s2 + $0x24] ss:$8 sps:$4 sm:$0xff]   ;;  %v1478_v12 = vld [vmem:[%s1915_s3 + $0x74] ss:$8 sps:$4 sm:$0xff]   ;;  %v1480_v13 = vld [vmem:[%s1915_s3 + $0x70] ss:$8 sps:$4 sm:$0xff]  }
  0x11   : > { %v1477_v11 = vld [vmem:[%s1672_s12 + $0x4] ss:$8 sps:$4 sm:$0xff]   ;;  %v1456_v14 = vld [vmem:[%s1914_s2 + $0x20] ss:$8 sps:$4 sm:$0xff]   ;;  %v1457_v16 = vld [vmem:[%s1914_s2 + $0x14] ss:$8 sps:$4 sm:$0xff]   ;;  %798 = vmatprep.subr.bf16.mxu1 %v1478_v12 }
  0x12   : > { %540 = vmatpush1.bf16.msra.mxu0 %v1444_v3  ;;  %1291 = vmatprep.mubr.msk.bf16.mxu0 %vm533_vm0, %v1477_v11  ;;  %v1481_v15 = vld [vmem:[%s1915_s3 + $0x64] ss:$8 sps:$4 sm:$0xff]   ;;  %v1483_v17 = vld [vmem:[%s1915_s3 + $0x60] ss:$8 sps:$4 sm:$0xff]   ;;  %v1484_v18 = vld [vmem:[%s1915_s3 + $0x54] ss:$8 sps:$4 sm:$0xff]   ;;  %v394_v3 = vlaneseq }
  0x13   : > { %541 = vmatprep.subr.bf16.mxu0 %v1445_v4  ;;  %799 = vmatpush1.bf16.msra.mxu1 %v1480_v13  ;;  %v1459_v19 = vld [vmem:[%s1914_s2 + $0x10] ss:$8 sps:$4 sm:$0xff]   ;;  %v1460_v20 = vld [vmem:[%s1914_s2 + $0x4] ss:$8 sps:$4 sm:$0xff]   ;;  %v1462_v23 = vld [vmem:[%s1914_s2] ss:$8 sps:$4 sm:$0xff]  }
  0x14   : > { %800 = vmatprep.subr.bf16.mxu1 %v1481_v15  ;;  %v1486_v21 = vld [vmem:[%s1915_s3 + $0x50] ss:$8 sps:$4 sm:$0xff]   ;;  %v1487_v22 = vld [vmem:[%s1915_s3 + $0x44] ss:$8 sps:$4 sm:$0xff]   ;;  %v1463_v24 = vld [vmem:[%s1914_s2 + $0xb4] ss:$8 sps:$4 sm:$0xff]  }
  0x15   : > { %v1489_v25 = vld [vmem:[%s1915_s3 + $0x40] ss:$8 sps:$4 sm:$0xff]   ;;  %v1490_v26 = vld [vmem:[%s1915_s3 + $0x34] ss:$8 sps:$4 sm:$0xff]   ;;  %v1465_v27 = vld [vmem:[%s1914_s2 + $0xb0] ss:$8 sps:$4 sm:$0xff]  }
  0x16   : > { %542 = vmatpush1.bf16.msra.mxu0 %v1447_v5  ;;  %v1466_v28 = vld [vmem:[%s1914_s2 + $0xa4] ss:$8 sps:$4 sm:$0xff]   ;;  %v1468_v29 = vld [vmem:[%s1914_s2 + $0xa0] ss:$8 sps:$4 sm:$0xff]   ;;  %v1492_v30 = vld [vmem:[%s1915_s3 + $0x30] ss:$8 sps:$4 sm:$0xff]  }
  0x17   : > { %543 = vmatprep.subr.bf16.mxu0 %v1448_v6  ;;  %801 = vmatpush1.bf16.msra.mxu1 %v1483_v17  ;;  %v1469_v31 = vld [vmem:[%s1914_s2 + $0x94] ss:$8 sps:$4 sm:$0xff]   ;;  %v1493_v32 = vld [vmem:[%s1915_s3 + $0x24] ss:$8 sps:$4 sm:$0xff]   ;;  %v1495_v33 = vld [vmem:[%s1915_s3 + $0x20] ss:$8 sps:$4 sm:$0xff]  }
  0x18   : > { %802 = vmatprep.subr.bf16.mxu1 %v1484_v18  ;;  %v1496_v34 = vld [vmem:[%s1915_s3 + $0x14] ss:$8 sps:$4 sm:$0xff]   ;;  %v1471_v35 = vld [vmem:[%s1914_s2 + $0x90] ss:$8 sps:$4 sm:$0xff]   ;;  %v1472_v36 = vld [vmem:[%s1914_s2 + $0x84] ss:$8 sps:$4 sm:$0xff]  }
  0x19   : > { %v1498_v37 = vld [vmem:[%s1915_s3 + $0x10] ss:$8 sps:$4 sm:$0xff]   ;;  %v1499_v38 = vld [vmem:[%s1915_s3 + $0x4] ss:$8 sps:$4 sm:$0xff]   ;;  %v1474_v39 = vld [vmem:[%s1914_s2 + $0x80] ss:$8 sps:$4 sm:$0xff]  }
  0x1a   : > { %544 = vmatpush1.bf16.msra.mxu0 %v1450_v7  ;;  %v1501_v40 = vld [vmem:[%s1915_s3] ss:$8 sps:$4 sm:$0xff]   ;;  %v1502_v42 = vld [vmem:[%s1915_s3 + $0xf4] ss:$8 sps:$4 sm:$0xff]   ;;  %v1504_v43 = vld [vmem:[%s1915_s3 + $0xf0] ss:$8 sps:$4 sm:$0xff]  }
  0x1b   : > { %545 = vmatprep.subr.bf16.mxu0 %v1451_v8  ;;  %803 = vmatpush1.bf16.msra.mxu1 %v1486_v21  ;;  %v1475_v41 = vld [vmem:[%s1672_s12] ss:$8 sps:$4 sm:$0xff]   ;;  %v1505_v44 = vld [vmem:[%s1915_s3 + $0xe4] ss:$8 sps:$4 sm:$0xff]   ;;  %v1508_v46 = vld [vmem:[%s1915_s3 + $0xd4] ss:$8 sps:$4 sm:$0xff]  }
  0x1c   : > { %804 = vmatprep.subr.bf16.mxu1 %v1487_v22  ;;  %v1507_v45 = vld [vmem:[%s1915_s3 + $0xe0] ss:$8 sps:$4 sm:$0xff]   ;;  %v1510_v47 = vld [vmem:[%s1915_s3 + $0xd0] ss:$8 sps:$4 sm:$0xff]   ;;  %v1511_v48 = vld [vmem:[%s1915_s3 + $0xc4] ss:$8 sps:$4 sm:$0xff]  }
  0x1d   : > { %v1513_v49 = vld [vmem:[%s1915_s3 + $0xc0] ss:$8 sps:$4 sm:$0xff]   ;;  %v1514_v50 = vld [vmem:[%s1915_s3 + $0xb4] ss:$8 sps:$4 sm:$0xff]   ;;  %v1516_v51 = vld [vmem:[%s1915_s3 + $0xb0] ss:$8 sps:$4 sm:$0xff]  }
  0x1e   : > { %546 = vmatpush1.bf16.msra.mxu0 %v1453_v9  ;;  %v1517_v52 = vld [vmem:[%s1915_s3 + $0xa4] ss:$8 sps:$4 sm:$0xff]   ;;  %v1519_v53 = vld [vmem:[%s1915_s3 + $0xa0] ss:$8 sps:$4 sm:$0xff]   ;;  %v1520_v54 = vld [vmem:[%s1915_s3 + $0x94] ss:$8 sps:$4 sm:$0xff]  }
  0x1f   : > { %547 = vmatprep.subr.bf16.mxu0 %v1454_v10  ;;  %805 = vmatpush1.bf16.msra.mxu1 %v1489_v25  ;;  %v1522_v55 = vld [vmem:[%s1915_s3 + $0x90] ss:$8 sps:$4 sm:$0xff]   ;;  %v1523_v56 = vld [vmem:[%s1915_s3 + $0x84] ss:$8 sps:$4 sm:$0xff]   ;;  %v1525_v57 = vld [vmem:[%s1915_s3 + $0x80] ss:$8 sps:$4 sm:$0xff]  }
  0x20   : > { %806 = vmatprep.subr.bf16.mxu1 %v1490_v26  ;;  %v1526_v58 = vld [vmem:[%s1917_s5 + $0x78] sm:$0xff]   ;;  %v1528_v60 = vld [vmem:[%s1917_s5 + $0x70] sm:$0xff]   ;;  %v1531_v63 = vld [vmem:[%s1917_s5 + $0x28] sm:$0xff]   ;;  %s1260_s20 = sshll.u32 %s1926_s27, 1  ;;  %v395_v4 = vshrl.u32 %v394_v3, 7  ;;  %vm1575_vm9 = vmmov 0  }
  0x21   : > { %v1527_v59 = vld [vmem:[%s1917_s5 + $0x38] sm:$0xff]   ;;  %v1529_v61 = vld [vmem:[%s1917_s5 + $0x30] sm:$0xff]   ;;  %v1532_v0 = vld [vmem:[%s1917_s5 + $0x60] sm:$0xff]   ;;  %s343_s23 = scalar_lea.vmem %s1912_s0, %s1260_s20  ;;  %s1354_s22 = sshll.u32 %s1926_s27, 3 }
  0x22   : > { %548 = vmatpush1.bf16.msra.mxu0 %v1456_v14  ;;  %v1533_v1 = vld [vmem:[%s1917_s5 + $0x20] sm:$0xff]   ;;  %v1534_v2 = vld [vmem:[%s1917_s5 + $0x58] sm:$0xff]   ;;  %v400_v5 = vsub.s32 1, %v395_v4  ;;  %v396_v6 = vsub.s32 0, %v395_v4  ;;  %s363_s25 = scalar_lea.vmem %s1920_s8, %s1354_s22 }
  0x23   : > { %549 = vmatprep.subr.bf16.mxu0 %v1457_v16  ;;  %807 = vmatpush1.bf16.msra.mxu1 %v1492_v30  ;;  %v392_v7 = vld [vmem:[%s343_s23] sm:$0x3]  ;;  %v1537_v30 = vld [vmem:[%s1917_s5 + $0x10] sm:$0xff]  }
  0x24   : > { %808 = vmatprep.subr.bf16.mxu1 %v1493_v32  ;;  %v401_v8 = vrot.slane %v392_v7, %v400_v5  ;;  %v397_v9 = vrot.slane %v392_v7, %v396_v6  ;;  %v1539_v32 = vld [vmem:[%s1917_s5 + $0x8] sm:$0xff]  }
  0x26   : > { %550 = vmatpush1.bf16.msra.mxu0 %v1459_v19 }
  0x27   : > { %551 = vmatprep.subr.bf16.mxu0 %v1460_v20  ;;  %809 = vmatpush1.bf16.msra.mxu1 %v1495_v33  ;;  %v1540_v33 = vld [vmem:[%s1917_s5 + $0x40] sm:$0xff]  }
  0x28   : > { %810 = vmatprep.subr.bf16.mxu1 %v1496_v34  ;;  %v1541_v34 = vld [vmem:[%s1917_s5] sm:$0xff]  }
  0x2a   : > { %552 = vmatpush1.bf16.msra.mxu0 %v1462_v23 }
  0x2b   : > { %561 = vmatprep.subr.bf16.mxu0 %v1463_v24  ;;  %811 = vmatpush1.bf16.msra.mxu1 %v1498_v37  ;;  %v1543_v37 = vld [vmem:[%s1919_s7 + $0x30] sm:$0xff]  }
  0x2c   : > { %812 = vmatprep.subr.bf16.mxu1 %v1499_v38  ;;  %v1544_v38 = vld [vmem:[%s1919_s7 + $0x28] sm:$0xff]  }
  0x2e   : > { %562 = vmatpush2.bf16.msra.mxu0 %v1465_v27 }
  0x2f   : > { %563 = vmatprep.subr.bf16.mxu0 %v1466_v28  ;;  %813 = vmatpush1.bf16.msra.mxu1 %v1501_v40  ;;  %v1535_v28 = vld [vmem:[%s1917_s5 + $0x18] sm:$0xff]   ;;  %v626_v40 = vld [vmem:[%s1916_s4] sm:$0x3] }
  0x30   : > { %814 = vmatprep.subr.bf16.mxu1 %v1502_v42  ;;  %v631_v42 = vrot.slane %v626_v40, %v396_v6 }
  0x32   : > { %564 = vmatpush2.bf16.msra.mxu0 %v1468_v29  ;;  %v1536_v29 = vld [vmem:[%s1917_s5 + $0x50] sm:$0xff]  }
  0x33   : > { %565 = vmatprep.subr.bf16.mxu0 %v1469_v31  ;;  %815 = vmatpush2.bf16.msra.mxu1 %v1504_v43  ;;  %v1538_v31 = vld [vmem:[%s1917_s5 + $0x48] sm:$0xff]  }
  0x34   : > { %816 = vmatprep.subr.bf16.mxu1 %v1505_v44 }
  0x36   : > { %566 = vmatpush2.bf16.msra.mxu0 %v1471_v35  ;;  %v1542_v35 = vld [vmem:[%s1919_s7 + $0x38] sm:$0xff]  }
  0x37   : > { %567 = vmatprep.subr.bf16.mxu0 %v1472_v36  ;;  %817 = vmatpush2.bf16.msra.mxu1 %v1507_v45  ;;  %v1574_v36 = vmov 0.0  }
  0x38   : > { %818 = vmatprep.subr.bf16.mxu1 %v1508_v46 }
  0x3a   : > { %568 = vmatpush2.bf16.msra.mxu0 %v1474_v39  ;;  %v1545_v39 = vld [vmem:[%s1919_s7 + $0x20] sm:$0xff]  }
  0x3b   : > { %819 = vmatpush2.bf16.msra.mxu1 %v1510_v47  ;;  %1362 = vmatprep.subr.bf16.mxu0 %v1526_v58 }
  0x3c   : > { %820 = vmatprep.subr.bf16.mxu1 %v1511_v48 }
  0x3d   : > { %570 = vmatmul.mubr.bf16.vlgmr.msra.gmra.mxu0 %v1475_v41  ;;  %v635_v41 = vrot.slane %v626_v40, %v400_v5 }
  0x3e   : > { %1363 = vmatpush3.bf16.msra.mxu0 %v1527_v59 }
  0x3f   : > { %821 = vmatpush2.bf16.msra.mxu1 %v1513_v49  ;;  %1364 = vmatprep.subr.bf16.mxu0 %v1528_v60 }
  0x40   : > { %822 = vmatprep.subr.bf16.mxu1 %v1514_v50 }
  0x42   : > { %1365 = vmatpush3.bf16.msra.mxu0 %v1529_v61  ;;  %v1546_v61 = vld [vmem:[%s1919_s7 + $0x18] sm:$0xff]  }
  0x43   : > { %823 = vmatpush2.bf16.msra.mxu1 %v1516_v51  ;;  %1366 = vmatprep.subr.bf16.mxu0 %v1530_v62  ;;  %v1547_v62 = vld [vmem:[%s1919_s7 + $0x10] sm:$0xff]  }
  0x44   : > { %824 = vmatprep.subr.bf16.mxu1 %v1517_v52 }
  0x46   : > { %1367 = vmatpush3.bf16.msra.mxu0 %v1531_v63  ;;  %v1548_v63 = vld [vmem:[%s1919_s7 + $0x8] sm:$0xff]  }
  0x47   : > { %825 = vmatpush2.bf16.msra.mxu1 %v1519_v53  ;;  %1368 = vmatprep.subr.bf16.mxu0 %v1532_v0  ;;  %v1549_v0 = vld [vmem:[%s1919_s7] sm:$0xff]  }
  0x48   : > { %826 = vmatprep.subr.bf16.mxu1 %v1520_v54 }
  0x4a   : > { %1369 = vmatpush3.bf16.msra.mxu0 %v1533_v1 }
  0x4b   : > { %827 = vmatpush2.bf16.msra.mxu1 %v1522_v55  ;;  %1370 = vmatprep.subr.bf16.mxu0 %v1534_v2  ;;  %v1324_v2 = vld [vmem:[%s1918_s6] ss:$0 sm:$0xff] }
  0x4c   : > { %828 = vmatprep.subr.bf16.mxu1 %v1523_v56 }
  0x4e   : > { %1371 = vmatpush3.bf16.msra.mxu0 %v1535_v28 }
  0x4f   : > { %829 = vmatpush2.bf16.msra.mxu1 %v1525_v57  ;;  %1372 = vmatprep.subr.bf16.mxu0 %v1536_v29 }
  0x50   : > { %1393 = vmatprep.subr.bf16.mxu1 %v1574_v36 }
  0x52   : > { %1373 = vmatpush3.bf16.msra.mxu0 %v1537_v30 }
  0x53   : > { %1374 = vmatprep.subr.bf16.mxu0 %v1538_v31 }
  0x56   : > { %1375 = vmatpush3.bf16.msra.mxu0 %v1539_v32 }
  0x57   : > { %1376 = vmatprep.subr.bf16.mxu0 %v1540_v33 }
  0x5a   : > { %1377 = vmatpush3.bf16.msra.mxu0 %v1541_v34 }
  0xfd   : > { %v571_v10 = vpop.f32.mrf.mxu0 }
  0xfe   : > { %v572_v13 = vadd.f32 %v571_v10, %v397_v9 }
  0xff   : > { %v573_v11 = vpop.f32.mrf.mxu0 }
 0x100   : > { %v574_v12 = vadd.f32 %v573_v11, %v401_v8  ;;  %v584_v20 = vmul.f32 0.2, %v572_v13  ;;  %vm580_vm3 = vcmp.ge.f32.partialorder %v572_v13, 0.0 }
 0x101   : > { %v575_v14 = vpop.f32.mrf.mxu0 }
 0x102   : > { %v576_v15 = vadd.f32 %v575_v14, %v397_v9  ;;  %v585_v17 = vmul.f32 0.2, %v574_v12  ;;  %vm581_vm2 = vcmp.ge.f32.partialorder %v574_v12, 0.0  ;;  %v588_v26 = vsel %vm580_vm3, %v572_v13, %v584_v20 }
 0x103   : > { %v577_v16 = vpop.f32.mrf.mxu0 }
 0x104   : > { %vm582_vm1 = vcmp.ge.f32.partialorder %v576_v15, 0.0  ;;  %v586_v18 = vmul.f32 0.2, %v576_v15  ;;  %v578_v19 = vadd.f32 %v577_v16, %v401_v8  ;;  %v589_v23 = vsel %vm581_vm2, %v574_v12, %v585_v17 }
 0x106   : > { %v587_v21 = vmul.f32 0.2, %v578_v19  ;;  %vm583_vm4 = vcmp.ge.f32.partialorder %v578_v19, 0.0  ;;  %v590_v22 = vsel %vm582_vm1, %v576_v15, %v586_v18 }
 0x107   : > { %v592_v27 = vpack.c.bf16 %v590_v22, %v588_v26 }
 0x108   : > { %v591_v24 = vsel %vm583_vm4, %v578_v19, %v587_v21 }
 0x109   : > { %v593_v25 = vpack.c.bf16 %v591_v24, %v589_v23 }
 0x10b   : > { %830 = vmatprep.mubr.bf16.mxu1 %v593_v25 }
 0x10c   : > { %831 = vmatmul.mubr.bf16.vlgmr.msra.gmra.mxu1 %v592_v27 }
 0x10d   : > { %1394 = vmatpush3.bf16.msra.mxu1 %v1542_v35  ;;  %1409 = vmatprep.mubr.msk.bf16.mxu1 %vm1575_vm9, %v1574_v36 }
 0x10e   : > { %1395 = vmatprep.subr.bf16.mxu1 %v1574_v36 }
 0x111   : > { %1396 = vmatpush3.bf16.msra.mxu1 %v1543_v37 }
 0x112   : > { %1397 = vmatprep.subr.bf16.mxu1 %v1574_v36 }
 0x115   : > { %1398 = vmatpush3.bf16.msra.mxu1 %v1544_v38 }
 0x116   : > { %1399 = vmatprep.subr.bf16.mxu1 %v1574_v36 }
 0x119   : > { %1400 = vmatpush3.bf16.msra.mxu1 %v1545_v39 }
 0x11a   : > { %1401 = vmatprep.subr.bf16.mxu1 %v1574_v36 }
 0x11d   : > { %1402 = vmatpush3.bf16.msra.mxu1 %v1546_v61 }
 0x11e   : > { %1403 = vmatprep.subr.bf16.mxu1 %v1574_v36 }
 0x121   : > { %1404 = vmatpush3.bf16.msra.mxu1 %v1547_v62 }
 0x122   : > { %1405 = vmatprep.subr.bf16.mxu1 %v1574_v36 }
 0x125   : > { %1406 = vmatpush3.bf16.msra.mxu1 %v1548_v63 }
 0x126   : > { %1407 = vmatprep.subr.bf16.mxu1 %v1574_v36 }
 0x129   : > { %1408 = vmatpush3.bf16.msra.mxu1 %v1549_v0 }
 0x1cc   : > { %v832_v43 = vpop.f32.mrf.mxu1 }
 0x1cd   : > { %v833_v46 = vadd.f32 %v832_v43, %v631_v42 }
 0x1ce   : > { %v834_v44 = vpop.f32.mrf.mxu1 }
 0x1cf   : > { %v835_v45 = vadd.f32 %v834_v44, %v635_v41  ;;  %v845_v53 = vmul.f32 0.2, %v833_v46  ;;  %vm841_vm7 = vcmp.ge.f32.partialorder %v833_v46, 0.0 }
 0x1d0   : > { %v836_v47 = vpop.f32.mrf.mxu1 }
 0x1d1   : > { %v837_v48 = vadd.f32 %v836_v47, %v631_v42  ;;  %v846_v50 = vmul.f32 0.2, %v835_v45  ;;  %vm842_vm6 = vcmp.ge.f32.partialorder %v835_v45, 0.0  ;;  %v849_v58 = vsel %vm841_vm7, %v833_v46, %v845_v53 }
 0x1d2   : > { %v838_v49 = vpop.f32.mrf.mxu1 }
 0x1d3   : > { %vm843_vm5 = vcmp.ge.f32.partialorder %v837_v48, 0.0  ;;  %v847_v51 = vmul.f32 0.2, %v837_v48  ;;  %v839_v52 = vadd.f32 %v838_v49, %v635_v41  ;;  %v850_v56 = vsel %vm842_vm6, %v835_v45, %v846_v50 }
 0x1d5   : > { %vm844_vm8 = vcmp.ge.f32.partialorder %v839_v52, 0.0  ;;  %v848_v54 = vmul.f32 0.2, %v839_v52  ;;  %v851_v55 = vsel %vm843_vm5, %v837_v48, %v847_v51 }
 0x1d6   : > { %v853_v60 = vpack.c.bf16 %v851_v55, %v849_v58 }
 0x1d7   : > { %v852_v57 = vsel %vm844_vm8, %v839_v52, %v848_v54 }
 0x1d8   : > { %v854_v59 = vpack.c.bf16 %v852_v57, %v850_v56 }
 0x1da   : > { %1022 = vmatprep.mubr.bf16.mxu0 %v854_v59 }
 0x1db   : > { %1023 = vmatmul.mubr.bf16.vlgmr.msra.gmra.mxu0 %v853_v60 }
 0x29b   : > { %v1378_v1 = vpop.f32.mrf.mxu0 }
 0x29d   : > { %v1379_v3 = vpop.f32.mrf.mxu0 }
 0x29e   : > { %v1380_v4 = vadd.f32 %v1379_v3, %v1378_v1 }
 0x29f   : > { %v1381_v5 = vpop.f32.mrf.mxu0 }
 0x2a0   : > { %v1025_v6 = vadd.f32 %v1380_v4, %v1324_v2 }
 0x2a1   : > { %v1382_v7 = vpop.f32.mrf.mxu0 }
 0x2a2   : > { %v1383_v8 = vadd.f32 %v1382_v7, %v1381_v5  ;;  %v1033_v9 = vmul.f32 0.2, %v1025_v6  ;;  %vm1031_vm10 = vcmp.ge.f32.partialorder %v1025_v6, 0.0 }
 0x2a4   : > { %v1028_v10 = vadd.f32 %v1383_v8, %v1324_v2  ;;  %v1035_v12 = vsel %vm1031_vm10, %v1025_v6, %v1033_v9 }
 0x2a6   : > { %vm1032_vm11 = vcmp.ge.f32.partialorder %v1028_v10, 0.0  ;;  %v1034_v11 = vmul.f32 0.2, %v1028_v10 }
 0x2a8   : > { %v1036_v13 = vsel %vm1032_vm11, %v1028_v10, %v1034_v11 }
 0x2a9   : > { %v1037_v14 = vpack.c.bf16 %v1036_v13, %v1035_v12 }
 0x2ab   : > { %1410 = vmatmul.mubr.bf16.vlgmr.msra.gmra.mxu1 %v1037_v14 }
 0x36b   : > { %v1136_v15 = vpop.f32.mrf.mxu1 }
 0x36d   : > { %v1411_v16 = vpop.f32.mrf.mxu1 }
 0x36f   : > { %v1139_v17 = vpop.f32.mrf.mxu1 }
 0x370   : > { %v1360_v18 = vpack.c.bf16 %v1139_v17, %v1136_v15 }
 0x371   : > { %v1412_v19 = vpop.f32.mrf.mxu1 }
 0x372   : > { %1361 = vst [vmem:[%s363_s25] sm:$0xff] %v1360_v18  }
 0x373 PF: > { %s18_s29 = sadd.s32 1, %s1572_s29   ;;  %s1921_s27 = smov %s1568_s28 }
 0x374   : > { %p15_p5 = scmp.ge.s32.totalorder %s18_s29, 4   ;;  %s1922_s28 = smov %s1924_s30 }
 0x376   :  { %17 = sbr.rel (!%p15_p5) target bundleno = 2 (0x2), region = 85 }

</bundles_post_ra>
